<compile_context>
chip_gen: v7x
topology: tpu7x:2x2x1
jax: 0.10.0
libtpu: 0.0.40
codegen_flags: <defaults>
</compile_context>

<pallas_src>
import functools

import jax
import jax.numpy as jnp
from jax.experimental import pallas as pl
from jax.experimental.pallas import tpu as pltpu


def _round_up(x, m):
  return (x + m - 1) // m * m


def _basic_block_kernel(x_ref, w1_ref, b1_ref, w2_ref, b2_ref, *rest,
                        stride, has_downsample, Hout, Wout, Cp):
  """One batch element of the fused residual block.

  x_ref  : (1, H+2, W+2, Ckp) spatially pre-padded input, channels padded to
           a multiple of 128, bf16
  w1_ref : (3, 3*Ckp, Cp) conv1 weights (BN1 scale folded); ky-major rows,
           kx taps concatenated along the contraction axis, bf16
  w2_ref : (3, 3*Cp, Cp)  conv2 weights (BN2 scale folded), bf16
  b*_ref : (1, Cp)        folded BN shifts (bias), f32
  wd_ref : (Ckp, Cp)      1x1 downsample weight (BNd scale folded), bf16
  o_ref  : (1, Hout, Wout, Cp) f32
  h1pad  : VMEM scratch (Hout+2, Wout+2, Cp) bf16, zero border for conv2
  """
  if has_downsample:
    wd_ref, bd_ref, o_ref, h1pad = rest
  else:
    o_ref, h1pad = rest

  f32, bf16 = jnp.float32, jnp.bfloat16
  HW = Hout * Wout
  s = stride

  x = x_ref[0]                                    # (Hp, Wp, Ckp) bf16

  def conv3x3(src, w_ref, bias, s):
    """3x3 conv as 3 large-K MXU matmuls (kx taps concatenated along K).

    src  : (Hs, Ws, C) bf16, zero padded by 1 px; C is a multiple of 128.
    w_ref: (3, 3*C, Cp) bf16 with K index = kx*C + c; bias: (1, Cp) f32.
    Returns (HW, Cp) f32 = conv + bias.
    """
    C = src.shape[-1]
    w_lim = (Wout - 1) * s + 1
    h_lim = (Hout - 1) * s + 1
    # Build the kx-shifted operand ONCE (lane-aligned channel concat):
    # one pass of copies instead of one copy per tap.
    xcat = jnp.concatenate(
        [src[:, kx:kx + w_lim:s, :] for kx in range(3)], axis=-1)
    # Initialize the accumulator with the folded-BN bias (saves a zeros
    # materialization and a separate full-size add).
    acc = jnp.broadcast_to(bias, (HW, Cp))
    for ky in range(3):
      rows = xcat[ky:ky + h_lim:s]                # leading-axis slice: cheap
      acc = acc + jnp.dot(rows.reshape(HW, 3 * C), w_ref[ky],
                          preferred_element_type=f32)
    return acc

  # conv1 (BN1 scale folded into weights) -> bias -> ReLU
  h1 = jnp.maximum(conv3x3(x, w1_ref, b1_ref[...], s), 0.0)

  # Stage h1 in a zero-bordered bf16 scratch for conv2's padding = 1.  The
  # scratch persists across grid steps, so the border is zeroed only once;
  # the interior is fully overwritten every step.
  @pl.when(pl.program_id(0) == 0)
  def _():
    h1pad[...] = jnp.zeros_like(h1pad)

  h1pad[1:Hout + 1, 1:Wout + 1, :] = h1.reshape(Hout, Wout, Cp).astype(bf16)

  # conv2 (BN2 scale folded) -> bias
  h2 = conv3x3(h1pad[...], w2_ref, b2_ref[...], 1)

  # identity path
  if has_downsample:
    xs = x[1:1 + (Hout - 1) * s + 1:s, 1:1 + (Wout - 1) * s + 1:s, :]
    ident = jnp.dot(xs.reshape(HW, xs.shape[-1]), wd_ref[...],
                    preferred_element_type=f32) + bd_ref[...]
  else:
    # Identity case: Cin == Cout, so x's padded channel width equals Cp and
    # its padded channels are zero (they match h2's zero padded channels).
    ident = x[1:Hout + 1, 1:Wout + 1, :].reshape(HW, Cp).astype(f32)

  out = jnp.maximum(h2 + ident, 0.0)
  o_ref[0] = out.reshape(Hout, Wout, Cp).astype(o_ref.dtype)


def _make_call(N, Hp, Wp, Ckp, Hout, Wout, Cp, stride, has_downsample,
               single_buffer_consts=True):
  kernel = functools.partial(
      _basic_block_kernel, stride=stride, has_downsample=has_downsample,
      Hout=Hout, Wout=Wout, Cp=Cp)

  const_kwargs = {}
  if single_buffer_consts:
    # Grid-constant weights / biases: no point double-buffering them.
    const_kwargs = dict(pipeline_mode=pl.Buffered(1))

  def const_spec(shape):
    return pl.BlockSpec(shape, lambda n: (0,) * len(shape), **const_kwargs)

  in_specs = [
      pl.BlockSpec((1, Hp, Wp, Ckp), lambda n: (n, 0, 0, 0)),   # x (bf16)
      const_spec((3, 3 * Ckp, Cp)),                             # w1 (bf16)
      const_spec((1, Cp)),                                      # bn1 shift
      const_spec((3, 3 * Cp, Cp)),                              # w2 (bf16)
      const_spec((1, Cp)),                                      # bn2 shift
  ]
  if has_downsample:
    in_specs += [const_spec((Ckp, Cp)),                         # wd (bf16)
                 const_spec((1, Cp))]                           # bnd shift

  HW = Hout * Wout
  flops = 2 * N * HW * (9 * Ckp * Cp + 9 * Cp * Cp)
  bytes_accessed = (2 * N * Hp * Wp * Ckp                  # x (bf16)
                    + 2 * (9 * Ckp * Cp + 9 * Cp * Cp)     # weights (bf16)
                    + 4 * 2 * Cp                           # biases
                    + 4 * N * HW * Cp)                     # output (f32)
  if has_downsample:
    flops += 2 * N * HW * Ckp * Cp
    bytes_accessed += 2 * Ckp * Cp + 4 * Cp

  # VMEM budget per grid step: double-buffered x / out blocks, single-buffered
  # weights, staging scratch, concat / accumulator temporaries + headroom.
  per_step = (2 * Hp * Wp * Ckp * 2                        # x block (bf16) x2
              + 2 * HW * Cp * 4                            # out block (f32) x2
              + (Hout + 2) * (Wout + 2) * Cp * 2           # h1pad scratch
              + (9 * Ckp * Cp + 9 * Cp * Cp + Ckp * Cp) * 2  # weights (x1)
              + Hp * Wout * 3 * Ckp * 2                    # xcat (conv1)
              + (Hout + 2) * Wout * 3 * Cp * 2             # xcat (conv2)
              + 6 * HW * Cp * 4)                           # f32 temporaries
  try:
    vmem_cap = pltpu.get_tpu_info().vmem_capacity_bytes
  except Exception:                                        # pragma: no cover
    vmem_cap = 64 << 20                                    # conservative (v7x)
  # Leave ~25% of physical VMEM as headroom (v7x only has 64 MiB total).
  vmem_limit = max(int(per_step * 1.5) + (8 << 20), 16 << 20)
  vmem_limit = min(vmem_limit, (int(vmem_cap) * 3) // 4)

  grid_spec = pltpu.PrefetchScalarGridSpec(
      num_scalar_prefetch=0,
      grid=(N,),
      in_specs=in_specs,
      out_specs=pl.BlockSpec((1, Hout, Wout, Cp), lambda n: (n, 0, 0, 0)),
      scratch_shapes=[pltpu.VMEM((Hout + 2, Wout + 2, Cp), jnp.bfloat16)],
  )
  return pl.pallas_call(
      kernel,
      grid_spec=grid_spec,
      out_shape=jax.ShapeDtypeStruct((N, Hout, Wout, Cp), jnp.float32),
      compiler_params=pltpu.CompilerParams(
          dimension_semantics=("parallel",),       # batch axis is independent
          vmem_limit_bytes=int(vmem_limit)),
      cost_estimate=pl.CostEstimate(flops=flops, transcendentals=0,
                                    bytes_accessed=bytes_accessed),
  )


def basic_block_2d(x_nchw, p, stride=1, eps=1e-5):
  """Pallas implementation of BasicBlock2D.forward (NCHW in / NCHW out)."""
  N, Cin, H, W = x_nchw.shape
  Cout = p['w1'].shape[0]
  has_downsample = (stride != 1) or (Cin != Cout)
  Hout = (H - 1) // stride + 1
  Wout = (W - 1) // stride + 1

  Cp = _round_up(Cout, 128)     # lane-dense output / MXU-N channel width
  Ckp = _round_up(Cin, 128)     # lane-aligned input channel width (K = 3*Ckp)

  # bf16 activations (halves x HBM traffic); spatial halo + channel padding.
  x_nhwc = jnp.transpose(x_nchw, (0, 2, 3, 1)).astype(jnp.bfloat16)
  x_pad = jnp.pad(x_nhwc, ((0, 0), (1, 1), (1, 1), (0, Ckp - Cin)))

  def fold_bn(g, b, m, v):
    scale = g / jnp.sqrt(v + eps)
    return scale, b - m * scale

  def prep_w(w, scale, cin_pad):
    # PyTorch (O, I, kh, kw) -> (kh, kw*I_pad, Cp): ky-major rows, kx taps
    # concatenated along the contraction axis (matches the in-kernel concat);
    # BN scale folded into the weights.
    O, I, kh, kw = w.shape
    wt = jnp.transpose(w * scale[:, None, None, None], (2, 3, 1, 0))
    wt = jnp.pad(wt, ((0, 0), (0, 0), (0, cin_pad - I), (0, Cp - O)))
    return wt.reshape(kh, kw * cin_pad, Cp).astype(jnp.bfloat16)

  def prep_b(shift):
    return jnp.pad(shift, (0, Cp - Cout)).reshape(1, Cp).astype(jnp.float32)

  s1, sh1 = fold_bn(p['g1'], p['b1'], p['m1'], p['v1'])
  s2, sh2 = fold_bn(p['g2'], p['b2'], p['m2'], p['v2'])
  args = [x_pad, prep_w(p['w1'], s1, Ckp), prep_b(sh1),
          prep_w(p['w2'], s2, Cp), prep_b(sh2)]
  if has_downsample:
    sd, shd = fold_bn(p['gd'], p['bd'], p['md'], p['vd'])
    wd = jnp.transpose(p['wd'][:, :, 0, 0] * sd[:, None])        # (I, O)
    wd = jnp.pad(wd, ((0, Ckp - Cin), (0, Cp - Cout))).astype(jnp.bfloat16)
    args += [wd, prep_b(shd)]

  call_args = (N, H + 2, W + 2, Ckp, Hout, Wout, Cp, stride, has_downsample)
  try:
    out_nhwc = _make_call(*call_args, single_buffer_consts=True)(*args)
  except Exception:
    # Fallback if this JAX version rejects single-buffered pipeline_mode.
    out_nhwc = _make_call(*call_args, single_buffer_consts=False)(*args)
  return jnp.transpose(out_nhwc[..., :Cout], (0, 3, 1, 2))


# ----------------------- pure-JAX reference (for checking) -------------------
def _reference(x, p, stride, has_downsample, eps=1e-5):
  def conv(x, w, s, pad):
    return jax.lax.conv_general_dilated(
        x, w, (s, s), [(pad, pad), (pad, pad)],
        dimension_numbers=('NCHW', 'OIHW', 'NCHW'))

  def bn(x, g, b, m, v):
    g, b, m, v = (t[None, :, None, None] for t in (g, b, m, v))
    return (x - m) / jnp.sqrt(v + eps) * g + b

  out = jax.nn.relu(bn(conv(x, p['w1'], stride, 1),
                       p['g1'], p['b1'], p['m1'], p['v1']))
  out = bn(conv(out, p['w2'], 1, 1), p['g2'], p['b2'], p['m2'], p['v2'])
  if has_downsample:
    identity = bn(conv(x, p['wd'], stride, 0),
                  p['gd'], p['bd'], p['md'], p['vd'])
  else:
    identity = x
  return jax.nn.relu(out + identity)


def _init_params(key, in_ch, out_ch, has_downsample):
  ks = jax.random.split(key, 16)
  p = {
      'w1': 0.1 * jax.random.normal(ks[0], (out_ch, in_ch, 3, 3), jnp.float32),
      'g1': jax.random.uniform(ks[1], (out_ch,), jnp.float32, 0.5, 1.5),
      'b1': 0.1 * jax.random.normal(ks[2], (out_ch,), jnp.float32),
      'm1': 0.1 * jax.random.normal(ks[3], (out_ch,), jnp.float32),
      'v1': jax.random.uniform(ks[4], (out_ch,), jnp.float32, 0.5, 1.5),
      'w2': 0.1 * jax.random.normal(ks[5], (out_ch, out_ch, 3, 3), jnp.float32),
      'g2': jax.random.uniform(ks[6], (out_ch,), jnp.float32, 0.5, 1.5),
      'b2': 0.1 * jax.random.normal(ks[7], (out_ch,), jnp.float32),
      'm2': 0.1 * jax.random.normal(ks[8], (out_ch,), jnp.float32),
      'v2': jax.random.uniform(ks[9], (out_ch,), jnp.float32, 0.5, 1.5),
  }
  if has_downsample:
    p.update({
        'wd': 0.1 * jax.random.normal(ks[10], (out_ch, in_ch, 1, 1), jnp.float32),
        'gd': jax.random.uniform(ks[11], (out_ch,), jnp.float32, 0.5, 1.5),
        'bd': 0.1 * jax.random.normal(ks[12], (out_ch,), jnp.float32),
        'md': 0.1 * jax.random.normal(ks[13], (out_ch,), jnp.float32),
        'vd': jax.random.uniform(ks[14], (out_ch,), jnp.float32, 0.5, 1.5),
    })
  return p


if __name__ == "__main__":
  key = jax.random.PRNGKey(0)

  # bf16 MXU operands / activations (f32 accumulation) -> relaxed tolerance.
  ATOL = RTOL = 5e-2

  # Case 1: in_ch != out_ch -> downsample branch (1x1 conv + BN) active.
  k_x1, k_p1, k_x2, k_p2 = jax.random.split(key, 4)
  x1 = jax.random.normal(k_x1, (2, 4, 16, 16), jnp.float32)
  p1 = _init_params(k_p1, 4, 8, has_downsample=True)
  out1 = jax.block_until_ready(basic_block_2d(x1, p1, stride=1))
  ref1 = _reference(x1, p1, stride=1, has_downsample=True)
  assert out1.shape == (2, 8, 16, 16)
  assert jnp.allclose(out1, ref1, atol=ATOL, rtol=RTOL), "mismatch (downsample)"

  # Case 2: in_ch == out_ch, stride 1 -> pure identity skip connection.
  x2 = jax.random.normal(k_x2, (2, 8, 16, 16), jnp.float32)
  p2 = _init_params(k_p2, 8, 8, has_downsample=False)
  out2 = jax.block_until_ready(basic_block_2d(x2, p2, stride=1))
  ref2 = _reference(x2, p2, stride=1, has_downsample=False)
  assert out2.shape == (2, 8, 16, 16)
  assert jnp.allclose(out2, ref2, atol=ATOL, rtol=RTOL), "mismatch (identity)"

  print("KERNEL_OK")
</pallas_src>

<mosaic_0001>
module attributes {stable_mosaic.version = 11 : i64} {
  func.func @_basic_block_kernel(%arg0: i32, %arg1: memref<1x18x18x128xbf16, #tpu.memory_space<vmem>>, %arg2: memref<3x384x128xbf16, #tpu.memory_space<vmem>>, %arg3: memref<1x128xf32, #tpu.memory_space<vmem>>, %arg4: memref<3x384x128xbf16, #tpu.memory_space<vmem>>, %arg5: memref<1x128xf32, #tpu.memory_space<vmem>>, %arg6: memref<128x128xbf16, #tpu.memory_space<vmem>>, %arg7: memref<1x128xf32, #tpu.memory_space<vmem>>, %arg8: memref<1x16x16x128xf32, #tpu.memory_space<vmem>>, %arg9: memref<18x18x128xbf16, #tpu.memory_space<vmem>>) attributes {dimension_semantics = [#tpu.dimension_semantics<parallel>], iteration_bounds = array<i64: 2>, scalar_prefetch = 0 : i64, scratch_operands = 1 : i64, tpu.core_type = #tpu.core_type<tc>, window_params = [{transform_indices = @transform_0, window_bounds = array<i64: 1, 18, 18, 128>}, {pipeline_mode = #tpu.pipeline_mode<synchronous>, transform_indices = @transform_1, window_bounds = array<i64: 3, 384, 128>}, {pipeline_mode = #tpu.pipeline_mode<synchronous>, transform_indices = @transform_2, window_bounds = array<i64: 1, 128>}, {pipeline_mode = #tpu.pipeline_mode<synchronous>, transform_indices = @transform_3, window_bounds = array<i64: 3, 384, 128>}, {pipeline_mode = #tpu.pipeline_mode<synchronous>, transform_indices = @transform_4, window_bounds = array<i64: 1, 128>}, {pipeline_mode = #tpu.pipeline_mode<synchronous>, transform_indices = @transform_5, window_bounds = array<i64: 128, 128>}, {pipeline_mode = #tpu.pipeline_mode<synchronous>, transform_indices = @transform_6, window_bounds = array<i64: 1, 128>}, {transform_indices = @transform_7, window_bounds = array<i64: 1, 16, 16, 128>}]} {
    %c0 = arith.constant 0 : index
    %c0_0 = arith.constant 0 : index
    %c0_1 = arith.constant 0 : index
    %c0_2 = arith.constant 0 : index
    %0 = vector.load %arg1[%c0, %c0_0, %c0_1, %c0_2] : memref<1x18x18x128xbf16, #tpu.memory_space<vmem>>, vector<1x18x18x128xbf16>
    %1 = vector.shape_cast %0 : vector<1x18x18x128xbf16> to vector<18x18x128xbf16>
    %c0_3 = arith.constant 0 : index
    %c0_4 = arith.constant 0 : index
    %2 = vector.load %arg3[%c0_3, %c0_4] : memref<1x128xf32, #tpu.memory_space<vmem>>, vector<1x128xf32>
    %3 = vector.extract_strided_slice %1 {offsets = [0, 0, 0], sizes = [18, 16, 128], strides = [1, 1, 1]} : vector<18x18x128xbf16> to vector<18x16x128xbf16>
    %4 = vector.extract_strided_slice %1 {offsets = [0, 1, 0], sizes = [18, 16, 128], strides = [1, 1, 1]} : vector<18x18x128xbf16> to vector<18x16x128xbf16>
    %5 = vector.extract_strided_slice %1 {offsets = [0, 2, 0], sizes = [18, 16, 128], strides = [1, 1, 1]} : vector<18x18x128xbf16> to vector<18x16x128xbf16>
    %6 = tpu.concatenate %3, %4, %5 in 2 : vector<18x16x128xbf16>, vector<18x16x128xbf16>, vector<18x16x128xbf16> -> vector<18x16x384xbf16>
    %7 = vector.shape_cast %2 : vector<1x128xf32> to vector<1x128xf32>
    %8 = vector.broadcast %7 : vector<1x128xf32> to vector<256x128xf32>
    %9 = vector.extract_strided_slice %6 {offsets = [0, 0, 0], sizes = [16, 16, 384], strides = [1, 1, 1]} : vector<18x16x384xbf16> to vector<16x16x384xbf16>
    %10 = vector.shape_cast %9 : vector<16x16x384xbf16> to vector<256x384xbf16>
    %c0_5 = arith.constant 0 : index
    %c0_6 = arith.constant 0 : index
    %c0_7 = arith.constant 0 : index
    %11 = vector.load %arg2[%c0_5, %c0_6, %c0_7] : memref<3x384x128xbf16, #tpu.memory_space<vmem>>, vector<1x384x128xbf16>
    %12 = vector.shape_cast %11 : vector<1x384x128xbf16> to vector<384x128xbf16>
    %cst = arith.constant dense<0.000000e+00> : vector<256x128xf32>
    %13 = tpu.matmul %10, %12, %cst {dimension_numbers = #tpu.dot_dimension_numbers<[1], [0], [0], [1], [0, 0, 1, 1], [], []>} : vector<256x384xbf16>, vector<384x128xbf16>, vector<256x128xf32> -> vector<256x128xf32>
    %14 = arith.addf %8, %13 : vector<256x128xf32>
    %15 = vector.extract_strided_slice %6 {offsets = [1, 0, 0], sizes = [16, 16, 384], strides = [1, 1, 1]} : vector<18x16x384xbf16> to vector<16x16x384xbf16>
    %16 = vector.shape_cast %15 : vector<16x16x384xbf16> to vector<256x384xbf16>
    %c1 = arith.constant 1 : index
    %c0_8 = arith.constant 0 : index
    %c0_9 = arith.constant 0 : index
    %17 = vector.load %arg2[%c1, %c0_8, %c0_9] : memref<3x384x128xbf16, #tpu.memory_space<vmem>>, vector<1x384x128xbf16>
    %18 = vector.shape_cast %17 : vector<1x384x128xbf16> to vector<384x128xbf16>
    %cst_10 = arith.constant dense<0.000000e+00> : vector<256x128xf32>
    %19 = tpu.matmul %16, %18, %cst_10 {dimension_numbers = #tpu.dot_dimension_numbers<[1], [0], [0], [1], [0, 0, 1, 1], [], []>} : vector<256x384xbf16>, vector<384x128xbf16>, vector<256x128xf32> -> vector<256x128xf32>
    %20 = arith.addf %14, %19 : vector<256x128xf32>
    %21 = vector.extract_strided_slice %6 {offsets = [2, 0, 0], sizes = [16, 16, 384], strides = [1, 1, 1]} : vector<18x16x384xbf16> to vector<16x16x384xbf16>
    %22 = vector.shape_cast %21 : vector<16x16x384xbf16> to vector<256x384xbf16>
    %c2 = arith.constant 2 : index
    %c0_11 = arith.constant 0 : index
    %c0_12 = arith.constant 0 : index
    %23 = vector.load %arg2[%c2, %c0_11, %c0_12] : memref<3x384x128xbf16, #tpu.memory_space<vmem>>, vector<1x384x128xbf16>
    %24 = vector.shape_cast %23 : vector<1x384x128xbf16> to vector<384x128xbf16>
    %cst_13 = arith.constant dense<0.000000e+00> : vector<256x128xf32>
    %25 = tpu.matmul %22, %24, %cst_13 {dimension_numbers = #tpu.dot_dimension_numbers<[1], [0], [0], [1], [0, 0, 1, 1], [], []>} : vector<256x384xbf16>, vector<384x128xbf16>, vector<256x128xf32> -> vector<256x128xf32>
    %26 = arith.addf %20, %25 : vector<256x128xf32>
    %cst_14 = arith.constant 0.000000e+00 : f32
    %27 = vector.broadcast %cst_14 : f32 to vector<256x128xf32>
    %28 = arith.maximumf %26, %27 : vector<256x128xf32>
    %c0_i32 = arith.constant 0 : i32
    %29 = arith.cmpi eq, %arg0, %c0_i32 : i32
    %30 = arith.extui %29 : i1 to i32
    %c0_i32_15 = arith.constant 0 : i32
    %31 = arith.cmpi ne, %30, %c0_i32_15 : i32
    scf.if %31 {
      %cst_46 = arith.constant 0.000000e+00 : bf16
      %75 = vector.broadcast %cst_46 : bf16 to vector<18x18x128xbf16>
      %c0_47 = arith.constant 0 : index
      %c0_48 = arith.constant 0 : index
      %c0_49 = arith.constant 0 : index
      %76 = vector.load %arg9[%c0_47, %c0_48, %c0_49] : memref<18x18x128xbf16, #tpu.memory_space<vmem>>, vector<18x18x128xbf16>
      tpu.vector_store %arg9[%c0_47, %c0_48, %c0_49], %75 {strides = array<i32>} : memref<18x18x128xbf16, #tpu.memory_space<vmem>>, vector<18x18x128xbf16>,
    } else {
    }
    %32 = vector.shape_cast %28 : vector<256x128xf32> to vector<16x16x128xf32>
    %33 = arith.truncf %32 : vector<16x16x128xf32> to vector<16x16x128xbf16>
    %c1_16 = arith.constant 1 : index
    %c1_17 = arith.constant 1 : index
    %c0_18 = arith.constant 0 : index
    %34 = vector.load %arg9[%c1_16, %c1_17, %c0_18] : memref<18x18x128xbf16, #tpu.memory_space<vmem>>, vector<16x16x128xbf16>
    tpu.vector_store %arg9[%c1_16, %c1_17, %c0_18], %33 {strides = array<i32>} : memref<18x18x128xbf16, #tpu.memory_space<vmem>>, vector<16x16x128xbf16>,
    %c0_19 = arith.constant 0 : index
    %c0_20 = arith.constant 0 : index
    %c0_21 = arith.constant 0 : index
    %35 = vector.load %arg9[%c0_19, %c0_20, %c0_21] : memref<18x18x128xbf16, #tpu.memory_space<vmem>>, vector<18x18x128xbf16>
    %c0_22 = arith.constant 0 : index
    %c0_23 = arith.constant 0 : index
    %36 = vector.load %arg5[%c0_22, %c0_23] : memref<1x128xf32, #tpu.memory_space<vmem>>, vector<1x128xf32>
    %37 = vector.extract_strided_slice %35 {offsets = [0, 0, 0], sizes = [18, 16, 128], strides = [1, 1, 1]} : vector<18x18x128xbf16> to vector<18x16x128xbf16>
    %38 = vector.extract_strided_slice %35 {offsets = [0, 1, 0], sizes = [18, 16, 128], strides = [1, 1, 1]} : vector<18x18x128xbf16> to vector<18x16x128xbf16>
    %39 = vector.extract_strided_slice %35 {offsets = [0, 2, 0], sizes = [18, 16, 128], strides = [1, 1, 1]} : vector<18x18x128xbf16> to vector<18x16x128xbf16>
    %40 = tpu.concatenate %37, %38, %39 in 2 : vector<18x16x128xbf16>, vector<18x16x128xbf16>, vector<18x16x128xbf16> -> vector<18x16x384xbf16>
    %41 = vector.shape_cast %36 : vector<1x128xf32> to vector<1x128xf32>
    %42 = vector.broadcast %41 : vector<1x128xf32> to vector<256x128xf32>
    %43 = vector.extract_strided_slice %40 {offsets = [0, 0, 0], sizes = [16, 16, 384], strides = [1, 1, 1]} : vector<18x16x384xbf16> to vector<16x16x384xbf16>
    %44 = vector.shape_cast %43 : vector<16x16x384xbf16> to vector<256x384xbf16>
    %c0_24 = arith.constant 0 : index
    %c0_25 = arith.constant 0 : index
    %c0_26 = arith.constant 0 : index
    %45 = vector.load %arg4[%c0_24, %c0_25, %c0_26] : memref<3x384x128xbf16, #tpu.memory_space<vmem>>, vector<1x384x128xbf16>
    %46 = vector.shape_cast %45 : vector<1x384x128xbf16> to vector<384x128xbf16>
    %cst_27 = arith.constant dense<0.000000e+00> : vector<256x128xf32>
    %47 = tpu.matmul %44, %46, %cst_27 {dimension_numbers = #tpu.dot_dimension_numbers<[1], [0], [0], [1], [0, 0, 1, 1], [], []>} : vector<256x384xbf16>, vector<384x128xbf16>, vector<256x128xf32> -> vector<256x128xf32>
    %48 = arith.addf %42, %47 : vector<256x128xf32>
    %49 = vector.extract_strided_slice %40 {offsets = [1, 0, 0], sizes = [16, 16, 384], strides = [1, 1, 1]} : vector<18x16x384xbf16> to vector<16x16x384xbf16>
    %50 = vector.shape_cast %49 : vector<16x16x384xbf16> to vector<256x384xbf16>
    %c1_28 = arith.constant 1 : index
    %c0_29 = arith.constant 0 : index
    %c0_30 = arith.constant 0 : index
    %51 = vector.load %arg4[%c1_28, %c0_29, %c0_30] : memref<3x384x128xbf16, #tpu.memory_space<vmem>>, vector<1x384x128xbf16>
    %52 = vector.shape_cast %51 : vector<1x384x128xbf16> to vector<384x128xbf16>
    %cst_31 = arith.constant dense<0.000000e+00> : vector<256x128xf32>
    %53 = tpu.matmul %50, %52, %cst_31 {dimension_numbers = #tpu.dot_dimension_numbers<[1], [0], [0], [1], [0, 0, 1, 1], [], []>} : vector<256x384xbf16>, vector<384x128xbf16>, vector<256x128xf32> -> vector<256x128xf32>
    %54 = arith.addf %48, %53 : vector<256x128xf32>
    %55 = vector.extract_strided_slice %40 {offsets = [2, 0, 0], sizes = [16, 16, 384], strides = [1, 1, 1]} : vector<18x16x384xbf16> to vector<16x16x384xbf16>
    %56 = vector.shape_cast %55 : vector<16x16x384xbf16> to vector<256x384xbf16>
    %c2_32 = arith.constant 2 : index
    %c0_33 = arith.constant 0 : index
    %c0_34 = arith.constant 0 : index
    %57 = vector.load %arg4[%c2_32, %c0_33, %c0_34] : memref<3x384x128xbf16, #tpu.memory_space<vmem>>, vector<1x384x128xbf16>
    %58 = vector.shape_cast %57 : vector<1x384x128xbf16> to vector<384x128xbf16>
    %cst_35 = arith.constant dense<0.000000e+00> : vector<256x128xf32>
    %59 = tpu.matmul %56, %58, %cst_35 {dimension_numbers = #tpu.dot_dimension_numbers<[1], [0], [0], [1], [0, 0, 1, 1], [], []>} : vector<256x384xbf16>, vector<384x128xbf16>, vector<256x128xf32> -> vector<256x128xf32>
    %60 = arith.addf %54, %59 : vector<256x128xf32>
    %61 = vector.extract_strided_slice %1 {offsets = [1, 1, 0], sizes = [16, 16, 128], strides = [1, 1, 1]} : vector<18x18x128xbf16> to vector<16x16x128xbf16>
    %62 = vector.shape_cast %61 : vector<16x16x128xbf16> to vector<256x128xbf16>
    %c0_36 = arith.constant 0 : index
    %c0_37 = arith.constant 0 : index
    %63 = vector.load %arg6[%c0_36, %c0_37] : memref<128x128xbf16, #tpu.memory_space<vmem>>, vector<128x128xbf16>
    %cst_38 = arith.constant dense<0.000000e+00> : vector<256x128xf32>
    %64 = tpu.matmul %62, %63, %cst_38 {dimension_numbers = #tpu.dot_dimension_numbers<[1], [0], [0], [1], [0, 0, 1, 1], [], []>} : vector<256x128xbf16>, vector<128x128xbf16>, vector<256x128xf32> -> vector<256x128xf32>
    %c0_39 = arith.constant 0 : index
    %c0_40 = arith.constant 0 : index
    %65 = vector.load %arg7[%c0_39, %c0_40] : memref<1x128xf32, #tpu.memory_space<vmem>>, vector<1x128xf32>
    %66 = vector.broadcast %65 : vector<1x128xf32> to vector<256x128xf32>
    %67 = arith.addf %64, %66 : vector<256x128xf32>
    %68 = arith.addf %60, %67 : vector<256x128xf32>
    %cst_41 = arith.constant 0.000000e+00 : f32
    %69 = vector.broadcast %cst_41 : f32 to vector<256x128xf32>
    %70 = arith.maximumf %68, %69 : vector<256x128xf32>
    %71 = vector.shape_cast %70 : vector<256x128xf32> to vector<16x16x128xf32>
    %c0_42 = arith.constant 0 : index
    %c0_43 = arith.constant 0 : index
    %c0_44 = arith.constant 0 : index
    %c0_45 = arith.constant 0 : index
    %72 = vector.load %arg8[%c0_42, %c0_43, %c0_44, %c0_45] : memref<1x16x16x128xf32, #tpu.memory_space<vmem>>, vector<1x16x16x128xf32>
    %73 = vector.shape_cast %72 : vector<1x16x16x128xf32> to vector<16x16x128xf32>
    %74 = vector.shape_cast %71 : vector<16x16x128xf32> to vector<1x16x16x128xf32>
    tpu.vector_store %arg8[%c0_42, %c0_43, %c0_44, %c0_45], %74 {strides = array<i32>} : memref<1x16x16x128xf32, #tpu.memory_space<vmem>>, vector<1x16x16x128xf32>,
    return
  }
  func.func @transform_0(%arg0: i32) -> (i32, i32, i32, i32) {
    %c0_i32 = arith.constant 0 : i32
    %c0_i32_0 = arith.constant 0 : i32
    %c0_i32_1 = arith.constant 0 : i32
    %c0_i32_2 = arith.constant 0 : i32
    return %arg0, %c0_i32, %c0_i32_0, %c0_i32_1 : i32, i32, i32, i32
  }
  func.func @transform_1(%arg0: i32) -> (i32, i32, i32) {
    %c0_i32 = arith.constant 0 : i32
    %c0_i32_0 = arith.constant 0 : i32
    %c0_i32_1 = arith.constant 0 : i32
    %c0_i32_2 = arith.constant 0 : i32
    return %c0_i32, %c0_i32_0, %c0_i32_1 : i32, i32, i32
  }
  func.func @transform_2(%arg0: i32) -> (i32, i32) {
    %c0_i32 = arith.constant 0 : i32
    %c0_i32_0 = arith.constant 0 : i32
    %c0_i32_1 = arith.constant 0 : i32
    return %c0_i32, %c0_i32_0 : i32, i32
  }
  func.func @transform_3(%arg0: i32) -> (i32, i32, i32) {
    %c0_i32 = arith.constant 0 : i32
    %c0_i32_0 = arith.constant 0 : i32
    %c0_i32_1 = arith.constant 0 : i32
    %c0_i32_2 = arith.constant 0 : i32
    return %c0_i32, %c0_i32_0, %c0_i32_1 : i32, i32, i32
  }
  func.func @transform_4(%arg0: i32) -> (i32, i32) {
    %c0_i32 = arith.constant 0 : i32
    %c0_i32_0 = arith.constant 0 : i32
    %c0_i32_1 = arith.constant 0 : i32
    return %c0_i32, %c0_i32_0 : i32, i32
  }
  func.func @transform_5(%arg0: i32) -> (i32, i32) {
    %c0_i32 = arith.constant 0 : i32
    %c0_i32_0 = arith.constant 0 : i32
    %c0_i32_1 = arith.constant 0 : i32
    return %c0_i32, %c0_i32_0 : i32, i32
  }
  func.func @transform_6(%arg0: i32) -> (i32, i32) {
    %c0_i32 = arith.constant 0 : i32
    %c0_i32_0 = arith.constant 0 : i32
    %c0_i32_1 = arith.constant 0 : i32
    return %c0_i32, %c0_i32_0 : i32, i32
  }
  func.func @transform_7(%arg0: i32) -> (i32, i32, i32, i32) {
    %c0_i32 = arith.constant 0 : i32
    %c0_i32_0 = arith.constant 0 : i32
    %c0_i32_1 = arith.constant 0 : i32
    %c0_i32_2 = arith.constant 0 : i32
    return %arg0, %c0_i32, %c0_i32_0, %c0_i32_1 : i32, i32, i32, i32
  }
}

module attributes {stable_mosaic.version = 11 : i64} {
  func.func @_basic_block_kernel(%arg0: i32, %arg1: memref<1x18x18x128xbf16, #tpu.memory_space<vmem>>, %arg2: memref<3x384x128xbf16, #tpu.memory_space<vmem>>, %arg3: memref<1x128xf32, #tpu.memory_space<vmem>>, %arg4: memref<3x384x128xbf16, #tpu.memory_space<vmem>>, %arg5: memref<1x128xf32, #tpu.memory_space<vmem>>, %arg6: memref<128x128xbf16, #tpu.memory_space<vmem>>, %arg7: memref<1x128xf32, #tpu.memory_space<vmem>>, %arg8: memref<1x16x16x128xf32, #tpu.memory_space<vmem>>, %arg9: memref<18x18x128xbf16, #tpu.memory_space<vmem>>) attributes {dimension_semantics = [#tpu.dimension_semantics<parallel>], iteration_bounds = array<i64: 2>, scalar_prefetch = 0 : i64, scratch_operands = 1 : i64, tpu.core_type = #tpu.core_type<tc>, window_params = [{transform_indices = @transform_0, window_bounds = array<i64: 1, 18, 18, 128>}, {pipeline_mode = #tpu.pipeline_mode<synchronous>, transform_indices = @transform_1, window_bounds = array<i64: 3, 384, 128>}, {pipeline_mode = #tpu.pipeline_mode<synchronous>, transform_indices = @transform_2, window_bounds = array<i64: 1, 128>}, {pipeline_mode = #tpu.pipeline_mode<synchronous>, transform_indices = @transform_3, window_bounds = array<i64: 3, 384, 128>}, {pipeline_mode = #tpu.pipeline_mode<synchronous>, transform_indices = @transform_4, window_bounds = array<i64: 1, 128>}, {pipeline_mode = #tpu.pipeline_mode<synchronous>, transform_indices = @transform_5, window_bounds = array<i64: 128, 128>}, {pipeline_mode = #tpu.pipeline_mode<synchronous>, transform_indices = @transform_6, window_bounds = array<i64: 1, 128>}, {transform_indices = @transform_7, window_bounds = array<i64: 1, 16, 16, 128>}]} {
    %c0 = arith.constant 0 : index
    %c0_0 = arith.constant 0 : index
    %c0_1 = arith.constant 0 : index
    %c0_2 = arith.constant 0 : index
    %0 = vector.load %arg1[%c0, %c0_0, %c0_1, %c0_2] : memref<1x18x18x128xbf16, #tpu.memory_space<vmem>>, vector<1x18x18x128xbf16>
    %1 = vector.shape_cast %0 : vector<1x18x18x128xbf16> to vector<18x18x128xbf16>
    %c0_3 = arith.constant 0 : index
    %c0_4 = arith.constant 0 : index
    %2 = vector.load %arg3[%c0_3, %c0_4] : memref<1x128xf32, #tpu.memory_space<vmem>>, vector<1x128xf32>
    %3 = vector.extract_strided_slice %1 {offsets = [0, 0, 0], sizes = [18, 16, 128], strides = [1, 1, 1]} : vector<18x18x128xbf16> to vector<18x16x128xbf16>
    %4 = vector.extract_strided_slice %1 {offsets = [0, 1, 0], sizes = [18, 16, 128], strides = [1, 1, 1]} : vector<18x18x128xbf16> to vector<18x16x128xbf16>
    %5 = vector.extract_strided_slice %1 {offsets = [0, 2, 0], sizes = [18, 16, 128], strides = [1, 1, 1]} : vector<18x18x128xbf16> to vector<18x16x128xbf16>
    %6 = tpu.concatenate %3, %4, %5 in 2 : vector<18x16x128xbf16>, vector<18x16x128xbf16>, vector<18x16x128xbf16> -> vector<18x16x384xbf16>
    %7 = vector.shape_cast %2 : vector<1x128xf32> to vector<1x128xf32>
    %8 = vector.broadcast %7 : vector<1x128xf32> to vector<256x128xf32>
    %9 = vector.extract_strided_slice %6 {offsets = [0, 0, 0], sizes = [16, 16, 384], strides = [1, 1, 1]} : vector<18x16x384xbf16> to vector<16x16x384xbf16>
    %10 = vector.shape_cast %9 : vector<16x16x384xbf16> to vector<256x384xbf16>
    %c0_5 = arith.constant 0 : index
    %c0_6 = arith.constant 0 : index
    %c0_7 = arith.constant 0 : index
    %11 = vector.load %arg2[%c0_5, %c0_6, %c0_7] : memref<3x384x128xbf16, #tpu.memory_space<vmem>>, vector<1x384x128xbf16>
    %12 = vector.shape_cast %11 : vector<1x384x128xbf16> to vector<384x128xbf16>
    %cst = arith.constant dense<0.000000e+00> : vector<256x128xf32>
    %13 = tpu.matmul %10, %12, %cst {dimension_numbers = #tpu.dot_dimension_numbers<[1], [0], [0], [1], [0, 0, 1, 1], [], []>} : vector<256x384xbf16>, vector<384x128xbf16>, vector<256x128xf32> -> vector<256x128xf32>
    %14 = arith.addf %8, %13 : vector<256x128xf32>
    %15 = vector.extract_strided_slice %6 {offsets = [1, 0, 0], sizes = [16, 16, 384], strides = [1, 1, 1]} : vector<18x16x384xbf16> to vector<16x16x384xbf16>
    %16 = vector.shape_cast %15 : vector<16x16x384xbf16> to vector<256x384xbf16>
    %c1 = arith.constant 1 : index
    %c0_8 = arith.constant 0 : index
    %c0_9 = arith.constant 0 : index
    %17 = vector.load %arg2[%c1, %c0_8, %c0_9] : memref<3x384x128xbf16, #tpu.memory_space<vmem>>, vector<1x384x128xbf16>
    %18 = vector.shape_cast %17 : vector<1x384x128xbf16> to vector<384x128xbf16>
    %cst_10 = arith.constant dense<0.000000e+00> : vector<256x128xf32>
    %19 = tpu.matmul %16, %18, %cst_10 {dimension_numbers = #tpu.dot_dimension_numbers<[1], [0], [0], [1], [0, 0, 1, 1], [], []>} : vector<256x384xbf16>, vector<384x128xbf16>, vector<256x128xf32> -> vector<256x128xf32>
    %20 = arith.addf %14, %19 : vector<256x128xf32>
    %21 = vector.extract_strided_slice %6 {offsets = [2, 0, 0], sizes = [16, 16, 384], strides = [1, 1, 1]} : vector<18x16x384xbf16> to vector<16x16x384xbf16>
    %22 = vector.shape_cast %21 : vector<16x16x384xbf16> to vector<256x384xbf16>
    %c2 = arith.constant 2 : index
    %c0_11 = arith.constant 0 : index
    %c0_12 = arith.constant 0 : index
    %23 = vector.load %arg2[%c2, %c0_11, %c0_12] : memref<3x384x128xbf16, #tpu.memory_space<vmem>>, vector<1x384x128xbf16>
    %24 = vector.shape_cast %23 : vector<1x384x128xbf16> to vector<384x128xbf16>
    %cst_13 = arith.constant dense<0.000000e+00> : vector<256x128xf32>
    %25 = tpu.matmul %22, %24, %cst_13 {dimension_numbers = #tpu.dot_dimension_numbers<[1], [0], [0], [1], [0, 0, 1, 1], [], []>} : vector<256x384xbf16>, vector<384x128xbf16>, vector<256x128xf32> -> vector<256x128xf32>
    %26 = arith.addf %20, %25 : vector<256x128xf32>
    %cst_14 = arith.constant 0.000000e+00 : f32
    %27 = vector.broadcast %cst_14 : f32 to vector<256x128xf32>
    %28 = arith.maximumf %26, %27 : vector<256x128xf32>
    %c0_i32 = arith.constant 0 : i32
    %29 = arith.cmpi eq, %arg0, %c0_i32 : i32
    %30 = arith.extui %29 : i1 to i32
    %c0_i32_15 = arith.constant 0 : i32
    %31 = arith.cmpi ne, %30, %c0_i32_15 : i32
    scf.if %31 {
      %cst_46 = arith.constant 0.000000e+00 : bf16
      %75 = vector.broadcast %cst_46 : bf16 to vector<18x18x128xbf16>
      %c0_47 = arith.constant 0 : index
      %c0_48 = arith.constant 0 : index
      %c0_49 = arith.constant 0 : index
      %76 = vector.load %arg9[%c0_47, %c0_48, %c0_49] : memref<18x18x128xbf16, #tpu.memory_space<vmem>>, vector<18x18x128xbf16>
      tpu.vector_store %arg9[%c0_47, %c0_48, %c0_49], %75 {strides = array<i32>} : memref<18x18x128xbf16, #tpu.memory_space<vmem>>, vector<18x18x128xbf16>,
    } else {
    }
    %32 = vector.shape_cast %28 : vector<256x128xf32> to vector<16x16x128xf32>
    %33 = arith.truncf %32 : vector<16x16x128xf32> to vector<16x16x128xbf16>
    %c1_16 = arith.constant 1 : index
    %c1_17 = arith.constant 1 : index
    %c0_18 = arith.constant 0 : index
    %34 = vector.load %arg9[%c1_16, %c1_17, %c0_18] : memref<18x18x128xbf16, #tpu.memory_space<vmem>>, vector<16x16x128xbf16>
    tpu.vector_store %arg9[%c1_16, %c1_17, %c0_18], %33 {strides = array<i32>} : memref<18x18x128xbf16, #tpu.memory_space<vmem>>, vector<16x16x128xbf16>,
    %c0_19 = arith.constant 0 : index
    %c0_20 = arith.constant 0 : index
    %c0_21 = arith.constant 0 : index
    %35 = vector.load %arg9[%c0_19, %c0_20, %c0_21] : memref<18x18x128xbf16, #tpu.memory_space<vmem>>, vector<18x18x128xbf16>
    %c0_22 = arith.constant 0 : index
    %c0_23 = arith.constant 0 : index
    %36 = vector.load %arg5[%c0_22, %c0_23] : memref<1x128xf32, #tpu.memory_space<vmem>>, vector<1x128xf32>
    %37 = vector.extract_strided_slice %35 {offsets = [0, 0, 0], sizes = [18, 16, 128], strides = [1, 1, 1]} : vector<18x18x128xbf16> to vector<18x16x128xbf16>
    %38 = vector.extract_strided_slice %35 {offsets = [0, 1, 0], sizes = [18, 16, 128], strides = [1, 1, 1]} : vector<18x18x128xbf16> to vector<18x16x128xbf16>
    %39 = vector.extract_strided_slice %35 {offsets = [0, 2, 0], sizes = [18, 16, 128], strides = [1, 1, 1]} : vector<18x18x128xbf16> to vector<18x16x128xbf16>
    %40 = tpu.concatenate %37, %38, %39 in 2 : vector<18x16x128xbf16>, vector<18x16x128xbf16>, vector<18x16x128xbf16> -> vector<18x16x384xbf16>
    %41 = vector.shape_cast %36 : vector<1x128xf32> to vector<1x128xf32>
    %42 = vector.broadcast %41 : vector<1x128xf32> to vector<256x128xf32>
    %43 = vector.extract_strided_slice %40 {offsets = [0, 0, 0], sizes = [16, 16, 384], strides = [1, 1, 1]} : vector<18x16x384xbf16> to vector<16x16x384xbf16>
    %44 = vector.shape_cast %43 : vector<16x16x384xbf16> to vector<256x384xbf16>
    %c0_24 = arith.constant 0 : index
    %c0_25 = arith.constant 0 : index
    %c0_26 = arith.constant 0 : index
    %45 = vector.load %arg4[%c0_24, %c0_25, %c0_26] : memref<3x384x128xbf16, #tpu.memory_space<vmem>>, vector<1x384x128xbf16>
    %46 = vector.shape_cast %45 : vector<1x384x128xbf16> to vector<384x128xbf16>
    %cst_27 = arith.constant dense<0.000000e+00> : vector<256x128xf32>
    %47 = tpu.matmul %44, %46, %cst_27 {dimension_numbers = #tpu.dot_dimension_numbers<[1], [0], [0], [1], [0, 0, 1, 1], [], []>} : vector<256x384xbf16>, vector<384x128xbf16>, vector<256x128xf32> -> vector<256x128xf32>
    %48 = arith.addf %42, %47 : vector<256x128xf32>
    %49 = vector.extract_strided_slice %40 {offsets = [1, 0, 0], sizes = [16, 16, 384], strides = [1, 1, 1]} : vector<18x16x384xbf16> to vector<16x16x384xbf16>
    %50 = vector.shape_cast %49 : vector<16x16x384xbf16> to vector<256x384xbf16>
    %c1_28 = arith.constant 1 : index
    %c0_29 = arith.constant 0 : index
    %c0_30 = arith.constant 0 : index
    %51 = vector.load %arg4[%c1_28, %c0_29, %c0_30] : memref<3x384x128xbf16, #tpu.memory_space<vmem>>, vector<1x384x128xbf16>
    %52 = vector.shape_cast %51 : vector<1x384x128xbf16> to vector<384x128xbf16>
    %cst_31 = arith.constant dense<0.000000e+00> : vector<256x128xf32>
    %53 = tpu.matmul %50, %52, %cst_31 {dimension_numbers = #tpu.dot_dimension_numbers<[1], [0], [0], [1], [0, 0, 1, 1], [], []>} : vector<256x384xbf16>, vector<384x128xbf16>, vector<256x128xf32> -> vector<256x128xf32>
    %54 = arith.addf %48, %53 : vector<256x128xf32>
    %55 = vector.extract_strided_slice %40 {offsets = [2, 0, 0], sizes = [16, 16, 384], strides = [1, 1, 1]} : vector<18x16x384xbf16> to vector<16x16x384xbf16>
    %56 = vector.shape_cast %55 : vector<16x16x384xbf16> to vector<256x384xbf16>
    %c2_32 = arith.constant 2 : index
    %c0_33 = arith.constant 0 : index
    %c0_34 = arith.constant 0 : index
    %57 = vector.load %arg4[%c2_32, %c0_33, %c0_34] : memref<3x384x128xbf16, #tpu.memory_space<vmem>>, vector<1x384x128xbf16>
    %58 = vector.shape_cast %57 : vector<1x384x128xbf16> to vector<384x128xbf16>
    %cst_35 = arith.constant dense<0.000000e+00> : vector<256x128xf32>
    %59 = tpu.matmul %56, %58, %cst_35 {dimension_numbers = #tpu.dot_dimension_numbers<[1], [0], [0], [1], [0, 0, 1, 1], [], []>} : vector<256x384xbf16>, vector<384x128xbf16>, vector<256x128xf32> -> vector<256x128xf32>
    %60 = arith.addf %54, %59 : vector<256x128xf32>
    %61 = vector.extract_strided_slice %1 {offsets = [1, 1, 0], sizes = [16, 16, 128], strides = [1, 1, 1]} : vector<18x18x128xbf16> to vector<16x16x128xbf16>
    %62 = vector.shape_cast %61 : vector<16x16x128xbf16> to vector<256x128xbf16>
    %c0_36 = arith.constant 0 : index
    %c0_37 = arith.constant 0 : index
    %63 = vector.load %arg6[%c0_36, %c0_37] : memref<128x128xbf16, #tpu.memory_space<vmem>>, vector<128x128xbf16>
    %cst_38 = arith.constant dense<0.000000e+00> : vector<256x128xf32>
    %64 = tpu.matmul %62, %63, %cst_38 {dimension_numbers = #tpu.dot_dimension_numbers<[1], [0], [0], [1], [0, 0, 1, 1], [], []>} : vector<256x128xbf16>, vector<128x128xbf16>, vector<256x128xf32> -> vector<256x128xf32>
    %c0_39 = arith.constant 0 : index
    %c0_40 = arith.constant 0 : index
    %65 = vector.load %arg7[%c0_39, %c0_40] : memref<1x128xf32, #tpu.memory_space<vmem>>, vector<1x128xf32>
    %66 = vector.broadcast %65 : vector<1x128xf32> to vector<256x128xf32>
    %67 = arith.addf %64, %66 : vector<256x128xf32>
    %68 = arith.addf %60, %67 : vector<256x128xf32>
    %cst_41 = arith.constant 0.000000e+00 : f32
    %69 = vector.broadcast %cst_41 : f32 to vector<256x128xf32>
    %70 = arith.maximumf %68, %69 : vector<256x128xf32>
    %71 = vector.shape_cast %70 : vector<256x128xf32> to vector<16x16x128xf32>
    %c0_42 = arith.constant 0 : index
    %c0_43 = arith.constant 0 : index
    %c0_44 = arith.constant 0 : index
    %c0_45 = arith.constant 0 : index
    %72 = vector.load %arg8[%c0_42, %c0_43, %c0_44, %c0_45] : memref<1x16x16x128xf32, #tpu.memory_space<vmem>>, vector<1x16x16x128xf32>
    %73 = vector.shape_cast %72 : vector<1x16x16x128xf32> to vector<16x16x128xf32>
    %74 = vector.shape_cast %71 : vector<16x16x128xf32> to vector<1x16x16x128xf32>
    tpu.vector_store %arg8[%c0_42, %c0_43, %c0_44, %c0_45], %74 {strides = array<i32>} : memref<1x16x16x128xf32, #tpu.memory_space<vmem>>, vector<1x16x16x128xf32>,
    return
  }
  func.func @transform_0(%arg0: i32) -> (i32, i32, i32, i32) {
    %c0_i32 = arith.constant 0 : i32
    %c0_i32_0 = arith.constant 0 : i32
    %c0_i32_1 = arith.constant 0 : i32
    %c0_i32_2 = arith.constant 0 : i32
    return %arg0, %c0_i32, %c0_i32_0, %c0_i32_1 : i32, i32, i32, i32
  }
  func.func @transform_1(%arg0: i32) -> (i32, i32, i32) {
    %c0_i32 = arith.constant 0 : i32
    %c0_i32_0 = arith.constant 0 : i32
    %c0_i32_1 = arith.constant 0 : i32
    %c0_i32_2 = arith.constant 0 : i32
    return %c0_i32, %c0_i32_0, %c0_i32_1 : i32, i32, i32
  }
  func.func @transform_2(%arg0: i32) -> (i32, i32) {
    %c0_i32 = arith.constant 0 : i32
    %c0_i32_0 = arith.constant 0 : i32
    %c0_i32_1 = arith.constant 0 : i32
    return %c0_i32, %c0_i32_0 : i32, i32
  }
  func.func @transform_3(%arg0: i32) -> (i32, i32, i32) {
    %c0_i32 = arith.constant 0 : i32
    %c0_i32_0 = arith.constant 0 : i32
    %c0_i32_1 = arith.constant 0 : i32
    %c0_i32_2 = arith.constant 0 : i32
    return %c0_i32, %c0_i32_0, %c0_i32_1 : i32, i32, i32
  }
  func.func @transform_4(%arg0: i32) -> (i32, i32) {
    %c0_i32 = arith.constant 0 : i32
    %c0_i32_0 = arith.constant 0 : i32
    %c0_i32_1 = arith.constant 0 : i32
    return %c0_i32, %c0_i32_0 : i32, i32
  }
  func.func @transform_5(%arg0: i32) -> (i32, i32) {
    %c0_i32 = arith.constant 0 : i32
    %c0_i32_0 = arith.constant 0 : i32
    %c0_i32_1 = arith.constant 0 : i32
    return %c0_i32, %c0_i32_0 : i32, i32
  }
  func.func @transform_6(%arg0: i32) -> (i32, i32) {
    %c0_i32 = arith.constant 0 : i32
    %c0_i32_0 = arith.constant 0 : i32
    %c0_i32_1 = arith.constant 0 : i32
    return %c0_i32, %c0_i32_0 : i32, i32
  }
  func.func @transform_7(%arg0: i32) -> (i32, i32, i32, i32) {
    %c0_i32 = arith.constant 0 : i32
    %c0_i32_0 = arith.constant 0 : i32
    %c0_i32_1 = arith.constant 0 : i32
    %c0_i32_2 = arith.constant 0 : i32
    return %arg0, %c0_i32, %c0_i32_0, %c0_i32_1 : i32, i32, i32, i32
  }
}

</mosaic_0001>

<bundles_post_ra>
// kernel: tpu_custom_call.1
= control target key start
LH: loop header
LB: loop body
LE: loop exit
PB: predicated region body
PF: predicated region fallthrough
CT: control target
= control target key end

     0   :  { %12 = vsyncpa [#allocation4], 0  ;;  %s11288_s0 = inlined_call_operand.vmem [shape: bf16[2,18,18,128], index: 0, kind: input, shape index: {}]   ;;  %s11289_s1 = inlined_call_operand.vmem [shape: bf16[3,384,128], index: 1, kind: input, shape index: {}]   ;;  %s11290_s2 = inlined_call_operand.vmem [shape: f32[1,128], index: 2, kind: input, shape index: {}]   ;;  %s11291_s3 = inlined_call_operand.hbm [shape: bf16[3,384,128], index: 3, kind: input, shape index: {}]   ;;  %s11292_s4 = inlined_call_operand.vmem [shape: f32[1,128], index: 4, kind: input, shape index: {}]   ;;  %s11293_s5 = inlined_call_operand.vmem [shape: bf16[128,128], index: 5, kind: input, shape index: {}]   ;;  %s11294_s6 = inlined_call_operand.vmem [shape: f32[1,128], index: 6, kind: input, shape index: {}]   ;;  %s11295_s7 = inlined_call_operand.hbm [shape: f32[2,16,16,128], index: 7, kind: output, shape index: {}]  }
   0x1   :  { %13 = vsyncpa [#allocation5], 0 }
   0x2   :  { %15 = vsyncpa [#allocation5 + $0x1], 0  ;;  %s8618_s24 = smov 0   ;;  %s8620_s25 = smov 0  }
   0x3   :  { %s8622_s26 = smov 0   ;;  %s8624_s27 = smov 0  }
   0x4 LB: > { %s8639_s28 = sadd.s32 4294967295, %s8569_s27   ;;  %s6127_s29 = sadd.s32 4294967294, %s8569_s27   ;;  %s8569_s27 = sphi %s8624_s27, %s11570_s27   ;;  %s8565_s26 = sphi %s8622_s26, %s11569_s26   ;;  %s8561_s25 = sphi %s8620_s25, %s11568_s25   ;;  %s8557_s24 = sphi %s8618_s24, %s11567_s24  }
   0x5   : > { %s8643_s30 = sadd.s32 1, %s8569_s27   ;;  %s180_s8 = sadd.s32 1, %s8565_s26 }
   0x6   : > { %s177_s9 = ssub.s32 %s8569_s27, %s8643_s30  ;;  %p190_p0 = scmp.ne.s32.totalorder %s8565_s26, %s8561_s25 }
   0x7   : > { %p178_p1 = scmp.eq.s32.totalorder %s177_s9, 0  ;;  %p191_p2 = scmp.eq.s32.totalorder %s8639_s28, 1 }
   0x8   : > { %p196_p3 = scmp.ne.s32.totalorder %s8561_s25, %s8557_s24  ;;  %p197_p4 = scmp.eq.s32.totalorder %s6127_s29, 1 }
   0x9   : > { %s8654_s10 = scalar_select %p178_p1, %s8565_s26, %s180_s8  }
   0xa   : > { %p8656_p5 = por %p191_p2, %p190_p0  ;;  %p8660_p6 = por %p197_p4, %p196_p3 }
   0xb   : > { %p6128_p7 = scmp.ge.s32.totalorder %s8569_s27, 1  ;;  %p204_p8 = scmp.lt.s32.totalorder %s8569_s27, 3 }
   0xc   : > { %s11379_s11 = scalar_select %p8656_p5, 1, 0 }
   0xd   : > { %s11380_s12 = scalar_select %p8660_p6, 1, 0 }
   0xe   : > { %p11296_p10 = scmp.eq.s32.totalorder %s8639_s28, 0  ;;  %p8668_p11 = pnand %p6128_p7, %p204_p8 }
   0xf   : > { %s8571_s14 = smov [#allocation3]   ;;  %s8475_s19 = scalar_lea.hbm %s11291_s3, 9216 }
  0x10   : > { %s11381_s13 = scalar_select %p8668_p11, 1, 0 }
  0x11   : > { %s222_s15 = sshll.u32 %s8571_s14, 4  ;;  %p8192_p12 = pneg %p8668_p11  ;;  %s223_s15 = int_to_ptr.vmem [resolvable:$true] %s222_s15 }
  0x12   : > { %p8476_p0 = scmp.ne.s32.totalorder %s11291_s3, %s8475_s19  ;;  %p8482_p4 = scmp.lt.u32.totalorder %s8475_s19, %s11291_s3 }
  0x13   : > { %p8676_p13 = pnand %p11296_p10, %p8192_p12 }
  0x15   : > { %p8477_p1 = pneg %p8676_p13 }
  0x17   : > { %p8478_p2 = pnand %p8477_p1, %p8476_p0 }
  0x19   : > { %p8479_p3 = pneg %p8478_p2 }
  0x1b   : > { %p8484_p7 = pnand %p8482_p4, %p8479_p3 }
  0x1d   : > { %8487 = shalt.err (!%p8484_p7)
}
  0x1e   : > { %s8488_s29 = scalar_lea.vmem %s223_s15, 9216  ;;  %p8496_p10 = scmp.lt.s32.totalorder %s223_s15, %s223_s15 }
  0x1f   : > { %p8489_p8 = scmp.ne.s32.totalorder %s223_s15, %s8488_s29  ;;  %p8497_p6 = scmp.lt.s32.totalorder %s8488_s29, %s8488_s29 }
  0x21   : > { %p8491_p12 = pnand %p8489_p8, %p8477_p1  ;;  %p8498_p5 = por %p8497_p6, %p8496_p10 }
  0x23   : > { %p8492_p9 = pneg %p8491_p12 }
  0x25   : > { %p8499_p11 = pnand %p8498_p5, %p8492_p9 }
  0x27   : > { %8502 = shalt.err (!%p8499_p11)
}
  0x28   : > { %s8572_s8 = smov 64   ;;  %s8573_s9 = smov 4  }
  0x29   : > { %8195 = dma.hbm_to_vmem [thread:$0]  (!%p8676_p13), %s11291_s3, 9216, %s223_s15, [#allocation4], %s8572_s8, %s8572_s8, %s8573_s9  }
  0x2a   : > { %p11383_p0 = scmp.ne.s32.totalorder %s11381_s13, 0 }
  0x2c   : > { %255 = sbr.rel (%p11383_p0) target bundleno = 1341 (0x53d), region = 48 }
  0x33   : > { %p11384_p2 = scmp.eq.s32.totalorder %s8639_s28, 0 }
  0x35   : > { %8548 = dma.done.wait (%p11384_p2), [#allocation4], 9216   ;;  %p11385_p1 = pmov %p11384_p2 }
  0x36   : > { %s284_s18 = sand.u32 1, %s8561_s25   ;;  %v8241_v0 = vld [vmem:[%s11289_s1 + $0x40] sm:$0xff]   ;;  %v8244_v3 = vld [vmem:[%s11289_s1 + $0x48] sm:$0xff]   ;;  %v8247_v6 = vld [vmem:[%s11289_s1 + $0x50] sm:$0xff]   ;;  %p287_p5 = scmp.lt.s32.totalorder %s8639_s28, 1  ;;  %vm745_vm1 = vcmask 1046528  }
  0x37   : > { %8550 = vsyncadd (%p11385_p1), [#allocation4], 4294958080  ;;  %s8705_s19 = sshll.u32 %s284_s18, 8  ;;  %v8242_v1 = vld [vmem:[%s11289_s1 + $0x80] sm:$0xff]   ;;  %6545 = vmatprep.subr.bf16.mxu0 %v8241_v0  ;;  %v8245_v4 = vld [vmem:[%s11289_s1 + $0x88] sm:$0xff]   ;;  %p11468_p6 = scmp.ne.s32.totalorder %s8639_s28, 0 }
  0x38   : > { %v8243_v2 = vld [vmem:[%s11289_s1] sm:$0xff]   ;;  %7385 = vmatprep.subr.bf16.mxu1 %v8242_v1  ;;  %v8246_v5 = vld [vmem:[%s11289_s1 + $0x8] sm:$0xff]   ;;  %v8248_v7 = vld [vmem:[%s11289_s1 + $0x90] sm:$0xff]   ;;  %s288_s13 = scalar_select %p287_p5, %s8639_s28, 1  ;;  %vm510_vm0 = vsmask.f32 7424 }
  0x39   : > { %6546 = vmatpush3.bf16.msra.mxu0 %v8243_v2  ;;  %7386 = vmatpush3.bf16.msra.mxu1 %v8242_v1  ;;  %v8249_v8 = vld [vmem:[%s11289_s1 + $0x10] sm:$0xff]   ;;  %v8250_v9 = vld [vmem:[%s11289_s1 + $0x58] sm:$0xff]   ;;  %v8253_v12 = vld [vmem:[%s11289_s1 + $0x60] sm:$0xff]  }
  0x3a   : > { %6547 = vmatprep.subr.bf16.mxu0 %v8244_v3  ;;  %7387 = vmatprep.subr.bf16.mxu1 %v8245_v4  ;;  %v8251_v10 = vld [vmem:[%s11289_s1 + $0x98] sm:$0xff]   ;;  %v8254_v13 = vld [vmem:[%s11289_s1 + $0xa0] sm:$0xff]   ;;  %v8256_v15 = vld [vmem:[%s11289_s1 + $0x68] sm:$0xff]   ;;  %s8185_s17 = smul.u32 216, %s288_s13 }
  0x3b   : > { %v8252_v11 = vld [vmem:[%s11289_s1 + $0x18] sm:$0xff]   ;;  %v8255_v14 = vld [vmem:[%s11289_s1 + $0x20] sm:$0xff]   ;;  %v8257_v16 = vld [vmem:[%s11289_s1 + $0xa8] sm:$0xff]  }
  0x3c   : > { %v8258_v17 = vld [vmem:[%s11289_s1 + $0x28] sm:$0xff]   ;;  %v8259_v18 = vld [vmem:[%s11289_s1 + $0x70] sm:$0xff]   ;;  %s8775_s14 = scalar_lea.vmem %s11288_s0, %s8185_s17  ;;  %v8262_v21 = vld [vmem:[%s11289_s1 + $0x78] sm:$0xff]   ;;  %s9912_s17 = scalar_lea.vmem [#allocation6], %s8705_s19 }
  0x3d   : > { %6548 = vmatpush3.bf16.msra.mxu0 %v8246_v5  ;;  %7388 = vmatpush3.bf16.msra.mxu1 %v8245_v4  ;;  %v8260_v19 = vld [vmem:[%s11289_s1 + $0xb0] sm:$0xff]   ;;  %v8263_v22 = vld [vmem:[%s11289_s1 + $0xb8] sm:$0xff]   ;;  %v8265_v23 = vld [vmem:[%s8775_s14] sm:$0xff]  }
  0x3e   : > { %6549 = vmatprep.subr.bf16.mxu0 %v8247_v6  ;;  %7389 = vmatprep.subr.bf16.mxu1 %v8248_v7  ;;  %v8261_v20 = vld [vmem:[%s11289_s1 + $0x30] sm:$0xff]   ;;  %v8266_v24 = vld [vmem:[%s8775_s14 + $0x8] ss:$0 sps:$4 sm:$0x11]   ;;  %v8786_v25 = vld [vmem:[%s8775_s14 + $0xc] sm:$0xf] }
  0x3f   : > { %11386 = vst [vmem:[#allocation9_spill] sm:$0xff] %v8786_v25  ;;  %v8789_v26 = vld [vmem:[%s8775_s14 + $0x10] sm:$0xf]  ;;  %v8792_v27 = vld [vmem:[%s8775_s14 + $0x14] sm:$0x1]  ;;  %v512_v28 = vshrl.u32 %v8265_v23, 16 }
  0x40   : > { %11387 = vst [vmem:[#allocation10_spill] sm:$0xff] %v8789_v26  ;;  %11388 = vst [vmem:[#allocation11_spill] sm:$0xff] %v8792_v27  ;;  %v514_v29 = vshll.u32 %v8265_v23, 16  ;;  %v519_v30 = vshll.u32 %v8266_v24, 16  ;;  %v746_v31 = vrot.slane %v8265_v23, 1  ;;  %v8264_v32 = vld [vmem:[%s11289_s1 + $0x38] sm:$0xff]   ;;  %v8799_v34 = vcombine.low %v8786_v25, %v8789_v26 }
  0x41   : > { %6550 = vmatpush3.bf16.msra.mxu0 %v8249_v8  ;;  %7390 = vmatpush3.bf16.msra.mxu1 %v8248_v7  ;;  %v747_v33 = vrot.slane %v8266_v24, 1  ;;  %v6154_v35 = vcombine.low %v8792_v27, %v8792_v27  ;;  %v8269_v38 = vld [vmem:[%s11289_s1 + $0x100] sm:$0xff]   ;;  %v8807_v39 = vld [vmem:[%s8775_s14 + $0x18] sm:$0xf]  ;;  %v8816_v45 = vld [vmem:[%s8775_s14 + $0x1c] sm:$0xf] }
  0x42   : > { %6551 = vmatprep.subr.bf16.mxu0 %v8250_v9  ;;  %7391 = vmatprep.subr.bf16.mxu1 %v8251_v10  ;;  %v516_v36 = vrot.slane %v514_v29, 1  ;;  %v521_v37 = vrot.slane %v519_v30, 1  ;;  %11389 = vst [vmem:[#allocation12_spill] sm:$0xff] %v8807_v39  ;;  %v749_v41 = vrot.slane %v8799_v34, 1  ;;  %v8270_v43 = vld [vmem:[%s11289_s1 + $0xc0] sm:$0xff]   ;;  %v524_v44 = vshrl.u32 %v8799_v34, 16 }
  0x43   : > { %v748_v40 = vsel %vm745_vm1, %v746_v31, %v747_v33  ;;  %v750_v42 = vrot.slane %v6154_v35, 1  ;;  %11390 = vst [vmem:[#allocation13_spill] sm:$0xff] %v8816_v45  ;;  %v526_v47 = vshll.u32 %v8799_v34, 16  ;;  %v531_v48 = vshll.u32 %v6154_v35, 16  ;;  %v8820_v49 = vld [vmem:[%s8775_s14 + $0x20] sm:$0x1] }
  0x44   : > { %v517_v46 = vor.u32 %v516_v36, %v512_v28  ;;  %7401 = vmatprep.mubr.bf16.mxu1 %v748_v40  ;;  %11391 = vst [vmem:[#allocation14_spill] sm:$0xff] %v8820_v49  ;;  %v8824_v50 = vcombine.low %v8807_v39, %v8816_v45  ;;  %v8827_v51 = vld [vmem:[%s8775_s14 + $0x24] sm:$0xf]  ;;  %v6155_v53 = vcombine.low %v8820_v49, %v8820_v49  ;;  %v8835_v54 = vld [vmem:[%s8775_s14 + $0x28] sm:$0xf] }
  0x45   : > { %6552 = vmatpush3.bf16.msra.mxu0 %v8252_v11  ;;  %7392 = vmatpush3.bf16.msra.mxu1 %v8251_v10  ;;  %11392 = vst [vmem:[#allocation15_spill] sm:$0xff] %v8827_v51  ;;  %v8830_v52 = vsel %vm745_vm1, %v749_v41, %v750_v42  ;;  %11393 = vst [vmem:[#allocation16_spill] sm:$0xff] %v8835_v54  ;;  %v8838_v55 = vld [vmem:[%s8775_s14 + $0x2c] sm:$0x1]  ;;  %v8841_v56 = vld [vmem:[%s8775_s14 + $0x30] sm:$0xf]  ;;  %v8853_v0 = vcombine.low %v8827_v51, %v8835_v54 }
  0x46   : > { %6553 = vmatprep.subr.bf16.mxu0 %v8253_v12  ;;  %7393 = vmatprep.subr.bf16.mxu1 %v8254_v13  ;;  %11394 = vst [vmem:[#allocation17_spill] sm:$0xff] %v8838_v55  ;;  %11395 = vst [vmem:[#allocation18_spill] sm:$0xff] %v8841_v56  ;;  %v522_v57 = vsel %vm510_vm0, %v517_v46, %v521_v37  ;;  %v528_v58 = vrot.slane %v526_v47, 1  ;;  %v533_v59 = vrot.slane %v531_v48, 1  ;;  %v752_v60 = vrot.slane %v8824_v50, 1  ;;  %v8279_v62 = vld [vmem:[%s11289_s1 + $0x108] sm:$0xff]  }
  0x47   : > { %v8846_v61 = vld [vmem:[%s8775_s14 + $0x34] sm:$0xf]  ;;  %1048 = vmatprep.mubr.bf16.mxu0 %v522_v57  ;;  %v753_v63 = vrot.slane %v6155_v53, 1  ;;  %v6156_v1 = vcombine.low %v8838_v55, %v8838_v55  ;;  %v536_v2 = vshrl.u32 %v8824_v50, 16  ;;  %v8859_v3 = vld [vmem:[%s8775_s14 + $0x38] sm:$0x1] }
  0x48   : > { %11396 = vst [vmem:[#allocation19_spill] sm:$0xff] %v8846_v61  ;;  %11397 = vst [vmem:[#allocation20_spill] sm:$0xff] %v8859_v3  ;;  %v8862_v4 = vld [vmem:[%s8775_s14 + $0x3c] sm:$0xf]  ;;  %v8280_v5 = vld [vmem:[%s11289_s1 + $0xc8] sm:$0xff]   ;;  %v529_v6 = vor.u32 %v528_v58, %v524_v44  ;;  %v538_v7 = vshll.u32 %v8824_v50, 16  ;;  %v8871_v9 = vcombine.low %v8841_v56, %v8846_v61 }
  0x49   : > { %6554 = vmatpush3.bf16.msra.mxu0 %v8255_v14  ;;  %7394 = vmatpush3.bf16.msra.mxu1 %v8254_v13  ;;  %11398 = vst [vmem:[#allocation21_spill] sm:$0xff] %v8862_v4  ;;  %v543_v8 = vshll.u32 %v6155_v53, 16  ;;  %v8874_v10 = vld [vmem:[%s8775_s14 + $0x40] sm:$0xf]  ;;  %v8877_v11 = vld [vmem:[%s8775_s14 + $0x44] sm:$0x1]  ;;  %v8880_v12 = vsel %vm745_vm1, %v752_v60, %v753_v63 }
  0x4a   : > { %6555 = vmatprep.subr.bf16.mxu0 %v8256_v15  ;;  %7395 = vmatprep.subr.bf16.mxu1 %v8257_v16  ;;  %11399 = vst [vmem:[#allocation22_spill] sm:$0xff] %v8874_v10  ;;  %11400 = vst [vmem:[#allocation23_spill] sm:$0xff] %v8877_v11  ;;  %v755_v13 = vrot.slane %v8853_v0, 1  ;;  %v756_v14 = vrot.slane %v6156_v1, 1  ;;  %v8885_v15 = vcombine.low %v8859_v3, %v8859_v3  ;;  %v550_v29 = vshll.u32 %v8853_v0, 16  ;;  %v8290_v42 = vld [vmem:[%s11289_s1 + $0xd0] sm:$0xff]  }
  0x4b   : > { %v8902_v24 = vcombine.low %v8862_v4, %v8874_v10  ;;  %v8906_v28 = vcombine.low %v8877_v11, %v8877_v11  ;;  %v8910_v30 = vld [vmem:[%s8775_s14 + $0x4c] sm:$0xf]  ;;  %v555_v33 = vshll.u32 %v6156_v1, 16  ;;  %v8917_v35 = vld [vmem:[%s8775_s14 + $0x50] sm:$0x1]  ;;  %v8295_v46 = vld [vmem:[%s11289_s1 + $0x118] sm:$0xff]  }
  0x4c   : > { %11402 = vst [vmem:[#allocation25_spill] sm:$0xff] %v8910_v30  ;;  %v8913_v31 = vsel %vm745_vm1, %v755_v13, %v756_v14  ;;  %11403 = vst [vmem:[#allocation26_spill] sm:$0xff] %v8917_v35  ;;  %v552_v40 = vrot.slane %v550_v29, 1  ;;  %v8931_v41 = vcombine.low %v8917_v35, %v8917_v35  ;;  %v8940_v44 = vld [vmem:[%s8775_s14 + $0x58] sm:$0xf]  ;;  %v560_v14 = vshrl.u32 %v8871_v9, 16 }
  0x4d   : > { %6556 = vmatpush3.bf16.msra.mxu0 %v8258_v17  ;;  %7396 = vmatpush3.bf16.msra.mxu1 %v8257_v16  ;;  %v8888_v16 = vsel %vm510_vm0, %v529_v6, %v533_v59  ;;  %v540_v17 = vrot.slane %v538_v7, 1  ;;  %11405 = vst [vmem:[#allocation28_spill] sm:$0xff] %v8940_v44  ;;  %v761_v47 = vrot.slane %v8902_v24, 1  ;;  %v762_v48 = vrot.slane %v8906_v28, 1  ;;  %v8950_v53 = vld [vmem:[%s8775_s14 + $0x5c] sm:$0x1] }
  0x4e   : > { %6557 = vmatprep.subr.bf16.mxu0 %v8259_v18  ;;  %7397 = vmatprep.subr.bf16.mxu1 %v8260_v19  ;;  %v545_v18 = vrot.slane %v543_v8, 1  ;;  %11406 = vst [vmem:[#allocation29_spill] sm:$0xff] %v8950_v53  ;;  %v557_v57 = vrot.slane %v555_v33, 1  ;;  %v562_v59 = vshll.u32 %v8871_v9, 16  ;;  %v8296_v60 = vld [vmem:[%s11289_s1 + $0xd8] sm:$0xff]   ;;  %v765_v63 = vrot.slane %v8931_v41, 1 }
  0x4f   : > { %v8301_v6 = vld [vmem:[%s11289_s1 + $0x120] sm:$0xff]   ;;  %v8975_v7 = vcombine.low %v8950_v53, %v8950_v53  ;;  %v8978_v8 = vld [vmem:[%s8775_s14 + $0x68] sm:$0x1]  ;;  %v8981_v13 = vsel %vm745_vm1, %v761_v47, %v762_v48  ;;  %v9005_v33 = vld [vmem:[%s8775_s14 + $0x6c] sm:$0xf] }
  0x50   : > { %11409 = vst [vmem:[#allocation32_spill] sm:$0xff] %v8978_v8  ;;  %v8998_v29 = vcombine.low %v8978_v8, %v8978_v8  ;;  %11410 = vst [vmem:[#allocation33_spill] sm:$0xff] %v9005_v33  ;;  %v9048_v8 = vld [vmem:[%s8775_s14 + $0x88] sm:$0xf] }
  0x51   : > { %6558 = vmatpush3.bf16.msra.mxu0 %v8261_v20  ;;  %7398 = vmatpush3.bf16.msra.mxu1 %v8260_v19  ;;  %v758_v19 = vrot.slane %v8871_v9, 1  ;;  %v8289_v20 = vld [vmem:[%s11289_s1 + $0x110] sm:$0xff]   ;;  %11417 = vst [vmem:[#allocation40_spill] sm:$0xff] %v9048_v8  ;;  %v9152_v3 = vld [vmem:[%s8775_s14 + $0xa8] sm:$0xf]  ;;  %v603_v55 = vshll.u32 %v8975_v7, 16 }
  0x52   : > { %6559 = vmatprep.subr.bf16.mxu0 %v8262_v21  ;;  %7399 = vmatprep.subr.bf16.mxu1 %v8263_v22  ;;  %v759_v21 = vrot.slane %v8885_v15, 1  ;;  %11425 = vst [vmem:[#allocation48_spill] sm:$0xff] %v9152_v3 }
  0x55   : > { %6560 = vmatpush3.bf16.msra.mxu0 %v8264_v32  ;;  %7400 = vmatpush3.bf16.msra.mxu1 %v8263_v22  ;;  %v8898_v22 = vld [vmem:[%s8775_s14 + $0x48] sm:$0xf]  ;;  %v548_v32 = vshrl.u32 %v8853_v0, 16 }
  0x56   : > { %6681 = vmatprep.subr.bf16.mxu0 %v8269_v38  ;;  %7721 = vmatprep.subr.bf16.mxu1 %v8269_v38  ;;  %11401 = vst [vmem:[#allocation24_spill] sm:$0xff] %v8898_v22  ;;  %v8921_v36 = vcombine.low %v8898_v22, %v8910_v30  ;;  %v8927_v38 = vsel %vm745_vm1, %v758_v19, %v759_v21  ;;  %v9155_v30 = vld [vmem:[%s8775_s14 + $0xac] sm:$0xf]  ;;  %v9158_v22 = vld [vmem:[%s8775_s14 + $0xb0] sm:$0x1] }
  0x57   : > { %11426 = vst [vmem:[#allocation49_spill] sm:$0xff] %v9155_v30  ;;  %11427 = vst [vmem:[#allocation50_spill] sm:$0xff] %v9158_v22 }
  0x58   : > { %1049 = vmatmul.mubr.bf16.vlgmr.msra.gmra.mrb[0].mxu0 %v8265_v23  ;;  %7402 = vmatmul.mubr.bf16.vlgmr.msra.gmra.mrb[0].mxu1 %v8830_v52  ;;  %v541_v23 = vor.u32 %v540_v17, %v536_v2  ;;  %v764_v58 = vrot.slane %v8921_v36, 1  ;;  %v8965_v2 = vld [vmem:[%s8775_s14 + $0x60] sm:$0xf]  ;;  %v564_v17 = vrot.slane %v562_v59, 1  ;;  %v771_v59 = vrot.slane %v8998_v29, 1 }
  0x59   : > { %6682 = vmatpush3.bf16.msra.mxu0 %v8270_v43  ;;  %7729 = vmatpush3.bf16.msra.mxu1 %v8270_v43  ;;  %v8937_v43 = vld [vmem:[%s8775_s14 + $0x54] sm:$0xf]  ;;  %11407 = vst [vmem:[#allocation30_spill] sm:$0xff] %v8965_v2 }
  0x5a   : > { %7405 = vmatprep.mubr.bf16.mxu1 %v8880_v12  ;;  %6683 = vmatprep.subr.bf16.mxu0 %v8279_v62  ;;  %v8924_v37 = vsel %vm510_vm0, %v541_v23, %v545_v18  ;;  %11404 = vst [vmem:[#allocation27_spill] sm:$0xff] %v8937_v43  ;;  %v8962_v1 = vcombine.low %v8937_v43, %v8940_v44  ;;  %v567_v18 = vshll.u32 %v8885_v15, 16  ;;  %v8302_v15 = vld [vmem:[%s11289_s1 + $0xe0] sm:$0xff]   ;;  %v591_v44 = vshll.u32 %v8931_v41, 16 }
  0x5b   : > { %1056 = vmatprep.mubr.bf16.mxu0 %v8888_v16  ;;  %7722 = vmatprep.subr.bf16.mxu1 %v8279_v62  ;;  %v553_v62 = vor.u32 %v552_v40, %v548_v32  ;;  %v8993_v21 = vsel %vm745_vm1, %v764_v58, %v765_v63  ;;  %v768_v32 = vrot.slane %v8975_v7, 1  ;;  %v9008_v40 = vld [vmem:[%s8775_s14 + $0x70] sm:$0xf]  ;;  %v565_v47 = vor.u32 %v564_v17, %v560_v14  ;;  %v9031_v63 = vld [vmem:[%s8775_s14 + $0x78] sm:$0xf] }
  0x5c   : > { %v767_v23 = vrot.slane %v8962_v1, 1  ;;  %11411 = vst [vmem:[#allocation34_spill] sm:$0xff] %v9008_v40  ;;  %v569_v48 = vrot.slane %v567_v18, 1  ;;  %11413 = vst [vmem:[#allocation36_spill] sm:$0xff] %v9031_v63  ;;  %v9037_v14 = vld [vmem:[%s8775_s14 + $0x80] sm:$0x1] }
  0x5d   : > { %6684 = vmatpush3.bf16.msra.mxu0 %v8280_v5  ;;  %7730 = vmatpush3.bf16.msra.mxu1 %v8280_v5  ;;  %v8968_v5 = vld [vmem:[%s8775_s14 + $0x64] sm:$0xf]  ;;  %11415 = vst [vmem:[#allocation38_spill] sm:$0xff] %v9037_v14  ;;  %v572_v18 = vshrl.u32 %v8902_v24, 16  ;;  %v9069_v35 = vcombine.low %v9037_v14, %v9037_v14  ;;  %v9190_v7 = vld [vmem:[%s8775_s14 + $0xb4] sm:$0xf] }
  0x5e   : > { %6685 = vmatprep.subr.bf16.mxu0 %v8289_v20  ;;  %7723 = vmatprep.subr.bf16.mxu1 %v8289_v20  ;;  %11408 = vst [vmem:[#allocation31_spill] sm:$0xff] %v8968_v5  ;;  %v8987_v19 = vcombine.low %v8965_v2, %v8968_v5  ;;  %v8990_v20 = vsel %vm510_vm0, %v553_v62, %v557_v57  ;;  %v574_v57 = vshll.u32 %v8902_v24, 16  ;;  %11428 = vst [vmem:[#allocation51_spill] sm:$0xff] %v9190_v7 }
  0x5f   : > { %v9028_v62 = vcombine.low %v9005_v33, %v9008_v40  ;;  %v8309_v40 = vld [vmem:[%s11289_s1 + $0x130] sm:$0xff]   ;;  %v9054_v33 = vsel %vm745_vm1, %v767_v23, %v768_v32  ;;  %v9057_v5 = vsel %vm510_vm0, %v565_v47, %v569_v48  ;;  %v9072_v23 = vld [vmem:[%s8775_s14 + $0x8c] sm:$0x1]  ;;  %v586_v48 = vshll.u32 %v8921_v36, 16 }
  0x60   : > { %1057 = vmatmul.mubr.bf16.gmra.mrb[4].mxu0 %v8799_v34  ;;  %7406 = vmatmul.mubr.bf16.gmra.mrb[4].mxu1 %v8913_v31  ;;  %v770_v58 = vrot.slane %v8987_v19, 1  ;;  %11418 = vst [vmem:[#allocation41_spill] sm:$0xff] %v9072_v23  ;;  %v608_v27 = vshrl.u32 %v8987_v19, 16 }
  0x61   : > { %1064 = vmatprep.mubr.bf16.mxu0 %v8924_v37  ;;  %7409 = vmatprep.mubr.bf16.mxu1 %v8927_v38  ;;  %v588_v11 = vrot.slane %v586_v48, 1  ;;  %v8311_v48 = vld [vmem:[%s11289_s1 + $0x138] sm:$0xff]  }
  0x62   : > { %6686 = vmatpush3.bf16.msra.mxu0 %v8290_v42  ;;  %7731 = vmatpush3.bf16.msra.mxu1 %v8290_v42  ;;  %v8303_v42 = vld [vmem:[%s11289_s1 + $0x128] sm:$0xff]   ;;  %v9061_v53 = vsel %vm745_vm1, %v770_v58, %v771_v59  ;;  %v9090_v58 = vld [vmem:[%s8775_s14 + $0x90] sm:$0xf]  ;;  %v9093_v59 = vld [vmem:[%s8775_s14 + $0x94] sm:$0xf] }
  0x63   : > { %7724 = vmatprep.subr.bf16.mxu1 %v8295_v46  ;;  %6687 = vmatprep.subr.bf16.mxu0 %v8295_v46  ;;  %v9016_v46 = vld [vmem:[%s8775_s14 + $0x74] sm:$0x1]  ;;  %11419 = vst [vmem:[#allocation42_spill] sm:$0xff] %v9090_v58  ;;  %11420 = vst [vmem:[#allocation43_spill] sm:$0xff] %v9093_v59 }
  0x64   : > { %11412 = vst [vmem:[#allocation35_spill] sm:$0xff] %v9016_v46  ;;  %v9041_v17 = vcombine.low %v9016_v46, %v9016_v46  ;;  %v579_v46 = vshll.u32 %v8906_v28, 16  ;;  %v773_v28 = vrot.slane %v9028_v62, 1 }
  0x66   : > { %7732 = vmatpush3.bf16.msra.mxu1 %v8296_v60  ;;  %6688 = vmatpush3.bf16.msra.mxu0 %v8296_v60  ;;  %v8304_v60 = vld [vmem:[%s11289_s1 + $0xe8] sm:$0xff]   ;;  %v774_v47 = vrot.slane %v9041_v17, 1  ;;  %v581_v14 = vrot.slane %v579_v46, 1  ;;  %v9108_v46 = vcombine.low %v9090_v58, %v9093_v59  ;;  %v9138_v58 = vld [vmem:[%s8775_s14 + $0xa4] sm:$0x1] }
  0x67   : > { %7725 = vmatprep.subr.bf16.mxu1 %v8301_v6  ;;  %6689 = vmatprep.subr.bf16.mxu0 %v8301_v6  ;;  %v9034_v6 = vld [vmem:[%s8775_s14 + $0x7c] sm:$0xf]  ;;  %11424 = vst [vmem:[#allocation47_spill] sm:$0xff] %v9138_v58  ;;  %v6166_v10 = vcombine.low %v9138_v58, %v9138_v58 }
  0x68   : > { %1065 = vmatmul.mubr.bf16.gmra.mrb[8].mxu0 %v8824_v50  ;;  %7410 = vmatmul.mubr.bf16.gmra.mrb[8].mxu1 %v8981_v13  ;;  %11414 = vst [vmem:[#allocation37_spill] sm:$0xff] %v9034_v6  ;;  %v9065_v2 = vcombine.low %v9031_v63, %v9034_v6  ;;  %v8310_v6 = vld [vmem:[%s11289_s1 + $0xf0] sm:$0xff]   ;;  %v584_v63 = vshrl.u32 %v8921_v36, 16 }
  0x69   : > { %1072 = vmatprep.mubr.bf16.mxu0 %v8990_v20  ;;  %7413 = vmatprep.mubr.bf16.mxu1 %v8993_v21 }
  0x6a   : > { %7733 = vmatpush3.bf16.msra.mxu1 %v8302_v15  ;;  %6690 = vmatpush3.bf16.msra.mxu0 %v8302_v15  ;;  %v9045_v15 = vld [vmem:[%s8775_s14 + $0x84] sm:$0xf] }
  0x6b   : > { %7726 = vmatprep.subr.bf16.mxu1 %v8303_v42  ;;  %6691 = vmatprep.subr.bf16.mxu0 %v8303_v42  ;;  %11416 = vst [vmem:[#allocation39_spill] sm:$0xff] %v9045_v15  ;;  %v576_v42 = vrot.slane %v574_v57, 1  ;;  %v9077_v32 = vcombine.low %v9045_v15, %v9048_v8  ;;  %v9087_v57 = vcombine.low %v9072_v23, %v9072_v23  ;;  %v776_v8 = vrot.slane %v9065_v2, 1 }
  0x6c   : > { %v777_v15 = vrot.slane %v9069_v35, 1 }
  0x6d   : > { %v779_v23 = vrot.slane %v9077_v32, 1  ;;  %v780_v43 = vrot.slane %v9087_v57, 1  ;;  %v646_v26 = vshll.u32 %v9077_v32, 16 }
  0x6e   : > { %7734 = vmatpush3.bf16.msra.mxu1 %v8304_v60  ;;  %6692 = vmatpush3.bf16.msra.mxu0 %v8304_v60  ;;  %v577_v60 = vor.u32 %v576_v42, %v572_v18  ;;  %v9115_v42 = vsel %vm745_vm1, %v773_v28, %v774_v47  ;;  %v9125_v59 = vsel %vm745_vm1, %v776_v8, %v777_v15  ;;  %v8312_v28 = vld [vmem:[%s11289_s1 + $0xf8] sm:$0xff]   ;;  %v9135_v47 = vld [vmem:[%s8775_s14 + $0xa0] sm:$0xf]  ;;  %v593_v8 = vrot.slane %v591_v44, 1 }
  0x6f   : > { %7727 = vmatprep.subr.bf16.mxu1 %v8309_v40  ;;  %6693 = vmatprep.subr.bf16.mxu0 %v8309_v40  ;;  %v9096_v40 = vld [vmem:[%s8775_s14 + $0x98] sm:$0x1]  ;;  %11423 = vst [vmem:[#allocation46_spill] sm:$0xff] %v9135_v47  ;;  %v9168_v4 = vsel %vm745_vm1, %v779_v23, %v780_v43 }
  0x70   : > { %1073 = vmatmul.mubr.bf16.gmra.mrb[12].mxu0 %v8853_v0  ;;  %7414 = vmatmul.mubr.bf16.gmra.mrb[12].mxu1 %v9054_v33  ;;  %11421 = vst [vmem:[#allocation44_spill] sm:$0xff] %v9096_v40  ;;  %v9112_v18 = vcombine.low %v9096_v40, %v9096_v40  ;;  %v9122_v41 = vsel %vm510_vm0, %v577_v60, %v581_v14  ;;  %v9128_v40 = vld [vmem:[%s8775_s14 + $0x9c] sm:$0xf]  ;;  %v782_v14 = vrot.slane %v9108_v46, 1  ;;  %v9147_v60 = vld [vmem:[%s11289_s1 + $0x140] sm:$0xff]  }
  0x71   : > { %1080 = vmatprep.mubr.bf16.mxu0 %v9057_v5  ;;  %7417 = vmatprep.mubr.bf16.mxu1 %v9061_v53  ;;  %11422 = vst [vmem:[#allocation45_spill] sm:$0xff] %v9128_v40  ;;  %v9162_v44 = vcombine.low %v9128_v40, %v9135_v47  ;;  %v9178_v47 = vcombine.low %v9158_v22, %v9158_v22  ;;  %v9200_v22 = vld [vmem:[%s8775_s14 + $0xbc] sm:$0x1]  ;;  %v610_v40 = vshll.u32 %v8987_v19, 16 }
  0x72   : > { %7735 = vmatpush3.bf16.msra.mxu1 %v8310_v6  ;;  %6694 = vmatpush3.bf16.msra.mxu0 %v8310_v6  ;;  %v598_v6 = vshll.u32 %v8962_v1, 16  ;;  %v783_v15 = vrot.slane %v9112_v18, 1  ;;  %11430 = vst [vmem:[#allocation53_spill] sm:$0xff] %v9200_v22  ;;  %v663_v25 = vshll.u32 %v9112_v18, 16  ;;  %v8322_v18 = vld [vmem:[%s11289_s1 + $0x178] sm:$0xff]  }
  0x73   : > { %7728 = vmatprep.subr.bf16.mxu1 %v8311_v48  ;;  %6695 = vmatprep.subr.bf16.mxu0 %v8311_v48  ;;  %v589_v48 = vor.u32 %v588_v11, %v584_v63  ;;  %v596_v11 = vshrl.u32 %v8962_v1, 16  ;;  %v785_v23 = vrot.slane %v9162_v44, 1  ;;  %v670_v61 = vshll.u32 %v9162_v44, 16 }
  0x74   : > { %v600_v63 = vrot.slane %v598_v6, 1  ;;  %v9184_v43 = vsel %vm745_vm1, %v782_v14, %v783_v15  ;;  %v786_v6 = vrot.slane %v6166_v10, 1  ;;  %v789_v15 = vrot.slane %v9178_v47, 1 }
  0x75   : > { %v9181_v58 = vsel %vm510_vm0, %v589_v48, %v593_v8  ;;  %v605_v48 = vrot.slane %v603_v55, 1  ;;  %v6168_v55 = vcombine.low %v9200_v22, %v9200_v22 }
  0x76   : > { %7736 = vmatpush3.bf16.msra.mxu1 %v8312_v28  ;;  %6696 = vmatpush3.bf16.msra.mxu0 %v8312_v28  ;;  %v9174_v28 = vcombine.low %v9152_v3, %v9155_v30  ;;  %v9193_v30 = vld [vmem:[%s8775_s14 + $0xb8] sm:$0xf]  ;;  %v601_v8 = vor.u32 %v600_v63, %v596_v11  ;;  %v8323_v3 = vld [vmem:[%s11289_s1 + $0x1c0] sm:$0xff]   ;;  %v615_v11 = vshll.u32 %v8998_v29, 16  ;;  %v675_v63 = vshll.u32 %v6166_v10, 16 }
  0x77   : > { %7433 = vmatprep.subr.bf16.mxu1 %v9147_v60  ;;  %11429 = vst [vmem:[#allocation52_spill] sm:$0xff] %v9193_v30  ;;  %v9209_v56 = vcombine.low %v9190_v7, %v9193_v30  ;;  %6817 = vmatprep.subr.bf16.mxu0 %v8323_v3  ;;  %v9215_v54 = vsel %vm745_vm1, %v785_v23, %v786_v6  ;;  %v612_v30 = vrot.slane %v610_v40, 1  ;;  %v668_v3 = vshrl.u32 %v9162_v44, 16 }
  0x78   : > { %1081 = vmatmul.mubr.bf16.gmra.mrb[16].mxu0 %v8871_v9  ;;  %7418 = vmatmul.mubr.bf16.gmra.mrb[16].mxu1 %v9115_v42  ;;  %v788_v14 = vrot.slane %v9174_v28, 1  ;;  %v9218_v51 = vsel %vm510_vm0, %v601_v8, %v605_v48  ;;  %v672_v7 = vrot.slane %v670_v61, 1  ;;  %v792_v10 = vrot.slane %v6168_v55, 1 }
  0x79   : > { %1088 = vmatprep.mubr.bf16.mxu0 %v9122_v41  ;;  %7421 = vmatprep.mubr.bf16.mxu1 %v9125_v59  ;;  %v791_v22 = vrot.slane %v9209_v56, 1  ;;  %v617_v29 = vrot.slane %v615_v11, 1  ;;  %v677_v23 = vrot.slane %v675_v63, 1  ;;  %v622_v6 = vshll.u32 %v9028_v62, 16 }
  0x7a   : > { %v9221_v49 = vsel %vm745_vm1, %v788_v14, %v789_v15  ;;  %v613_v8 = vor.u32 %v612_v30, %v608_v27  ;;  %v673_v40 = vor.u32 %v672_v7, %v668_v3  ;;  %v627_v48 = vshll.u32 %v9041_v17, 16 }
  0x7b   : > { %v682_v61 = vshll.u32 %v9174_v28, 16  ;;  %v9234_v14 = vsel %vm745_vm1, %v791_v22, %v792_v10  ;;  %v620_v15 = vshrl.u32 %v9028_v62, 16  ;;  %v680_v11 = vshrl.u32 %v9174_v28, 16  ;;  %v9252_v10 = vld [vmem:[%s8775_s14 + $0xc0] sm:$0xf] }
  0x7c   : > { %v9239_v63 = vsel %vm510_vm0, %v613_v8, %v617_v29  ;;  %v9242_v45 = vsel %vm510_vm0, %v673_v40, %v677_v23  ;;  %v624_v27 = vrot.slane %v622_v6, 1  ;;  %v687_v30 = vshll.u32 %v9178_v47, 16  ;;  %11431 = vst [vmem:[#allocation54_spill] sm:$0xff] %v9252_v10  ;;  %v9255_v23 = vld [vmem:[%s8775_s14 + $0xc4] sm:$0xf]  ;;  %v8314_v40 = vld [vmem:[%s11289_s1 + $0x148] sm:$0xff]  }
  0x7d   : > { %v629_v17 = vrot.slane %v627_v48, 1  ;;  %v684_v7 = vrot.slane %v682_v61, 1  ;;  %v634_v22 = vshll.u32 %v9065_v2, 16  ;;  %v639_v3 = vshll.u32 %v9069_v35, 16  ;;  %11432 = vst [vmem:[#allocation55_spill] sm:$0xff] %v9255_v23 }
  0x7e   : > { %v625_v29 = vor.u32 %v624_v27, %v620_v15  ;;  %v689_v6 = vrot.slane %v687_v30, 1  ;;  %v694_v8 = vshll.u32 %v9209_v56, 16  ;;  %v632_v35 = vshrl.u32 %v9065_v2, 16 }
  0x7f   : > { %v685_v47 = vor.u32 %v684_v7, %v680_v11  ;;  %v692_v48 = vshrl.u32 %v9209_v56, 16  ;;  %v699_v61 = vshll.u32 %v6168_v55, 16  ;;  %v9265_v39 = vcombine.low %v9252_v10, %v9255_v23  ;;  %v8315_v55 = vld [vmem:[%s11289_s1 + $0x150] sm:$0xff]   ;;  %v9280_v23 = vld [vmem:[%s8775_s14 + $0xc8] sm:$0x1] }
  0x80   : > { %1089 = vmatmul.mubr.bf16.gmra.mrb[20].mxu0 %v8902_v24  ;;  %7422 = vmatmul.mubr.bf16.gmra.mrb[20].mxu1 %v9168_v4  ;;  %v9268_v15 = vsel %vm510_vm0, %v625_v29, %v629_v17  ;;  %v636_v11 = vrot.slane %v634_v22, 1  ;;  %v641_v27 = vrot.slane %v639_v3, 1  ;;  %v696_v7 = vrot.slane %v694_v8, 1  ;;  %11433 = vst [vmem:[#allocation56_spill] sm:$0xff] %v9280_v23 }
  0x81   : > { %1096 = vmatprep.mubr.bf16.mxu0 %v9181_v58  ;;  %7425 = vmatprep.mubr.bf16.mxu1 %v9184_v43  ;;  %v9271_v30 = vsel %vm510_vm0, %v685_v47, %v689_v6  ;;  %v701_v17 = vrot.slane %v699_v61, 1  ;;  %v706_v22 = vshll.u32 %v9265_v39, 16  ;;  %v9288_v47 = vcombine.low %v9280_v23, %v9280_v23 }
  0x82   : > { %v637_v3 = vor.u32 %v636_v11, %v632_v35  ;;  %v697_v29 = vor.u32 %v696_v7, %v692_v48  ;;  %v644_v8 = vshrl.u32 %v9077_v32, 16  ;;  %v648_v61 = vrot.slane %v646_v26, 1  ;;  %v8317_v26 = vld [vmem:[%s11289_s1 + $0x160] sm:$0xff]  }
  0x83   : > { %v651_v10 = vshll.u32 %v9087_v57, 16  ;;  %v704_v48 = vshrl.u32 %v9265_v39, 16  ;;  %v708_v11 = vrot.slane %v706_v22, 1  ;;  %v658_v7 = vshll.u32 %v9108_v46, 16 }
  0x84   : > { %v9294_v6 = vsel %vm510_vm0, %v637_v3, %v641_v27  ;;  %v9299_v35 = vsel %vm510_vm0, %v697_v29, %v701_v17  ;;  %v649_v57 = vor.u32 %v648_v61, %v644_v8  ;;  %v656_v29 = vshrl.u32 %v9108_v46, 16 }
  0x85   : > { %v653_v27 = vrot.slane %v651_v10, 1  ;;  %v709_v17 = vor.u32 %v708_v11, %v704_v48  ;;  %v660_v23 = vrot.slane %v658_v7, 1  ;;  %v665_v61 = vrot.slane %v663_v25, 1  ;;  %v8324_v25 = vld [vmem:[%s11289_s1 + $0x200] sm:$0xff]   ;;  %v8329_v11 = vld [vmem:[%s11289_s1 + $0x218] sm:$0xff]  }
  0x86   : > { %v8325_v7 = vld [vmem:[%s11289_s1 + $0x180] sm:$0xff]  }
  0x87   : > { %v9315_v3 = vsel %vm510_vm0, %v649_v57, %v653_v27  ;;  %v661_v8 = vor.u32 %v660_v23, %v656_v29  ;;  %v8326_v23 = vld [vmem:[%s11289_s1 + $0x208] sm:$0xff]   ;;  %v8334_v57 = vld [vmem:[%s11289_s1 + $0x230] sm:$0xff]   ;;  %v8336_v27 = vld [vmem:[%s11289_s1 + $0x238] sm:$0xff]  }
  0x88   : > { %1097 = vmatmul.mubr.bf16.gmra.mrb[24].mxu0 %v8921_v36  ;;  %7426 = vmatmul.mubr.bf16.gmra.mrb[24].mxu1 %v9215_v54  ;;  %v8338_v29 = vld [vmem:[%s11289_s1 + $0x198] sm:$0xff]  }
  0x89   : > { %1104 = vmatprep.mubr.bf16.mxu0 %v9218_v51  ;;  %7429 = vmatprep.mubr.bf16.mxu1 %v9221_v49  ;;  %v9333_v48 = vsel %vm510_vm0, %v661_v8, %v665_v61  ;;  %v8340_v8 = vld [vmem:[%s11289_s1 + $0x1a0] sm:$0xff]   ;;  %v8341_v61 = vld [vmem:[%s11289_s1 + $0x1e8] sm:$0xff]  }
  0x90   : > { %1105 = vmatmul.mubr.bf16.gmra.mrb[28].mxu0 %v8962_v1  ;;  %7430 = vmatmul.mubr.bf16.gmra.mrb[28].mxu1 %v9234_v14 }
  0x91   : > { %1112 = vmatprep.mubr.bf16.mxu0 %v9239_v63  ;;  %1691 = vmatprep.mubr.bf16.mxu1 %v9242_v45 }
  0x98   : > { %1113 = vmatmul.mubr.bf16.gmra.mrb[32].mxu0 %v8987_v19  ;;  %1692 = vmatmul.mubr.bf16.vlgmr.msra.gmra.mrb[32].mxu1 %v9162_v44 }
  0x99   : > { %7434 = vmatpush3.bf16.msra.mxu1 %v9147_v60  ;;  %1120 = vmatprep.mubr.bf16.mxu0 %v9268_v15  ;;  %v8316_v60 = vld [vmem:[%s11289_s1 + $0x158] sm:$0xff]  }
  0x9a   : > { %7435 = vmatprep.subr.bf16.mxu1 %v8314_v40  ;;  %1699 = vmatprep.mubr.bf16.mxu1 %v9271_v30 }
  0x9d   : > { %7436 = vmatpush3.bf16.msra.mxu1 %v8314_v40  ;;  %v711_v40 = vshll.u32 %v9288_v47, 16 }
  0x9e   : > { %7437 = vmatprep.subr.bf16.mxu1 %v8315_v55 }
  0x9f   : > { %v713_v22 = vrot.slane %v711_v40, 1  ;;  %v8331_v40 = vld [vmem:[%s11289_s1 + $0x220] sm:$0xff]  }
  0xa0   : > { %1121 = vmatmul.mubr.bf16.gmra.mrb[36].mxu0 %v9028_v62  ;;  %1700 = vmatmul.mubr.bf16.gmra.mrb[36].mxu1 %v9174_v28 }
  0xa1   : > { %7438 = vmatpush3.bf16.msra.mxu1 %v8315_v55  ;;  %1128 = vmatprep.mubr.bf16.mxu0 %v9294_v6  ;;  %v8318_v55 = vld [vmem:[%s11289_s1 + $0x168] sm:$0xff]   ;;  %v9320_v10 = vsel %vm510_vm0, %v709_v17, %v713_v22  ;;  %v8333_v22 = vld [vmem:[%s11289_s1 + $0x1d0] sm:$0xff]  }
  0xa2   : > { %7439 = vmatprep.subr.bf16.mxu1 %v8316_v60  ;;  %1707 = vmatprep.mubr.bf16.mxu1 %v9299_v35  ;;  %v8328_v17 = vld [vmem:[%s11289_s1 + $0x1c8] sm:$0xff]  }
  0xa5   : > { %7440 = vmatpush3.bf16.msra.mxu1 %v8316_v60  ;;  %v8321_v60 = vld [vmem:[%s11289_s1 + $0x170] sm:$0xff]  }
  0xa6   : > { %7441 = vmatprep.subr.bf16.mxu1 %v8317_v26 }
  0xa8   : > { %1129 = vmatmul.mubr.bf16.gmra.mrb[40].mxu0 %v9065_v2  ;;  %1708 = vmatmul.mubr.bf16.gmra.mrb[40].mxu1 %v9209_v56 }
  0xa9   : > { %7442 = vmatpush3.bf16.msra.mxu1 %v8317_v26  ;;  %1136 = vmatprep.mubr.bf16.mxu0 %v9315_v3  ;;  %v8332_v26 = vld [vmem:[%s11289_s1 + $0x228] sm:$0xff]  }
  0xaa   : > { %7443 = vmatprep.subr.bf16.mxu1 %v8318_v55  ;;  %1715 = vmatprep.mubr.bf16.mxu1 %v9320_v10 }
  0xad   : > { %7444 = vmatpush3.bf16.msra.mxu1 %v8318_v55  ;;  %v8337_v55 = vld [vmem:[%s11289_s1 + $0x1d8] sm:$0xff]  }
  0xae   : > { %7445 = vmatprep.subr.bf16.mxu1 %v8321_v60 }
  0xb0   : > { %1137 = vmatmul.mubr.bf16.gmra.mrb[44].mxu0 %v9077_v32  ;;  %1716 = vmatmul.mubr.bf16.gmra.mrb[44].mxu1 %v9265_v39 }
  0xb1   : > { %7446 = vmatpush3.bf16.msra.mxu1 %v8321_v60  ;;  %1144 = vmatprep.mubr.bf16.mxu0 %v9333_v48  ;;  %v8339_v60 = vld [vmem:[%s11289_s1 + $0x1e0] sm:$0xff]  }
  0xb2   : > { %7447 = vmatprep.subr.bf16.mxu1 %v8322_v18  ;;  %7449 = vmatprep.mubr.bf16.mxu1 %v8830_v52  ;;  %v8327_v52 = vld [vmem:[%s11289_s1 + $0x210] sm:$0xff]  }
  0xb5   : > { %7448 = vmatpush3.bf16.msra.mxu1 %v8322_v18  ;;  %v794_v18 = vrot.slane %v9265_v39, 1 }
  0xb6   : > { %7481 = vmatprep.subr.bf16.mxu1 %v8324_v25 }
  0xb8   : > { %1145 = vmatmul.mubr.bf16.gmra.mrb[48].mxu0 %v9108_v46  ;;  %7450 = vmatmul.mubr.bf16.vlgmr.msra.gmra.mrb[0].mxu1 %v8880_v12 }
  0xb9   : > { %1152 = vmatprep.mubr.bf16.mxu0 %v9242_v45  ;;  %7453 = vmatprep.mubr.bf16.mxu1 %v8913_v31 }
  0xba   : > { %7482 = vmatpush3.bf16.msra.mxu1 %v8324_v25  ;;  %v795_v25 = vrot.slane %v9288_v47, 1  ;;  %v8345_v47 = vld [vmem:[%s11289_s1 + $0x1f8] sm:$0xff]  }
  0xbb   : > { %7483 = vmatprep.subr.bf16.mxu1 %v8326_v23 }
  0xbe   : > { %7484 = vmatpush3.bf16.msra.mxu1 %v8326_v23  ;;  %v8342_v23 = vld [vmem:[%s11289_s1 + $0x1a8] sm:$0xff]  }
  0xbf   : > { %7485 = vmatprep.subr.bf16.mxu1 %v8327_v52 }
  0xc0   : > { %1153 = vmatmul.mubr.bf16.gmra.mrb[52].mxu0 %v9162_v44  ;;  %7454 = vmatmul.mubr.bf16.gmra.mrb[4].mxu1 %v8927_v38 }
  0xc1   : > { %1160 = vmatprep.mubr.bf16.mxu0 %v9271_v30  ;;  %7457 = vmatprep.mubr.bf16.mxu1 %v8981_v13 }
  0xc2   : > { %7486 = vmatpush3.bf16.msra.mxu1 %v8327_v52  ;;  %v8343_v52 = vld [vmem:[%s11289_s1 + $0x1f0] sm:$0xff]  }
  0xc3   : > { %7487 = vmatprep.subr.bf16.mxu1 %v8329_v11 }
  0xc6   : > { %7488 = vmatpush3.bf16.msra.mxu1 %v8329_v11  ;;  %v796_v11 = vsel %vm745_vm1, %v794_v18, %v795_v25 }
  0xc7   : > { %7489 = vmatprep.subr.bf16.mxu1 %v8331_v40 }
  0xc8   : > { %1161 = vmatmul.mubr.bf16.gmra.mrb[56].mxu0 %v9174_v28  ;;  %7458 = vmatmul.mubr.bf16.gmra.mrb[8].mxu1 %v8993_v21 }
  0xc9   : > { %1168 = vmatprep.mubr.bf16.mxu0 %v9299_v35  ;;  %7461 = vmatprep.mubr.bf16.mxu1 %v9054_v33 }
  0xca   : > { %7490 = vmatpush3.bf16.msra.mxu1 %v8331_v40  ;;  %v8344_v40 = vld [vmem:[%s11289_s1 + $0x1b0] sm:$0xff]  }
  0xcb   : > { %7491 = vmatprep.subr.bf16.mxu1 %v8332_v26 }
  0xce   : > { %7492 = vmatpush3.bf16.msra.mxu1 %v8332_v26  ;;  %v8346_v26 = vld [vmem:[%s11289_s1 + $0x1b8] sm:$0xff]  }
  0xcf   : > { %7493 = vmatprep.subr.bf16.mxu1 %v8334_v57 }
  0xd0   : > { %1169 = vmatmul.mubr.bf16.gmra.mrb[60].mxu0 %v9209_v56  ;;  %7462 = vmatmul.mubr.bf16.gmra.mrb[12].mxu1 %v9061_v53 }
  0xd1   : > { %1595 = vmatprep.mubr.bf16.mxu0 %v8888_v16  ;;  %7465 = vmatprep.mubr.bf16.mxu1 %v9115_v42  ;;  %v8330_v16 = vld [vmem:[%s11289_s1 + $0x188] sm:$0xff]  }
  0xd2   : > { %7494 = vmatpush3.bf16.msra.mxu1 %v8334_v57 }
  0xd3   : > { %7495 = vmatprep.subr.bf16.mxu1 %v8336_v27 }
  0xd6   : > { %7496 = vmatpush3.bf16.msra.mxu1 %v8336_v27 }
  0xd8   : > { %1596 = vmatmul.mubr.bf16.vlgmr.msra.gmra.mrb[64].mxu0 %v8799_v34  ;;  %7466 = vmatmul.mubr.bf16.gmra.mrb[16].mxu1 %v9125_v59  ;;  %v8335_v34 = vld [vmem:[%s11289_s1 + $0x190] sm:$0xff]  }
  0xd9   : > { %6818 = vmatpush3.bf16.msra.mxu0 %v8325_v7  ;;  %1603 = vmatprep.mubr.bf16.mxu0 %v8924_v37 }
  0xda   : > { %7469 = vmatprep.mubr.bf16.mxu1 %v9168_v4  ;;  %6819 = vmatprep.subr.bf16.mxu0 %v8328_v17 }
  0xdd   : > { %6820 = vmatpush3.bf16.msra.mxu0 %v8330_v16 }
  0xde   : > { %6821 = vmatprep.subr.bf16.mxu0 %v8333_v22 }
  0xe0   : > { %1604 = vmatmul.mubr.bf16.gmra.mrb[68].mxu0 %v8824_v50  ;;  %7470 = vmatmul.mubr.bf16.gmra.mrb[20].mxu1 %v9184_v43 }
  0xe1   : > { %1611 = vmatprep.mubr.bf16.mxu0 %v8990_v20  ;;  %7473 = vmatprep.mubr.bf16.mxu1 %v9215_v54 }
  0xe2   : > { %6822 = vmatpush3.bf16.msra.mxu0 %v8335_v34 }
  0xe3   : > { %6823 = vmatprep.subr.bf16.mxu0 %v8337_v55 }
  0xe6   : > { %6824 = vmatpush3.bf16.msra.mxu0 %v8338_v29 }
  0xe7   : > { %6825 = vmatprep.subr.bf16.mxu0 %v8339_v60 }
  0xe8   : > { %1612 = vmatmul.mubr.bf16.gmra.mrb[72].mxu0 %v8853_v0  ;;  %7474 = vmatmul.mubr.bf16.gmra.mrb[24].mxu1 %v9221_v49 }
  0xe9   : > { %1619 = vmatprep.mubr.bf16.mxu0 %v9057_v5  ;;  %7477 = vmatprep.mubr.bf16.mxu1 %v9234_v14 }
  0xea   : > { %6826 = vmatpush3.bf16.msra.mxu0 %v8340_v8 }
  0xeb   : > { %6827 = vmatprep.subr.bf16.mxu0 %v8341_v61 }
  0xee   : > { %6828 = vmatpush3.bf16.msra.mxu0 %v8342_v23 }
  0xef   : > { %6829 = vmatprep.subr.bf16.mxu0 %v8343_v52 }
  0xf0   : > { %1620 = vmatmul.mubr.bf16.gmra.mrb[76].mxu0 %v8871_v9  ;;  %7478 = vmatmul.mubr.bf16.gmra.mrb[28].mxu1 %v796_v11 }
  0xf1   : > { %1627 = vmatprep.mubr.bf16.mxu0 %v9122_v41  ;;  %7497 = vmatprep.mubr.bf16.mxu1 %v8880_v12  ;;  %v9467_v12 = vld [vmem:[%s8775_s14 + $0xcc] sm:$0xff]  }
  0xf2   : > { %6830 = vmatpush3.bf16.msra.mxu0 %v8344_v40 }
  0xf3   : > { %6831 = vmatprep.subr.bf16.mxu0 %v8345_v47 }
  0xf6   : > { %6832 = vmatpush3.bf16.msra.mxu0 %v8346_v26 }
  0xf8   : > { %1628 = vmatmul.mubr.bf16.gmra.mrb[80].mxu0 %v8902_v24  ;;  %7498 = vmatmul.mubr.bf16.vlgmr.msra.gmra.mrb[0].mxu1 %v8913_v31  ;;  %v9470_v31 = vld [vmem:[%s8775_s14 + $0xd4] ss:$0 sps:$4 sm:$0x11]  }
  0xf9   : > { %1635 = vmatprep.mubr.bf16.mxu0 %v9181_v58  ;;  %7501 = vmatprep.mubr.bf16.mxu1 %v8927_v38  ;;  %v798_v38 = vrot.slane %v9470_v31, 1 }
 0x100   : > { %1636 = vmatmul.mubr.bf16.gmra.mrb[84].mxu0 %v8921_v36  ;;  %7502 = vmatmul.mubr.bf16.gmra.mrb[4].mxu1 %v8981_v13 }
 0x101   : > { %1643 = vmatprep.mubr.bf16.mxu0 %v9218_v51  ;;  %7505 = vmatprep.mubr.bf16.mxu1 %v8993_v21 }
 0x108   : > { %1644 = vmatmul.mubr.bf16.gmra.mrb[88].mxu0 %v8962_v1  ;;  %7506 = vmatmul.mubr.bf16.gmra.mrb[8].mxu1 %v9054_v33 }
 0x109   : > { %1651 = vmatprep.mubr.bf16.mxu0 %v9239_v63  ;;  %7509 = vmatprep.mubr.bf16.mxu1 %v9061_v53 }
 0x110   : > { %1652 = vmatmul.mubr.bf16.gmra.mrb[92].mxu0 %v8987_v19  ;;  %7510 = vmatmul.mubr.bf16.gmra.mrb[12].mxu1 %v9115_v42 }
 0x111   : > { %1659 = vmatprep.mubr.bf16.mxu0 %v9268_v15  ;;  %7513 = vmatprep.mubr.bf16.mxu1 %v9125_v59 }
 0x118   : > { %1660 = vmatmul.mubr.bf16.gmra.mrb[96].mxu0 %v9028_v62  ;;  %7514 = vmatmul.mubr.bf16.gmra.mrb[16].mxu1 %v9168_v4  ;;  %v797_v4 = vrot.slane %v9467_v12, 1 }
 0x119   : > { %1667 = vmatprep.mubr.bf16.mxu0 %v9294_v6  ;;  %7517 = vmatprep.mubr.bf16.mxu1 %v9184_v43 }
 0x11a   : > { %v799_v21 = vsel %vm745_vm1, %v797_v4, %v798_v38 }
 0x120   : > { %1668 = vmatmul.mubr.bf16.gmra.mrb[100].mxu0 %v9065_v2  ;;  %7518 = vmatmul.mubr.bf16.gmra.mrb[20].mxu1 %v9215_v54 }
 0x121   : > { %1675 = vmatprep.mubr.bf16.mxu0 %v9315_v3  ;;  %7521 = vmatprep.mubr.bf16.mxu1 %v9221_v49 }
 0x128   : > { %1676 = vmatmul.mubr.bf16.gmra.mrb[104].mxu0 %v9077_v32  ;;  %7522 = vmatmul.mubr.bf16.gmra.mrb[24].mxu1 %v9234_v14 }
 0x129   : > { %1683 = vmatprep.mubr.bf16.mxu0 %v9333_v48  ;;  %7525 = vmatprep.mubr.bf16.mxu1 %v796_v11 }
 0x12b   : > { %v6561_v54 = vpop.f32.mrb[0].mxu0 }
 0x12c   : > { %v6562_v53 = vpop.f32.mrb[1].mxu0 }
 0x12d   : > { %v9477_v13 = vadd.f32 %v6562_v53, %v6561_v54  ;;  %v6564_v49 = vpop.f32.mrb[2].mxu0 }
 0x12e   : > { %v6565_v33 = vpop.f32.mrb[3].mxu0 }
 0x12f   : > { %v9480_v59 = vadd.f32 %v6565_v33, %v6564_v49 }
 0x130   : > { %1684 = vmatmul.mubr.bf16.gmra.mrb[108].mxu0 %v9108_v46  ;;  %7526 = vmatmul.mubr.bf16.gmra.mrb[28].mxu1 %v799_v21 }
 0x131   : > { %2142 = vmatprep.mubr.bf16.mxu0 %v8924_v37 }
 0x133   : > { %v6567_v42 = vpop.f32.mrb[4].mxu0 }
 0x134   : > { %v6568_v43 = vpop.f32.mrb[5].mxu0 }
 0x135   : > { %v9484_v14 = vadd.f32 %v6568_v43, %v6567_v42  ;;  %v6570_v57 = vpop.f32.mrb[6].mxu0 }
 0x136   : > { %v6571_v27 = vpop.f32.mrb[7].mxu0 }
 0x137   : > { %v9486_v7 = vadd.f32 %v6571_v27, %v6570_v57 }
 0x138   : > { %2143 = vmatmul.mubr.bf16.vlgmr.msra.gmra.mrb[112].mxu0 %v8824_v50 }
 0x139   : > { %2150 = vmatprep.mubr.bf16.mxu0 %v8990_v20 }
 0x13b   : > { %v6573_v17 = vpop.f32.mrb[8].mxu0 }
 0x13c   : > { %v6574_v16 = vpop.f32.mrb[9].mxu0 }
 0x13d   : > { %v9490_v22 = vadd.f32 %v6574_v16, %v6573_v17  ;;  %v6576_v34 = vpop.f32.mrb[10].mxu0 }
 0x13e   : > { %v6577_v55 = vpop.f32.mrb[11].mxu0 }
 0x13f   : > { %v9492_v29 = vadd.f32 %v6577_v55, %v6576_v34 }
 0x140   : > { %2151 = vmatmul.mubr.bf16.gmra.mrb[116].mxu0 %v8853_v0 }
 0x141   : > { %2158 = vmatprep.mubr.bf16.mxu0 %v9057_v5 }
 0x143   : > { %v6579_v37 = vpop.f32.mrb[12].mxu0 }
 0x144   : > { %v6580_v60 = vpop.f32.mrb[13].mxu0 }
 0x145   : > { %v9496_v8 = vadd.f32 %v6580_v60, %v6579_v37  ;;  %v6582_v61 = vpop.f32.mrb[14].mxu0 }
 0x146   : > { %v6583_v50 = vpop.f32.mrb[15].mxu0 }
 0x147   : > { %v9498_v18 = vadd.f32 %v6583_v50, %v6582_v61 }
 0x148   : > { %2159 = vmatmul.mubr.bf16.gmra.mrb[120].mxu0 %v8871_v9 }
 0x149   : > { %2166 = vmatprep.mubr.bf16.mxu0 %v9122_v41 }
 0x14b   : > { %v6585_v20 = vpop.f32.mrb[16].mxu0 }
 0x14c   : > { %v6586_v25 = vpop.f32.mrb[17].mxu0 }
 0x14d   : > { %v9502_v23 = vadd.f32 %v6586_v25, %v6585_v20  ;;  %v6588_v52 = vpop.f32.mrb[18].mxu0 }
 0x14e   : > { %v6589_v0 = vpop.f32.mrb[19].mxu0 }
 0x14f   : > { %v9504_v11 = vadd.f32 %v6589_v0, %v6588_v52 }
 0x150   : > { %2167 = vmatmul.mubr.bf16.gmra.mrb[124].mxu0 %v8902_v24 }
 0x151   : > { %2174 = vmatprep.mubr.bf16.mxu0 %v9181_v58 }
 0x153   : > { %v6591_v5 = vpop.f32.mrb[20].mxu0 }
 0x154   : > { %v6592_v40 = vpop.f32.mrb[21].mxu0 }
 0x155   : > { %v9508_v47 = vadd.f32 %v6592_v40, %v6591_v5  ;;  %v6594_v26 = vpop.f32.mrb[22].mxu0 }
 0x156   : > { %v6595_v9 = vpop.f32.mrb[23].mxu0 }
 0x157   : > { %v9510_v4 = vadd.f32 %v6595_v9, %v6594_v26 }
 0x158   : > { %2175 = vmatmul.mubr.bf16.gmra.mrb[128].mxu0 %v8921_v36 }
 0x159   : > { %2182 = vmatprep.mubr.bf16.mxu0 %v9218_v51 }
 0x15b   : > { %v6597_v41 = vpop.f32.mrb[24].mxu0 }
 0x15c   : > { %v6598_v38 = vpop.f32.mrb[25].mxu0 }
 0x15d   : > { %v9514_v54 = vadd.f32 %v6598_v38, %v6597_v41  ;;  %v6600_v53 = vpop.f32.mrb[26].mxu0 }
 0x15e   : > { %v6601_v24 = vpop.f32.mrb[27].mxu0 }
 0x15f   : > { %v9516_v49 = vadd.f32 %v6601_v24, %v6600_v53 }
 0x160   : > { %2183 = vmatmul.mubr.bf16.gmra.mrb[132].mxu0 %v8962_v1 }
 0x161   : > { %2190 = vmatprep.mubr.bf16.mxu0 %v9239_v63 }
 0x163   : > { %v6603_v58 = vpop.f32.mrb[28].mxu0 }
 0x164   : > { %v6604_v21 = vpop.f32.mrb[29].mxu0 }
 0x165   : > { %v9520_v33 = vadd.f32 %v6604_v21, %v6603_v58  ;;  %v6606_v42 = vpop.f32.mrb[30].mxu0 }
 0x166   : > { %v6607_v36 = vpop.f32.mrb[31].mxu0 }
 0x167   : > { %v9522_v43 = vadd.f32 %v6607_v36, %v6606_v42 }
 0x168   : > { %2191 = vmatmul.mubr.bf16.gmra.mrb[136].mxu0 %v8987_v19 }
 0x169   : > { %2198 = vmatprep.mubr.bf16.mxu0 %v9268_v15 }
 0x16b   : > { %v6609_v51 = vpop.f32.mrb[32].mxu0  ;;  %v6769_v57 = vpop.f32.mrb[32].mxu1 }
 0x16c   : > { %v6610_v27 = vpop.f32.mrb[33].mxu0  ;;  %v6770_v17 = vpop.f32.mrb[33].mxu1 }
 0x16d   : > { %v9526_v16 = vadd.f32 %v6610_v27, %v6609_v51  ;;  %v6612_v1 = vpop.f32.mrb[34].mxu0  ;;  %v6771_v63 = vadd.f32 %v6770_v17, %v6769_v57  ;;  %v6772_v34 = vpop.f32.mrb[34].mxu1 }
 0x16e   : > { %v6613_v55 = vpop.f32.mrb[35].mxu0  ;;  %v6773_v37 = vpop.f32.mrb[35].mxu1 }
 0x16f   : > { %v9528_v60 = vadd.f32 %v6613_v55, %v6612_v1  ;;  %v6774_v61 = vadd.f32 %v6773_v37, %v6772_v34 }
 0x170   : > { %2199 = vmatmul.mubr.bf16.gmra.mrb[140].mxu0 %v9028_v62 }
 0x171   : > { %2206 = vmatprep.mubr.bf16.mxu0 %v9294_v6 }
 0x173   : > { %v6615_v19 = vpop.f32.mrb[36].mxu0  ;;  %v6775_v15 = vpop.f32.mrb[36].mxu1 }
 0x174   : > { %v6616_v50 = vpop.f32.mrb[37].mxu0  ;;  %v6776_v20 = vpop.f32.mrb[37].mxu1 }
 0x175   : > { %v9532_v25 = vadd.f32 %v6616_v50, %v6615_v19  ;;  %v6618_v52 = vpop.f32.mrb[38].mxu0  ;;  %v6777_v0 = vadd.f32 %v6776_v20, %v6775_v15  ;;  %v6778_v5 = vpop.f32.mrb[38].mxu1 }
 0x176   : > { %v6619_v40 = vpop.f32.mrb[39].mxu0  ;;  %v6779_v26 = vpop.f32.mrb[39].mxu1 }
 0x177   : > { %v9534_v9 = vadd.f32 %v6619_v40, %v6618_v52  ;;  %v6780_v41 = vadd.f32 %v6779_v26, %v6778_v5  ;;  %v9553_v26 = vld [vmem:[%s11290_s2] ss:$0 sm:$0xff] }
 0x178   : > { %2207 = vmatmul.mubr.bf16.gmra.mrb[144].mxu0 %v9065_v2 }
 0x179   : > { %2214 = vmatprep.mubr.bf16.mxu0 %v9315_v3 }
 0x17b   : > { %v6621_v62 = vpop.f32.mrb[40].mxu0  ;;  %v6781_v6 = vpop.f32.mrb[40].mxu1 }
 0x17c   : > { %v6622_v38 = vpop.f32.mrb[41].mxu0  ;;  %v6782_v53 = vpop.f32.mrb[41].mxu1 }
 0x17d   : > { %v9538_v24 = vadd.f32 %v6622_v38, %v6621_v62  ;;  %v6624_v58 = vpop.f32.mrb[42].mxu0  ;;  %v6783_v21 = vadd.f32 %v6782_v53, %v6781_v6  ;;  %v6784_v42 = vpop.f32.mrb[42].mxu1 }
 0x17e   : > { %v6625_v36 = vpop.f32.mrb[43].mxu0  ;;  %v6785_v51 = vpop.f32.mrb[43].mxu1 }
 0x17f   : > { %v9540_v57 = vadd.f32 %v6625_v36, %v6624_v58  ;;  %v6786_v27 = vadd.f32 %v6785_v51, %v6784_v42 }
 0x180   : > { %2215 = vmatmul.mubr.bf16.gmra.mrb[148].mxu0 %v9077_v32 }
 0x181   : > { %2222 = vmatprep.mubr.bf16.mxu0 %v9333_v48 }
 0x183   : > { %v6627_v2 = vpop.f32.mrb[44].mxu0  ;;  %v6787_v3 = vpop.f32.mrb[44].mxu1 }
 0x184   : > { %v6628_v17 = vpop.f32.mrb[45].mxu0  ;;  %v6788_v1 = vpop.f32.mrb[45].mxu1 }
 0x185   : > { %v9544_v34 = vadd.f32 %v6628_v17, %v6627_v2  ;;  %v6630_v55 = vpop.f32.mrb[46].mxu0  ;;  %v6789_v37 = vadd.f32 %v6788_v1, %v6787_v3  ;;  %v6790_v19 = vpop.f32.mrb[46].mxu1 }
 0x186   : > { %v6631_v15 = vpop.f32.mrb[47].mxu0  ;;  %v6791_v50 = vpop.f32.mrb[47].mxu1 }
 0x187   : > { %v9546_v20 = vadd.f32 %v6631_v15, %v6630_v55  ;;  %v6792_v52 = vadd.f32 %v6791_v50, %v6790_v19 }
 0x188   : > { %2223 = vmatmul.mubr.bf16.gmra.mrb[152].mxu0 %v9108_v46 }
 0x189   : > { %2230 = vmatprep.mubr.bf16.mxu0 %v9242_v45 }
 0x18b   : > { %v6633_v32 = vpop.f32.mrb[48].mxu0 }
 0x18c   : > { %v6634_v48 = vpop.f32.mrb[49].mxu0 }
 0x18d   : > { %v6635_v5 = vadd.f32 %v6634_v48, %v6633_v32  ;;  %v6636_v40 = vpop.f32.mrb[50].mxu0  ;;  %v716_v32 = vshrl.u32 %v9467_v12, 16 }
 0x18e   : > { %v6637_v62 = vpop.f32.mrb[51].mxu0 }
 0x18f   : > { %v7837_v6 = vadd.f32 %v6635_v5, %v9553_v26  ;;  %v6638_v38 = vadd.f32 %v6637_v62, %v6636_v40 }
 0x190   : > { %2231 = vmatmul.mubr.bf16.gmra.mrb[156].mxu0 %v9162_v44 }
 0x191   : > { %v7845_v53 = vadd.f32 %v6638_v38, %v9553_v26  ;;  %v9558_v46 = vadd.f32 %v7837_v6, %v6771_v63  ;;  %2238 = vmatprep.mubr.bf16.mxu0 %v9271_v30  ;;  %v718_v30 = vshll.u32 %v9467_v12, 16 }
 0x193   : > { %11434 = vst [vmem:[#allocation57_spill] sm:$0xff] %v9558_v46  ;;  %v9561_v45 = vadd.f32 %v7845_v53, %v6774_v61  ;;  %v6639_v58 = vpop.f32.mrb[52].mxu0  ;;  %v720_v48 = vrot.slane %v718_v30, 1 }
 0x194   : > { %v6640_v42 = vpop.f32.mrb[53].mxu0 }
 0x195   : > { %11435 = vst [vmem:[#allocation58_spill] sm:$0xff] %v9561_v45  ;;  %v6641_v36 = vadd.f32 %v6640_v42, %v6639_v58  ;;  %v6642_v51 = vpop.f32.mrb[54].mxu0 }
 0x196   : > { %v6643_v2 = vpop.f32.mrb[55].mxu0 }
 0x197   : > { %v7833_v3 = vadd.f32 %v6641_v36, %v9553_v26  ;;  %v6644_v17 = vadd.f32 %v6643_v2, %v6642_v51 }
 0x198   : > { %2239 = vmatmul.mubr.bf16.gmra.mrb[160].mxu0 %v9174_v28  ;;  %v723_v28 = vshll.u32 %v9470_v31, 16 }
 0x199   : > { %v7841_v44 = vadd.f32 %v6644_v17, %v9553_v26  ;;  %v9566_v1 = vadd.f32 %v7833_v3, %v6777_v0  ;;  %2246 = vmatprep.mubr.bf16.mxu0 %v9299_v35  ;;  %v7741_v17 = vadd.f32 %v9477_v13, %v9553_v26 }
 0x19a   : > { %v725_v62 = vrot.slane %v723_v28, 1  ;;  %v7745_v28 = vadd.f32 %v9486_v7, %v9553_v26 }
 0x19b   : > { %11436 = vst [vmem:[#allocation59_spill] sm:$0xff] %v9566_v1  ;;  %v9570_v63 = vadd.f32 %v7841_v44, %v6780_v41  ;;  %v6645_v61 = vpop.f32.mrb[56].mxu0  ;;  %v721_v41 = vor.u32 %v720_v48, %v716_v32 }
 0x19c   : > { %v6646_v55 = vpop.f32.mrb[57].mxu0 }
 0x19d   : > { %11437 = vst [vmem:[#allocation60_spill] sm:$0xff] %v9570_v63  ;;  %v6647_v19 = vadd.f32 %v6646_v55, %v6645_v61  ;;  %v6648_v15 = vpop.f32.mrb[58].mxu0  ;;  %v726_v36 = vsel %vm510_vm0, %v721_v41, %v725_v62  ;;  %v7749_v55 = vadd.f32 %v9480_v59, %v9553_v26  ;;  %v7757_v41 = vadd.f32 %v9490_v22, %v9553_v26 }
 0x19e   : > { %v6649_v50 = vpop.f32.mrb[59].mxu0  ;;  %v7761_v22 = vadd.f32 %v9498_v18, %v9553_v26 }
 0x19f   : > { %v7853_v5 = vadd.f32 %v6647_v19, %v9553_v26  ;;  %v6650_v0 = vadd.f32 %v6649_v50, %v6648_v15  ;;  %v7737_v50 = vadd.f32 %v9484_v14, %v9553_v26  ;;  %v7765_v14 = vadd.f32 %v9492_v29, %v9553_v26 }
 0x1a0   : > { %2247 = vmatmul.mubr.bf16.gmra.mrb[164].mxu0 %v9209_v56 }
 0x1a1   : > { %v7861_v35 = vadd.f32 %v6650_v0, %v9553_v26  ;;  %v9577_v40 = vadd.f32 %v7853_v5, %v6783_v21  ;;  %2254 = vmatprep.mubr.bf16.mxu0 %v9320_v10 }
 0x1a3   : > { %11438 = vst [vmem:[#allocation61_spill] sm:$0xff] %v9577_v40  ;;  %v9580_v6 = vadd.f32 %v7861_v35, %v6786_v27  ;;  %v6651_v38 = vpop.f32.mrb[60].mxu0 }
 0x1a4   : > { %v6652_v53 = vpop.f32.mrb[61].mxu0 }
 0x1a5   : > { %11439 = vst [vmem:[#allocation62_spill] sm:$0xff] %v9580_v6  ;;  %v6653_v58 = vadd.f32 %v6652_v53, %v6651_v38  ;;  %v6654_v42 = vpop.f32.mrb[62].mxu0 }
 0x1a6   : > { %v6655_v31 = vpop.f32.mrb[63].mxu0 }
 0x1a7   : > { %v7849_v51 = vadd.f32 %v6653_v58, %v9553_v26  ;;  %v6656_v56 = vadd.f32 %v6655_v31, %v6654_v42 }
 0x1a8   : > { %2255 = vmatmul.mubr.bf16.gmra.mrb[168].mxu0 %v9265_v39 }
 0x1a9   : > { %v7857_v21 = vadd.f32 %v6656_v56, %v9553_v26  ;;  %v9586_v2 = vadd.f32 %v7849_v51, %v6789_v37  ;;  %2262 = vmatprep.mubr.bf16.mxu0 %v726_v36  ;;  %v7753_v51 = vadd.f32 %v9496_v8, %v9553_v26  ;;  %v7773_v8 = vadd.f32 %v9502_v23, %v9553_v26 }
 0x1ab   : > { %11440 = vst [vmem:[#allocation63_spill] sm:$0xff] %v9586_v2  ;;  %v9588_v10 = vadd.f32 %v7857_v21, %v6792_v52  ;;  %v6697_v27 = vpop.f32.mrb[64].mxu0 }
 0x1ac   : > { %v6698_v3 = vpop.f32.mrb[65].mxu0 }
 0x1ad   : > { %11441 = vst [vmem:[#allocation64_spill] sm:$0xff] %v9588_v10  ;;  %v6699_v44 = vadd.f32 %v6698_v3, %v6697_v27  ;;  %v6700_v30 = vpop.f32.mrb[66].mxu0 }
 0x1ae   : > { %v6701_v61 = vpop.f32.mrb[67].mxu0 }
 0x1af   : > { %v9594_v19 = vadd.f32 %v7741_v17, %v6699_v44  ;;  %v6702_v39 = vadd.f32 %v6701_v61, %v6700_v30 }
 0x1b0   : > { %2263 = vmatmul.mubr.bf16.gmra.mrb[172].mxu0 %v9467_v12 }
 0x1b1   : > { %v9597_v37 = vadd.f32 %v7749_v55, %v6702_v39 }
 0x1b3   : > { %v6703_v52 = vpop.f32.mrb[68].mxu0 }
 0x1b4   : > { %v6704_v15 = vpop.f32.mrb[69].mxu0 }
 0x1b5   : > { %v6705_v32 = vadd.f32 %v6704_v15, %v6703_v52  ;;  %v6706_v13 = vpop.f32.mrb[70].mxu0 }
 0x1b6   : > { %v6707_v48 = vpop.f32.mrb[71].mxu0 }
 0x1b7   : > { %v9603_v5 = vadd.f32 %v7737_v50, %v6705_v32  ;;  %v6708_v59 = vadd.f32 %v6707_v48, %v6706_v13  ;;  %v7781_v32 = vadd.f32 %v9504_v11, %v9553_v26 }
 0x1b9   : > { %v9605_v0 = vadd.f32 %v7745_v28, %v6708_v59 }
 0x1bb   : > { %v6709_v35 = vpop.f32.mrb[72].mxu0 }
 0x1bc   : > { %v6710_v12 = vpop.f32.mrb[73].mxu0 }
 0x1bd   : > { %v6711_v62 = vadd.f32 %v6710_v12, %v6709_v35  ;;  %v6712_v38 = vpop.f32.mrb[74].mxu0 }
 0x1be   : > { %v6713_v53 = vpop.f32.mrb[75].mxu0 }
 0x1bf   : > { %v9611_v58 = vadd.f32 %v7757_v41, %v6711_v62  ;;  %v6714_v42 = vadd.f32 %v6713_v53, %v6712_v38  ;;  %v7769_v41 = vadd.f32 %v9508_v47, %v9553_v26 }
 0x1c1   : > { %v9613_v7 = vadd.f32 %v7765_v14, %v6714_v42  ;;  %v7777_v42 = vadd.f32 %v9510_v4, %v9553_v26 }
 0x1c3   : > { %v6715_v31 = vpop.f32.mrb[76].mxu0 }
 0x1c4   : > { %v6716_v36 = vpop.f32.mrb[77].mxu0 }
 0x1c5   : > { %v6717_v56 = vadd.f32 %v6716_v36, %v6715_v31  ;;  %v6718_v21 = vpop.f32.mrb[78].mxu0 }
 0x1c6   : > { %v6719_v27 = vpop.f32.mrb[79].mxu0 }
 0x1c7   : > { %v9619_v3 = vadd.f32 %v7753_v51, %v6717_v56  ;;  %v6720_v17 = vadd.f32 %v6719_v27, %v6718_v21 }
 0x1c9   : > { %v9621_v29 = vadd.f32 %v7761_v22, %v6720_v17  ;;  %v7789_v22 = vadd.f32 %v9514_v54, %v9553_v26 }
 0x1cb   : > { %v6721_v44 = vpop.f32.mrb[80].mxu0  ;;  %v9623_v30 = vpop.f32.mrb[0].mxu1 }
 0x1cc   : > { %v6722_v61 = vpop.f32.mrb[81].mxu0  ;;  %v9625_v55 = vpop.f32.mrb[1].mxu1 }
 0x1cd   : > { %v6723_v39 = vadd.f32 %v6722_v61, %v6721_v44  ;;  %v6724_v52 = vpop.f32.mrb[82].mxu0  ;;  %v9629_v15 = vpop.f32.mrb[2].mxu1 }
 0x1ce   : > { %v6725_v50 = vpop.f32.mrb[83].mxu0  ;;  %v9631_v18 = vpop.f32.mrb[3].mxu1 }
 0x1cf   : > { %v9635_v13 = vadd.f32 %v7773_v8, %v6723_v39  ;;  %v6726_v48 = vadd.f32 %v6725_v50, %v6724_v52  ;;  %v7797_v39 = vadd.f32 %v9516_v49, %v9553_v26 }
 0x1d1   : > { %v9637_v28 = vadd.f32 %v7781_v32, %v6726_v48 }
 0x1d3   : > { %v6727_v59 = vpop.f32.mrb[84].mxu0  ;;  %v9639_v35 = vpop.f32.mrb[4].mxu1 }
 0x1d4   : > { %v6728_v12 = vpop.f32.mrb[85].mxu0  ;;  %v9641_v23 = vpop.f32.mrb[5].mxu1 }
 0x1d5   : > { %v6729_v62 = vadd.f32 %v6728_v12, %v6727_v59  ;;  %v6730_v38 = vpop.f32.mrb[86].mxu0  ;;  %v9645_v53 = vpop.f32.mrb[6].mxu1 }
 0x1d6   : > { %v6731_v14 = vpop.f32.mrb[87].mxu0  ;;  %v9647_v11 = vpop.f32.mrb[7].mxu1 }
 0x1d7   : > { %v9651_v31 = vadd.f32 %v7769_v41, %v6729_v62  ;;  %v6732_v36 = vadd.f32 %v6731_v14, %v6730_v38  ;;  %v7785_v41 = vadd.f32 %v9520_v33, %v9553_v26 }
 0x1d9   : > { %v9653_v51 = vadd.f32 %v7777_v42, %v6732_v36  ;;  %v7793_v36 = vadd.f32 %v9522_v43, %v9553_v26 }
 0x1db   : > { %v6733_v56 = vpop.f32.mrb[88].mxu0  ;;  %v9655_v21 = vpop.f32.mrb[8].mxu1 }
 0x1dc   : > { %v6734_v27 = vpop.f32.mrb[89].mxu0  ;;  %v9657_v47 = vpop.f32.mrb[9].mxu1 }
 0x1dd   : > { %v6735_v17 = vadd.f32 %v6734_v27, %v6733_v56  ;;  %v6736_v44 = vpop.f32.mrb[90].mxu0  ;;  %v9661_v61 = vpop.f32.mrb[10].mxu1 }
 0x1de   : > { %v6737_v8 = vpop.f32.mrb[91].mxu0  ;;  %v9663_v4 = vpop.f32.mrb[11].mxu1 }
 0x1df   : > { %v9667_v52 = vadd.f32 %v7789_v22, %v6735_v17  ;;  %v6738_v50 = vadd.f32 %v6737_v8, %v6736_v44 }
 0x1e1   : > { %v9669_v32 = vadd.f32 %v7797_v39, %v6738_v50  ;;  %v7805_v39 = vadd.f32 %v9526_v16, %v9553_v26 }
 0x1e3   : > { %v6739_v48 = vpop.f32.mrb[92].mxu0  ;;  %v9671_v59 = vpop.f32.mrb[12].mxu1 }
 0x1e4   : > { %v6740_v12 = vpop.f32.mrb[93].mxu0  ;;  %v9673_v54 = vpop.f32.mrb[13].mxu1 }
 0x1e5   : > { %v6741_v62 = vadd.f32 %v6740_v12, %v6739_v48  ;;  %v6742_v38 = vpop.f32.mrb[94].mxu0  ;;  %v9677_v14 = vpop.f32.mrb[14].mxu1 }
 0x1e6   : > { %v6743_v42 = vpop.f32.mrb[95].mxu0  ;;  %v9679_v49 = vpop.f32.mrb[15].mxu1 }
 0x1e7   : > { %v9683_v56 = vadd.f32 %v7785_v41, %v6741_v62  ;;  %v6744_v27 = vadd.f32 %v6743_v42, %v6742_v38  ;;  %v7813_v41 = vadd.f32 %v9528_v60, %v9553_v26 }
 0x1e9   : > { %v9685_v22 = vadd.f32 %v7793_v36, %v6744_v27 }
 0x1eb   : > { %v6745_v17 = vpop.f32.mrb[96].mxu0  ;;  %v9687_v44 = vpop.f32.mrb[16].mxu1 }
 0x1ec   : > { %v6746_v8 = vpop.f32.mrb[97].mxu0  ;;  %v9689_v33 = vpop.f32.mrb[17].mxu1 }
 0x1ed   : > { %v6747_v50 = vadd.f32 %v6746_v8, %v6745_v17  ;;  %v6748_v48 = vpop.f32.mrb[98].mxu0  ;;  %v9693_v12 = vpop.f32.mrb[18].mxu1  ;;  %v7801_v17 = vadd.f32 %v9532_v25, %v9553_v26 }
 0x1ee   : > { %v6749_v10 = vpop.f32.mrb[99].mxu0  ;;  %v9695_v43 = vpop.f32.mrb[19].mxu1 }
 0x1ef   : > { %v9699_v62 = vadd.f32 %v7805_v39, %v6747_v50  ;;  %v6750_v38 = vadd.f32 %v6749_v10, %v6748_v48  ;;  %v7809_v10 = vadd.f32 %v9534_v9, %v9553_v26 }
 0x1f1   : > { %v9701_v42 = vadd.f32 %v7813_v41, %v6750_v38 }
 0x1f3   : > { %v6751_v36 = vpop.f32.mrb[100].mxu0  ;;  %v9703_v27 = vpop.f32.mrb[20].mxu1 }
 0x1f4   : > { %v6752_v2 = vpop.f32.mrb[101].mxu0  ;;  %v9705_v16 = vpop.f32.mrb[21].mxu1 }
 0x1f5   : > { %v6753_v8 = vadd.f32 %v6752_v2, %v6751_v36  ;;  %v6754_v6 = vpop.f32.mrb[102].mxu0  ;;  %v9709_v40 = vpop.f32.mrb[22].mxu1  ;;  %v7821_v2 = vadd.f32 %v9538_v24, %v9553_v26 }
 0x1f6   : > { %11442 = vst [vmem:[#allocation65_spill] sm:$0xff] %v9709_v40  ;;  %v6755_v63 = vpop.f32.mrb[103].mxu0  ;;  %v9711_v60 = vpop.f32.mrb[23].mxu1 }
 0x1f7   : > { %v9715_v39 = vadd.f32 %v7801_v17, %v6753_v8  ;;  %v6756_v50 = vadd.f32 %v6755_v63, %v6754_v6  ;;  %v7829_v63 = vadd.f32 %v9540_v57, %v9553_v26 }
 0x1f9   : > { %v9717_v48 = vadd.f32 %v7809_v10, %v6756_v50 }
 0x1fb   : > { %v6757_v41 = vpop.f32.mrb[104].mxu0  ;;  %v9719_v38 = vpop.f32.mrb[24].mxu1 }
 0x1fc   : > { %11443 = vst [vmem:[#allocation66_spill] sm:$0xff] %v9719_v38  ;;  %v6758_v1 = vpop.f32.mrb[105].mxu0  ;;  %v9721_v25 = vpop.f32.mrb[25].mxu1 }
 0x1fd   : > { %11444 = vst [vmem:[#allocation67_spill] sm:$0xff] %v9721_v25  ;;  %v6759_v36 = vadd.f32 %v6758_v1, %v6757_v41  ;;  %v6760_v45 = vpop.f32.mrb[106].mxu0  ;;  %v9725_v46 = vpop.f32.mrb[26].mxu1  ;;  %v7817_v1 = vadd.f32 %v9544_v34, %v9553_v26 }
 0x1fe   : > { %11445 = vst [vmem:[#allocation68_spill] sm:$0xff] %v9725_v46  ;;  %v6761_v40 = vpop.f32.mrb[107].mxu0  ;;  %v9727_v9 = vpop.f32.mrb[27].mxu1 }
 0x1ff   : > { %11446 = vst [vmem:[#allocation69_spill] sm:$0xff] %v9727_v9  ;;  %v9731_v6 = vadd.f32 %v7821_v2, %v6759_v36  ;;  %v6762_v17 = vadd.f32 %v6761_v40, %v6760_v45  ;;  %v7825_v45 = vadd.f32 %v9546_v20, %v9553_v26 }
 0x201   : > { %v9733_v8 = vadd.f32 %v7829_v63, %v6762_v17 }
 0x203   : > { %v6763_v10 = vpop.f32.mrb[108].mxu0  ;;  %v9735_v50 = vpop.f32.mrb[28].mxu1 }
 0x204   : > { %11447 = vst [vmem:[#allocation70_spill] sm:$0xff] %v9735_v50  ;;  %v6764_v38 = vpop.f32.mrb[109].mxu0  ;;  %v9737_v24 = vpop.f32.mrb[29].mxu1 }
 0x205   : > { %11448 = vst [vmem:[#allocation71_spill] sm:$0xff] %v9737_v24  ;;  %v6765_v41 = vadd.f32 %v6764_v38, %v6763_v10  ;;  %v6766_v46 = vpop.f32.mrb[110].mxu0  ;;  %v9741_v9 = vpop.f32.mrb[30].mxu1 }
 0x206   : > { %11449 = vst [vmem:[#allocation72_spill] sm:$0xff] %v9741_v9  ;;  %v6767_v25 = vpop.f32.mrb[111].mxu0  ;;  %v9743_v57 = vpop.f32.mrb[31].mxu1 }
 0x207   : > { %11450 = vst [vmem:[#allocation73_spill] sm:$0xff] %v9743_v57  ;;  %v9747_v40 = vadd.f32 %v7817_v1, %v6765_v41  ;;  %v6768_v2 = vadd.f32 %v6767_v25, %v6766_v46 }
 0x209   : > { %v9749_v36 = vadd.f32 %v7825_v45, %v6768_v2 }
 0x20b   : > { %v6833_v63 = vpop.f32.mrb[112].mxu0 }
 0x20c   : > { %v6834_v17 = vpop.f32.mrb[113].mxu0 }
 0x20d   : > { %v6835_v50 = vadd.f32 %v6834_v17, %v6833_v63  ;;  %v6836_v24 = vpop.f32.mrb[114].mxu0 }
 0x20e   : > { %v6837_v34 = vpop.f32.mrb[115].mxu0 }
 0x20f   : > { %v7743_v38 = vadd.f32 %v9594_v19, %v6835_v50  ;;  %v6838_v10 = vadd.f32 %v6837_v34, %v6836_v24 }
 0x211   : > { %v9753_v9 = vadd.f32 %v7743_v38, %v9625_v55  ;;  %v7751_v57 = vadd.f32 %v9597_v37, %v6838_v10 }
 0x213   : > { %v2464_v20 = vmax.f32 %v9753_v9, 0.0  ;;  %v9758_v26 = vadd.f32 %v7751_v57, %v9631_v18  ;;  %v6839_v46 = vpop.f32.mrb[116].mxu0 }
 0x214   : > { %v6840_v25 = vpop.f32.mrb[117].mxu0 }
 0x215   : > { %v2465_v1 = vmax.f32 %v9758_v26, 0.0  ;;  %v6841_v41 = vadd.f32 %v6840_v25, %v6839_v46  ;;  %v6842_v45 = vpop.f32.mrb[118].mxu0 }
 0x216   : > { %v6843_v2 = vpop.f32.mrb[119].mxu0 }
 0x217   : > { %v7739_v19 = vadd.f32 %v9603_v5, %v6841_v41  ;;  %v6844_v50 = vadd.f32 %v6843_v2, %v6842_v45 }
 0x219   : > { %v9763_v55 = vadd.f32 %v7739_v19, %v9623_v30  ;;  %v7747_v37 = vadd.f32 %v9605_v0, %v6844_v50 }
 0x21b   : > { %v2466_v24 = vmax.f32 %v9763_v55, 0.0  ;;  %v9768_v18 = vadd.f32 %v7747_v37, %v9629_v15  ;;  %v6845_v57 = vpop.f32.mrb[120].mxu0 }
 0x21c   : > { %v6846_v63 = vpop.f32.mrb[121].mxu0 }
 0x21d   : > { %v2467_v17 = vmax.f32 %v9768_v18, 0.0  ;;  %v6847_v34 = vadd.f32 %v6846_v63, %v6845_v57  ;;  %v6848_v38 = vpop.f32.mrb[122].mxu0 }
 0x21e   : > { %v6849_v10 = vpop.f32.mrb[123].mxu0 }
 0x21f   : > { %v7759_v5 = vadd.f32 %v9611_v58, %v6847_v34  ;;  %v6850_v46 = vadd.f32 %v6849_v10, %v6848_v38 }
 0x221   : > { %v9773_v30 = vadd.f32 %v7759_v5, %v9641_v23  ;;  %v7767_v0 = vadd.f32 %v9613_v7, %v6850_v46 }
 0x223   : > { %v2468_v25 = vmax.f32 %v9773_v30, 0.0  ;;  %v9778_v15 = vadd.f32 %v7767_v0, %v9647_v11  ;;  %v6851_v41 = vpop.f32.mrb[124].mxu0 }
 0x224   : > { %v6852_v45 = vpop.f32.mrb[125].mxu0 }
 0x225   : > { %v2469_v2 = vmax.f32 %v9778_v15, 0.0  ;;  %v6853_v19 = vadd.f32 %v6852_v45, %v6851_v41  ;;  %v6854_v50 = vpop.f32.mrb[126].mxu0 }
 0x226   : > { %v6855_v37 = vpop.f32.mrb[127].mxu0 }
 0x227   : > { %v7755_v58 = vadd.f32 %v9619_v3, %v6853_v19  ;;  %v6856_v57 = vadd.f32 %v6855_v37, %v6854_v50 }
 0x229   : > { %v9783_v23 = vadd.f32 %v7755_v58, %v9639_v35  ;;  %v7763_v7 = vadd.f32 %v9621_v29, %v6856_v57 }
 0x22b   : > { %v2470_v63 = vmax.f32 %v9783_v23, 0.0  ;;  %v9788_v11 = vadd.f32 %v7763_v7, %v9645_v53  ;;  %v6857_v34 = vpop.f32.mrb[128].mxu0 }
 0x22c   : > { %v6858_v38 = vpop.f32.mrb[129].mxu0 }
 0x22d   : > { %v2471_v10 = vmax.f32 %v9788_v11, 0.0  ;;  %v6859_v5 = vadd.f32 %v6858_v38, %v6857_v34  ;;  %v6860_v46 = vpop.f32.mrb[130].mxu0 }
 0x22e   : > { %v6861_v0 = vpop.f32.mrb[131].mxu0 }
 0x22f   : > { %v7775_v3 = vadd.f32 %v9635_v13, %v6859_v5  ;;  %v6862_v41 = vadd.f32 %v6861_v0, %v6860_v46 }
 0x231   : > { %v9793_v35 = vadd.f32 %v7775_v3, %v9657_v47  ;;  %v7783_v29 = vadd.f32 %v9637_v28, %v6862_v41 }
 0x233   : > { %v2472_v45 = vmax.f32 %v9793_v35, 0.0  ;;  %v9798_v53 = vadd.f32 %v7783_v29, %v9663_v4  ;;  %v6863_v19 = vpop.f32.mrb[132].mxu0 }
 0x234   : > { %v6864_v50 = vpop.f32.mrb[133].mxu0 }
 0x235   : > { %v2473_v37 = vmax.f32 %v9798_v53, 0.0  ;;  %v6865_v58 = vadd.f32 %v6864_v50, %v6863_v19  ;;  %v6866_v57 = vpop.f32.mrb[134].mxu0 }
 0x236   : > { %v6867_v7 = vpop.f32.mrb[135].mxu0 }
 0x237   : > { %v7771_v13 = vadd.f32 %v9651_v31, %v6865_v58  ;;  %v6868_v34 = vadd.f32 %v6867_v7, %v6866_v57 }
 0x239   : > { %v9803_v47 = vadd.f32 %v7771_v13, %v9655_v21  ;;  %v7779_v28 = vadd.f32 %v9653_v51, %v6868_v34 }
 0x23b   : > { %v2474_v38 = vmax.f32 %v9803_v47, 0.0  ;;  %v9808_v4 = vadd.f32 %v7779_v28, %v9661_v61  ;;  %v6869_v5 = vpop.f32.mrb[136].mxu0 }
 0x23c   : > { %v6870_v46 = vpop.f32.mrb[137].mxu0 }
 0x23d   : > { %v2475_v0 = vmax.f32 %v9808_v4, 0.0  ;;  %v6871_v3 = vadd.f32 %v6870_v46, %v6869_v5  ;;  %v6872_v41 = vpop.f32.mrb[138].mxu0 }
 0x23e   : > { %v6873_v29 = vpop.f32.mrb[139].mxu0 }
 0x23f   : > { %v7791_v31 = vadd.f32 %v9667_v52, %v6871_v3  ;;  %v6874_v19 = vadd.f32 %v6873_v29, %v6872_v41 }
 0x241   : > { %v9813_v21 = vadd.f32 %v7791_v31, %v9673_v54  ;;  %v7799_v51 = vadd.f32 %v9669_v32, %v6874_v19 }
 0x243   : > { %v2476_v50 = vmax.f32 %v9813_v21, 0.0  ;;  %v9818_v61 = vadd.f32 %v7799_v51, %v9679_v49  ;;  %v6875_v58 = vpop.f32.mrb[140].mxu0 }
 0x244   : > { %v6876_v57 = vpop.f32.mrb[141].mxu0 }
 0x245   : > { %v6877_v13 = vadd.f32 %v6876_v57, %v6875_v58  ;;  %v6878_v34 = vpop.f32.mrb[142].mxu0 }
 0x246   : > { %v6879_v28 = vpop.f32.mrb[143].mxu0 }
 0x247   : > { %v7787_v52 = vadd.f32 %v9683_v56, %v6877_v13  ;;  %v6880_v5 = vadd.f32 %v6879_v28, %v6878_v34 }
 0x249   : > { %v9823_v54 = vadd.f32 %v7787_v52, %v9671_v59  ;;  %v7795_v32 = vadd.f32 %v9685_v22, %v6880_v5 }
 0x24b   : > { %v9828_v49 = vadd.f32 %v7795_v32, %v9677_v14  ;;  %v6881_v3 = vpop.f32.mrb[144].mxu0 }
 0x24c   : > { %v6882_v41 = vpop.f32.mrb[145].mxu0 }
 0x24d   : > { %v6883_v31 = vadd.f32 %v6882_v41, %v6881_v3  ;;  %v6884_v19 = vpop.f32.mrb[146].mxu0  ;;  %v11460_v41 = vld [vmem:[#allocation61_spill] sm:$0xff] }
 0x24e   : > { %v6885_v51 = vpop.f32.mrb[147].mxu0 }
 0x24f   : > { %v7807_v56 = vadd.f32 %v9699_v62, %v6883_v31  ;;  %v6886_v58 = vadd.f32 %v6885_v51, %v6884_v19 }
 0x251   : > { %v9833_v59 = vadd.f32 %v7807_v56, %v9689_v33  ;;  %v7815_v22 = vadd.f32 %v9701_v42, %v6886_v58 }
 0x253   : > { %v9838_v14 = vadd.f32 %v7815_v22, %v9695_v43  ;;  %v6887_v13 = vpop.f32.mrb[148].mxu0 }
 0x254   : > { %v6888_v34 = vpop.f32.mrb[149].mxu0 }
 0x255   : > { %v6889_v52 = vadd.f32 %v6888_v34, %v6887_v13  ;;  %v6890_v5 = vpop.f32.mrb[150].mxu0  ;;  %v11456_v34 = vld [vmem:[#allocation59_spill] sm:$0xff] }
 0x256   : > { %v6891_v32 = vpop.f32.mrb[151].mxu0 }
 0x257   : > { %v7803_v62 = vadd.f32 %v9715_v39, %v6889_v52  ;;  %v6892_v3 = vadd.f32 %v6891_v32, %v6890_v5 }
 0x259   : > { %v9843_v33 = vadd.f32 %v7803_v62, %v9687_v44  ;;  %v7811_v42 = vadd.f32 %v9717_v48, %v6892_v3 }
 0x25b   : > { %v9848_v43 = vadd.f32 %v7811_v42, %v9693_v12  ;;  %v6893_v31 = vpop.f32.mrb[152].mxu0 }
 0x25c   : > { %v6894_v19 = vpop.f32.mrb[153].mxu0 }
 0x25d   : > { %v6895_v56 = vadd.f32 %v6894_v19, %v6893_v31  ;;  %v6896_v58 = vpop.f32.mrb[154].mxu0 }
 0x25e   : > { %v6897_v22 = vpop.f32.mrb[155].mxu0 }
 0x25f   : > { %v7823_v39 = vadd.f32 %v9731_v6, %v6895_v56  ;;  %v6898_v13 = vadd.f32 %v6897_v22, %v6896_v58  ;;  %v11451_v56 = vld [vmem:[#allocation65_spill] sm:$0xff] }
 0x261   : > { %v9853_v44 = vadd.f32 %v7823_v39, %v9705_v16  ;;  %v7831_v48 = vadd.f32 %v9733_v8, %v6898_v13 }
 0x263   : > { %v9858_v12 = vadd.f32 %v7831_v48, %v9711_v60  ;;  %v6899_v52 = vpop.f32.mrb[156].mxu0 }
 0x264   : > { %v6900_v5 = vpop.f32.mrb[157].mxu0 }
 0x265   : > { %v6901_v62 = vadd.f32 %v6900_v5, %v6899_v52  ;;  %v6902_v3 = vpop.f32.mrb[158].mxu0  ;;  %v11452_v5 = vld [vmem:[#allocation57_spill] sm:$0xff] }
 0x266   : > { %v6903_v42 = vpop.f32.mrb[159].mxu0 }
 0x267   : > { %v7819_v6 = vadd.f32 %v9747_v40, %v6901_v62  ;;  %v6904_v31 = vadd.f32 %v6903_v42, %v6902_v3  ;;  %v11453_v3 = vld [vmem:[#allocation67_spill] sm:$0xff]  ;;  %v11454_v42 = vld [vmem:[#allocation58_spill] sm:$0xff] }
 0x269   : > { %v9863_v16 = vadd.f32 %v7819_v6, %v9703_v27  ;;  %v7827_v8 = vadd.f32 %v9749_v36, %v6904_v31  ;;  %v11455_v31 = vld [vmem:[#allocation69_spill] sm:$0xff] }
 0x26b   : > { %v9868_v60 = vadd.f32 %v7827_v8, %v11451_v56  ;;  %v6905_v58 = vpop.f32.mrb[160].mxu0 }
 0x26c   : > { %v6906_v22 = vpop.f32.mrb[161].mxu0 }
 0x26d   : > { %v6907_v13 = vadd.f32 %v6906_v22, %v6905_v58  ;;  %v6908_v48 = vpop.f32.mrb[162].mxu0 }
 0x26e   : > { %v6909_v52 = vpop.f32.mrb[163].mxu0 }
 0x26f   : > { %v7839_v40 = vadd.f32 %v11452_v5, %v6907_v13  ;;  %v6910_v62 = vadd.f32 %v6909_v52, %v6908_v48  ;;  %v11457_v52 = vld [vmem:[#allocation66_spill] sm:$0xff] }
 0x271   : > { %v9873_v27 = vadd.f32 %v7839_v40, %v11453_v3  ;;  %v7847_v36 = vadd.f32 %v11454_v42, %v6910_v62  ;;  %v11458_v40 = vld [vmem:[#allocation60_spill] sm:$0xff] }
 0x272   : > { %v11459_v42 = vld [vmem:[#allocation68_spill] sm:$0xff] }
 0x273   : > { %v9878_v8 = vadd.f32 %v7847_v36, %v11455_v31  ;;  %v6911_v56 = vpop.f32.mrb[164].mxu0 }
 0x274   : > { %v6912_v19 = vpop.f32.mrb[165].mxu0 }
 0x275   : > { %v6913_v58 = vadd.f32 %v6912_v19, %v6911_v56  ;;  %v6914_v22 = vpop.f32.mrb[166].mxu0 }
 0x276   : > { %v6915_v32 = vpop.f32.mrb[167].mxu0 }
 0x277   : > { %v7835_v13 = vadd.f32 %v11456_v34, %v6913_v58  ;;  %v6916_v48 = vadd.f32 %v6915_v32, %v6914_v22  ;;  %v11461_v58 = vld [vmem:[#allocation71_spill] sm:$0xff] }
 0x279   : > { %v9883_v5 = vadd.f32 %v7835_v13, %v11457_v52  ;;  %v7843_v62 = vadd.f32 %v11458_v40, %v6916_v48  ;;  %v11462_v13 = vld [vmem:[#allocation62_spill] sm:$0xff]  ;;  %v11463_v40 = vld [vmem:[#allocation73_spill] sm:$0xff]  ;;  %v11467_v52 = vld [vmem:[#allocation72_spill] sm:$0xff] }
 0x27b   : > { %v9888_v36 = vadd.f32 %v7843_v62, %v11459_v42  ;;  %v6917_v31 = vpop.f32.mrb[168].mxu0 }
 0x27c   : > { %v6918_v6 = vpop.f32.mrb[169].mxu0 }
 0x27d   : > { %v6919_v19 = vadd.f32 %v6918_v6, %v6917_v31  ;;  %v6920_v56 = vpop.f32.mrb[170].mxu0 }
 0x27e   : > { %v6921_v51 = vpop.f32.mrb[171].mxu0 }
 0x27f   : > { %v7855_v34 = vadd.f32 %v11460_v41, %v6919_v19  ;;  %v6922_v32 = vadd.f32 %v6921_v51, %v6920_v56  ;;  %v11464_v41 = vld [vmem:[#allocation63_spill] sm:$0xff]  ;;  %v11465_v56 = vld [vmem:[#allocation70_spill] sm:$0xff] }
 0x281   : > { %v9893_v22 = vadd.f32 %v7855_v34, %v11461_v58  ;;  %v7863_v48 = vadd.f32 %v11462_v13, %v6922_v32  ;;  %v11466_v32 = vld [vmem:[#allocation64_spill] sm:$0xff] }
 0x283   : > { %v9898_v62 = vadd.f32 %v7863_v48, %v11463_v40  ;;  %v6923_v42 = vpop.f32.mrb[172].mxu0 }
 0x284   : > { %v6924_v3 = vpop.f32.mrb[173].mxu0 }
 0x285   : > { %v6925_v31 = vadd.f32 %v6924_v3, %v6923_v42  ;;  %v6926_v39 = vpop.f32.mrb[174].mxu0  ;;  %2499 = sbr.rel (%p11468_p6) target bundleno = 673 (0x2a1), region = 56  ;;  %v8574_v3 = vmov (!%p11468_p6), 0  }
 0x286   : > { %v6927_v28 = vpop.f32.mrb[175].mxu0  ;;  %2500 = vst [vmem:[#allocation2] sm:$0xf] (!%p11468_p6), %v8574_v3  ;;  %2501 = vst [vmem:[#allocation2 + $0x4] sm:$0xf] (!%p11468_p6), %v8574_v3 }
 0x287   : > { %v7851_v51 = vadd.f32 %v11464_v41, %v6925_v31  ;;  %v6928_v19 = vadd.f32 %v6927_v28, %v6926_v39  ;;  %2502 = vst [vmem:[#allocation2 + $0x8] sm:$0x1] (!%p11468_p6), %v8574_v3  ;;  %2503 = vst [vmem:[#allocation2 + $0xc] sm:$0xf] (!%p11468_p6), %v8574_v3 }
 0x288   : > { %2504 = vst [vmem:[#allocation2 + $0x10] sm:$0xf] (!%p11468_p6), %v8574_v3  ;;  %2505 = vst [vmem:[#allocation2 + $0x14] sm:$0x1] (!%p11468_p6), %v8574_v3 }
 0x289   : > { %v9903_v34 = vadd.f32 %v7851_v51, %v11465_v56  ;;  %v7859_v58 = vadd.f32 %v11466_v32, %v6928_v19  ;;  %2506 = vst [vmem:[#allocation2 + $0x18] sm:$0xf] (!%p11468_p6), %v8574_v3  ;;  %2507 = vst [vmem:[#allocation2 + $0x1c] sm:$0xf] (!%p11468_p6), %v8574_v3 }
 0x28a   : > { %2508 = vst [vmem:[#allocation2 + $0x20] sm:$0x1] (!%p11468_p6), %v8574_v3  ;;  %2509 = vst [vmem:[#allocation2 + $0x24] sm:$0xf] (!%p11468_p6), %v8574_v3 }
 0x28b   : > { %v9908_v48 = vadd.f32 %v7859_v58, %v11467_v52  ;;  %2510 = vst [vmem:[#allocation2 + $0x28] sm:$0xf] (!%p11468_p6), %v8574_v3  ;;  %2511 = vst [vmem:[#allocation2 + $0x2c] sm:$0x1] (!%p11468_p6), %v8574_v3 }
 0x28c   : > { %2512 = vst [vmem:[#allocation2 + $0x30] sm:$0xf] %v8574_v3  ;;  %2513 = vst [vmem:[#allocation2 + $0x34] sm:$0xf] %v8574_v3 }
 0x28d   : > { %2514 = vst [vmem:[#allocation2 + $0x38] sm:$0x1] %v8574_v3  ;;  %2515 = vst [vmem:[#allocation2 + $0x3c] sm:$0xf] %v8574_v3 }
 0x28e   : > { %2516 = vst [vmem:[#allocation2 + $0x40] sm:$0xf] %v8574_v3  ;;  %2517 = vst [vmem:[#allocation2 + $0x44] sm:$0x1] %v8574_v3 }
 0x28f   : > { %2518 = vst [vmem:[#allocation2 + $0x48] sm:$0xf] %v8574_v3  ;;  %2519 = vst [vmem:[#allocation2 + $0x4c] sm:$0xf] %v8574_v3 }
 0x290   : > { %2520 = vst [vmem:[#allocation2 + $0x50] sm:$0x1] %v8574_v3  ;;  %2521 = vst [vmem:[#allocation2 + $0x54] sm:$0xf] %v8574_v3 }
 0x291   : > { %2522 = vst [vmem:[#allocation2 + $0x58] sm:$0xf] %v8574_v3  ;;  %2523 = vst [vmem:[#allocation2 + $0x5c] sm:$0x1] %v8574_v3 }
 0x292   : > { %2524 = vst [vmem:[#allocation2 + $0x60] sm:$0xf] %v8574_v3  ;;  %2525 = vst [vmem:[#allocation2 + $0x64] sm:$0xf] %v8574_v3 }
 0x293   : > { %2526 = vst [vmem:[#allocation2 + $0x68] sm:$0x1] %v8574_v3  ;;  %2527 = vst [vmem:[#allocation2 + $0x6c] sm:$0xf] %v8574_v3 }
 0x294   : > { %2528 = vst [vmem:[#allocation2 + $0x70] sm:$0xf] %v8574_v3  ;;  %2529 = vst [vmem:[#allocation2 + $0x74] sm:$0x1] %v8574_v3 }
 0x295   : > { %2530 = vst [vmem:[#allocation2 + $0x78] sm:$0xf] %v8574_v3  ;;  %2531 = vst [vmem:[#allocation2 + $0x7c] sm:$0xf] %v8574_v3 }
 0x296   : > { %2532 = vst [vmem:[#allocation2 + $0x80] sm:$0x1] %v8574_v3  ;;  %2533 = vst [vmem:[#allocation2 + $0x84] sm:$0xf] %v8574_v3 }
 0x297   : > { %2534 = vst [vmem:[#allocation2 + $0x88] sm:$0xf] %v8574_v3  ;;  %2535 = vst [vmem:[#allocation2 + $0x8c] sm:$0x1] %v8574_v3 }
 0x298   : > { %2536 = vst [vmem:[#allocation2 + $0x90] sm:$0xf] %v8574_v3  ;;  %2537 = vst [vmem:[#allocation2 + $0x94] sm:$0xf] %v8574_v3 }
 0x299   : > { %2538 = vst [vmem:[#allocation2 + $0x98] sm:$0x1] %v8574_v3  ;;  %2539 = vst [vmem:[#allocation2 + $0x9c] sm:$0xf] %v8574_v3 }
 0x29a   : > { %2540 = vst [vmem:[#allocation2 + $0xa0] sm:$0xf] %v8574_v3  ;;  %2541 = vst [vmem:[#allocation2 + $0xa4] sm:$0x1] %v8574_v3 }
 0x29b   : > { %2542 = vst [vmem:[#allocation2 + $0xa8] sm:$0xf] %v8574_v3  ;;  %2543 = vst [vmem:[#allocation2 + $0xac] sm:$0xf] %v8574_v3 }
 0x29c   : > { %2544 = vst [vmem:[#allocation2 + $0xb0] sm:$0x1] %v8574_v3  ;;  %2545 = vst [vmem:[#allocation2 + $0xb4] sm:$0xf] %v8574_v3 }
 0x29d   : > { %2546 = vst [vmem:[#allocation2 + $0xb8] sm:$0xf] %v8574_v3  ;;  %2547 = vst [vmem:[#allocation2 + $0xbc] sm:$0x1] %v8574_v3 }
 0x29e   : > { %2548 = vst [vmem:[#allocation2 + $0xc0] sm:$0xf] %v8574_v3  ;;  %2549 = vst [vmem:[#allocation2 + $0xc4] sm:$0xf] %v8574_v3 }
 0x29f   : > { %2550 = vst [vmem:[#allocation2 + $0xc8] sm:$0x1] %v8574_v3  ;;  %2551 = vst [vmem:[#allocation2 + $0xcc] sm:$0xf] %v8574_v3 }
 0x2a0   : > { %2552 = vst [vmem:[#allocation2 + $0xd0] sm:$0xf] %v8574_v3  ;;  %2553 = vst [vmem:[#allocation2 + $0xd4] sm:$0x1] %v8574_v3 }
 0x2a1 PF: > { %v8349_v28 = vld [vmem:[#allocation3 + $0x40] sm:$0xff]   ;;  %v9919_v39 = vpack.c.bf16 %v2464_v20, %v2464_v20  ;;  %v9924_v42 = vpack.c.bf16 %v2465_v1, %v2465_v1  ;;  %v8352_v41 = vld [vmem:[#allocation3 + $0x48] sm:$0xff]   ;;  %v8355_v56 = vld [vmem:[#allocation3 + $0x50] sm:$0xff]   ;;  %v9931_v26 = vpack.c.bf16 %v2466_v24, %v2466_v24  ;;  %v6515_v55 = vpack.c.bf16 %v2467_v17, %v2467_v17  ;;  %s6544_s14 = sshll.u32 %s8639_s28, 12  ;;  %s6053_s21 = sshll.u32 %s9912_s17, 4  ;;  %s11240_s21 = int_to_ptr.vmem [resolvable:$true] %s6053_s21 }
 0x2a2   : > { %v8350_v52 = vld [vmem:[#allocation3 + $0x80] sm:$0xff]   ;;  %6953 = vmatprep.subr.bf16.mxu0 %v8349_v28  ;;  %v8353_v19 = vld [vmem:[#allocation3 + $0x88] sm:$0xff]   ;;  %v8356_v1 = vld [vmem:[#allocation3 + $0x90] sm:$0xff]   ;;  %v6516_v17 = vpack.c.bf16 %v2468_v25, %v2468_v25  ;;  %vm2981_vm2 = vcmask 1040384   ;;  %vm2974_vm3 = vcmask 1043456   ;;  %v9957_v30 = vpack.c.bf16 %v2469_v2, %v2469_v2  ;;  %s11238_s23 = scalar_lea.hbm %s11295_s7, %s6544_s14  ;;  %s11247_s28 = scalar_lea.sflag [#allocation5], %s284_s18 }
 0x2a3   : > { %v8351_v31 = vld [vmem:[#allocation3] sm:$0xff]   ;;  %7529 = vmatprep.subr.bf16.mxu1 %v8350_v52  ;;  %v2654_v51 = vshrl.u32 %v9919_v39, 16  ;;  %v8354_v9 = vld [vmem:[#allocation3 + $0x8] sm:$0xff]   ;;  %v2662_v20 = vshrl.u32 %v9924_v42, 16  ;;  %v8357_v58 = vld [vmem:[#allocation3 + $0x10] sm:$0xff]   ;;  %v2657_v3 = vshll.u32 %v9919_v39, 16  ;;  %v9991_v11 = vpack.c.bf16 %v2473_v37, %v2473_v37 }
 0x2a4   : > { %6954 = vmatpush3.bf16.msra.mxu0 %v8351_v31  ;;  %7530 = vmatpush3.bf16.msra.mxu1 %v8350_v52  ;;  %v8358_v28 = vld [vmem:[#allocation3 + $0x58] sm:$0xff]   ;;  %v2671_v24 = vshrl.u32 %v9931_v26, 16  ;;  %v2665_v40 = vshll.u32 %v9924_v42, 16  ;;  %v8363_v13 = vld [vmem:[#allocation3 + $0x20] sm:$0xff]   ;;  %v2682_v25 = vshll.u32 %v6515_v55, 16  ;;  %v2696_v57 = vshrl.u32 %v9957_v30, 16 }
 0x2a5   : > { %6955 = vmatprep.subr.bf16.mxu0 %v8352_v41  ;;  %7531 = vmatprep.subr.bf16.mxu1 %v8353_v19  ;;  %v9933_v32 = vrot.slane %v2654_v51, 7  ;;  %v9936_v52 = vrot.slane %v2662_v20, 7  ;;  %v8359_v31 = vld [vmem:[#allocation3 + $0x98] sm:$0xff]   ;;  %v2679_v20 = vshrl.u32 %v6515_v55, 16  ;;  %v8369_v29 = vld [vmem:[#allocation3 + $0x30] sm:$0xff]   ;;  %v2691_v15 = vshll.u32 %v6516_v17, 16 }
 0x2a6   : > { %v8360_v41 = vld [vmem:[#allocation3 + $0x18] sm:$0xff]   ;;  %v9964_v7 = vrot.slane %v2696_v57, 7  ;;  %v9978_v57 = vld [vmem:[#allocation2] sm:$0xff]   ;;  %vm2650_vm4 = vsmask.f32 256  ;;  %s8503_s29 = scalar_lea.vmem %s11240_s21, 4096 }
 0x2a7   : > { %v2660_v51 = vrot.slane %v9933_v32, 4  ;;  %v2669_v18 = vrot.slane %v9936_v52, 4  ;;  %v9950_v6 = vrot.slane %v2679_v20, 7  ;;  %v8366_v20 = vld [vmem:[#allocation3 + $0x28] sm:$0xff]   ;;  %v8370_v46 = vld [vmem:[#allocation3 + $0x78] sm:$0xff]   ;;  %v2659_v23 = vor.u32 %v2657_v3, %v9933_v32  ;;  %vm9995_vm7 = vmand %vm2981_vm2, %vm2650_vm4  ;;  %p8504_p9 = scmp.ne.s32.totalorder %s11240_s21, %s8503_s29  ;;  %p11565_p10 = scmp.ne.s32.totalorder %s11379_s11, 0 }
 0x2a8   : > { %6956 = vmatpush3.bf16.msra.mxu0 %v8354_v9  ;;  %7532 = vmatpush3.bf16.msra.mxu1 %v8353_v19  ;;  %v8361_v19 = vld [vmem:[#allocation3 + $0x60] sm:$0xff]   ;;  %v9943_v9 = vrot.slane %v2671_v24, 7  ;;  %v2688_v24 = vshrl.u32 %v6516_v17, 16  ;;  %v8371_v2 = vld [vmem:[#allocation3 + $0xb8] sm:$0xff]   ;;  %v9976_v17 = vpack.c.bf16 %v2471_v10, %v2471_v10  ;;  %vm2651_vm5 = vsmask.f32 4368 }
 0x2a9   : > { %6957 = vmatprep.subr.bf16.mxu0 %v8355_v56  ;;  %7533 = vmatprep.subr.bf16.mxu1 %v8356_v1  ;;  %v8362_v56 = vld [vmem:[#allocation3 + $0xa0] sm:$0xff]   ;;  %v8372_v10 = vld [vmem:[#allocation3 + $0x38] sm:$0xff]   ;;  %vm2975_vm6 = vsmask.f32 7938  ;;  %v3309_v39 = vshrl.u32 %v9978_v57, 16  ;;  %v3311_v53 = vshll.u32 %v9978_v57, 16  ;;  %vm10005_vm8 = vmor %vm2650_vm4, %vm2651_vm5  ;;  %p8505_p11 = pnand %p8504_p9, %p11565_p10 }
 0x2aa   : > { %v2677_v42 = vrot.slane %v9943_v9, 4  ;;  %v3542_v3 = vrot.slane %v9978_v57, 1  ;;  %vm10015_vm9 = vmand %vm2974_vm3, %vm2975_vm6  ;;  %vm5260_vm10 = vsmask.f32 3328  ;;  %vm5261_vm11 = vsmask.f32 7440 }
 0x2ab   : > { %v3313_v32 = vrot.slane %v3311_v53, 1  ;;  %v2993_v53 = vld [vmem:[#allocation2 + $0x24] sm:$0xf]  ;;  %vm10693_vm12 = vmor %vm5260_vm10, %vm5261_vm11  ;;  %p8506_p13 = pneg %p8505_p11  ;;  %s8575_s8 = smov [#allocation6]  }
 0x2ac   : > { %6958 = vmatpush3.bf16.msra.mxu0 %v8357_v58  ;;  %7534 = vmatpush3.bf16.msra.mxu1 %v8356_v1  ;;  %v8364_v1 = vld [vmem:[#allocation3 + $0x68] sm:$0xff]   ;;  %v2674_v58 = vshll.u32 %v9931_v26, 16  ;;  %v9960_v26 = vrot.slane %v2688_v24, 7  ;;  %v8374_v24 = vld [vmem:[#allocation2 + $0x8] ss:$0 sps:$4 sm:$0x11]  }
 0x2ad   : > { %6959 = vmatprep.subr.bf16.mxu0 %v8358_v28  ;;  %7535 = vmatprep.subr.bf16.mxu1 %v8359_v31  ;;  %v8365_v28 = vld [vmem:[#allocation3 + $0xa8] sm:$0xff]   ;;  %v3316_v37 = vshll.u32 %v8374_v24, 16  ;;  %s8507_s13 = sshll.u32 %s8575_s8, 4  ;;  %s8508_s13 = int_to_ptr.vmem [resolvable:$false] %s8507_s13 }
 0x2ae   : > { %v2694_v55 = vrot.slane %v9960_v26, 4  ;;  %v2676_v35 = vor.u32 %v2674_v58, %v9943_v9  ;;  %s8509_s9 = scalar_lea.vmem %s8508_s13, 8192  ;;  %p8510_p3 = scmp.lt.s32.totalorder %s11240_s21, %s8508_s13 }
 0x2af   : > { %p8511_p4 = scmp.lt.s32.totalorder %s8509_s9, %s8503_s29 }
 0x2b0   : > { %6960 = vmatpush3.bf16.msra.mxu0 %v8360_v41  ;;  %7536 = vmatpush3.bf16.msra.mxu1 %v8359_v31  ;;  %v2686_v41 = vrot.slane %v9950_v6, 4  ;;  %v8367_v31 = vld [vmem:[#allocation3 + $0x70] sm:$0xff]  }
 0x2b1   : > { %6961 = vmatprep.subr.bf16.mxu0 %v8361_v19  ;;  %7537 = vmatprep.subr.bf16.mxu1 %v8362_v56  ;;  %v8368_v19 = vld [vmem:[#allocation3 + $0xb0] sm:$0xff]   ;;  %p8512_p7 = por %p8511_p4, %p8510_p3 }
 0x2b3   : > { %p8513_p8 = pnand %p8512_p7, %p8506_p13 }
 0x2b4   : > { %6962 = vmatpush3.bf16.msra.mxu0 %v8363_v13  ;;  %7538 = vmatpush3.bf16.msra.mxu1 %v8362_v56  ;;  %v9969_v13 = vpack.c.bf16 %v2470_v63, %v2470_v63  ;;  %v2667_v56 = vor.u32 %v2665_v40, %v9936_v52  ;;  %v9986_v63 = vpack.c.bf16 %v2472_v45, %v2472_v45  ;;  %v2977_v40 = vld [vmem:[#allocation2 + $0xc] sm:$0xf]  ;;  %v2699_v52 = vshll.u32 %v9957_v30, 16 }
 0x2b5   : > { %6963 = vmatprep.subr.bf16.mxu0 %v8364_v1  ;;  %7539 = vmatprep.subr.bf16.mxu1 %v8365_v28  ;;  %v2684_v1 = vor.u32 %v2682_v25, %v9950_v6  ;;  %v2693_v45 = vor.u32 %v2691_v15, %v9960_v26 }
 0x2b6   : > { %v2668_v9 = vsel %vm10005_vm8, %v2660_v51, %v2667_v56  ;;  %v2978_v51 = vsel %vm10015_vm9, %v2659_v23, %v2977_v40  ;;  %v10027_v56 = vld [vmem:[#allocation3 + $0x140] sm:$0xff]   ;;  %v10037_v23 = vpack.c.bf16 %v2474_v38, %v2474_v38  ;;  %v3314_v40 = vor.u32 %v3313_v32, %v3309_v39 }
 0x2b7   : > { %2980 = vst [vmem:[#allocation2 + $0x10] sm:$0xf] %v2668_v9  ;;  %2979 = vst [vmem:[#allocation2 + $0xc] sm:$0xf] %v2978_v51  ;;  %v2705_v38 = vshrl.u32 %v9969_v13, 16  ;;  %v2708_v6 = vshll.u32 %v9969_v13, 16 }
 0x2b8   : > { %6964 = vmatpush3.bf16.msra.mxu0 %v8366_v20  ;;  %7540 = vmatpush3.bf16.msra.mxu1 %v8365_v28  ;;  %v2983_v20 = vld [vmem:[#allocation2 + $0x14] sm:$0x1]  ;;  %v2713_v39 = vshrl.u32 %v9976_v17, 16  ;;  %v2730_v9 = vshrl.u32 %v9991_v11, 16  ;;  %v3004_v32 = vld [vmem:[#allocation2 + $0x38] sm:$0x1] }
 0x2b9   : > { %6965 = vmatprep.subr.bf16.mxu0 %v8367_v31  ;;  %7541 = vmatprep.subr.bf16.mxu1 %v8368_v19  ;;  %v3543_v31 = vrot.slane %v8374_v24, 1  ;;  %v2984_v15 = vsel %vm9995_vm7, %v2669_v18, %v2983_v20  ;;  %v2986_v24 = vld [vmem:[#allocation2 + $0x18] sm:$0xf]  ;;  %v3000_v20 = vld [vmem:[#allocation2 + $0x30] sm:$0xf]  ;;  %v8430_v28 = vld [vmem:[#allocation3 + $0x1a8] sm:$0xff]  }
 0x2ba   : > { %2985 = vst [vmem:[#allocation2 + $0x14] sm:$0x1] %v2984_v15  ;;  %v2715_v13 = vrot.slane %v2713_v39, 7  ;;  %v10073_v15 = vpack.c.bf16 %v2476_v50, %v2476_v50  ;;  %v11477_v50 = vmax.f32 %v9828_v49, 0.0 }
 0x2bb   : > { %v3544_v18 = vsel %vm745_vm1, %v3542_v3, %v3543_v31  ;;  %v2997_v3 = vld [vmem:[#allocation2 + $0x2c] sm:$0x1]  ;;  %v2725_v31 = vshll.u32 %v9986_v63, 16 }
 0x2bc   : > { %6966 = vmatpush3.bf16.msra.mxu0 %v8369_v29  ;;  %7542 = vmatpush3.bf16.msra.mxu1 %v8368_v19  ;;  %v2685_v29 = vsel %vm10005_vm8, %v2677_v42, %v2684_v1  ;;  %v3318_v19 = vrot.slane %v3316_v37, 1  ;;  %v2990_v42 = vld [vmem:[#allocation2 + $0x20] sm:$0x1]  ;;  %v2703_v1 = vrot.slane %v9964_v7, 4  ;;  %v2701_v37 = vor.u32 %v2699_v52, %v9964_v7 }
 0x2bd   : > { %6967 = vmatprep.subr.bf16.mxu0 %v8370_v46  ;;  %7543 = vmatprep.subr.bf16.mxu1 %v8371_v2  ;;  %2989 = vst [vmem:[#allocation2 + $0x1c] sm:$0xf] %v2685_v29  ;;  %v2987_v46 = vsel %vm10015_vm9, %v2676_v35, %v2986_v24  ;;  %v2991_v30 = vsel %vm9995_vm7, %v2686_v41, %v2990_v42 }
 0x2be   : > { %7545 = vmatprep.mubr.bf16.mxu1 %v3544_v18  ;;  %2988 = vst [vmem:[#allocation2 + $0x18] sm:$0xf] %v2987_v46  ;;  %v2994_v35 = vsel %vm10015_vm9, %v2693_v45, %v2993_v53  ;;  %2992 = vst [vmem:[#allocation2 + $0x20] sm:$0x1] %v2991_v30  ;;  %v2998_v47 = vsel %vm9995_vm7, %v2703_v1, %v2997_v3  ;;  %v3319_v41 = vsel %vm510_vm0, %v3314_v40, %v3318_v19  ;;  %v3007_v19 = vld [vmem:[#allocation2 + $0x3c] sm:$0xf] }
 0x2bf   : > { %2995 = vst [vmem:[#allocation2 + $0x24] sm:$0xf] %v2994_v35  ;;  %v2702_v7 = vsel %vm10005_vm8, %v2694_v55, %v2701_v37  ;;  %2999 = vst [vmem:[#allocation2 + $0x2c] sm:$0x1] %v2998_v47  ;;  %3844 = vmatprep.mubr.bf16.mxu0 %v3319_v41  ;;  %v2707_v45 = vrot.slane %v2705_v38, 7  ;;  %v2733_v55 = vshll.u32 %v9991_v11, 16  ;;  %v10089_v52 = vpack.c.bf16 %v11477_v50, %v11477_v50 }
 0x2c0   : > { %6968 = vmatpush3.bf16.msra.mxu0 %v8372_v10  ;;  %7544 = vmatpush3.bf16.msra.mxu1 %v8371_v2  ;;  %v2716_v2 = vshll.u32 %v9976_v17, 16  ;;  %v2722_v10 = vshrl.u32 %v9986_v63, 16  ;;  %2996 = vst [vmem:[#allocation2 + $0x28] sm:$0xf] %v2702_v7  ;;  %v10068_v17 = vpack.c.bf16 %v2475_v0, %v2475_v0  ;;  %v11476_v11 = vmax.f32 %v9823_v54, 0.0  ;;  %v8375_v0 = vld [vmem:[#allocation2 + $0xc] sm:$0xff]  }
 0x2c1   : > { %7577 = vmatprep.subr.bf16.mxu1 %v10027_v56  ;;  %v2710_v29 = vor.u32 %v2708_v6, %v2707_v45  ;;  %v8376_v24 = vld [vmem:[#allocation2 + $0x14] ss:$0 sps:$4 sm:$0x11]   ;;  %v11478_v18 = vmax.f32 %v9833_v59, 0.0  ;;  %v11479_v46 = vmax.f32 %v9838_v14, 0.0  ;;  %v8382_v1 = vld [vmem:[#allocation3 + $0x148] sm:$0xff]  }
 0x2c2   : > { %v10062_v26 = vrot.slane %v2722_v10, 7  ;;  %v2718_v63 = vor.u32 %v2716_v2, %v2715_v13  ;;  %v10083_v4 = vpack.c.bf16 %v11476_v11, %v11476_v11  ;;  %v2711_v53 = vrot.slane %v2707_v45, 4  ;;  %v3011_v50 = vld [vmem:[#allocation2 + $0x44] sm:$0x1] }
 0x2c3   : > { %3845 = vmatmul.mubr.bf16.vlgmr.msra.gmra.mrb[176].mxu0 %v9978_v57  ;;  %v11475_v57 = vmax.f32 %v9818_v61, 0.0  ;;  %v10094_v61 = vpack.c.bf16 %v11478_v18, %v11478_v18  ;;  %v10099_v54 = vpack.c.bf16 %v11479_v46, %v11479_v46  ;;  %v2720_v40 = vrot.slane %v2715_v13, 4  ;;  %v8387_v18 = vld [vmem:[#allocation3 + $0x150] sm:$0xff]  }
 0x2c4   : > { %v2727_v21 = vor.u32 %v2725_v31, %v10062_v26  ;;  %v3001_v49 = vsel %vm10015_vm9, %v2710_v29, %v3000_v20  ;;  %v2728_v30 = vrot.slane %v10062_v26, 4  ;;  %v3545_v37 = vrot.slane %v8375_v0, 1 }
 0x2c5   : > { %v10078_v51 = vpack.c.bf16 %v11475_v57, %v11475_v57  ;;  %v10101_v42 = vld [vmem:[#allocation2 + $0x18] sm:$0xff]   ;;  %v3546_v59 = vrot.slane %v8376_v24, 1  ;;  %v3321_v35 = vshrl.u32 %v8375_v0, 16  ;;  %v3323_v3 = vshll.u32 %v8375_v0, 16  ;;  %3002 = vst [vmem:[#allocation2 + $0x30] sm:$0xf] %v3001_v49 }
 0x2c6   : > { %v3328_v47 = vshll.u32 %v8376_v24, 16  ;;  %v8379_v14 = vld [vmem:[#allocation2 + $0x20] ss:$0 sps:$4 sm:$0x11]   ;;  %v3548_v38 = vrot.slane %v10101_v42, 1  ;;  %v3333_v6 = vshrl.u32 %v10101_v42, 16  ;;  %v2719_v39 = vsel %vm10005_vm8, %v2711_v53, %v2718_v63 }
 0x2c7   : > { %v10111_v41 = vsel %vm745_vm1, %v3545_v37, %v3546_v59  ;;  %v3325_v7 = vrot.slane %v3323_v3, 1  ;;  %v10113_v2 = vld [vmem:[#allocation2 + $0x24] sm:$0xff]   ;;  %3003 = vst [vmem:[#allocation2 + $0x34] sm:$0xf] %v2719_v39  ;;  %v3005_v10 = vsel %vm9995_vm7, %v2720_v40, %v3004_v32  ;;  %v3008_v45 = vsel %vm10015_vm9, %v2727_v21, %v3007_v19 }
 0x2c8   : > { %7546 = vmatmul.mubr.bf16.vlgmr.msra.gmra.mrb[48].mxu1 %v10111_v41  ;;  %v3330_v13 = vrot.slane %v3328_v47, 1  ;;  %v3549_v20 = vrot.slane %v8379_v14, 1  ;;  %v3335_v31 = vshll.u32 %v10101_v42, 16  ;;  %v3340_v26 = vshll.u32 %v8379_v14, 16  ;;  %3006 = vst [vmem:[#allocation2 + $0x38] sm:$0x1] %v3005_v10 }
 0x2c9   : > { %3009 = vst [vmem:[#allocation2 + $0x3c] sm:$0xf] %v3008_v45  ;;  %7578 = vmatpush3.bf16.msra.mxu1 %v10027_v56  ;;  %v3326_v29 = vor.u32 %v3325_v7, %v3321_v35  ;;  %v8381_v63 = vld [vmem:[#allocation2 + $0x2c] ss:$0 sps:$4 sm:$0x11]   ;;  %v3551_v57 = vrot.slane %v10113_v2, 1 }
 0x2ca   : > { %v2732_v11 = vrot.slane %v2730_v9, 7  ;;  %v3345_v32 = vshrl.u32 %v10113_v2, 16  ;;  %v10125_v19 = vsel %vm745_vm1, %v3548_v38, %v3549_v20  ;;  %7579 = vmatprep.subr.bf16.mxu1 %v8382_v1  ;;  %v3337_v24 = vrot.slane %v3335_v31, 1  ;;  %v3014_v38 = vld [vmem:[#allocation2 + $0x48] sm:$0xf]  ;;  %v8392_v10 = vld [vmem:[#allocation3 + $0x158] sm:$0xff]  }
 0x2cb   : > { %v3342_v21 = vrot.slane %v3340_v26, 1  ;;  %v3347_v46 = vshll.u32 %v10113_v2, 16  ;;  %v10129_v53 = vsel %vm510_vm0, %v3326_v29, %v3330_v13  ;;  %7549 = vmatprep.mubr.bf16.mxu1 %v10125_v19  ;;  %v3552_v56 = vrot.slane %v8381_v63, 1 }
 0x2cc   : > { %v2735_v40 = vor.u32 %v2733_v55, %v2732_v11  ;;  %v2737_v9 = vrot.slane %v2732_v11, 4  ;;  %3852 = vmatprep.mubr.bf16.mxu0 %v10129_v53  ;;  %v3338_v49 = vor.u32 %v3337_v24, %v3333_v6  ;;  %v3352_v59 = vshll.u32 %v8381_v63, 16 }
 0x2cd   : > { %v3349_v37 = vrot.slane %v3347_v46, 1  ;;  %v2739_v35 = vshrl.u32 %v10037_v23, 16  ;;  %3853 = vmatmul.mubr.bf16.gmra.mrb[180].mxu0 %v8375_v0  ;;  %v10135_v3 = vsel %vm745_vm1, %v3551_v57, %v3552_v56  ;;  %7580 = vmatpush3.bf16.msra.mxu1 %v8382_v1  ;;  %v2742_v55 = vshll.u32 %v10037_v23, 16 }
 0x2ce   : > { %v2736_v47 = vsel %vm10005_vm8, %v2728_v30, %v2735_v40  ;;  %v3012_v14 = vsel %vm9995_vm7, %v2737_v9, %v3011_v50  ;;  %v10143_v6 = vsel %vm510_vm0, %v3338_v49, %v3342_v21  ;;  %v10145_v39 = vld [vmem:[#allocation2 + $0x30] sm:$0xff]   ;;  %7581 = vmatprep.subr.bf16.mxu1 %v8387_v18  ;;  %v3354_v7 = vrot.slane %v3352_v59, 1  ;;  %v8397_v9 = vld [vmem:[#allocation3 + $0x160] sm:$0xff]  }
 0x2cf   : > { %3010 = vst [vmem:[#allocation2 + $0x40] sm:$0xf] %v2736_v47  ;;  %3013 = vst [vmem:[#allocation2 + $0x44] sm:$0x1] %v3012_v14  ;;  %v3350_v0 = vor.u32 %v3349_v37, %v3345_v32  ;;  %v2741_v1 = vrot.slane %v2739_v35, 7  ;;  %3860 = vmatprep.mubr.bf16.mxu0 %v10143_v6  ;;  %v2747_v45 = vshrl.u32 %v10068_v17, 16 }
 0x2d0   : > { %v8384_v30 = vld [vmem:[#allocation2 + $0x38] ss:$0 sps:$4 sm:$0x11]   ;;  %v11480_v23 = vmax.f32 %v9843_v33, 0.0  ;;  %v11481_v20 = vmax.f32 %v9848_v43, 0.0  ;;  %v11482_v26 = vmax.f32 %v9853_v44, 0.0  ;;  %7550 = vmatmul.mubr.bf16.gmra.mrb[52].mxu1 %v10135_v3 }
 0x2d1   : > { %v3554_v63 = vrot.slane %v10145_v39, 1  ;;  %v10167_v57 = vsel %vm510_vm0, %v3350_v0, %v3354_v7  ;;  %v2744_v33 = vor.u32 %v2742_v55, %v2741_v1  ;;  %v2745_v11 = vrot.slane %v2741_v1, 4  ;;  %7582 = vmatpush3.bf16.msra.mxu1 %v8387_v18  ;;  %v3018_v50 = vld [vmem:[#allocation2 + $0x50] sm:$0x1]  ;;  %v3021_v59 = vld [vmem:[#allocation2 + $0x54] sm:$0xf] }
 0x2d2   : > { %v10152_v13 = vpack.c.bf16 %v11480_v23, %v11480_v23  ;;  %v10157_v31 = vpack.c.bf16 %v11481_v20, %v11481_v20  ;;  %v10162_v29 = vpack.c.bf16 %v11482_v26, %v11482_v26  ;;  %v3555_v32 = vrot.slane %v8384_v30, 1  ;;  %7583 = vmatprep.subr.bf16.mxu1 %v8392_v10  ;;  %v3025_v35 = vld [vmem:[#allocation2 + $0x5c] sm:$0x1] }
 0x2d3   : > { %v2749_v43 = vrot.slane %v2747_v45, 7  ;;  %v2750_v24 = vshll.u32 %v10068_v17, 16  ;;  %v2756_v21 = vshrl.u32 %v10073_v15, 16  ;;  %v3015_v44 = vsel %vm10015_vm9, %v2744_v33, %v3014_v38 }
 0x2d4   : > { %v2759_v46 = vshll.u32 %v10073_v15, 16  ;;  %v2764_v56 = vshrl.u32 %v10078_v51, 16  ;;  %v2767_v40 = vshll.u32 %v10078_v51, 16  ;;  %v10177_v49 = vsel %vm745_vm1, %v3554_v63, %v3555_v32  ;;  %3016 = vst [vmem:[#allocation2 + $0x48] sm:$0xf] %v3015_v44  ;;  %v8402_v51 = vld [vmem:[#allocation3 + $0x168] sm:$0xff]  }
 0x2d5   : > { %v2752_v18 = vor.u32 %v2750_v24, %v2749_v43  ;;  %v2754_v37 = vrot.slane %v2749_v43, 4  ;;  %v2758_v17 = vrot.slane %v2756_v21, 7  ;;  %7553 = vmatprep.mubr.bf16.mxu1 %v10177_v49  ;;  %v3357_v15 = vshrl.u32 %v10145_v39, 16  ;;  %3861 = vmatmul.mubr.bf16.gmra.mrb[184].mxu0 %v10101_v42  ;;  %v8407_v44 = vld [vmem:[#allocation3 + $0x170] sm:$0xff]  }
 0x2d6   : > { %v2766_v47 = vrot.slane %v2764_v56, 7  ;;  %v3359_v14 = vshll.u32 %v10145_v39, 16  ;;  %v3364_v55 = vshll.u32 %v8384_v30, 16  ;;  %v10183_v38 = vld [vmem:[#allocation2 + $0x3c] sm:$0xff]   ;;  %7584 = vmatpush3.bf16.msra.mxu1 %v8392_v10  ;;  %3868 = vmatprep.mubr.bf16.mxu0 %v10167_v57  ;;  %v2776_v10 = vshll.u32 %v10083_v4, 16 }
 0x2d7   : > { %v2753_v0 = vsel %vm10005_vm8, %v2745_v11, %v2752_v18  ;;  %v3019_v7 = vsel %vm9995_vm7, %v2754_v37, %v3018_v50  ;;  %v2761_v1 = vor.u32 %v2759_v46, %v2758_v17  ;;  %v2762_v45 = vrot.slane %v2758_v17, 4  ;;  %v10189_v23 = vld [vmem:[#allocation2 + $0x44] ss:$0 sps:$4 sm:$0x11]   ;;  %7585 = vmatprep.subr.bf16.mxu1 %v8397_v9  ;;  %v3032_v17 = vld [vmem:[#allocation2 + $0x68] sm:$0x1] }
 0x2d8   : > { %3017 = vst [vmem:[#allocation2 + $0x4c] sm:$0xf] %v2753_v0  ;;  %3020 = vst [vmem:[#allocation2 + $0x50] sm:$0x1] %v3019_v7  ;;  %v2769_v30 = vor.u32 %v2767_v40, %v2766_v47  ;;  %v2771_v20 = vrot.slane %v2766_v47, 4  ;;  %v3361_v42 = vrot.slane %v3359_v14, 1 }
 0x2d9   : > { %v3366_v26 = vrot.slane %v3364_v55, 1  ;;  %v3557_v63 = vrot.slane %v10183_v38, 1  ;;  %v3022_v33 = vsel %vm10015_vm9, %v2761_v1, %v3021_v59  ;;  %v2773_v11 = vshrl.u32 %v10083_v4, 16  ;;  %v3028_v40 = vld [vmem:[#allocation2 + $0x60] sm:$0xf] }
 0x2da   : > { %v3558_v32 = vrot.slane %v10189_v23, 1  ;;  %v2770_v43 = vsel %vm10005_vm8, %v2762_v45, %v2769_v30  ;;  %3023 = vst [vmem:[#allocation2 + $0x54] sm:$0xf] %v3022_v33  ;;  %v3026_v24 = vsel %vm9995_vm7, %v2771_v20, %v3025_v35  ;;  %v3362_v21 = vor.u32 %v3361_v42, %v3357_v15  ;;  %7586 = vmatpush3.bf16.msra.mxu1 %v8397_v9  ;;  %v3035_v47 = vld [vmem:[#allocation2 + $0x6c] sm:$0xf]  ;;  %v8412_v30 = vld [vmem:[#allocation3 + $0x178] sm:$0xff]  }
 0x2db   : > { %3024 = vst [vmem:[#allocation2 + $0x58] sm:$0xf] %v2770_v43  ;;  %3027 = vst [vmem:[#allocation2 + $0x5c] sm:$0x1] %v3026_v24  ;;  %v2775_v50 = vrot.slane %v2773_v11, 7  ;;  %v2781_v46 = vshrl.u32 %v10089_v52, 16  ;;  %7587 = vmatprep.subr.bf16.mxu1 %v8402_v51 }
 0x2dc   : > { %v2784_v56 = vshll.u32 %v10089_v52, 16  ;;  %v2790_v4 = vshrl.u32 %v10094_v61, 16  ;;  %v10206_v18 = vsel %vm745_vm1, %v3557_v63, %v3558_v32  ;;  %v10209_v37 = vsel %vm510_vm0, %v3362_v21, %v3366_v26  ;;  %v3039_v9 = vld [vmem:[#allocation2 + $0x74] sm:$0x1] }
 0x2dd   : > { %v2793_v59 = vshll.u32 %v10094_v61, 16  ;;  %v2798_v35 = vshrl.u32 %v10099_v54, 16  ;;  %7554 = vmatmul.mubr.bf16.gmra.mrb[56].mxu1 %v10206_v18  ;;  %v2778_v52 = vor.u32 %v2776_v10, %v2775_v50  ;;  %v2779_v15 = vrot.slane %v2775_v50, 4  ;;  %3869 = vmatmul.mubr.bf16.gmra.mrb[188].mxu0 %v10113_v2 }
 0x2de   : > { %v2783_v14 = vrot.slane %v2781_v46, 7  ;;  %v2792_v55 = vrot.slane %v2790_v4, 7  ;;  %v2801_v7 = vshll.u32 %v10099_v54, 16  ;;  %v3369_v1 = vshrl.u32 %v10183_v38, 16  ;;  %7588 = vmatpush3.bf16.msra.mxu1 %v8402_v51  ;;  %3876 = vmatprep.mubr.bf16.mxu0 %v10209_v37 }
 0x2df   : > { %v2800_v0 = vrot.slane %v2798_v35, 7  ;;  %v3371_v45 = vshll.u32 %v10183_v38, 16  ;;  %v10217_v61 = vld [vmem:[#allocation2 + $0x48] sm:$0xff]   ;;  %v3029_v26 = vsel %vm10015_vm9, %v2778_v52, %v3028_v40  ;;  %v10222_v33 = vld [vmem:[#allocation2 + $0x50] ss:$0 sps:$4 sm:$0x11]   ;;  %7589 = vmatprep.subr.bf16.mxu1 %v8407_v44 }
 0x2e0   : > { %v2786_v20 = vor.u32 %v2784_v56, %v2783_v14  ;;  %v2788_v42 = vrot.slane %v2783_v14, 4  ;;  %v2795_v63 = vor.u32 %v2793_v59, %v2792_v55  ;;  %3030 = vst [vmem:[#allocation2 + $0x60] sm:$0xf] %v3029_v26  ;;  %v2796_v54 = vrot.slane %v2792_v55, 4 }
 0x2e1   : > { %v2803_v11 = vor.u32 %v2801_v7, %v2800_v0  ;;  %v2805_v10 = vrot.slane %v2800_v0, 4  ;;  %v3373_v32 = vrot.slane %v3371_v45, 1  ;;  %v3560_v43 = vrot.slane %v10217_v61, 1  ;;  %v3046_v45 = vld [vmem:[#allocation2 + $0x80] sm:$0x1] }
 0x2e2   : > { %v2787_v2 = vsel %vm10005_vm8, %v2779_v15, %v2786_v20  ;;  %v3033_v24 = vsel %vm9995_vm7, %v2788_v42, %v3032_v17  ;;  %v3036_v51 = vsel %vm10015_vm9, %v2795_v63, %v3035_v47  ;;  %v3561_v21 = vrot.slane %v10222_v33, 1  ;;  %v10233_v50 = vld [vmem:[#allocation2 + $0x54] sm:$0xff]   ;;  %v10242_v17 = vld [vmem:[#allocation2 + $0x5c] ss:$0 sps:$4 sm:$0x11]   ;;  %7590 = vmatpush3.bf16.msra.mxu1 %v8407_v44 }
 0x2e3   : > { %3031 = vst [vmem:[#allocation2 + $0x64] sm:$0xf] %v2787_v2  ;;  %3034 = vst [vmem:[#allocation2 + $0x68] sm:$0x1] %v3033_v24  ;;  %v2804_v46 = vsel %vm10005_vm8, %v2796_v54, %v2803_v11  ;;  %v3040_v56 = vsel %vm9995_vm7, %v2805_v10, %v3039_v9  ;;  %v11483_v40 = vmax.f32 %v9858_v12, 0.0  ;;  %v3374_v59 = vor.u32 %v3373_v32, %v3369_v1  ;;  %v8413_v9 = vld [vmem:[#allocation3 + $0x1c0] sm:$0xff]  }
 0x2e4   : > { %3037 = vst [vmem:[#allocation2 + $0x6c] sm:$0xf] %v3036_v51  ;;  %3038 = vst [vmem:[#allocation2 + $0x70] sm:$0xf] %v2804_v46  ;;  %v3376_v35 = vshll.u32 %v10189_v23, 16  ;;  %v2807_v47 = vshrl.u32 %v10152_v13, 16  ;;  %v10248_v15 = vsel %vm745_vm1, %v3560_v43, %v3561_v21  ;;  %7591 = vmatprep.subr.bf16.mxu1 %v8412_v30 }
 0x2e5   : > { %v6533_v4 = vpack.c.bf16 %v11483_v40, %v11483_v40  ;;  %3041 = vst [vmem:[#allocation2 + $0x74] sm:$0x1] %v3040_v56  ;;  %v2810_v52 = vshll.u32 %v10152_v13, 16  ;;  %v3563_v14 = vrot.slane %v10233_v50, 1  ;;  %v2815_v12 = vshrl.u32 %v10157_v31, 16  ;;  %7557 = vmatprep.mubr.bf16.mxu1 %v10248_v15  ;;  %3877 = vmatmul.mubr.bf16.gmra.mrb[192].mxu0 %v10145_v39 }
 0x2e6   : > { %v2818_v55 = vshll.u32 %v10157_v31, 16  ;;  %v3564_v23 = vrot.slane %v10242_v17, 1  ;;  %v3378_v0 = vrot.slane %v3376_v35, 1  ;;  %v2809_v7 = vrot.slane %v2807_v47, 7  ;;  %v3042_v1 = vld [vmem:[#allocation2 + $0x78] sm:$0xf]  ;;  %7592 = vmatpush3.bf16.msra.mxu1 %v8412_v30 }
 0x2e7   : > { %v2824_v13 = vshrl.u32 %v10162_v29, 16  ;;  %v2817_v44 = vrot.slane %v2815_v12, 7  ;;  %v2827_v20 = vshll.u32 %v10162_v29, 16  ;;  %v2832_v42 = vshrl.u32 %v6533_v4, 16  ;;  %v3049_v10 = vld [vmem:[#allocation2 + $0x84] sm:$0xf]  ;;  %7225 = vmatprep.subr.bf16.mxu1 %v8413_v9 }
 0x2e8   : > { %v2835_v26 = vshll.u32 %v6533_v4, 16  ;;  %v10258_v63 = vsel %vm745_vm1, %v3563_v14, %v3564_v23  ;;  %v10262_v31 = vsel %vm510_vm0, %v3374_v59, %v3378_v0  ;;  %v2812_v54 = vor.u32 %v2810_v52, %v2809_v7  ;;  %v3053_v51 = vld [vmem:[#allocation2 + $0x8c] sm:$0x1] }
 0x2e9   : > { %v2813_v11 = vrot.slane %v2809_v7, 4  ;;  %7558 = vmatmul.mubr.bf16.gmra.mrb[60].mxu1 %v10258_v63  ;;  %3884 = vmatprep.mubr.bf16.mxu0 %v10262_v31  ;;  %v2820_v32 = vor.u32 %v2818_v55, %v2817_v44  ;;  %v2822_v29 = vrot.slane %v2817_v44, 4  ;;  %v2826_v43 = vrot.slane %v2824_v13, 7 }
 0x2ea   : > { %v2834_v2 = vrot.slane %v2832_v42, 7  ;;  %v10266_v24 = vld [vmem:[#allocation2 + $0x60] sm:$0xff]   ;;  %v3043_v39 = vsel %vm10015_vm9, %v2812_v54, %v3042_v1  ;;  %v3381_v21 = vshrl.u32 %v10217_v61, 16  ;;  %v11484_v46 = vmax.f32 %v9863_v16, 0.0 }
 0x2eb   : > { %v11485_v56 = vmax.f32 %v9868_v60, 0.0  ;;  %v10277_v4 = vld [vmem:[#allocation2 + $0x68] ss:$0 sps:$4 sm:$0x11]   ;;  %v10279_v59 = vld [vmem:[#allocation2 + $0x6c] sm:$0xff]   ;;  %v2821_v35 = vsel %vm10005_vm8, %v2813_v11, %v2820_v32  ;;  %v3047_v47 = vsel %vm9995_vm7, %v2822_v29, %v3046_v45  ;;  %v2829_v52 = vor.u32 %v2827_v20, %v2826_v43 }
 0x2ec   : > { %v6534_v30 = vpack.c.bf16 %v11484_v46, %v11484_v46  ;;  %3044 = vst [vmem:[#allocation2 + $0x78] sm:$0xf] %v3043_v39  ;;  %v2837_v16 = vor.u32 %v2835_v26, %v2834_v2  ;;  %v3566_v14 = vrot.slane %v10266_v24, 1  ;;  %3045 = vst [vmem:[#allocation2 + $0x7c] sm:$0xf] %v2821_v35  ;;  %v2830_v60 = vrot.slane %v2826_v43, 4 }
 0x2ed   : > { %v6535_v40 = vpack.c.bf16 %v11485_v56, %v11485_v56  ;;  %3048 = vst [vmem:[#allocation2 + $0x80] sm:$0x1] %v3047_v47  ;;  %v11486_v12 = vmax.f32 %v9873_v27, 0.0  ;;  %v11487_v9 = vmax.f32 %v9878_v8, 0.0  ;;  %v3567_v0 = vrot.slane %v10277_v4, 1  ;;  %3885 = vmatmul.mubr.bf16.gmra.mrb[196].mxu0 %v10183_v38  ;;  %v8421_v47 = vld [vmem:[#allocation3 + $0x100] sm:$0xff]  }
 0x2ee   : > { %v10295_v7 = vld [vmem:[#allocation2 + $0x74] ss:$0 sps:$4 sm:$0x11]   ;;  %v3569_v1 = vrot.slane %v10279_v59, 1  ;;  %v2839_v13 = vrot.slane %v2834_v2, 4  ;;  %v3050_v44 = vsel %vm10015_vm9, %v2829_v52, %v3049_v10  ;;  %v2838_v27 = vsel %vm10005_vm8, %v2830_v60, %v2837_v16  ;;  %7089 = vmatprep.subr.bf16.mxu0 %v8421_v47 }
 0x2ef   : > { %v6536_v55 = vpack.c.bf16 %v11486_v12, %v11486_v12  ;;  %v10292_v23 = vpack.c.bf16 %v11487_v9, %v11487_v9  ;;  %3051 = vst [vmem:[#allocation2 + $0x84] sm:$0xf] %v3050_v44  ;;  %v3383_v45 = vshll.u32 %v10217_v61, 16  ;;  %v3388_v8 = vshll.u32 %v10222_v33, 16  ;;  %3052 = vst [vmem:[#allocation2 + $0x88] sm:$0xf] %v2838_v27 }
 0x2f0   : > { %v2841_v20 = vshrl.u32 %v6534_v30, 16  ;;  %v10305_v42 = vsel %vm745_vm1, %v3566_v14, %v3567_v0  ;;  %v3570_v26 = vrot.slane %v10295_v7, 1  ;;  %v3054_v54 = vsel %vm9995_vm7, %v2839_v13, %v3053_v51  ;;  %v3056_v43 = vld [vmem:[#allocation2 + $0x90] sm:$0xf]  ;;  %v3060_v46 = vld [vmem:[#allocation2 + $0x98] sm:$0x1] }
 0x2f1   : > { %v2844_v11 = vshll.u32 %v6534_v30, 16  ;;  %7561 = vmatprep.mubr.bf16.mxu1 %v10305_v42  ;;  %3055 = vst [vmem:[#allocation2 + $0x8c] sm:$0x1] %v3054_v54  ;;  %v3385_v10 = vrot.slane %v3383_v45, 1  ;;  %v3390_v32 = vrot.slane %v3388_v8, 1  ;;  %v2849_v33 = vshrl.u32 %v6535_v40, 16 }
 0x2f2   : > { %v2843_v29 = vrot.slane %v2841_v20, 7  ;;  %v10313_v2 = vsel %vm745_vm1, %v3569_v1, %v3570_v26  ;;  %v2852_v39 = vshll.u32 %v6535_v40, 16  ;;  %v2858_v56 = vshrl.u32 %v6536_v55, 16  ;;  %v3063_v16 = vld [vmem:[#allocation2 + $0x9c] sm:$0xf] }
 0x2f3   : > { %v2861_v35 = vshll.u32 %v6536_v55, 16  ;;  %7562 = vmatmul.mubr.bf16.gmra.mrb[64].mxu1 %v10313_v2  ;;  %v3386_v51 = vor.u32 %v3385_v10, %v3381_v21  ;;  %v2851_v38 = vrot.slane %v2849_v33, 7  ;;  %v10316_v14 = vld [vmem:[#allocation2 + $0x78] sm:$0xff]   ;;  %v11488_v12 = vmax.f32 %v9883_v5, 0.0  ;;  %v3067_v10 = vld [vmem:[#allocation2 + $0xa4] sm:$0x1] }
 0x2f4   : > { %v2846_v30 = vor.u32 %v2844_v11, %v2843_v29  ;;  %v2847_v52 = vrot.slane %v2843_v29, 4  ;;  %v2860_v60 = vrot.slane %v2858_v56, 7  ;;  %v11489_v40 = vmax.f32 %v9888_v36, 0.0  ;;  %v10328_v0 = vld [vmem:[#allocation2 + $0x80] ss:$0 sps:$4 sm:$0x11]  }
 0x2f5   : > { %v10321_v9 = vpack.c.bf16 %v11488_v12, %v11488_v12  ;;  %v10331_v21 = vsel %vm510_vm0, %v3386_v51, %v3390_v32  ;;  %v2854_v1 = vor.u32 %v2852_v39, %v2851_v38  ;;  %v2856_v13 = vrot.slane %v2851_v38, 4  ;;  %v8423_v32 = vld [vmem:[#allocation3 + $0xc0] sm:$0xff]  }
 0x2f6   : > { %v10326_v55 = vpack.c.bf16 %v11489_v40, %v11489_v40  ;;  %v3057_v44 = vsel %vm10015_vm9, %v2846_v30, %v3056_v43  ;;  %v3572_v5 = vrot.slane %v10316_v14, 1  ;;  %3892 = vmatprep.mubr.bf16.mxu0 %v10331_v21  ;;  %v2863_v36 = vor.u32 %v2861_v35, %v2860_v60  ;;  %v10339_v20 = vld [vmem:[#allocation2 + $0x84] sm:$0xff]   ;;  %7090 = vmatpush3.bf16.msra.mxu0 %v8423_v32 }
 0x2f7   : > { %3058 = vst [vmem:[#allocation2 + $0x90] sm:$0xf] %v3057_v44  ;;  %v2864_v27 = vrot.slane %v2860_v60, 4  ;;  %v2866_v45 = vshrl.u32 %v10292_v23, 16  ;;  %v3573_v8 = vrot.slane %v10328_v0, 1  ;;  %v2855_v26 = vsel %vm10005_vm8, %v2847_v52, %v2854_v1  ;;  %3893 = vmatmul.mubr.bf16.gmra.mrb[200].mxu0 %v10217_v61 }
 0x2f8   : > { %v3061_v54 = vsel %vm9995_vm7, %v2856_v13, %v3060_v46  ;;  %v2869_v11 = vshll.u32 %v10292_v23, 16  ;;  %v10346_v29 = vld [vmem:[#allocation2 + $0x8c] ss:$0 sps:$4 sm:$0x11]   ;;  %3059 = vst [vmem:[#allocation2 + $0x94] sm:$0xf] %v2855_v26  ;;  %v3064_v43 = vsel %vm10015_vm9, %v2863_v36, %v3063_v16 }
 0x2f9   : > { %3062 = vst [vmem:[#allocation2 + $0x98] sm:$0x1] %v3061_v54  ;;  %v2868_v33 = vrot.slane %v2866_v45, 7  ;;  %v11490_v39 = vmax.f32 %v9893_v22, 0.0  ;;  %v11491_v35 = vmax.f32 %v9898_v62, 0.0  ;;  %v10361_v23 = vsel %vm745_vm1, %v3572_v5, %v3573_v8  ;;  %v8425_v16 = vld [vmem:[#allocation3 + $0x108] sm:$0xff]  }
 0x2fa   : > { %v3575_v47 = vrot.slane %v10339_v20, 1  ;;  %3065 = vst [vmem:[#allocation2 + $0x9c] sm:$0xf] %v3064_v43  ;;  %v3393_v51 = vshrl.u32 %v10233_v50, 16  ;;  %v3395_v22 = vshll.u32 %v10233_v50, 16  ;;  %7565 = vmatprep.mubr.bf16.mxu1 %v10361_v23  ;;  %v3576_v30 = vrot.slane %v10346_v29, 1  ;;  %7091 = vmatprep.subr.bf16.mxu0 %v8425_v16 }
 0x2fb   : > { %v10353_v56 = vpack.c.bf16 %v11490_v39, %v11490_v39  ;;  %v10358_v46 = vpack.c.bf16 %v11491_v35, %v11491_v35  ;;  %v2871_v62 = vor.u32 %v2869_v11, %v2868_v33  ;;  %v2873_v52 = vrot.slane %v2868_v33, 4  ;;  %v8426_v36 = vld [vmem:[#allocation3 + $0xc8] sm:$0xff]   ;;  %v3074_v54 = vld [vmem:[#allocation2 + $0xb0] sm:$0x1]  ;;  %v8427_v11 = vld [vmem:[#allocation3 + $0x110] sm:$0xff]  }
 0x2fc   : > { %v3400_v38 = vshll.u32 %v10242_v17, 16  ;;  %v3397_v60 = vrot.slane %v3395_v22, 1  ;;  %v2875_v12 = vshrl.u32 %v10321_v9, 16  ;;  %v2878_v61 = vshll.u32 %v10321_v9, 16  ;;  %v3070_v17 = vld [vmem:[#allocation2 + $0xa8] sm:$0xf]  ;;  %7092 = vmatpush3.bf16.msra.mxu0 %v8426_v36 }
 0x2fd   : > { %v2883_v40 = vshrl.u32 %v10326_v55, 16  ;;  %v10374_v1 = vsel %vm745_vm1, %v3575_v47, %v3576_v30  ;;  %v2872_v13 = vsel %vm10005_vm8, %v2864_v27, %v2871_v62  ;;  %v3068_v44 = vsel %vm9995_vm7, %v2873_v52, %v3067_v10  ;;  %7093 = vmatprep.subr.bf16.mxu0 %v8427_v11 }
 0x2fe   : > { %v3402_v5 = vrot.slane %v3400_v38, 1  ;;  %7566 = vmatmul.mubr.bf16.gmra.mrb[68].mxu1 %v10374_v1  ;;  %3066 = vst [vmem:[#allocation2 + $0xa0] sm:$0xf] %v2872_v13  ;;  %3069 = vst [vmem:[#allocation2 + $0xa4] sm:$0x1] %v3068_v44  ;;  %v3398_v9 = vor.u32 %v3397_v60, %v3393_v51  ;;  %v2877_v45 = vrot.slane %v2875_v12, 7 }
 0x2ff   : > { %v2885_v8 = vrot.slane %v2883_v40, 7  ;;  %v2886_v26 = vshll.u32 %v10326_v55, 16  ;;  %v2892_v27 = vshrl.u32 %v10353_v56, 16  ;;  %v2895_v32 = vshll.u32 %v10353_v56, 16  ;;  %v10386_v43 = vld [vmem:[#allocation2 + $0x90] sm:$0xff]  }
 0x300   : > { %v2900_v10 = vshrl.u32 %v10358_v46, 16  ;;  %v2903_v33 = vshll.u32 %v10358_v46, 16  ;;  %v10389_v39 = vsel %vm510_vm0, %v3398_v9, %v3402_v5  ;;  %v2880_v35 = vor.u32 %v2878_v61, %v2877_v45  ;;  %v10391_v55 = vld [vmem:[#allocation2 + $0x98] ss:$0 sps:$4 sm:$0x11]  }
 0x301   : > { %v2881_v47 = vrot.slane %v2877_v45, 4  ;;  %v2888_v51 = vor.u32 %v2886_v26, %v2885_v8  ;;  %3900 = vmatprep.mubr.bf16.mxu0 %v10389_v39  ;;  %v2890_v22 = vrot.slane %v2885_v8, 4  ;;  %v3077_v56 = vld [vmem:[#allocation2 + $0xb4] sm:$0xf]  ;;  %v3578_v30 = vrot.slane %v10386_v43, 1 }
 0x302   : > { %v3071_v62 = vsel %vm10015_vm9, %v2880_v35, %v3070_v17  ;;  %3901 = vmatmul.mubr.bf16.gmra.mrb[204].mxu0 %v10233_v50  ;;  %v2894_v52 = vrot.slane %v2892_v27, 7  ;;  %v3081_v38 = vld [vmem:[#allocation2 + $0xbc] sm:$0x1]  ;;  %v3579_v16 = vrot.slane %v10391_v55, 1  ;;  %v2902_v12 = vrot.slane %v2900_v10, 7  ;;  %v8429_v50 = vld [vmem:[#allocation3 + $0xd0] sm:$0xff]  }
 0x303   : > { %v2889_v46 = vsel %vm10005_vm8, %v2881_v47, %v2888_v51  ;;  %3072 = vst [vmem:[#allocation2 + $0xa8] sm:$0xf] %v3071_v62  ;;  %v3075_v60 = vsel %vm9995_vm7, %v2890_v22, %v3074_v54  ;;  %v3405_v61 = vshrl.u32 %v10266_v24, 16  ;;  %v3407_v44 = vshll.u32 %v10266_v24, 16  ;;  %7094 = vmatpush3.bf16.msra.mxu0 %v8429_v50 }
 0x304   : > { %3073 = vst [vmem:[#allocation2 + $0xac] sm:$0xf] %v2889_v46  ;;  %3076 = vst [vmem:[#allocation2 + $0xb0] sm:$0x1] %v3075_v60  ;;  %v2897_v40 = vor.u32 %v2895_v32, %v2894_v52  ;;  %v2898_v13 = vrot.slane %v2894_v52, 4  ;;  %v3412_v5 = vshll.u32 %v10277_v4, 16  ;;  %v10407_v17 = vsel %vm745_vm1, %v3578_v30, %v3579_v16 }
 0x305   : > { %v10409_v36 = vld [vmem:[#allocation2 + $0x9c] sm:$0xff]   ;;  %v2905_v9 = vor.u32 %v2903_v33, %v2902_v12  ;;  %v2907_v45 = vrot.slane %v2902_v12, 4  ;;  %7569 = vmatprep.mubr.bf16.mxu1 %v10407_v17  ;;  %v10412_v8 = vld [vmem:[#allocation2 + $0xa4] ss:$0 sps:$4 sm:$0x11]   ;;  %v3409_v54 = vrot.slane %v3407_v44, 1 }
 0x306   : > { %v3078_v26 = vsel %vm10015_vm9, %v2897_v40, %v3077_v56  ;;  %v3414_v11 = vrot.slane %v3412_v5, 1  ;;  %v3417_v27 = vshrl.u32 %v10279_v59, 16  ;;  %v3581_v4 = vrot.slane %v10409_v36, 1 }
 0x307   : > { %v2906_v32 = vsel %vm10005_vm8, %v2898_v13, %v2905_v9  ;;  %3079 = vst [vmem:[#allocation2 + $0xb4] sm:$0xf] %v3078_v26  ;;  %v3082_v10 = vsel %vm9995_vm7, %v2907_v45, %v3081_v38  ;;  %v3419_v33 = vshll.u32 %v10279_v59, 16  ;;  %v3582_v35 = vrot.slane %v10412_v8, 1 }
 0x308   : > { %3080 = vst [vmem:[#allocation2 + $0xb8] sm:$0xf] %v2906_v32  ;;  %3083 = vst [vmem:[#allocation2 + $0xbc] sm:$0x1] %v3082_v10  ;;  %v3410_v47 = vor.u32 %v3409_v54, %v3405_v61  ;;  %v3424_v51 = vshll.u32 %v10295_v7, 16  ;;  %v3429_v56 = vshrl.u32 %v10316_v14, 16 }
 0x309   : > { %v3421_v22 = vrot.slane %v3419_v33, 1  ;;  %v3431_v30 = vshll.u32 %v10316_v14, 16  ;;  %v3436_v46 = vshll.u32 %v10328_v0, 16  ;;  %v10429_v62 = vsel %vm745_vm1, %v3581_v4, %v3582_v35  ;;  %v8431_v33 = vld [vmem:[#allocation3 + $0x118] sm:$0xff]  }
 0x30a   : > { %v10434_v38 = vsel %vm510_vm0, %v3410_v47, %v3414_v11  ;;  %v3426_v16 = vrot.slane %v3424_v51, 1  ;;  %7570 = vmatmul.mubr.bf16.gmra.mrb[72].mxu1 %v10429_v62  ;;  %v3443_v13 = vshll.u32 %v10339_v20, 16  ;;  %v3448_v50 = vshll.u32 %v10346_v29, 16  ;;  %7095 = vmatprep.subr.bf16.mxu0 %v8431_v33  ;;  %v8414_v47 = vld [vmem:[#allocation3 + $0x180] sm:$0xff]   ;;  %v8419_v33 = vld [vmem:[#allocation3 + $0x1d8] sm:$0xff]  }
 0x30b   : > { %v10431_v52 = vld [vmem:[#allocation2 + $0xa8] sm:$0xff]   ;;  %v10437_v60 = vld [vmem:[#allocation2 + $0xb0] ss:$0 sps:$4 sm:$0x11]   ;;  %3908 = vmatprep.mubr.bf16.mxu0 %v10434_v38  ;;  %v3422_v7 = vor.u32 %v3421_v22, %v3417_v27  ;;  %v3433_v12 = vrot.slane %v3431_v30, 1  ;;  %v3438_v5 = vrot.slane %v3436_v46, 1 }
 0x30c   : > { %v3584_v61 = vrot.slane %v10431_v52, 1  ;;  %3909 = vmatmul.mubr.bf16.gmra.mrb[208].mxu0 %v10266_v24  ;;  %v3585_v0 = vrot.slane %v10437_v60, 1  ;;  %v3441_v26 = vshrl.u32 %v10339_v20, 16  ;;  %v3445_v11 = vrot.slane %v3443_v13, 1  ;;  %v8433_v46 = vld [vmem:[#allocation3 + $0x120] sm:$0xff]  }
 0x30d   : > { %v10444_v40 = vsel %vm510_vm0, %v3422_v7, %v3426_v16  ;;  %v3434_v44 = vor.u32 %v3433_v12, %v3429_v56  ;;  %v3450_v29 = vrot.slane %v3448_v50, 1  ;;  %v3455_v10 = vshll.u32 %v10386_v43, 16  ;;  %v8432_v56 = vld [vmem:[#allocation3 + $0xd8] sm:$0xff]   ;;  %v8415_v16 = vld [vmem:[#allocation3 + $0x1c8] sm:$0xff]   ;;  %v8435_v13 = vld [vmem:[#allocation3 + $0xe0] sm:$0xff]  }
 0x30e   : > { %3916 = vmatprep.mubr.bf16.mxu0 %v10444_v40  ;;  %v10450_v9 = vsel %vm745_vm1, %v3584_v61, %v3585_v0  ;;  %v3446_v35 = vor.u32 %v3445_v11, %v3441_v26  ;;  %v3453_v51 = vshrl.u32 %v10386_v43, 16  ;;  %v3460_v22 = vshll.u32 %v10391_v55, 16  ;;  %7096 = vmatpush3.bf16.msra.mxu0 %v8432_v56  ;;  %v8416_v12 = vld [vmem:[#allocation3 + $0x188] sm:$0xff]   ;;  %v8417_v55 = vld [vmem:[#allocation3 + $0x1d0] sm:$0xff]  }
 0x30f   : > { %v10452_v45 = vld [vmem:[#allocation2 + $0xb4] sm:$0xff]   ;;  %7573 = vmatprep.mubr.bf16.mxu1 %v10450_v9  ;;  %v10455_v24 = vld [vmem:[#allocation2 + $0xbc] ss:$0 sps:$4 sm:$0x11]   ;;  %v10461_v4 = vsel %vm510_vm0, %v3434_v44, %v3438_v5  ;;  %v3467_v7 = vshll.u32 %v10409_v36, 16  ;;  %7097 = vmatprep.subr.bf16.mxu0 %v8433_v46  ;;  %v3465_v0 = vshrl.u32 %v10409_v36, 16 }
 0x310   : > { %v3587_v54 = vrot.slane %v10452_v45, 1  ;;  %v3588_v27 = vrot.slane %v10455_v24, 1  ;;  %v10474_v30 = vsel %vm510_vm0, %v3446_v35, %v3450_v29  ;;  %v11493_v44 = vmax.f32 %v9908_v48, 0.0  ;;  %v8437_v11 = vld [vmem:[#allocation3 + $0x128] sm:$0xff]   ;;  %v8439_v35 = vld [vmem:[#allocation3 + $0x130] sm:$0xff]  }
 0x311   : > { %v3462_v26 = vrot.slane %v3460_v22, 1  ;;  %v8438_v29 = vld [vmem:[#allocation3 + $0xe8] sm:$0xff]  }
 0x312   : > { %v10464_v32 = vsel %vm745_vm1, %v3587_v54, %v3588_v27  ;;  %v6543_v5 = vpack.c.bf16 %v11493_v44, %v11493_v44  ;;  %v3469_v54 = vrot.slane %v3467_v7, 1  ;;  %7098 = vmatpush3.bf16.msra.mxu0 %v8435_v13  ;;  %v8418_v27 = vld [vmem:[#allocation3 + $0x190] sm:$0xff]   ;;  %v3479_v13 = vshll.u32 %v10431_v52, 16 }
 0x313   : > { %7574 = vmatmul.mubr.bf16.gmra.mrb[76].mxu1 %v10464_v32  ;;  %7099 = vmatprep.subr.bf16.mxu0 %v8437_v11  ;;  %v8443_v7 = vld [vmem:[#allocation3 + $0xf0] sm:$0xff]  }
 0x314   : > { %3917 = vmatmul.mubr.bf16.gmra.mrb[212].mxu0 %v10279_v59  ;;  %7593 = vmatprep.mubr.bf16.mxu1 %v10111_v41  ;;  %v3457_v59 = vrot.slane %v3455_v10, 1  ;;  %v11492_v41 = vmax.f32 %v9903_v34, 0.0  ;;  %v3472_v34 = vshll.u32 %v10412_v8, 16  ;;  %v2917_v56 = vshrl.u32 %v6543_v5, 16 }
 0x315   : > { %3924 = vmatprep.mubr.bf16.mxu0 %v10461_v4  ;;  %v2920_v46 = vshll.u32 %v6543_v5, 16  ;;  %v3481_v25 = vrot.slane %v3479_v13, 1  ;;  %v8447_v13 = vld [vmem:[#allocation3 + $0x200] sm:$0xff]  }
 0x316   : > { %v6542_v61 = vpack.c.bf16 %v11492_v41, %v11492_v41  ;;  %v3458_v50 = vor.u32 %v3457_v59, %v3453_v51  ;;  %v3474_v22 = vrot.slane %v3472_v34, 1  ;;  %v3088_v59 = vld [vmem:[#allocation2 + $0xc8] sm:$0x1]  ;;  %7100 = vmatpush3.bf16.msra.mxu0 %v8438_v29  ;;  %v8420_v41 = vld [vmem:[#allocation3 + $0x198] sm:$0xff]  }
 0x317   : > { %7101 = vmatprep.subr.bf16.mxu0 %v8439_v35  ;;  %v3484_v35 = vshll.u32 %v10437_v60, 16  ;;  %v3491_v60 = vshll.u32 %v10452_v45, 16 }
 0x318   : > { %v2909_v10 = vshrl.u32 %v6542_v61, 16  ;;  %v2912_v48 = vshll.u32 %v6542_v61, 16  ;;  %v10490_v51 = vsel %vm510_vm0, %v3458_v50, %v3462_v26  ;;  %v8445_v26 = vld [vmem:[#allocation3 + $0x138] sm:$0xff]  }
 0x31a   : > { %v2911_v8 = vrot.slane %v2909_v10, 7  ;;  %7102 = vmatpush3.bf16.msra.mxu0 %v8443_v7  ;;  %v8446_v10 = vld [vmem:[#allocation3 + $0xf8] sm:$0xff]  }
 0x31b   : > { %7594 = vmatmul.mubr.bf16.vlgmr.msra.gmra.mrb[48].mxu1 %v10125_v19  ;;  %7103 = vmatprep.subr.bf16.mxu0 %v8445_v26  ;;  %v8442_v7 = vld [vmem:[#allocation3 + $0x1f8] sm:$0xff]  }
 0x31c   : > { %3925 = vmatmul.mubr.bf16.gmra.mrb[216].mxu0 %v10316_v14  ;;  %7226 = vmatpush3.bf16.msra.mxu1 %v8414_v47  ;;  %v3084_v47 = vld [vmem:[#allocation2 + $0xc0] sm:$0xf]  ;;  %v2914_v61 = vor.u32 %v2912_v48, %v2911_v8  ;;  %v2915_v44 = vrot.slane %v2911_v8, 4  ;;  %v3496_v48 = vshll.u32 %v10455_v24, 16  ;;  %v3493_v8 = vrot.slane %v3491_v60, 1  ;;  %v8444_v24 = vld [vmem:[#allocation3 + $0x1b8] sm:$0xff]  }
 0x31d   : > { %3932 = vmatprep.mubr.bf16.mxu0 %v10474_v30  ;;  %7597 = vmatprep.mubr.bf16.mxu1 %v10135_v3 }
 0x31e   : > { %7227 = vmatprep.subr.bf16.mxu1 %v8415_v16  ;;  %v2919_v16 = vrot.slane %v2917_v56, 7  ;;  %v3085_v34 = vsel %vm10015_vm9, %v2914_v61, %v3084_v47  ;;  %7104 = vmatpush3.bf16.msra.mxu0 %v8446_v10  ;;  %v3489_v47 = vshrl.u32 %v10452_v45, 16  ;;  %v8450_v10 = vld [vmem:[#allocation3 + $0x218] sm:$0xff]  }
 0x31f   : > { %3086 = vst [vmem:[#allocation2 + $0xc0] sm:$0xf] %v3085_v34  ;;  %v8448_v34 = vld [vmem:[#allocation3 + $0x208] sm:$0xff]  }
 0x320   : > { %7228 = vmatpush3.bf16.msra.mxu1 %v8416_v12  ;;  %v8422_v12 = vld [vmem:[#allocation3 + $0x1e0] sm:$0xff]   ;;  %v2922_v5 = vor.u32 %v2920_v46, %v2919_v16  ;;  %v2924_v50 = vrot.slane %v2919_v16, 4  ;;  %v8434_v46 = vld [vmem:[#allocation3 + $0x1f0] sm:$0xff]   ;;  %v3498_v16 = vrot.slane %v3496_v48, 1 }
 0x321   : > { %7229 = vmatprep.subr.bf16.mxu1 %v8417_v55  ;;  %v3470_v55 = vor.u32 %v3469_v54, %v3465_v0  ;;  %v3477_v0 = vshrl.u32 %v10431_v52, 16  ;;  %v8428_v54 = vld [vmem:[#allocation3 + $0x1e8] sm:$0xff]  }
 0x322   : > { %v2923_v11 = vsel %vm10005_vm8, %v2915_v44, %v2922_v5  ;;  %v3089_v29 = vsel %vm9995_vm7, %v2924_v50, %v3088_v59  ;;  %v8465_v5 = vld [vmem:[#allocation2 + $0xc] sm:$0xff]  }
 0x323   : > { %7598 = vmatmul.mubr.bf16.gmra.mrb[52].mxu1 %v10177_v49  ;;  %3087 = vst [vmem:[#allocation2 + $0xc4] sm:$0xf] %v2923_v11  ;;  %3090 = vst [vmem:[#allocation2 + $0xc8] sm:$0x1] %v3089_v29  ;;  %v10505_v58 = vsel %vm510_vm0, %v3470_v55, %v3474_v22  ;;  %v3482_v56 = vor.u32 %v3481_v25, %v3477_v0  ;;  %v8436_v22 = vld [vmem:[#allocation3 + $0x1b0] sm:$0xff]   ;;  %v8466_v55 = vld [vmem:[#allocation2 + $0x18] sm:$0xff]  }
 0x324   : > { %3933 = vmatmul.mubr.bf16.gmra.mrb[220].mxu0 %v10339_v20  ;;  %7601 = vmatprep.mubr.bf16.mxu1 %v10206_v18  ;;  %v8467_v11 = vld [vmem:[#allocation2 + $0x24] sm:$0xff]   ;;  %v8469_v0 = vld [vmem:[#allocation2 + $0x3c] sm:$0xff]   ;;  %v8454_v25 = vld [vmem:[#allocation3 + $0x238] sm:$0xff]  }
 0x325   : > { %3940 = vmatprep.mubr.bf16.mxu0 %v10490_v51  ;;  %7230 = vmatpush3.bf16.msra.mxu1 %v8418_v27  ;;  %v8424_v27 = vld [vmem:[#allocation3 + $0x1a0] sm:$0xff]   ;;  %v8449_v29 = vld [vmem:[#allocation3 + $0x210] sm:$0xff]  }
 0x326   : > { %7231 = vmatprep.subr.bf16.mxu1 %v8419_v33  ;;  %v3486_v33 = vrot.slane %v3484_v35, 1  ;;  %v8468_v35 = vld [vmem:[#allocation2 + $0x30] sm:$0xff]  }
 0x328   : > { %v10516_v59 = vsel %vm510_vm0, %v3482_v56, %v3486_v33 }
 0x329   : > { %7232 = vmatpush3.bf16.msra.mxu1 %v8420_v41  ;;  %v3494_v41 = vor.u32 %v3493_v8, %v3489_v47 }
 0x32a   : > { %7233 = vmatprep.subr.bf16.mxu1 %v8422_v12  ;;  %v10533_v44 = vld [vmem:[#allocation2 + $0xc0] sm:$0xff]   ;;  %v10535_v12 = vld [vmem:[#allocation2 + $0xc8] ss:$0 sps:$4 sm:$0x11]  }
 0x32b   : > { %7602 = vmatmul.mubr.bf16.gmra.mrb[56].mxu1 %v10248_v15  ;;  %v10523_v61 = vsel %vm510_vm0, %v3494_v41, %v3498_v16  ;;  %v3590_v50 = vrot.slane %v10533_v44, 1  ;;  %v3591_v26 = vrot.slane %v10535_v12, 1  ;;  %v3503_v16 = vshll.u32 %v10533_v44, 16 }
 0x32c   : > { %3941 = vmatmul.mubr.bf16.gmra.mrb[224].mxu0 %v10386_v43  ;;  %7605 = vmatprep.mubr.bf16.mxu1 %v10258_v63  ;;  %v3501_v41 = vshrl.u32 %v10533_v44, 16 }
 0x32d   : > { %3948 = vmatprep.mubr.bf16.mxu0 %v10505_v58  ;;  %7234 = vmatpush3.bf16.msra.mxu1 %v8424_v27  ;;  %v8452_v27 = vld [vmem:[#allocation3 + $0x228] sm:$0xff]  }
 0x32e   : > { %7235 = vmatprep.subr.bf16.mxu1 %v8428_v54  ;;  %v10559_v54 = vld [vmem:[%s11293_s5] sm:$0xff]  }
 0x331   : > { %7236 = vmatpush3.bf16.msra.mxu1 %v8430_v28  ;;  %v8472_v28 = vld [vmem:[#allocation2 + $0x60] sm:$0xff]  }
 0x332   : > { %7237 = vmatprep.subr.bf16.mxu1 %v8434_v46 }
 0x333   : > { %7606 = vmatmul.mubr.bf16.gmra.mrb[60].mxu1 %v10305_v42 }
 0x334   : > { %3949 = vmatmul.mubr.bf16.gmra.mrb[228].mxu0 %v10409_v36  ;;  %7609 = vmatprep.mubr.bf16.mxu1 %v10313_v2 }
 0x335   : > { %3956 = vmatprep.mubr.bf16.mxu0 %v10516_v59  ;;  %7238 = vmatpush3.bf16.msra.mxu1 %v8436_v22 }
 0x336   : > { %7239 = vmatprep.subr.bf16.mxu1 %v8442_v7 }
 0x339   : > { %7240 = vmatpush3.bf16.msra.mxu1 %v8444_v24 }
 0x33a   : > { %7625 = vmatprep.subr.bf16.mxu1 %v8447_v13 }
 0x33b   : > { %7610 = vmatmul.mubr.bf16.gmra.mrb[64].mxu1 %v10361_v23 }
 0x33c   : > { %3957 = vmatmul.mubr.bf16.gmra.mrb[232].mxu0 %v10431_v52  ;;  %7613 = vmatprep.mubr.bf16.mxu1 %v10374_v1 }
 0x33d   : > { %3964 = vmatprep.mubr.bf16.mxu0 %v10523_v61 }
 0x343   : > { %7614 = vmatmul.mubr.bf16.gmra.mrb[68].mxu1 %v10407_v17 }
 0x344   : > { %3965 = vmatmul.mubr.bf16.gmra.mrb[236].mxu0 %v10452_v45  ;;  %7617 = vmatprep.mubr.bf16.mxu1 %v10429_v62 }
 0x345   : > { %4391 = vmatprep.mubr.bf16.mxu0 %v10129_v53  ;;  %v10543_v53 = vsel %vm745_vm1, %v3590_v50, %v3591_v26 }
 0x34b   : > { %7618 = vmatmul.mubr.bf16.gmra.mrb[72].mxu1 %v10450_v9 }
 0x34c   : > { %4392 = vmatmul.mubr.bf16.vlgmr.msra.gmra.mrb[240].mxu0 %v8465_v5  ;;  %7621 = vmatprep.mubr.bf16.mxu1 %v10464_v32 }
 0x34d   : > { %4399 = vmatprep.mubr.bf16.mxu0 %v10143_v6 }
 0x353   : > { %7622 = vmatmul.mubr.bf16.gmra.mrb[76].mxu1 %v10543_v53 }
 0x354   : > { %4400 = vmatmul.mubr.bf16.gmra.mrb[244].mxu0 %v8466_v55  ;;  %4938 = vmatprep.mubr.bf16.mxu1 %v10143_v6  ;;  %v8451_v6 = vld [vmem:[#allocation3 + $0x220] sm:$0xff]  }
 0x355   : > { %4407 = vmatprep.mubr.bf16.mxu0 %v10167_v57 }
 0x35b   : > { %4939 = vmatmul.mubr.bf16.vlgmr.msra.gmra.mrb[80].mxu1 %v8466_v55 }
 0x35c   : > { %4408 = vmatmul.mubr.bf16.gmra.mrb[248].mxu0 %v8467_v11  ;;  %7626 = vmatpush3.bf16.msra.mxu1 %v8447_v13  ;;  %v3505_v13 = vrot.slane %v3503_v16, 1 }
 0x35d   : > { %4415 = vmatprep.mubr.bf16.mxu0 %v10209_v37  ;;  %4946 = vmatprep.mubr.bf16.mxu1 %v10167_v57  ;;  %v8453_v57 = vld [vmem:[#allocation3 + $0x230] sm:$0xff]  }
 0x35e   : > { %7627 = vmatprep.subr.bf16.mxu1 %v8448_v34  ;;  %v3506_v55 = vor.u32 %v3505_v13, %v3501_v41 }
 0x360   : > { %7628 = vmatpush3.bf16.msra.mxu1 %v8448_v34 }
 0x361   : > { %7629 = vmatprep.subr.bf16.mxu1 %v8449_v29 }
 0x363   : > { %4947 = vmatmul.mubr.bf16.gmra.mrb[84].mxu1 %v8467_v11 }
 0x364   : > { %4416 = vmatmul.mubr.bf16.gmra.mrb[252].mxu0 %v8468_v35  ;;  %4954 = vmatprep.mubr.bf16.mxu1 %v10209_v37  ;;  %v8470_v37 = vld [vmem:[#allocation2 + $0x48] sm:$0xff]  }
 0x365   : > { %4423 = vmatprep.mubr.bf16.mxu0 %v10262_v31  ;;  %7630 = vmatpush3.bf16.msra.mxu1 %v8449_v29 }
 0x366   : > { %7631 = vmatprep.subr.bf16.mxu1 %v8450_v10 }
 0x369   : > { %7632 = vmatpush3.bf16.msra.mxu1 %v8450_v10  ;;  %v10606_v10 = vld [vmem:[#allocation2 + $0xcc] sm:$0xff]  }
 0x36a   : > { %7633 = vmatprep.subr.bf16.mxu1 %v8451_v6 }
 0x36b   : > { %4955 = vmatmul.mubr.bf16.gmra.mrb[88].mxu1 %v8468_v35  ;;  %v10612_v35 = vld [vmem:[#allocation2 + $0xd4] ss:$0 sps:$4 sm:$0x11]  }
 0x36c   : > { %4424 = vmatmul.mubr.bf16.gmra.mrb[0].mxu0 %v8469_v0  ;;  %4962 = vmatprep.mubr.bf16.mxu1 %v10262_v31  ;;  %v8471_v31 = vld [vmem:[#allocation2 + $0x54] sm:$0xff]  }
 0x36d   : > { %4431 = vmatprep.mubr.bf16.mxu0 %v10331_v21  ;;  %7634 = vmatpush3.bf16.msra.mxu1 %v8451_v6  ;;  %v3515_v6 = vshll.u32 %v10606_v10, 16 }
 0x36e   : > { %7635 = vmatprep.subr.bf16.mxu1 %v8452_v27 }
 0x371   : > { %7636 = vmatpush3.bf16.msra.mxu1 %v8452_v27 }
 0x372   : > { %7637 = vmatprep.subr.bf16.mxu1 %v8453_v57 }
 0x373   : > { %4963 = vmatmul.mubr.bf16.gmra.mrb[92].mxu1 %v8469_v0 }
 0x374   : > { %4432 = vmatmul.mubr.bf16.gmra.mrb[4].mxu0 %v8470_v37  ;;  %4970 = vmatprep.mubr.bf16.mxu1 %v10331_v21  ;;  %v8473_v21 = vld [vmem:[#allocation2 + $0x6c] sm:$0xff]  }
 0x375   : > { %4439 = vmatprep.mubr.bf16.mxu0 %v10389_v39  ;;  %7638 = vmatpush3.bf16.msra.mxu1 %v8453_v57 }
 0x376   : > { %7639 = vmatprep.subr.bf16.mxu1 %v8454_v25 }
 0x379   : > { %7640 = vmatpush3.bf16.msra.mxu1 %v8454_v25 }
 0x37a   : > { %7673 = vmatprep.subr.bf16.mxu1 %v10559_v54 }
 0x37b   : > { %4971 = vmatmul.mubr.bf16.gmra.mrb[96].mxu1 %v8470_v37  ;;  %v3513_v37 = vshrl.u32 %v10606_v10, 16 }
 0x37c   : > { %4440 = vmatmul.mubr.bf16.gmra.mrb[8].mxu0 %v8471_v31  ;;  %4978 = vmatprep.mubr.bf16.mxu1 %v10389_v39 }
 0x37d   : > { %4447 = vmatprep.mubr.bf16.mxu0 %v10434_v38 }
 0x383   : > { %4979 = vmatmul.mubr.bf16.gmra.mrb[100].mxu1 %v8471_v31  ;;  %v3517_v31 = vrot.slane %v3515_v6, 1 }
 0x384   : > { %4448 = vmatmul.mubr.bf16.gmra.mrb[12].mxu0 %v8472_v28  ;;  %4986 = vmatprep.mubr.bf16.mxu1 %v10434_v38 }
 0x385   : > { %4455 = vmatprep.mubr.bf16.mxu0 %v10444_v40 }
 0x38b   : > { %4987 = vmatmul.mubr.bf16.gmra.mrb[104].mxu1 %v8472_v28 }
 0x38c   : > { %4456 = vmatmul.mubr.bf16.gmra.mrb[16].mxu0 %v8473_v21  ;;  %4994 = vmatprep.mubr.bf16.mxu1 %v10444_v40 }
 0x38d   : > { %4463 = vmatprep.mubr.bf16.mxu0 %v10461_v4 }
 0x393   : > { %4995 = vmatmul.mubr.bf16.gmra.mrb[108].mxu1 %v8473_v21  ;;  %v3518_v21 = vor.u32 %v3517_v31, %v3513_v37 }
 0x394   : > { %4464 = vmatmul.mubr.bf16.gmra.mrb[20].mxu0 %v10316_v14  ;;  %5002 = vmatprep.mubr.bf16.mxu1 %v10461_v4 }
 0x395   : > { %4471 = vmatprep.mubr.bf16.mxu0 %v10474_v30 }
 0x396   : > { %v6969_v39 = vpop.f32.mrb[176].mxu0 }
 0x397   : > { %v6970_v33 = vpop.f32.mrb[177].mxu0 }
 0x398   : > { %v10571_v60 = vadd.f32 %v6970_v33, %v6969_v39  ;;  %v6972_v48 = vpop.f32.mrb[178].mxu0 }
 0x399   : > { %v6973_v38 = vpop.f32.mrb[179].mxu0 }
 0x39a   : > { %v10576_v40 = vadd.f32 %v6973_v38, %v6972_v48 }
 0x39b   : > { %5003 = vmatmul.mubr.bf16.gmra.mrb[112].mxu1 %v10316_v14 }
 0x39c   : > { %4472 = vmatmul.mubr.bf16.gmra.mrb[24].mxu0 %v10339_v20  ;;  %5010 = vmatprep.mubr.bf16.mxu1 %v10474_v30 }
 0x39d   : > { %4479 = vmatprep.mubr.bf16.mxu0 %v10490_v51 }
 0x3a0   : > { %v6975_v4 = vpop.f32.mrb[180].mxu0 }
 0x3a1   : > { %v6976_v56 = vpop.f32.mrb[181].mxu0 }
 0x3a2   : > { %v10583_v46 = vadd.f32 %v6976_v56, %v6975_v4  ;;  %v6978_v47 = vpop.f32.mrb[182].mxu0 }
 0x3a3   : > { %5011 = vmatmul.mubr.bf16.gmra.mrb[116].mxu1 %v10339_v20  ;;  %v6979_v14 = vpop.f32.mrb[183].mxu0 }
 0x3a4   : > { %4480 = vmatmul.mubr.bf16.gmra.mrb[28].mxu0 %v10386_v43  ;;  %5018 = vmatprep.mubr.bf16.mxu1 %v10490_v51  ;;  %v10585_v22 = vadd.f32 %v6979_v14, %v6978_v47 }
 0x3a5   : > { %4487 = vmatprep.mubr.bf16.mxu0 %v10505_v58 }
 0x3a8   : > { %v6981_v30 = vpop.f32.mrb[184].mxu0 }
 0x3a9   : > { %v6982_v20 = vpop.f32.mrb[185].mxu0 }
 0x3aa   : > { %v10591_v8 = vadd.f32 %v6982_v20, %v6981_v30  ;;  %v6984_v51 = vpop.f32.mrb[186].mxu0 }
 0x3ab   : > { %5019 = vmatmul.mubr.bf16.gmra.mrb[120].mxu1 %v10386_v43  ;;  %v6985_v7 = vpop.f32.mrb[187].mxu0  ;;  %v3508_v43 = vshll.u32 %v10535_v12, 16 }
 0x3ac   : > { %4488 = vmatmul.mubr.bf16.gmra.mrb[32].mxu0 %v10409_v36  ;;  %5026 = vmatprep.mubr.bf16.mxu1 %v10505_v58  ;;  %v10594_v24 = vadd.f32 %v6985_v7, %v6984_v51 }
 0x3ad   : > { %4495 = vmatprep.mubr.bf16.mxu0 %v10516_v59  ;;  %v3510_v34 = vrot.slane %v3508_v43, 1 }
 0x3af   : > { %v3511_v12 = vsel %vm510_vm0, %v3506_v55, %v3510_v34 }
 0x3b0   : > { %v6987_v58 = vpop.f32.mrb[188].mxu0 }
 0x3b1   : > { %v6988_v5 = vpop.f32.mrb[189].mxu0 }
 0x3b2   : > { %v10602_v50 = vadd.f32 %v6988_v5, %v6987_v58  ;;  %v6990_v26 = vpop.f32.mrb[190].mxu0  ;;  %v8458_v58 = vld [vmem:[%s11293_s5 + $0x8] sm:$0xff]  }
 0x3b3   : > { %5027 = vmatmul.mubr.bf16.gmra.mrb[124].mxu1 %v10409_v36  ;;  %v6991_v11 = vpop.f32.mrb[191].mxu0 }
 0x3b4   : > { %4496 = vmatmul.mubr.bf16.gmra.mrb[36].mxu0 %v10431_v52  ;;  %5034 = vmatprep.mubr.bf16.mxu1 %v10516_v59  ;;  %v10604_v29 = vadd.f32 %v6991_v11, %v6990_v26 }
 0x3b5   : > { %4503 = vmatprep.mubr.bf16.mxu0 %v10523_v61 }
 0x3b8   : > { %v6993_v36 = vpop.f32.mrb[192].mxu0 }
 0x3b9   : > { %v6994_v59 = vpop.f32.mrb[193].mxu0 }
 0x3ba   : > { %v10615_v27 = vadd.f32 %v6994_v59, %v6993_v36  ;;  %v6996_v0 = vpop.f32.mrb[194].mxu0 }
 0x3bb   : > { %5035 = vmatmul.mubr.bf16.gmra.mrb[128].mxu1 %v10431_v52  ;;  %v6997_v57 = vpop.f32.mrb[195].mxu0  ;;  %v3520_v52 = vshll.u32 %v10612_v35, 16 }
 0x3bc   : > { %4504 = vmatmul.mubr.bf16.gmra.mrb[40].mxu0 %v10452_v45  ;;  %5042 = vmatprep.mubr.bf16.mxu1 %v10523_v61  ;;  %v10617_v25 = vadd.f32 %v6997_v57, %v6996_v0 }
 0x3bd   : > { %4511 = vmatprep.mubr.bf16.mxu0 %v3511_v12  ;;  %v3522_v39 = vrot.slane %v3520_v52, 1  ;;  %v11495_v52 = vld [vmem:[#allocation10_spill] sm:$0xff] }
 0x3bf   : > { %v3523_v56 = vsel %vm510_vm0, %v3518_v21, %v3522_v39  ;;  %v11496_v21 = vld [vmem:[#allocation12_spill] sm:$0xff] }
 0x3c0   : > { %v6999_v61 = vpop.f32.mrb[196].mxu0  ;;  %v5288_v39 = vshrl.u32 %v11496_v21, 16 }
 0x3c1   : > { %v7000_v28 = vpop.f32.mrb[197].mxu0 }
 0x3c2   : > { %v10623_v33 = vadd.f32 %v7000_v28, %v6999_v61  ;;  %v7002_v48 = vpop.f32.mrb[198].mxu0  ;;  %v5273_v61 = vshll.u32 %v11495_v52, 16  ;;  %v5277_v28 = vshrl.u32 %v11495_v52, 16 }
 0x3c3   : > { %5043 = vmatmul.mubr.bf16.gmra.mrb[132].mxu1 %v10452_v45  ;;  %v7003_v38 = vpop.f32.mrb[199].mxu0 }
 0x3c4   : > { %4512 = vmatmul.mubr.bf16.gmra.mrb[44].mxu0 %v10533_v44  ;;  %5050 = vmatprep.mubr.bf16.mxu1 %v3511_v12  ;;  %v10625_v4 = vadd.f32 %v7003_v38, %v7002_v48  ;;  %v5291_v48 = vshll.u32 %v11496_v21, 16 }
 0x3ca   : > { %v7005_v47 = vpop.f32.mrb[200].mxu0 }
 0x3cb   : > { %5051 = vmatmul.mubr.bf16.gmra.mrb[136].mxu1 %v10533_v44  ;;  %v7006_v14 = vpop.f32.mrb[201].mxu0 }
 0x3cc   : > { %5058 = vmatprep.mubr.bf16.mxu1 %v3523_v56  ;;  %v10629_v30 = vadd.f32 %v7006_v14, %v7005_v47  ;;  %v7008_v45 = vpop.f32.mrb[202].mxu0  ;;  %v11497_v56 = vld [vmem:[#allocation13_spill] sm:$0xff] }
 0x3cd   : > { %v7009_v20 = vpop.f32.mrb[203].mxu0  ;;  %v5297_v47 = vshll.u32 %v11497_v56, 16  ;;  %v5301_v14 = vshrl.u32 %v11497_v56, 16 }
 0x3ce   : > { %v10631_v51 = vadd.f32 %v7009_v20, %v7008_v45 }
 0x3d3   : > { %5059 = vmatmul.mubr.bf16.gmra.mrb[140].mxu1 %v10606_v10 }
 0x3d4   : > { %7641 = vmatprep.mubr.bf16.mxu1 %v10125_v19  ;;  %v8459_v19 = vld [vmem:[%s11293_s5 + $0x10] sm:$0xff]  }
 0x3d5   : > { %v7011_v16 = vpop.f32.mrb[204].mxu0 }
 0x3d6   : > { %v7012_v7 = vpop.f32.mrb[205].mxu0 }
 0x3d7   : > { %v10635_v41 = vadd.f32 %v7012_v7, %v7011_v16  ;;  %v7014_v13 = vpop.f32.mrb[206].mxu0 }
 0x3d8   : > { %v7015_v43 = vpop.f32.mrb[207].mxu0 }
 0x3d9   : > { %v10637_v44 = vadd.f32 %v7015_v43, %v7014_v13  ;;  %v5275_v43 = vrot.slane %v5273_v61, 5 }
 0x3db   : > { %7642 = vmatmul.mubr.bf16.vlgmr.msra.gmra.mrb[48].mxu1 %v10135_v3  ;;  %v8460_v3 = vld [vmem:[%s11293_s5 + $0x18] sm:$0xff]  }
 0x3dc   : > { %7674 = vmatpush3.bf16.msra.mxu1 %v10559_v54  ;;  %7645 = vmatprep.mubr.bf16.mxu1 %v10177_v49  ;;  %v8461_v49 = vld [vmem:[%s11293_s5 + $0x20] sm:$0xff]  }
 0x3dd   : > { %7675 = vmatprep.subr.bf16.mxu1 %v8458_v58 }
 0x3df   : > { %v7017_v5 = vpop.f32.mrb[208].mxu0 }
 0x3e0   : > { %v7018_v26 = vpop.f32.mrb[209].mxu0  ;;  %7676 = vmatpush3.bf16.msra.mxu1 %v8458_v58  ;;  %v5279_v58 = vrot.slane %v5277_v28, 4 }
 0x3e1   : > { %v10648_v55 = vadd.f32 %v7018_v26, %v7017_v5  ;;  %v7020_v34 = vpop.f32.mrb[210].mxu0  ;;  %7677 = vmatprep.subr.bf16.mxu1 %v8459_v19  ;;  %v5293_v5 = vrot.slane %v5291_v48, 5  ;;  %v8464_v26 = vld [vmem:[%s11293_s5 + $0x38] sm:$0xff]  }
 0x3e2   : > { %v7021_v11 = vpop.f32.mrb[211].mxu0 }
 0x3e3   : > { %v10653_v54 = vadd.f32 %v7021_v11, %v7020_v34  ;;  %7646 = vmatmul.mubr.bf16.gmra.mrb[52].mxu1 %v10206_v18  ;;  %v8462_v18 = vld [vmem:[%s11293_s5 + $0x28] sm:$0xff]   ;;  %v5299_v11 = vrot.slane %v5297_v47, 5 }
 0x3e4   : > { %7649 = vmatprep.mubr.bf16.mxu1 %v10248_v15  ;;  %7678 = vmatpush3.bf16.msra.mxu1 %v8459_v19  ;;  %v11494_v15 = vld [vmem:[#allocation9_spill] sm:$0xff]  ;;  %v5290_v19 = vrot.slane %v5288_v39, 4 }
 0x3e5   : > { %7679 = vmatprep.subr.bf16.mxu1 %v8460_v3  ;;  %v5264_v37 = vshrl.u32 %v11494_v15, 16  ;;  %v5267_v31 = vshll.u32 %v11494_v15, 16 }
 0x3e7   : > { %v7023_v12 = vpop.f32.mrb[212].mxu0  ;;  %v5266_v16 = vrot.slane %v5264_v37, 4  ;;  %v5269_v7 = vrot.slane %v5267_v31, 5  ;;  %v11499_v37 = vld [vmem:[#allocation14_spill] sm:$0xff] }
 0x3e8   : > { %v7024_v36 = vpop.f32.mrb[213].mxu0  ;;  %7680 = vmatpush3.bf16.msra.mxu1 %v8460_v3  ;;  %v5303_v3 = vrot.slane %v5301_v14, 4  ;;  %v5307_v31 = vshll.u32 %v11499_v37, 16  ;;  %v11504_v14 = vld [vmem:[#allocation15_spill] sm:$0xff] }
 0x3e9   : > { %v10660_v59 = vadd.f32 %v7024_v36, %v7023_v12  ;;  %v7026_v6 = vpop.f32.mrb[214].mxu0  ;;  %7681 = vmatprep.subr.bf16.mxu1 %v8461_v49  ;;  %v5280_v12 = vor.u32 %v5279_v58, %v5275_v43  ;;  %v11498_v36 = vld [vmem:[#allocation11_spill] sm:$0xff]  ;;  %v3593_v58 = vrot.slane %v10606_v10, 1 }
 0x3ea   : > { %v7027_v0 = vpop.f32.mrb[215].mxu0  ;;  %v5304_v15 = vor.u32 %v5303_v3, %v5299_v11  ;;  %v5309_v56 = vrot.slane %v5307_v31, 5  ;;  %v11508_v37 = vld [vmem:[#allocation19_spill] sm:$0xff] }
 0x3eb   : > { %v10665_v57 = vadd.f32 %v7027_v0, %v7026_v6  ;;  %7650 = vmatmul.mubr.bf16.gmra.mrb[56].mxu1 %v10258_v63  ;;  %v8463_v63 = vld [vmem:[%s11293_s5 + $0x30] sm:$0xff]   ;;  %v5283_v6 = vshll.u32 %v11498_v36, 16  ;;  %v5294_v0 = vor.u32 %v5293_v5, %v5290_v19  ;;  %v3594_v19 = vrot.slane %v10612_v35, 1  ;;  %v11506_v35 = vld [vmem:[#allocation18_spill] sm:$0xff] }
 0x3ec   : > { %7653 = vmatprep.mubr.bf16.mxu1 %v10305_v42  ;;  %7682 = vmatpush3.bf16.msra.mxu1 %v8461_v49  ;;  %v5270_v49 = vor.u32 %v5269_v7, %v5266_v16  ;;  %v11505_v16 = vld [vmem:[#allocation16_spill] sm:$0xff]  ;;  %v5345_v31 = vshll.u32 %v11508_v37, 16 }
 0x3ed   : > { %7683 = vmatprep.subr.bf16.mxu1 %v8462_v18  ;;  %v5285_v21 = vrot.slane %v5283_v6, 5  ;;  %v5295_v39 = vrot.slane %v5294_v0, 4  ;;  %v5321_v7 = vshll.u32 %v11505_v16, 16  ;;  %v5336_v0 = vshrl.u32 %v11506_v35, 16 }
 0x3ef   : > { %v7029_v38 = vpop.f32.mrb[216].mxu0  ;;  %v5300_v3 = vsel %vm10693_vm12, %v5295_v39, %v5299_v11  ;;  %v10715_v6 = vrot.slane %v5321_v7, 5  ;;  %v5349_v11 = vshrl.u32 %v11508_v37, 16 }
 0x3f0   : > { %v7030_v42 = vpop.f32.mrb[217].mxu0  ;;  %7684 = vmatpush3.bf16.msra.mxu1 %v8462_v18 }
 0x3f1   : > { %v10680_v45 = vadd.f32 %v7030_v42, %v7029_v38  ;;  %v7032_v20 = vpop.f32.mrb[218].mxu0  ;;  %7685 = vmatprep.subr.bf16.mxu1 %v8463_v63  ;;  %v5305_v38 = vrot.slane %v5304_v15, 4  ;;  %v5312_v42 = vshrl.u32 %v11504_v14, 16  ;;  %v5339_v15 = vshll.u32 %v11506_v35, 16 }
 0x3f2   : > { %v7033_v13 = vpop.f32.mrb[219].mxu0  ;;  %v5351_v7 = vrot.slane %v5349_v11, 4  ;;  %v11516_v11 = vld [vmem:[#allocation20_spill] sm:$0xff] }
 0x3f3   : > { %v10685_v34 = vadd.f32 %v7033_v13, %v7032_v20  ;;  %7654 = vmatmul.mubr.bf16.gmra.mrb[60].mxu1 %v10313_v2  ;;  %v5271_v2 = vrot.slane %v5270_v49, 4  ;;  %v5315_v20 = vshll.u32 %v11504_v14, 16  ;;  %v5325_v13 = vshrl.u32 %v11505_v16, 16 }
 0x3f4   : > { %7657 = vmatprep.mubr.bf16.mxu1 %v10361_v23  ;;  %7686 = vmatpush3.bf16.msra.mxu1 %v8463_v63  ;;  %v5281_v23 = vrot.slane %v5280_v12, 4  ;;  %v5310_v49 = vsel %vm10693_vm12, %v5305_v38, %v5309_v56  ;;  %v11510_v56 = vld [vmem:[#allocation17_spill] sm:$0xff]  ;;  %v10740_v16 = vrot.slane %v5345_v31, 5 }
 0x3f5   : > { %7687 = vmatprep.subr.bf16.mxu1 %v8464_v26  ;;  %v5276_v5 = vsel %vm10693_vm12, %v5271_v2, %v5275_v43  ;;  %v5327_v10 = vrot.slane %v5325_v13, 4  ;;  %v10735_v39 = vcombine.low %v5300_v3, %v5310_v49  ;;  %v5331_v14 = vshll.u32 %v11510_v56, 16  ;;  %v11511_v13 = vld [vmem:[#allocation21_spill] sm:$0xff] }
 0x3f7   : > { %v7035_v18 = vpop.f32.mrb[220].mxu0  ;;  %v5328_v38 = vor.u32 %v5327_v10, %v10715_v6 }
 0x3f8   : > { %v7036_v52 = vpop.f32.mrb[221].mxu0  ;;  %7688 = vmatpush3.bf16.msra.mxu1 %v8464_v26  ;;  %v5286_v26 = vsel %vm10693_vm12, %v5281_v23, %v5285_v21  ;;  %v10733_v21 = vld [vmem:[%s11292_s4] ss:$0 sm:$0xff] }
 0x3f9   : > { %v10691_v61 = vadd.f32 %v7036_v52, %v7035_v18  ;;  %v7038_v28 = vpop.f32.mrb[222].mxu0  ;;  %v10726_v2 = vcombine.low %v5276_v5, %v5286_v26  ;;  %v11512_v5 = vld [vmem:[#allocation22_spill] sm:$0xff]  ;;  %v10749_v49 = vadd.f32 %v10571_v60, %v10733_v21  ;;  %v5329_v35 = vrot.slane %v5328_v38, 4 }
 0x3fa   : > { %v7039_v48 = vpop.f32.mrb[223].mxu0  ;;  %v5369_v26 = vshll.u32 %v11512_v5, 16  ;;  %v5373_v3 = vshrl.u32 %v11512_v5, 16  ;;  %v5352_v60 = vor.u32 %v5351_v7, %v10740_v16  ;;  %v11519_v7 = vld [vmem:[#allocation28_spill] sm:$0xff] }
 0x3fb   : > { %11500 = vst [vmem:[#allocation65_spill] sm:$0xff] %v10691_v61  ;;  %v10697_v47 = vadd.f32 %v7039_v48, %v7038_v28  ;;  %7658 = vmatmul.mubr.bf16.gmra.mrb[64].mxu1 %v10374_v1  ;;  %v5314_v1 = vrot.slane %v5312_v42, 4  ;;  %v10724_v28 = vsel %vm745_vm1, %v3593_v58, %v3594_v19  ;;  %v5338_v42 = vrot.slane %v5336_v0, 4 }
 0x3fc   : > { %7661 = vmatprep.mubr.bf16.mxu1 %v10407_v17  ;;  %v5317_v17 = vrot.slane %v5315_v20, 5  ;;  %v5341_v20 = vrot.slane %v5339_v15, 5  ;;  %v5360_v58 = vshrl.u32 %v11511_v13, 16  ;;  %v5363_v19 = vshll.u32 %v11511_v13, 16 }
 0x3fd   : > { %11503 = vst [vmem:[#allocation57_spill] sm:$0xff] %v10697_v47  ;;  %v5333_v0 = vrot.slane %v5331_v14, 5 }
 0x3fe   : > { %v5318_v48 = vor.u32 %v5317_v17, %v5314_v1  ;;  %v11514_v17 = vld [vmem:[#allocation25_spill] sm:$0xff]  ;;  %v5342_v31 = vor.u32 %v5341_v20, %v5338_v42  ;;  %v5362_v5 = vrot.slane %v5360_v58, 4  ;;  %v10772_v58 = vadd.f32 %v10576_v40, %v10733_v21 }
 0x3ff   : > { %v7041_v12 = vpop.f32.mrb[224].mxu0  ;;  %v5393_v10 = vshll.u32 %v11514_v17, 16  ;;  %v5397_v15 = vshrl.u32 %v11514_v17, 16  ;;  %v11518_v17 = vld [vmem:[#allocation27_spill] sm:$0xff]  ;;  %v5334_v40 = vsel %vm10693_vm12, %v5329_v35, %v5333_v0 }
 0x400   : > { %v7042_v36 = vpop.f32.mrb[225].mxu0  ;;  %v5408_v42 = vshrl.u32 %v11518_v17, 16  ;;  %v5411_v20 = vshll.u32 %v11518_v17, 16  ;;  %v11521_v17 = vld [vmem:[#allocation26_spill] sm:$0xff] }
 0x401   : > { %v10718_v18 = vadd.f32 %v7042_v36, %v7041_v12  ;;  %v7044_v43 = vpop.f32.mrb[226].mxu0  ;;  %v11513_v12 = vld [vmem:[#allocation24_spill] sm:$0xff]  ;;  %v10765_v47 = vrot.slane %v5393_v10, 5 }
 0x402   : > { %v7045_v52 = vpop.f32.mrb[227].mxu0  ;;  %v5384_v1 = vshrl.u32 %v11513_v12, 16  ;;  %v5387_v36 = vshll.u32 %v11513_v12, 16  ;;  %v5365_v12 = vrot.slane %v5363_v19, 5 }
 0x403   : > { %11507 = vst [vmem:[#allocation67_spill] sm:$0xff] %v10718_v18  ;;  %v10728_v23 = vadd.f32 %v7045_v52, %v7044_v43  ;;  %7662 = vmatmul.mubr.bf16.gmra.mrb[68].mxu1 %v10429_v62  ;;  %v5355_v52 = vshll.u32 %v11516_v11, 16 }
 0x404   : > { %7665 = vmatprep.mubr.bf16.mxu1 %v10450_v9  ;;  %v10754_v9 = vrot.slane %v5318_v48, 4  ;;  %v5375_v48 = vrot.slane %v5373_v3, 4  ;;  %v5386_v38 = vrot.slane %v5384_v1, 4  ;;  %v5389_v14 = vrot.slane %v5387_v36, 5 }
 0x405   : > { %11509 = vst [vmem:[#allocation58_spill] sm:$0xff] %v10728_v23  ;;  %v10761_v23 = vrot.slane %v5369_v26, 5  ;;  %v5357_v26 = vrot.slane %v5355_v52, 5  ;;  %v5421_v3 = vshrl.u32 %v11519_v7, 16  ;;  %v5343_v1 = vrot.slane %v5342_v31, 4 }
 0x406   : > { %v5324_v19 = vsel %vm10693_vm12, %v10754_v9, %v10715_v6  ;;  %v5353_v36 = vrot.slane %v5352_v60, 4  ;;  %v5366_v10 = vor.u32 %v5365_v12, %v5362_v5  ;;  %v5410_v52 = vrot.slane %v5408_v42, 4  ;;  %v11523_v12 = vld [vmem:[#allocation30_spill] sm:$0xff] }
 0x407   : > { %v7047_v62 = vpop.f32.mrb[228].mxu0  ;;  %v5423_v5 = vrot.slane %v5421_v3, 4  ;;  %v5435_v35 = vshll.u32 %v11523_v12, 16  ;;  %v5348_v0 = vsel %vm10693_vm12, %v5343_v1, %v10740_v16  ;;  %v6485_v16 = vcombine.low %v5324_v19, %v5334_v40 }
 0x408   : > { %v7048_v43 = vpop.f32.mrb[229].mxu0 }
 0x409   : > { %v10757_v37 = vadd.f32 %v7048_v43, %v7047_v62  ;;  %v7050_v56 = vpop.f32.mrb[230].mxu0  ;;  %v5399_v62 = vrot.slane %v5397_v15, 4  ;;  %v5417_v43 = vshll.u32 %v11519_v7, 16  ;;  %v11520_v15 = vld [vmem:[#allocation23_spill] sm:$0xff]  ;;  %v5413_v7 = vrot.slane %v5411_v20, 5 }
 0x40a   : > { %v7051_v13 = vpop.f32.mrb[231].mxu0  ;;  %v5379_v11 = vshll.u32 %v11520_v15, 16  ;;  %v5432_v15 = vshrl.u32 %v11523_v12, 16  ;;  %v11526_v12 = vld [vmem:[#allocation31_spill] sm:$0xff] }
 0x40b   : > { %11515 = vst [vmem:[#allocation69_spill] sm:$0xff] %v10757_v37  ;;  %v10763_v18 = vadd.f32 %v7051_v13, %v7050_v56  ;;  %7666 = vmatmul.mubr.bf16.gmra.mrb[72].mxu1 %v10464_v32  ;;  %v5376_v32 = vor.u32 %v5375_v48, %v10761_v23  ;;  %v5390_v13 = vor.u32 %v5389_v14, %v5386_v38  ;;  %v5367_v14 = vrot.slane %v5366_v10, 4 }
 0x40c   : > { %7669 = vmatprep.mubr.bf16.mxu1 %v10543_v53  ;;  %v5400_v9 = vor.u32 %v5399_v62, %v10765_v47  ;;  %v10787_v53 = vrot.slane %v5417_v43, 5  ;;  %v5358_v48 = vsel %vm10693_vm12, %v5353_v36, %v5357_v26  ;;  %v5381_v62 = vrot.slane %v5379_v11, 5 }
 0x40d   : > { %11517 = vst [vmem:[#allocation59_spill] sm:$0xff] %v10763_v18  ;;  %v5403_v18 = vshll.u32 %v11521_v17, 16  ;;  %v5377_v20 = vrot.slane %v5376_v32, 4  ;;  %v5391_v43 = vrot.slane %v5390_v13, 4  ;;  %v5414_v17 = vor.u32 %v5413_v7, %v5410_v52 }
 0x40e   : > { %v5401_v3 = vrot.slane %v5400_v9, 4  ;;  %v5441_v37 = vshll.u32 %v11526_v12, 16  ;;  %v5424_v1 = vor.u32 %v5423_v5, %v10787_v53  ;;  %v5434_v26 = vrot.slane %v5432_v15, 4 }
 0x40f   : > { %v7053_v56 = vpop.f32.mrb[232].mxu0  ;;  %v5437_v36 = vrot.slane %v5435_v35, 5  ;;  %v10805_v10 = vcombine.low %v5348_v0, %v5358_v48  ;;  %v5445_v11 = vshrl.u32 %v11526_v12, 16  ;;  %v10812_v9 = vadd.f32 %v10583_v46, %v10733_v21  ;;  %v11529_v48 = vld [vmem:[#allocation32_spill] sm:$0xff] }
 0x410   : > { %v7054_v6 = vpop.f32.mrb[233].mxu0  ;;  %v5372_v19 = vsel %vm10693_vm12, %v5367_v14, %v10761_v23  ;;  %v5396_v40 = vsel %vm10693_vm12, %v5391_v43, %v10765_v47  ;;  %v10824_v46 = vrot.slane %v5441_v37, 5  ;;  %v5425_v0 = vrot.slane %v5424_v1, 4  ;;  %v11530_v47 = vld [vmem:[#allocation34_spill] sm:$0xff] }
 0x411   : > { %v10789_v31 = vadd.f32 %v7054_v6, %v7053_v56  ;;  %v7056_v60 = vpop.f32.mrb[234].mxu0  ;;  %v5405_v56 = vrot.slane %v5403_v18, 5  ;;  %v11525_v6 = vld [vmem:[#allocation29_spill] sm:$0xff]  ;;  %v5438_v23 = vor.u32 %v5437_v36, %v5434_v26  ;;  %v5465_v43 = vshll.u32 %v11530_v47, 16 }
 0x412   : > { %v7057_v38 = vpop.f32.mrb[235].mxu0  ;;  %v11527_v18 = vld [vmem:[#allocation33_spill] sm:$0xff] }
 0x413   : > { %11522 = vst [vmem:[#allocation66_spill] sm:$0xff] %v10789_v31  ;;  %v10798_v42 = vadd.f32 %v7057_v38, %v7056_v60  ;;  %v5427_v31 = vshll.u32 %v11525_v6, 16  ;;  %7670 = vmatmul.mubr.bf16.gmra.mrb[76].mxu1 %v10724_v28  ;;  %v5456_v32 = vshrl.u32 %v11527_v18, 16  ;;  %v5459_v13 = vshll.u32 %v11527_v18, 16  ;;  %v11533_v26 = vld [vmem:[#allocation37_spill] sm:$0xff] }
 0x414   : > { %7689 = vmatprep.mubr.bf16.mxu1 %v10726_v2  ;;  %v5382_v2 = vsel %vm10693_vm12, %v5377_v20, %v5381_v62  ;;  %v5406_v7 = vsel %vm10693_vm12, %v5401_v3, %v5405_v56  ;;  %v5415_v60 = vrot.slane %v5414_v17, 4  ;;  %v5451_v38 = vshll.u32 %v11529_v48, 16 }
 0x415   : > { %11524 = vst [vmem:[#allocation60_spill] sm:$0xff] %v10798_v42  ;;  %v5429_v5 = vrot.slane %v5427_v31, 5  ;;  %v5447_v62 = vrot.slane %v5445_v11, 4  ;;  %v5458_v20 = vrot.slane %v5456_v32, 4  ;;  %v5461_v6 = vrot.slane %v5459_v13, 5  ;;  %v11532_v31 = vld [vmem:[#allocation36_spill] sm:$0xff] }
 0x416   : > { %v5469_v56 = vshrl.u32 %v11530_v47, 16  ;;  %v5480_v37 = vshrl.u32 %v11532_v31, 16  ;;  %v5483_v3 = vshll.u32 %v11532_v31, 16  ;;  %v10837_v17 = vadd.f32 %v10585_v22, %v10733_v21  ;;  %v11535_v47 = vld [vmem:[#allocation35_spill] sm:$0xff] }
 0x417   : > { %v7059_v28 = vpop.f32.mrb[236].mxu0  ;;  %v6487_v1 = vcombine.low %v5372_v19, %v5382_v2  ;;  %v5489_v36 = vshll.u32 %v11533_v26, 16  ;;  %v5493_v11 = vshrl.u32 %v11533_v26, 16  ;;  %v10843_v18 = vadd.f32 %v10591_v8, %v10733_v21 }
 0x418   : > { %v7060_v52 = vpop.f32.mrb[237].mxu0  ;;  %v10846_v32 = vcombine.low %v5396_v40, %v5406_v7  ;;  %v5420_v13 = vsel %vm10693_vm12, %v5415_v60, %v10787_v53  ;;  %v5430_v22 = vsel %vm10693_vm12, %v5425_v0, %v5429_v5  ;;  %v10855_v19 = vrot.slane %v5438_v23, 4  ;;  %v11534_v60 = vld [vmem:[#allocation39_spill] sm:$0xff] }
 0x419   : > { %v10826_v15 = vadd.f32 %v7060_v52, %v7059_v28  ;;  %v7062_v35 = vpop.f32.mrb[238].mxu0  ;;  %v10851_v28 = vrot.slane %v5451_v38, 5  ;;  %v5448_v2 = vor.u32 %v5447_v62, %v10824_v46  ;;  %v5462_v8 = vor.u32 %v5461_v6, %v5458_v20  ;;  %v11536_v20 = vld [vmem:[#allocation40_spill] sm:$0xff] }
 0x41a   : > { %v7063_v14 = vpop.f32.mrb[239].mxu0  ;;  %v5482_v40 = vrot.slane %v5480_v37, 4  ;;  %v5485_v7 = vrot.slane %v5483_v3, 5  ;;  %v5495_v53 = vrot.slane %v5493_v11, 4  ;;  %v5507_v38 = vshll.u32 %v11534_v60, 16 }
 0x41b   : > { %11528 = vst [vmem:[#allocation68_spill] sm:$0xff] %v10826_v15  ;;  %v10830_v12 = vadd.f32 %v7063_v14, %v7062_v35  ;;  %7690 = vmatmul.mubr.bf16.vlgmr.msra.gmra.mrb[48].mxu1 %v10735_v39  ;;  %v10858_v35 = vrot.slane %v5465_v43, 5  ;;  %v5471_v39 = vrot.slane %v5469_v56, 4  ;;  %v10860_v14 = vrot.slane %v5489_v36, 5 }
 0x41c   : > { %7693 = vmatprep.mubr.bf16.mxu1 %v6485_v16  ;;  %v5504_v16 = vshrl.u32 %v11534_v60, 16  ;;  %v6489_v23 = vcombine.low %v5420_v13, %v5430_v22  ;;  %v5475_v62 = vshll.u32 %v11535_v47, 16  ;;  %v5513_v6 = vshll.u32 %v11536_v20, 16 }
 0x41d   : > { %11531 = vst [vmem:[#allocation61_spill] sm:$0xff] %v10830_v12  ;;  %v10870_v31 = vrot.slane %v5448_v2, 4  ;;  %v10872_v37 = vrot.slane %v5462_v8, 4  ;;  %v5517_v3 = vshrl.u32 %v11536_v20, 16  ;;  %v5472_v11 = vor.u32 %v5471_v39, %v10858_v35  ;;  %v11541_v12 = vld [vmem:[#allocation45_spill] sm:$0xff] }
 0x41e   : > { %v5486_v13 = vor.u32 %v5485_v7, %v5482_v40  ;;  %v5496_v22 = vor.u32 %v5495_v53, %v10860_v14  ;;  %v5506_v60 = vrot.slane %v5504_v16, 4  ;;  %v5509_v47 = vrot.slane %v5507_v38, 5  ;;  %v11539_v40 = vld [vmem:[#allocation43_spill] sm:$0xff] }
 0x41f   : > { %v7105_v52 = vpop.f32.mrb[240].mxu0  ;;  %v5477_v8 = vrot.slane %v5475_v62, 5  ;;  %v10885_v20 = vrot.slane %v5513_v6, 5  ;;  %v5537_v7 = vshll.u32 %v11539_v40, 16  ;;  %v5541_v53 = vshrl.u32 %v11539_v40, 16 }
 0x420   : > { %v7106_v48 = vpop.f32.mrb[241].mxu0  ;;  %v5468_v16 = vsel %vm10693_vm12, %v10872_v37, %v10858_v35  ;;  %v5473_v38 = vrot.slane %v5472_v11, 4  ;;  %v5497_v6 = vrot.slane %v5496_v22, 4  ;;  %v5552_v15 = vshrl.u32 %v11541_v12, 16 }
 0x421   : > { %v7107_v5 = vadd.f32 %v7106_v48, %v7105_v52  ;;  %v7108_v0 = vpop.f32.mrb[242].mxu0  ;;  %v11537_v52 = vld [vmem:[#allocation38_spill] sm:$0xff]  ;;  %v10903_v35 = vrot.slane %v5537_v7, 5  ;;  %v5543_v37 = vrot.slane %v5541_v53, 4 }
 0x422   : > { %v7109_v43 = vpop.f32.mrb[243].mxu0  ;;  %v5499_v48 = vshll.u32 %v11537_v52, 16  ;;  %v5478_v22 = vsel %vm10693_vm12, %v5473_v38, %v5477_v8  ;;  %v5554_v7 = vrot.slane %v5552_v15, 4 }
 0x423   : > { %v10876_v26 = vadd.f32 %v10749_v49, %v7107_v5  ;;  %v7110_v36 = vadd.f32 %v7109_v43, %v7108_v0  ;;  %7694 = vmatmul.mubr.bf16.gmra.mrb[52].mxu1 %v10805_v10  ;;  %v11538_v49 = vld [vmem:[#allocation42_spill] sm:$0xff]  ;;  %v5519_v0 = vrot.slane %v5517_v3, 4  ;;  %v5454_v10 = vsel %vm10693_vm12, %v10870_v31, %v10851_v28 }
 0x424   : > { %v5528_v5 = vshrl.u32 %v11538_v49, 16  ;;  %7697 = vmatprep.mubr.bf16.mxu1 %v6487_v1  ;;  %v5531_v39 = vshll.u32 %v11538_v49, 16  ;;  %v5487_v1 = vrot.slane %v5486_v13, 4  ;;  %v5501_v43 = vrot.slane %v5499_v48, 5 }
 0x425   : > { %v10883_v2 = vadd.f32 %v10772_v58, %v7110_v36  ;;  %v5510_v3 = vor.u32 %v5509_v47, %v5506_v60  ;;  %v11540_v36 = vld [vmem:[#allocation41_spill] sm:$0xff]  ;;  %v5555_v28 = vshll.u32 %v11541_v12, 16  ;;  %v5520_v42 = vor.u32 %v5519_v0, %v10885_v20  ;;  %v11542_v47 = vld [vmem:[#allocation44_spill] sm:$0xff]  ;;  %v11543_v0 = vld [vmem:[#allocation46_spill] sm:$0xff] }
 0x426   : > { %v5523_v52 = vshll.u32 %v11540_v36, 16  ;;  %v5530_v56 = vrot.slane %v5528_v5, 4  ;;  %v5533_v61 = vrot.slane %v5531_v39, 5  ;;  %v5492_v48 = vsel %vm10693_vm12, %v5487_v1, %v10860_v14 }
 0x427   : > { %v7111_v58 = vpop.f32.mrb[244].mxu0  ;;  %v5502_v12 = vsel %vm10693_vm12, %v5497_v6, %v5501_v43  ;;  %v5511_v60 = vrot.slane %v5510_v3, 4  ;;  %v5547_v5 = vshll.u32 %v11542_v47, 16  ;;  %v5561_v39 = vshll.u32 %v11543_v0, 16  ;;  %v11546_v47 = vld [vmem:[#allocation49_spill] sm:$0xff] }
 0x428   : > { %v7112_v62 = vpop.f32.mrb[245].mxu0  ;;  %v5557_v53 = vrot.slane %v5555_v28, 5  ;;  %v5565_v8 = vshrl.u32 %v11543_v0, 16  ;;  %v5525_v14 = vrot.slane %v5523_v52, 5  ;;  %v5534_v38 = vor.u32 %v5533_v61, %v5530_v56 }
 0x429   : > { %v7113_v49 = vadd.f32 %v7112_v62, %v7111_v58  ;;  %v7114_v40 = vpop.f32.mrb[246].mxu0  ;;  %v5521_v58 = vrot.slane %v5520_v42, 4  ;;  %v5544_v1 = vor.u32 %v5543_v37, %v10903_v35  ;;  %v7900_v62 = vadd.f32 %v10594_v24, %v10733_v21 }
 0x42a   : > { %v7115_v31 = vpop.f32.mrb[247].mxu0  ;;  %v10927_v6 = vadd.f32 %v10602_v50, %v10733_v21  ;;  %v11544_v42 = vsel %vm10693_vm12, %v10855_v19, %v10824_v46  ;;  %v10938_v56 = vcombine.low %v5492_v48, %v5502_v12  ;;  %v5516_v50 = vsel %vm10693_vm12, %v5511_v60, %v10885_v20 }
 0x42b   : > { %v10906_v11 = vadd.f32 %v10812_v9, %v7113_v49  ;;  %v7116_v13 = vadd.f32 %v7115_v31, %v7114_v40  ;;  %7698 = vmatmul.mubr.bf16.gmra.mrb[56].mxu1 %v10846_v32  ;;  %v6490_v15 = vcombine.low %v11544_v42, %v5454_v10  ;;  %v10943_v43 = vrot.slane %v5547_v5, 5 }
 0x42c   : > { %7701 = vmatprep.mubr.bf16.mxu1 %v6489_v23  ;;  %v6491_v23 = vcombine.low %v5468_v16, %v5478_v22  ;;  %v5558_v52 = vor.u32 %v5557_v53, %v5554_v7  ;;  %v10945_v49 = vrot.slane %v5561_v39, 5  ;;  %v5567_v46 = vrot.slane %v5565_v8, 4  ;;  %v11545_v22 = vld [vmem:[#allocation48_spill] sm:$0xff]  ;;  %v11547_v8 = vld [vmem:[#allocation47_spill] sm:$0xff] }
 0x42d   : > { %v10919_v9 = vadd.f32 %v10837_v17, %v7116_v13  ;;  %v10931_v17 = vadd.f32 %v10604_v29, %v10733_v21  ;;  %v5526_v16 = vsel %vm10693_vm12, %v5521_v58, %v5525_v14  ;;  %v10949_v28 = vrot.slane %v5534_v38, 4 }
 0x42e   : > { %v7241_v32 = vpop.f32.mrb[80].mxu1  ;;  %v10951_v31 = vrot.slane %v5544_v1, 4  ;;  %v5576_v48 = vshrl.u32 %v11545_v22, 16  ;;  %v5579_v12 = vshll.u32 %v11545_v22, 16  ;;  %v5585_v5 = vshll.u32 %v11546_v47, 16  ;;  %v11548_v1 = vld [vmem:[#allocation51_spill] sm:$0xff] }
 0x42f   : > { %v7117_v61 = vpop.f32.mrb[248].mxu0  ;;  %v7242_v29 = vpop.f32.mrb[81].mxu1  ;;  %v5589_v0 = vshrl.u32 %v11546_v47, 16  ;;  %v5559_v53 = vrot.slane %v5558_v52, 4  ;;  %v5571_v58 = vshll.u32 %v11547_v8, 16  ;;  %v6493_v38 = vcombine.low %v5516_v50, %v5526_v16 }
 0x430   : > { %v7118_v24 = vpop.f32.mrb[249].mxu0  ;;  %v7243_v19 = vadd.f32 %v7242_v29, %v7241_v32  ;;  %v7244_v10 = vpop.f32.mrb[82].mxu1  ;;  %v5600_v42 = vshrl.u32 %v11548_v1, 16  ;;  %v11549_v32 = vld [vmem:[#allocation52_spill] sm:$0xff]  ;;  %v5578_v29 = vrot.slane %v5576_v48, 4 }
 0x431   : > { %v7119_v3 = vadd.f32 %v7118_v24, %v7117_v61  ;;  %v7120_v36 = vpop.f32.mrb[250].mxu0  ;;  %v7245_v20 = vpop.f32.mrb[83].mxu1  ;;  %v5603_v61 = vshll.u32 %v11548_v1, 16  ;;  %v5591_v52 = vrot.slane %v5589_v0, 4 }
 0x432   : > { %v7121_v40 = vpop.f32.mrb[251].mxu0  ;;  %v7246_v60 = vadd.f32 %v7245_v20, %v7244_v10  ;;  %v10961_v39 = vadd.f32 %v10876_v26, %v7243_v19  ;;  %v5540_v26 = vsel %vm10693_vm12, %v10949_v28, %v10903_v35  ;;  %v5564_v10 = vsel %vm10693_vm12, %v5559_v53, %v10945_v49  ;;  %v11550_v20 = vld [vmem:[#allocation50_spill] sm:$0xff] }
 0x433   : > { %v10954_v37 = vadd.f32 %v10843_v18, %v7119_v3  ;;  %v7122_v13 = vadd.f32 %v7121_v40, %v7120_v36  ;;  %7702 = vmatmul.mubr.bf16.gmra.mrb[60].mxu1 %v6490_v15  ;;  %v5568_v18 = vor.u32 %v5567_v46, %v10945_v49  ;;  %v5581_v3 = vrot.slane %v5579_v12, 5 }
 0x434   : > { %v10968_v14 = vadd.f32 %v10883_v2, %v7246_v60  ;;  %7705 = vmatprep.mubr.bf16.mxu1 %v6491_v23  ;;  %v5609_v2 = vshll.u32 %v11549_v32, 16  ;;  %v5613_v23 = vshrl.u32 %v11549_v32, 16  ;;  %v10982_v36 = vrot.slane %v5585_v5, 5  ;;  %v11552_v32 = vld [vmem:[#allocation53_spill] sm:$0xff] }
 0x435   : > { %v10963_v7 = vadd.f32 %v7900_v62, %v7122_v13  ;;  %v5550_v62 = vsel %vm10693_vm12, %v10951_v31, %v10943_v43  ;;  %v5569_v43 = vrot.slane %v5568_v18, 4  ;;  %v5573_v40 = vrot.slane %v5571_v58, 5  ;;  %v11551_v58 = vld [vmem:[#allocation54_spill] sm:$0xff] }
 0x436   : > { %v7247_v24 = vpop.f32.mrb[84].mxu1  ;;  %v5595_v13 = vshll.u32 %v11550_v20, 16  ;;  %v5602_v22 = vrot.slane %v5600_v42, 4  ;;  %v5605_v48 = vrot.slane %v5603_v61, 5  ;;  %v10991_v5 = vrot.slane %v5609_v2, 5 }
 0x437   : > { %v7123_v15 = vpop.f32.mrb[252].mxu0  ;;  %v7248_v46 = vpop.f32.mrb[85].mxu1  ;;  %v5615_v0 = vrot.slane %v5613_v23, 4  ;;  %v5582_v1 = vor.u32 %v5581_v3, %v5578_v29  ;;  %v5592_v49 = vor.u32 %v5591_v52, %v10982_v36  ;;  %v5624_v42 = vshrl.u32 %v11551_v58, 16 }
 0x438   : > { %v7124_v50 = vpop.f32.mrb[253].mxu0  ;;  %v7249_v16 = vadd.f32 %v7248_v46, %v7247_v24  ;;  %v7250_v28 = vpop.f32.mrb[86].mxu1  ;;  %v5627_v61 = vshll.u32 %v11551_v58, 16  ;;  %v5619_v2 = vshll.u32 %v11552_v32, 16  ;;  %v7920_v24 = vadd.f32 %v10617_v25, %v10733_v21 }
 0x439   : > { %v7125_v19 = vadd.f32 %v7124_v50, %v7123_v15  ;;  %v7126_v35 = vpop.f32.mrb[254].mxu0  ;;  %v7251_v12 = vpop.f32.mrb[87].mxu1  ;;  %v5606_v29 = vor.u32 %v5605_v48, %v5602_v22  ;;  %v5616_v3 = vor.u32 %v5615_v0, %v10991_v5 }
 0x43a   : > { %v7127_v31 = vpop.f32.mrb[255].mxu0  ;;  %v7252_v8 = vadd.f32 %v7251_v12, %v7250_v28  ;;  %v10995_v53 = vadd.f32 %v10906_v11, %v7249_v16  ;;  %v11553_v11 = vld [vmem:[#allocation55_spill] sm:$0xff]  ;;  %v5629_v20 = vrot.slane %v5627_v61, 5  ;;  %v5621_v25 = vrot.slane %v5619_v2, 5  ;;  %v11554_v2 = vld [vmem:[#allocation56_spill] sm:$0xff] }
 0x43b   : > { %v10989_v60 = vadd.f32 %v10927_v6, %v7125_v19  ;;  %v7128_v47 = vadd.f32 %v7127_v31, %v7126_v35  ;;  %7706 = vmatmul.mubr.bf16.gmra.mrb[64].mxu1 %v10938_v56  ;;  %v5574_v6 = vsel %vm10693_vm12, %v5569_v43, %v5573_v40  ;;  %v5633_v23 = vshll.u32 %v11553_v11, 16 }
 0x43c   : > { %v11006_v15 = vadd.f32 %v10919_v9, %v7252_v8  ;;  %7709 = vmatprep.mubr.bf16.mxu1 %v6493_v38  ;;  %v5637_v56 = vshrl.u32 %v11553_v11, 16  ;;  %v6494_v9 = vcombine.low %v5540_v26, %v5550_v62  ;;  %v6495_v46 = vcombine.low %v5564_v10, %v5574_v6 }
 0x43d   : > { %v10999_v18 = vadd.f32 %v10931_v17, %v7128_v47  ;;  %v7910_v17 = vadd.f32 %v10615_v27, %v10733_v21  ;;  %v5583_v38 = vrot.slane %v5582_v1, 4  ;;  %v5597_v19 = vrot.slane %v5595_v13, 5 }
 0x43e   : > { %v7253_v52 = vpop.f32.mrb[88].mxu1  ;;  %v5593_v40 = vrot.slane %v5592_v49, 4  ;;  %v5626_v31 = vrot.slane %v5624_v42, 4  ;;  %v5635_v8 = vrot.slane %v5633_v23, 5  ;;  %v5639_v22 = vrot.slane %v5637_v56, 4 }
 0x43f   : > { %v7129_v50 = vpop.f32.mrb[0].mxu0  ;;  %v7254_v43 = vpop.f32.mrb[89].mxu1  ;;  %v5607_v26 = vrot.slane %v5606_v29, 4  ;;  %v5617_v62 = vrot.slane %v5616_v3, 4  ;;  %v5588_v1 = vsel %vm10693_vm12, %v5583_v38, %v10982_v36  ;;  %v5643_v11 = vshll.u32 %v11554_v2, 16 }
 0x440   : > { %v7130_v35 = vpop.f32.mrb[1].mxu0  ;;  %v7255_v27 = vadd.f32 %v7254_v43, %v7253_v52  ;;  %v7256_v12 = vpop.f32.mrb[90].mxu1  ;;  %v5630_v6 = vor.u32 %v5629_v20, %v5626_v31  ;;  %v5598_v61 = vsel %vm10693_vm12, %v5593_v40, %v5597_v19  ;;  %v5640_v32 = vor.u32 %v5639_v22, %v5635_v8 }
 0x441   : > { %v7131_v16 = vadd.f32 %v7130_v35, %v7129_v50  ;;  %v7132_v28 = vpop.f32.mrb[2].mxu0  ;;  %v7257_v48 = vpop.f32.mrb[91].mxu1  ;;  %v5622_v23 = vsel %vm10693_vm12, %v5617_v62, %v5621_v25  ;;  %v6496_v50 = vcombine.low %v5588_v1, %v5598_v61  ;;  %v5645_v35 = vrot.slane %v5643_v11, 5 }
 0x442   : > { %v7133_v47 = vpop.f32.mrb[3].mxu0  ;;  %v11017_v10 = vadd.f32 %v10954_v37, %v7255_v27  ;;  %v7258_v13 = vadd.f32 %v7257_v48, %v7256_v12  ;;  %v5612_v37 = vsel %vm10693_vm12, %v5607_v26, %v10991_v5  ;;  %v5631_v29 = vrot.slane %v5630_v6, 4 }
 0x443   : > { %v7911_v0 = vadd.f32 %v7910_v17, %v7131_v16  ;;  %v7134_v58 = vadd.f32 %v7133_v47, %v7132_v28  ;;  %7710 = vmatmul.mubr.bf16.gmra.mrb[68].mxu1 %v6494_v9  ;;  %v6497_v38 = vcombine.low %v5612_v37, %v5622_v23  ;;  %v5641_v19 = vrot.slane %v5640_v32, 4 }
 0x444   : > { %v11023_v42 = vadd.f32 %v10963_v7, %v7258_v13  ;;  %7713 = vmatprep.mubr.bf16.mxu1 %v6495_v46  ;;  %v7905_v7 = vadd.f32 %v10623_v33, %v10733_v21  ;;  %v7915_v43 = vadd.f32 %v10625_v4, %v10733_v21  ;;  %v5636_v12 = vsel %vm10693_vm12, %v5631_v29, %v5635_v8 }
 0x445   : > { %v7921_v49 = vadd.f32 %v7920_v24, %v7134_v58  ;;  %v5646_v47 = vsel %vm10693_vm12, %v5641_v19, %v5645_v35  ;;  %v7940_v6 = vadd.f32 %v10631_v51, %v10733_v21 }
 0x446   : > { %v7259_v56 = vpop.f32.mrb[92].mxu1  ;;  %v6498_v58 = vcombine.low %v5636_v12, %v5646_v47 }
 0x447   : > { %v7135_v36 = vpop.f32.mrb[4].mxu0  ;;  %v7260_v24 = vpop.f32.mrb[93].mxu1 }
 0x448   : > { %v7136_v17 = vpop.f32.mrb[5].mxu0  ;;  %v7261_v9 = vadd.f32 %v7260_v24, %v7259_v56  ;;  %v7262_v46 = vpop.f32.mrb[94].mxu1  ;;  %v7925_v56 = vadd.f32 %v10635_v41, %v10733_v21 }
 0x449   : > { %v7137_v3 = vadd.f32 %v7136_v17, %v7135_v36  ;;  %v7138_v52 = vpop.f32.mrb[6].mxu0  ;;  %v7263_v40 = vpop.f32.mrb[95].mxu1 }
 0x44a   : > { %v7139_v5 = vpop.f32.mrb[7].mxu0  ;;  %v11038_v31 = vadd.f32 %v10989_v60, %v7261_v9  ;;  %v7264_v33 = vadd.f32 %v7263_v40, %v7262_v46  ;;  %v7930_v60 = vadd.f32 %v10629_v30, %v10733_v21 }
 0x44b   : > { %v7906_v16 = vadd.f32 %v7905_v7, %v7137_v3  ;;  %v7140_v28 = vadd.f32 %v7139_v5, %v7138_v52  ;;  %7714 = vmatmul.mubr.bf16.gmra.mrb[72].mxu1 %v6496_v50 }
 0x44c   : > { %v11041_v27 = vadd.f32 %v10999_v18, %v7264_v33  ;;  %7717 = vmatprep.mubr.bf16.mxu1 %v6497_v38 }
 0x44d   : > { %v7916_v20 = vadd.f32 %v7915_v43, %v7140_v28  ;;  %v7950_v43 = vadd.f32 %v10648_v55, %v10733_v21 }
 0x44e   : > { %v7265_v25 = vpop.f32.mrb[96].mxu1 }
 0x44f   : > { %v7141_v4 = vpop.f32.mrb[8].mxu0  ;;  %v7266_v48 = vpop.f32.mrb[97].mxu1 }
 0x450   : > { %v7142_v22 = vpop.f32.mrb[9].mxu0  ;;  %v7267_v13 = vadd.f32 %v7266_v48, %v7265_v25  ;;  %v7268_v18 = vpop.f32.mrb[98].mxu1 }
 0x451   : > { %v7143_v26 = vadd.f32 %v7142_v22, %v7141_v4  ;;  %v7144_v62 = vpop.f32.mrb[10].mxu0  ;;  %v7269_v8 = vpop.f32.mrb[99].mxu1 }
 0x452   : > { %v7145_v1 = vpop.f32.mrb[11].mxu0  ;;  %v11051_v32 = vadd.f32 %v7911_v0, %v7267_v13  ;;  %v7270_v2 = vadd.f32 %v7269_v8, %v7268_v18  ;;  %v7935_v0 = vadd.f32 %v10637_v44, %v10733_v21  ;;  %v7945_v13 = vadd.f32 %v10660_v59, %v10733_v21 }
 0x453   : > { %v7931_v61 = vadd.f32 %v7930_v60, %v7143_v26  ;;  %v7146_v63 = vadd.f32 %v7145_v1, %v7144_v62  ;;  %7718 = vmatmul.mubr.bf16.gmra.mrb[76].mxu1 %v6498_v58 }
 0x454   : > { %v11053_v37 = vadd.f32 %v7921_v49, %v7270_v2 }
 0x455   : > { %v7941_v11 = vadd.f32 %v7940_v6, %v7146_v63 }
 0x456   : > { %v7271_v23 = vpop.f32.mrb[100].mxu1 }
 0x457   : > { %v7147_v30 = vpop.f32.mrb[12].mxu0  ;;  %v7272_v17 = vpop.f32.mrb[101].mxu1 }
 0x458   : > { %v7148_v36 = vpop.f32.mrb[13].mxu0  ;;  %v7273_v51 = vadd.f32 %v7272_v17, %v7271_v23  ;;  %v7274_v50 = vpop.f32.mrb[102].mxu1 }
 0x459   : > { %v7149_v7 = vadd.f32 %v7148_v36, %v7147_v30  ;;  %v7150_v24 = vpop.f32.mrb[14].mxu0  ;;  %v7275_v3 = vpop.f32.mrb[103].mxu1 }
 0x45a   : > { %v7151_v29 = vpop.f32.mrb[15].mxu0  ;;  %v11059_v49 = vadd.f32 %v7906_v16, %v7273_v51  ;;  %v7276_v46 = vadd.f32 %v7275_v3, %v7274_v50  ;;  %v7960_v16 = vadd.f32 %v10653_v54, %v10733_v21  ;;  %v7970_v51 = vadd.f32 %v10680_v45, %v10733_v21 }
 0x45b   : > { %v7926_v52 = vadd.f32 %v7925_v56, %v7149_v7  ;;  %v7152_v9 = vadd.f32 %v7151_v29, %v7150_v24 }
 0x45c   : > { %v11061_v19 = vadd.f32 %v7916_v20, %v7276_v46 }
 0x45d   : > { %v7936_v38 = vadd.f32 %v7935_v0, %v7152_v9 }
 0x45e   : > { %v7277_v41 = vpop.f32.mrb[104].mxu1 }
 0x45f   : > { %v7153_v35 = vpop.f32.mrb[16].mxu0  ;;  %v7278_v40 = vpop.f32.mrb[105].mxu1 }
 0x460   : > { %v7154_v5 = vpop.f32.mrb[17].mxu0  ;;  %v7279_v12 = vadd.f32 %v7278_v40, %v7277_v41  ;;  %v7280_v44 = vpop.f32.mrb[106].mxu1 }
 0x461   : > { %v7155_v28 = vadd.f32 %v7154_v5, %v7153_v35  ;;  %v7156_v33 = vpop.f32.mrb[18].mxu0  ;;  %v7281_v4 = vpop.f32.mrb[107].mxu1 }
 0x462   : > { %v7157_v47 = vpop.f32.mrb[19].mxu0  ;;  %v11067_v20 = vadd.f32 %v7931_v61, %v7279_v12  ;;  %v7282_v60 = vadd.f32 %v7281_v4, %v7280_v44  ;;  %v7955_v61 = vadd.f32 %v10665_v57, %v10733_v21  ;;  %v11555_v12 = vld [vmem:[#allocation65_spill] sm:$0xff] }
 0x463   : > { %v7951_v25 = vadd.f32 %v7950_v43, %v7155_v28  ;;  %v7158_v22 = vadd.f32 %v7157_v47, %v7156_v33  ;;  %v7965_v44 = vadd.f32 %v11555_v12, %v10733_v21 }
 0x464   : > { %v11069_v58 = vadd.f32 %v7941_v11, %v7282_v60 }
 0x465   : > { %v7961_v48 = vadd.f32 %v7960_v16, %v7158_v22 }
 0x466   : > { %v7283_v55 = vpop.f32.mrb[108].mxu1 }
 0x467   : > { %v7159_v26 = vpop.f32.mrb[20].mxu0  ;;  %v7284_v18 = vpop.f32.mrb[109].mxu1 }
 0x468   : > { %v7160_v62 = vpop.f32.mrb[21].mxu0  ;;  %v7285_v8 = vadd.f32 %v7284_v18, %v7283_v55  ;;  %v7286_v54 = vpop.f32.mrb[110].mxu1 }
 0x469   : > { %v7161_v1 = vadd.f32 %v7160_v62, %v7159_v26  ;;  %v7162_v6 = vpop.f32.mrb[22].mxu0  ;;  %v7287_v2 = vpop.f32.mrb[111].mxu1  ;;  %v11556_v26 = vld [vmem:[#allocation57_spill] sm:$0xff] }
 0x46a   : > { %v7163_v63 = vpop.f32.mrb[23].mxu0  ;;  %v11075_v11 = vadd.f32 %v7926_v52, %v7285_v8  ;;  %v7288_v36 = vadd.f32 %v7287_v2, %v7286_v54  ;;  %v7980_v52 = vadd.f32 %v10685_v34, %v10733_v21 }
 0x46b   : > { %v7946_v30 = vadd.f32 %v7945_v13, %v7161_v1  ;;  %v7164_v23 = vadd.f32 %v7163_v63, %v7162_v6 }
 0x46c   : > { %v11077_v17 = vadd.f32 %v7936_v38, %v7288_v36 }
 0x46d   : > { %v7956_v56 = vadd.f32 %v7955_v61, %v7164_v23  ;;  %v11557_v61 = vld [vmem:[#allocation67_spill] sm:$0xff] }
 0x46e   : > { %v7289_v59 = vpop.f32.mrb[112].mxu1  ;;  %v7990_v2 = vadd.f32 %v11557_v61, %v10733_v21 }
 0x46f   : > { %v7165_v7 = vpop.f32.mrb[24].mxu0  ;;  %v7290_v50 = vpop.f32.mrb[113].mxu1 }
 0x470   : > { %v7166_v24 = vpop.f32.mrb[25].mxu0  ;;  %v7291_v3 = vadd.f32 %v7290_v50, %v7289_v59  ;;  %v7292_v57 = vpop.f32.mrb[114].mxu1  ;;  %v11558_v50 = vld [vmem:[#allocation58_spill] sm:$0xff] }
 0x471   : > { %v7167_v29 = vadd.f32 %v7166_v24, %v7165_v7  ;;  %v7168_v0 = vpop.f32.mrb[26].mxu0  ;;  %v7293_v46 = vpop.f32.mrb[115].mxu1 }
 0x472   : > { %v7169_v9 = vpop.f32.mrb[27].mxu0  ;;  %v11083_v38 = vadd.f32 %v7951_v25, %v7291_v3  ;;  %v7294_v5 = vadd.f32 %v7293_v46, %v7292_v57  ;;  %v7975_v25 = vadd.f32 %v11556_v26, %v10733_v21 }
 0x473   : > { %v7971_v35 = vadd.f32 %v7970_v51, %v7167_v29  ;;  %v7170_v41 = vadd.f32 %v7169_v9, %v7168_v0 }
 0x474   : > { %v11085_v40 = vadd.f32 %v7961_v48, %v7294_v5 }
 0x475   : > { %v7981_v43 = vadd.f32 %v7980_v52, %v7170_v41 }
 0x476   : > { %v7295_v45 = vpop.f32.mrb[116].mxu1 }
 0x477   : > { %v7171_v28 = vpop.f32.mrb[28].mxu0  ;;  %v7296_v47 = vpop.f32.mrb[117].mxu1 }
 0x478   : > { %v7172_v33 = vpop.f32.mrb[29].mxu0  ;;  %v7297_v22 = vadd.f32 %v7296_v47, %v7295_v45  ;;  %v7298_v34 = vpop.f32.mrb[118].mxu1 }
 0x479   : > { %v7173_v16 = vadd.f32 %v7172_v33, %v7171_v28  ;;  %v7174_v4 = vpop.f32.mrb[30].mxu0  ;;  %v7299_v55 = vpop.f32.mrb[119].mxu1  ;;  %v11559_v28 = vld [vmem:[#allocation69_spill] sm:$0xff] }
 0x47a   : > { %v7175_v60 = vpop.f32.mrb[31].mxu0  ;;  %v11091_v48 = vadd.f32 %v7946_v30, %v7297_v22  ;;  %v7300_v18 = vadd.f32 %v7299_v55, %v7298_v34  ;;  %v8000_v30 = vadd.f32 %v11558_v50, %v10733_v21  ;;  %v7985_v45 = vadd.f32 %v11559_v28, %v10733_v21  ;;  %v11560_v22 = vld [vmem:[#allocation59_spill] sm:$0xff] }
 0x47b   : > { %v7966_v62 = vadd.f32 %v7965_v44, %v7173_v16  ;;  %v7176_v13 = vadd.f32 %v7175_v60, %v7174_v4 }
 0x47c   : > { %v11093_v6 = vadd.f32 %v7956_v56, %v7300_v18 }
 0x47d   : > { %v7976_v1 = vadd.f32 %v7975_v25, %v7176_v13 }
 0x47e   : > { %v7301_v54 = vpop.f32.mrb[120].mxu1 }
 0x47f   : > { %v7177_v8 = vpop.f32.mrb[32].mxu0  ;;  %v7302_v23 = vpop.f32.mrb[121].mxu1 }
 0x480   : > { %v7178_v63 = vpop.f32.mrb[33].mxu0  ;;  %v7303_v59 = vadd.f32 %v7302_v23, %v7301_v54  ;;  %v7304_v24 = vpop.f32.mrb[122].mxu1 }
 0x481   : > { %v7179_v36 = vadd.f32 %v7178_v63, %v7177_v8  ;;  %v7180_v7 = vpop.f32.mrb[34].mxu0  ;;  %v7305_v29 = vpop.f32.mrb[123].mxu1  ;;  %v11561_v63 = vld [vmem:[#allocation66_spill] sm:$0xff] }
 0x482   : > { %v7181_v51 = vpop.f32.mrb[35].mxu0  ;;  %v11099_v56 = vadd.f32 %v7971_v35, %v7303_v59  ;;  %v7306_v57 = vadd.f32 %v7305_v29, %v7304_v24  ;;  %v7995_v35 = vadd.f32 %v11560_v22, %v10733_v21  ;;  %v8010_v61 = vadd.f32 %v11561_v63, %v10733_v21 }
 0x483   : > { %v7991_v0 = vadd.f32 %v7990_v2, %v7179_v36  ;;  %v7182_v3 = vadd.f32 %v7181_v51, %v7180_v7  ;;  %v11562_v51 = vld [vmem:[#allocation60_spill] sm:$0xff] }
 0x484   : > { %v11101_v52 = vadd.f32 %v7981_v43, %v7306_v57 }
 0x485   : > { %v8001_v9 = vadd.f32 %v8000_v30, %v7182_v3 }
 0x486   : > { %v7307_v41 = vpop.f32.mrb[124].mxu1 }
 0x487   : > { %v7183_v46 = vpop.f32.mrb[36].mxu0  ;;  %v7308_v33 = vpop.f32.mrb[125].mxu1 }
 0x488   : > { %v7184_v5 = vpop.f32.mrb[37].mxu0  ;;  %v7309_v47 = vadd.f32 %v7308_v33, %v7307_v41  ;;  %v7310_v16 = vpop.f32.mrb[126].mxu1 }
 0x489   : > { %v7185_v12 = vadd.f32 %v7184_v5, %v7183_v46  ;;  %v7186_v44 = vpop.f32.mrb[38].mxu0  ;;  %v7311_v34 = vpop.f32.mrb[127].mxu1 }
 0x48a   : > { %v7187_v4 = vpop.f32.mrb[39].mxu0  ;;  %v11107_v43 = vadd.f32 %v7966_v62, %v7309_v47  ;;  %v7312_v25 = vadd.f32 %v7311_v34, %v7310_v16  ;;  %v8474_v62 = vld [vmem:[%s11292_s4] ss:$0 sm:$0xff] }
 0x48b   : > { %v7986_v60 = vadd.f32 %v7985_v45, %v7185_v12  ;;  %v7188_v26 = vadd.f32 %v7187_v4, %v7186_v44  ;;  %v8020_v50 = vadd.f32 %v8474_v62, %v11562_v51  ;;  %v11563_v45 = vld [vmem:[#allocation68_spill] sm:$0xff] }
 0x48c   : > { %v11109_v13 = vadd.f32 %v7976_v1, %v7312_v25  ;;  %v8005_v33 = vadd.f32 %v8474_v62, %v11563_v45 }
 0x48d   : > { %v7996_v55 = vadd.f32 %v7995_v35, %v7188_v26  ;;  %v11564_v35 = vld [vmem:[#allocation61_spill] sm:$0xff] }
 0x48e   : > { %v7313_v8 = vpop.f32.mrb[128].mxu1  ;;  %v8015_v34 = vadd.f32 %v8474_v62, %v11564_v35 }
 0x48f   : > { %v7189_v18 = vpop.f32.mrb[40].mxu0  ;;  %v7314_v2 = vpop.f32.mrb[129].mxu1 }
 0x490   : > { %v7190_v54 = vpop.f32.mrb[41].mxu0  ;;  %v7315_v7 = vadd.f32 %v7314_v2, %v7313_v8  ;;  %v7316_v59 = vpop.f32.mrb[130].mxu1 }
 0x491   : > { %v7191_v23 = vadd.f32 %v7190_v54, %v7189_v18  ;;  %v7192_v36 = vpop.f32.mrb[42].mxu0  ;;  %v7317_v1 = vpop.f32.mrb[131].mxu1 }
 0x492   : > { %v7193_v24 = vpop.f32.mrb[43].mxu0  ;;  %v11117_v3 = vadd.f32 %v7991_v0, %v7315_v7  ;;  %v7318_v57 = vadd.f32 %v7317_v1, %v7316_v59 }
 0x493   : > { %v8011_v30 = vadd.f32 %v8010_v61, %v7191_v23  ;;  %v7194_v29 = vadd.f32 %v7193_v24, %v7192_v36 }
 0x494   : > { %v11119_v21 = vadd.f32 %v8001_v9, %v7318_v57 }
 0x495   : > { %v8021_v46 = vadd.f32 %v8020_v50, %v7194_v29 }
 0x496   : > { %v7319_v5 = vpop.f32.mrb[132].mxu1 }
 0x497   : > { %v7195_v41 = vpop.f32.mrb[44].mxu0  ;;  %v7320_v12 = vpop.f32.mrb[133].mxu1 }
 0x498   : > { %v7196_v28 = vpop.f32.mrb[45].mxu0  ;;  %v7321_v16 = vadd.f32 %v7320_v12, %v7319_v5  ;;  %v7322_v4 = vpop.f32.mrb[134].mxu1 }
 0x499   : > { %v7197_v44 = vadd.f32 %v7196_v28, %v7195_v41  ;;  %v7198_v47 = vpop.f32.mrb[46].mxu0  ;;  %v7323_v26 = vpop.f32.mrb[135].mxu1  ;;  %v11138_v41 = vld [vmem:[%s11294_s6] ss:$0 sm:$0xff] }
 0x49a   : > { %v7199_v22 = vpop.f32.mrb[47].mxu0  ;;  %v11123_v18 = vadd.f32 %v7986_v60, %v7321_v16  ;;  %v7324_v9 = vadd.f32 %v7323_v26, %v7322_v4  ;;  %v7878_v28 = vadd.f32 %v11006_v15, %v11138_v41  ;;  %v7883_v12 = vadd.f32 %v10968_v14, %v11138_v41 }
 0x49b   : > { %v8006_v0 = vadd.f32 %v8005_v33, %v7197_v44  ;;  %v7200_v25 = vadd.f32 %v7199_v22, %v7198_v47  ;;  %v7893_v15 = vadd.f32 %v11017_v10, %v11138_v41 }
 0x49c   : > { %v11125_v54 = vadd.f32 %v7996_v55, %v7324_v9  ;;  %v7898_v9 = vadd.f32 %v11041_v27, %v11138_v41 }
 0x49d   : > { %v8016_v8 = vadd.f32 %v8015_v34, %v7200_v25 }
 0x49e   : > { %v7325_v63 = vpop.f32.mrb[136].mxu1 }
 0x49f   : > { %v7326_v61 = vpop.f32.mrb[137].mxu1 }
 0x4a0   : > { %v7327_v2 = vadd.f32 %v7326_v61, %v7325_v63  ;;  %v7328_v23 = vpop.f32.mrb[138].mxu1 }
 0x4a1   : > { %v7329_v36 = vpop.f32.mrb[139].mxu1 }
 0x4a2   : > { %v11127_v7 = vadd.f32 %v8011_v30, %v7327_v2  ;;  %v7330_v59 = vadd.f32 %v7329_v36, %v7328_v23 }
 0x4a4   : > { %v11129_v24 = vadd.f32 %v8021_v46, %v7330_v59 }
 0x4a6   : > { %v7331_v62 = vpop.f32.mrb[140].mxu1 }
 0x4a7   : > { %v7332_v51 = vpop.f32.mrb[141].mxu1 }
 0x4a8   : > { %v7333_v50 = vadd.f32 %v7332_v51, %v7331_v62  ;;  %v7334_v1 = vpop.f32.mrb[142].mxu1  ;;  %v7908_v51 = vadd.f32 %v11059_v49, %v11138_v41 }
 0x4a9   : > { %v7335_v60 = vpop.f32.mrb[143].mxu1 }
 0x4aa   : > { %v11131_v29 = vadd.f32 %v8006_v0, %v7333_v50  ;;  %v7336_v57 = vadd.f32 %v7335_v60, %v7334_v1  ;;  %v7918_v60 = vadd.f32 %v11061_v19, %v11138_v41 }
 0x4ac   : > { %v11133_v55 = vadd.f32 %v8016_v8, %v7336_v57 }
 0x4ee   : > { %v7691_v30 = vpop.f32.mrb[48].mxu1 }
 0x4ef   : > { %v7868_v46 = vadd.f32 %v10995_v53, %v7691_v30  ;;  %v5816_v5 = vpop.f32.mrb[49].mxu1 }
 0x4f0   : > { %v7873_v45 = vadd.f32 %v10961_v39, %v5816_v5  ;;  %v7692_v33 = vpop.f32.mrb[50].mxu1  ;;  %v7888_v39 = vadd.f32 %v11038_v31, %v11138_v41  ;;  %v7903_v31 = vadd.f32 %v11023_v42, %v11138_v41  ;;  %v7913_v42 = vadd.f32 %v11051_v32, %v11138_v41 }
 0x4f1   : > { %v7869_v44 = vadd.f32 %v7868_v46, %v11138_v41  ;;  %v7879_v47 = vadd.f32 %v7878_v28, %v7692_v33  ;;  %v5819_v16 = vpop.f32.mrb[51].mxu1  ;;  %v7923_v46 = vadd.f32 %v11053_v37, %v11138_v41  ;;  %v7933_v37 = vadd.f32 %v11067_v20, %v11138_v41 }
 0x4f2   : > { %v7874_v4 = vadd.f32 %v7873_v45, %v11138_v41  ;;  %v7884_v53 = vadd.f32 %v7883_v12, %v5819_v16 }
 0x4f3   : > { %v5977_v22 = vmax.f32 %v7869_v44, 0.0  ;;  %v5978_v35 = vmax.f32 %v7879_v47, 0.0  ;;  %v7928_v44 = vadd.f32 %v11075_v11, %v11138_v41 }
 0x4f4   : > { %v5975_v34 = vmax.f32 %v7874_v4, 0.0  ;;  %v5976_v26 = vmax.f32 %v7884_v53, 0.0  ;;  %v7938_v4 = vadd.f32 %v11077_v17, %v11138_v41 }
 0x4f5   : > { %6009 = vst [vmem:[%s9912_s17 + $0x10] sm:$0xff] %v5977_v22  ;;  %6010 = vst [vmem:[%s9912_s17 + $0x18] sm:$0xff] %v5978_v35  ;;  %v7943_v35 = vadd.f32 %v11069_v58, %v11138_v41  ;;  %v7953_v58 = vadd.f32 %v11083_v38, %v11138_v41 }
 0x4f6   : > { %6007 = vst [vmem:[%s9912_s17] sm:$0xff] %v5975_v34  ;;  %6008 = vst [vmem:[%s9912_s17 + $0x8] sm:$0xff] %v5976_v26  ;;  %v7695_v14 = vpop.f32.mrb[52].mxu1 }
 0x4f7   : > { %v7889_v0 = vadd.f32 %v7888_v39, %v7695_v14  ;;  %v5832_v25 = vpop.f32.mrb[53].mxu1 }
 0x4f8   : > { %v7894_v8 = vadd.f32 %v7893_v15, %v5832_v25  ;;  %v7696_v63 = vpop.f32.mrb[54].mxu1 }
 0x4f9   : > { %v5981_v61 = vmax.f32 %v7889_v0, 0.0  ;;  %v7899_v2 = vadd.f32 %v7898_v9, %v7696_v63  ;;  %v5835_v23 = vpop.f32.mrb[55].mxu1  ;;  %v7948_v0 = vadd.f32 %v11091_v48, %v11138_v41 }
 0x4fa   : > { %v5979_v36 = vmax.f32 %v7894_v8, 0.0  ;;  %v7904_v59 = vadd.f32 %v7903_v31, %v5835_v23  ;;  %v7958_v8 = vadd.f32 %v11093_v6, %v11138_v41 }
 0x4fb   : > { %6013 = vst [vmem:[%s9912_s17 + $0x30] sm:$0xff] %v5981_v61  ;;  %v5982_v62 = vmax.f32 %v7899_v2, 0.0  ;;  %v7963_v61 = vadd.f32 %v11085_v40, %v11138_v41  ;;  %v7973_v40 = vadd.f32 %v11099_v56, %v11138_v41 }
 0x4fc   : > { %6011 = vst [vmem:[%s9912_s17 + $0x20] sm:$0xff] %v5979_v36  ;;  %v5980_v10 = vmax.f32 %v7904_v59, 0.0 }
 0x4fd   : > { %6014 = vst [vmem:[%s9912_s17 + $0x38] sm:$0xff] %v5982_v62 }
 0x4fe   : > { %6012 = vst [vmem:[%s9912_s17 + $0x28] sm:$0xff] %v5980_v10  ;;  %v7699_v27 = vpop.f32.mrb[56].mxu1  ;;  %v7968_v10 = vadd.f32 %v11107_v43, %v11138_v41 }
 0x4ff   : > { %v7909_v50 = vadd.f32 %v7908_v51, %v7699_v27  ;;  %v5848_v1 = vpop.f32.mrb[57].mxu1 }
 0x500   : > { %v7914_v57 = vadd.f32 %v7913_v42, %v5848_v1  ;;  %v7700_v30 = vpop.f32.mrb[58].mxu1  ;;  %v7978_v42 = vadd.f32 %v11109_v13, %v11138_v41 }
 0x501   : > { %v5985_v5 = vmax.f32 %v7909_v50, 0.0  ;;  %v7919_v49 = vadd.f32 %v7918_v60, %v7700_v30  ;;  %v5851_v28 = vpop.f32.mrb[59].mxu1  ;;  %v7983_v60 = vadd.f32 %v11101_v52, %v11138_v41  ;;  %v7993_v52 = vadd.f32 %v11117_v3, %v11138_v41 }
 0x502   : > { %v5983_v45 = vmax.f32 %v7914_v57, 0.0  ;;  %v7924_v33 = vadd.f32 %v7923_v46, %v5851_v28  ;;  %v7988_v28 = vadd.f32 %v11123_v18, %v11138_v41 }
 0x503   : > { %6017 = vst [vmem:[%s9912_s17 + $0x50] sm:$0xff] %v5985_v5  ;;  %v5986_v12 = vmax.f32 %v7919_v49, 0.0 }
 0x504   : > { %6015 = vst [vmem:[%s9912_s17 + $0x40] sm:$0xff] %v5983_v45  ;;  %v5984_v32 = vmax.f32 %v7924_v33, 0.0 }
 0x505   : > { %6018 = vst [vmem:[%s9912_s17 + $0x58] sm:$0xff] %v5986_v12  ;;  %v7998_v12 = vadd.f32 %v11125_v54, %v11138_v41  ;;  %v8008_v54 = vadd.f32 %v11131_v29, %v11138_v41 }
 0x506   : > { %6016 = vst [vmem:[%s9912_s17 + $0x48] sm:$0xff] %v5984_v32  ;;  %v7703_v19 = vpop.f32.mrb[60].mxu1 }
 0x507   : > { %v7929_v47 = vadd.f32 %v7928_v44, %v7703_v19  ;;  %v5864_v16 = vpop.f32.mrb[61].mxu1  ;;  %v8003_v19 = vadd.f32 %v11119_v21, %v11138_v41  ;;  %v8013_v21 = vadd.f32 %v11127_v7, %v11138_v41 }
 0x508   : > { %v7934_v53 = vadd.f32 %v7933_v37, %v5864_v16  ;;  %v7704_v22 = vpop.f32.mrb[62].mxu1 }
 0x509   : > { %v5989_v34 = vmax.f32 %v7929_v47, 0.0  ;;  %v7939_v11 = vadd.f32 %v7938_v4, %v7704_v22  ;;  %v5867_v26 = vpop.f32.mrb[63].mxu1 }
 0x50a   : > { %v5987_v39 = vmax.f32 %v7934_v53, 0.0  ;;  %v7944_v14 = vadd.f32 %v7943_v35, %v5867_v26 }
 0x50b   : > { %6021 = vst [vmem:[%s9912_s17 + $0x70] sm:$0xff] %v5989_v34  ;;  %v5990_v15 = vmax.f32 %v7939_v11, 0.0  ;;  %v8018_v11 = vadd.f32 %v11133_v55, %v11138_v41 }
 0x50c   : > { %6019 = vst [vmem:[%s9912_s17 + $0x60] sm:$0xff] %v5987_v39  ;;  %v5988_v20 = vmax.f32 %v7944_v14, 0.0  ;;  %v8023_v14 = vadd.f32 %v11129_v24, %v11138_v41 }
 0x50d   : > { %6022 = vst [vmem:[%s9912_s17 + $0x78] sm:$0xff] %v5990_v15 }
 0x50e   : > { %6020 = vst [vmem:[%s9912_s17 + $0x68] sm:$0xff] %v5988_v20  ;;  %v7707_v17 = vpop.f32.mrb[64].mxu1 }
 0x50f   : > { %v7949_v25 = vadd.f32 %v7948_v0, %v7707_v17  ;;  %v5880_v9 = vpop.f32.mrb[65].mxu1 }
 0x510   : > { %v7954_v63 = vadd.f32 %v7953_v58, %v5880_v9  ;;  %v7708_v31 = vpop.f32.mrb[66].mxu1 }
 0x511   : > { %v5993_v2 = vmax.f32 %v7949_v25, 0.0  ;;  %v7959_v48 = vadd.f32 %v7958_v8, %v7708_v31  ;;  %v5883_v23 = vpop.f32.mrb[67].mxu1 }
 0x512   : > { %v5991_v36 = vmax.f32 %v7954_v63, 0.0  ;;  %v7964_v59 = vadd.f32 %v7963_v61, %v5883_v23 }
 0x513   : > { %6025 = vst [vmem:[%s9912_s17 + $0x90] sm:$0xff] %v5993_v2  ;;  %v5994_v62 = vmax.f32 %v7959_v48, 0.0 }
 0x514   : > { %6023 = vst [vmem:[%s9912_s17 + $0x80] sm:$0xff] %v5991_v36  ;;  %v5992_v38 = vmax.f32 %v7964_v59, 0.0 }
 0x515   : > { %6026 = vst [vmem:[%s9912_s17 + $0x98] sm:$0xff] %v5994_v62 }
 0x516   : > { %6024 = vst [vmem:[%s9912_s17 + $0x88] sm:$0xff] %v5992_v38  ;;  %v7711_v6 = vpop.f32.mrb[68].mxu1 }
 0x517   : > { %v7969_v51 = vadd.f32 %v7968_v10, %v7711_v6  ;;  %v5896_v27 = vpop.f32.mrb[69].mxu1 }
 0x518   : > { %v7974_v50 = vadd.f32 %v7973_v40, %v5896_v27  ;;  %v7712_v1 = vpop.f32.mrb[70].mxu1 }
 0x519   : > { %v5997_v57 = vmax.f32 %v7969_v51, 0.0  ;;  %v7979_v43 = vadd.f32 %v7978_v42, %v7712_v1  ;;  %v5899_v30 = vpop.f32.mrb[71].mxu1 }
 0x51a   : > { %v5995_v46 = vmax.f32 %v7974_v50, 0.0  ;;  %v7984_v5 = vadd.f32 %v7983_v60, %v5899_v30 }
 0x51b   : > { %6029 = vst [vmem:[%s9912_s17 + $0xb0] sm:$0xff] %v5997_v57  ;;  %v5998_v49 = vmax.f32 %v7979_v43, 0.0 }
 0x51c   : > { %6027 = vst [vmem:[%s9912_s17 + $0xa0] sm:$0xff] %v5995_v46  ;;  %v5996_v56 = vmax.f32 %v7984_v5, 0.0 }
 0x51d   : > { %6030 = vst [vmem:[%s9912_s17 + $0xb8] sm:$0xff] %v5998_v49 }
 0x51e   : > { %6028 = vst [vmem:[%s9912_s17 + $0xa8] sm:$0xff] %v5996_v56  ;;  %v7715_v13 = vpop.f32.mrb[72].mxu1 }
 0x51f   : > { %v7989_v45 = vadd.f32 %v7988_v28, %v7715_v13  ;;  %v5912_v33 = vpop.f32.mrb[73].mxu1 }
 0x520   : > { %v7994_v32 = vadd.f32 %v7993_v52, %v5912_v33  ;;  %v7716_v44 = vpop.f32.mrb[74].mxu1 }
 0x521   : > { %v6001_v37 = vmax.f32 %v7989_v45, 0.0  ;;  %v7999_v18 = vadd.f32 %v7998_v12, %v7716_v44  ;;  %v5915_v47 = vpop.f32.mrb[75].mxu1 }
 0x522   : > { %v5999_v16 = vmax.f32 %v7994_v32, 0.0  ;;  %v8004_v4 = vadd.f32 %v8003_v19, %v5915_v47 }
 0x523   : > { %6033 = vst [vmem:[%s9912_s17 + $0xd0] sm:$0xff] %v6001_v37  ;;  %v6002_v3 = vmax.f32 %v7999_v18, 0.0 }
 0x524   : > { %6031 = vst [vmem:[%s9912_s17 + $0xc0] sm:$0xff] %v5999_v16  ;;  %v6000_v53 = vmax.f32 %v8004_v4, 0.0 }
 0x525   : > { %6034 = vst [vmem:[%s9912_s17 + $0xd8] sm:$0xff] %v6002_v3 }
 0x526   : > { %6032 = vst [vmem:[%s9912_s17 + $0xc8] sm:$0xff] %v6000_v53  ;;  %v7719_v22 = vpop.f32.mrb[76].mxu1 }
 0x527   : > { %v8009_v35 = vadd.f32 %v8008_v54, %v7719_v22  ;;  %v5928_v34 = vpop.f32.mrb[77].mxu1 }
 0x528   : > { %v8014_v26 = vadd.f32 %v8013_v21, %v5928_v34  ;;  %v7720_v39 = vpop.f32.mrb[78].mxu1 }
 0x529   : > { %v6005_v29 = vmax.f32 %v8009_v35, 0.0  ;;  %v8019_v15 = vadd.f32 %v8018_v11, %v7720_v39  ;;  %v5931_v7 = vpop.f32.mrb[79].mxu1 }
 0x52a   : > { %v6003_v20 = vmax.f32 %v8014_v26, 0.0  ;;  %v8024_v0 = vadd.f32 %v8023_v14, %v5931_v7 }
 0x52b   : > { %6037 = vst [vmem:[%s9912_s17 + $0xf0] sm:$0xff] %v6005_v29  ;;  %v6006_v17 = vmax.f32 %v8019_v15, 0.0 }
 0x52c   : > { %6035 = vst [vmem:[%s9912_s17 + $0xe0] sm:$0xff] %v6003_v20  ;;  %v6004_v24 = vmax.f32 %v8024_v0, 0.0 }
 0x52d   : > { %6038 = vst [vmem:[%s9912_s17 + $0xf8] sm:$0xff] %v6006_v17 }
 0x52e   : > { %6036 = vst [vmem:[%s9912_s17 + $0xe8] sm:$0xff] %v6004_v24 }
 0x52f   : > { %8516 = shalt.err (!%p8513_p8)
}
 0x530   : > { %s8517_s18 = scalar_lea.hbm %s11238_s23, 4096  ;;  %s8521_s20 = scalar_lea.hbm %s11295_s7, 8192 }
 0x531   : > { %p8518_p12 = scmp.ne.s32.totalorder %s11238_s23, %s8517_s18  ;;  %p8522_p1 = scmp.lt.u32.totalorder %s11238_s23, %s11295_s7 }
 0x532   : > { %p8523_p5 = scmp.lt.u32.totalorder %s8521_s20, %s8517_s18  ;;  %p8525_p9 = scmp.lt.u32.totalorder %s8517_s18, %s11238_s23 }
 0x533   : > { %p8519_p0 = pnand %p8518_p12, %p11565_p10 }
 0x534   : > { %p8524_p6 = por %p8523_p5, %p8522_p1 }
 0x535   : > { %p8520_p2 = pneg %p8519_p0 }
 0x536   : > { %p8526_p11 = por %p8525_p9, %p8524_p6 }
 0x538   : > { %p8527_p13 = pnand %p8526_p11, %p8520_p2 }
 0x53a   : > { %8530 = shalt.err (!%p8527_p13)
}
 0x53b   : > { %s8576_s19 = smov 128   ;;  %s8577_s22 = smov 8  }
 0x53c   : > { %8190 = dma.vmem_to_hbm [thread:$0]  (%p11565_p10), %s11240_s21, 4096, %s11238_s23, %s11247_s28, %s8576_s19, %s8576_s19, %s8577_s22  }
 0x53d PF: > { %p8202_p3 = scmp.ge.s32.totalorder %s8569_s27, 2  ;;  %s6068_s29 = sand.u32 1, %s8557_s24  }
 0x53e   : > { %p11566_p4 = scmp.ne.s32.totalorder %s11380_s12, 0  ;;  %s6069_s8 = scalar_lea.sflag [#allocation5], %s6068_s29 }
 0x540   : > { %p8197_p7 = pnand %p8202_p3, %p11566_p4 }
 0x542   : > { %8552 = dma.done.wait (!%p8197_p7), %s6069_s8, 4096  }
 0x543   : > { %8554 = vsyncadd (!%p8197_p7), %s6069_s8, 4294963200  ;;  %p18_p8 = scmp.ge.s32.totalorder %s8643_s30, 4   ;;  %s11567_s24 = smov %s8561_s25 }
 0x544   : > { %s11568_s25 = smov %s8565_s26  ;;  %s11569_s26 = smov %s8654_s10 }
 0x545   : > { %s11570_s27 = smov %s8643_s30  ;;  %20 = sbr.rel (!%p18_p8) target bundleno = 4 (0x4), region = 97 }
 0x54c   :  { %6074 = vsyncpa [#allocation4], 1 }
 0x54d   :  { %6076 = vsyncpa [#allocation4 + $0x1], 1 }
 0x54e   :  { %6077 = vsyncpa [#allocation5], 1 }
 0x54f   :  { %6079 = vsyncpa [#allocation5 + $0x1], 1 }

// kernel: tpu_custom_call.1
= control target key start
LH: loop header
LB: loop body
LE: loop exit
PB: predicated region body
PF: predicated region fallthrough
CT: control target
= control target key end

     0   :  { %12 = vsyncpa [#allocation4], 0  ;;  %s11288_s0 = inlined_call_operand.vmem [shape: bf16[2,18,18,128], index: 0, kind: input, shape index: {}]   ;;  %s11289_s1 = inlined_call_operand.vmem [shape: bf16[3,384,128], index: 1, kind: input, shape index: {}]   ;;  %s11290_s2 = inlined_call_operand.vmem [shape: f32[1,128], index: 2, kind: input, shape index: {}]   ;;  %s11291_s3 = inlined_call_operand.hbm [shape: bf16[3,384,128], index: 3, kind: input, shape index: {}]   ;;  %s11292_s4 = inlined_call_operand.vmem [shape: f32[1,128], index: 4, kind: input, shape index: {}]   ;;  %s11293_s5 = inlined_call_operand.vmem [shape: bf16[128,128], index: 5, kind: input, shape index: {}]   ;;  %s11294_s6 = inlined_call_operand.vmem [shape: f32[1,128], index: 6, kind: input, shape index: {}]   ;;  %s11295_s7 = inlined_call_operand.hbm [shape: f32[2,16,16,128], index: 7, kind: output, shape index: {}]  }
   0x1   :  { %13 = vsyncpa [#allocation5], 0 }
   0x2   :  { %15 = vsyncpa [#allocation5 + $0x1], 0  ;;  %s8618_s24 = smov 0   ;;  %s8620_s25 = smov 0  }
   0x3   :  { %s8622_s26 = smov 0   ;;  %s8624_s27 = smov 0  }
   0x4 LB: > { %s8639_s28 = sadd.s32 4294967295, %s8569_s27   ;;  %s6127_s29 = sadd.s32 4294967294, %s8569_s27   ;;  %s8569_s27 = sphi %s8624_s27, %s11570_s27   ;;  %s8565_s26 = sphi %s8622_s26, %s11569_s26   ;;  %s8561_s25 = sphi %s8620_s25, %s11568_s25   ;;  %s8557_s24 = sphi %s8618_s24, %s11567_s24  }
   0x5   : > { %s8643_s30 = sadd.s32 1, %s8569_s27   ;;  %s180_s8 = sadd.s32 1, %s8565_s26 }
   0x6   : > { %s177_s9 = ssub.s32 %s8569_s27, %s8643_s30  ;;  %p190_p0 = scmp.ne.s32.totalorder %s8565_s26, %s8561_s25 }
   0x7   : > { %p178_p1 = scmp.eq.s32.totalorder %s177_s9, 0  ;;  %p191_p2 = scmp.eq.s32.totalorder %s8639_s28, 1 }
   0x8   : > { %p196_p3 = scmp.ne.s32.totalorder %s8561_s25, %s8557_s24  ;;  %p197_p4 = scmp.eq.s32.totalorder %s6127_s29, 1 }
   0x9   : > { %s8654_s10 = scalar_select %p178_p1, %s8565_s26, %s180_s8  }
   0xa   : > { %p8656_p5 = por %p191_p2, %p190_p0  ;;  %p8660_p6 = por %p197_p4, %p196_p3 }
   0xb   : > { %p6128_p7 = scmp.ge.s32.totalorder %s8569_s27, 1  ;;  %p204_p8 = scmp.lt.s32.totalorder %s8569_s27, 3 }
   0xc   : > { %s11379_s11 = scalar_select %p8656_p5, 1, 0 }
   0xd   : > { %s11380_s12 = scalar_select %p8660_p6, 1, 0 }
   0xe   : > { %p11296_p10 = scmp.eq.s32.totalorder %s8639_s28, 0  ;;  %p8668_p11 = pnand %p6128_p7, %p204_p8 }
   0xf   : > { %s8571_s14 = smov [#allocation3]   ;;  %s8475_s19 = scalar_lea.hbm %s11291_s3, 9216 }
  0x10   : > { %s11381_s13 = scalar_select %p8668_p11, 1, 0 }
  0x11   : > { %s222_s15 = sshll.u32 %s8571_s14, 4  ;;  %p8192_p12 = pneg %p8668_p11  ;;  %s223_s15 = int_to_ptr.vmem [resolvable:$true] %s222_s15 }
  0x12   : > { %p8476_p0 = scmp.ne.s32.totalorder %s11291_s3, %s8475_s19  ;;  %p8482_p4 = scmp.lt.u32.totalorder %s8475_s19, %s11291_s3 }
  0x13   : > { %p8676_p13 = pnand %p11296_p10, %p8192_p12 }
  0x15   : > { %p8477_p1 = pneg %p8676_p13 }
  0x17   : > { %p8478_p2 = pnand %p8477_p1, %p8476_p0 }
  0x19   : > { %p8479_p3 = pneg %p8478_p2 }
  0x1b   : > { %p8484_p7 = pnand %p8482_p4, %p8479_p3 }
  0x1d   : > { %8487 = shalt.err (!%p8484_p7)
}
  0x1e   : > { %s8488_s29 = scalar_lea.vmem %s223_s15, 9216  ;;  %p8496_p10 = scmp.lt.s32.totalorder %s223_s15, %s223_s15 }
  0x1f   : > { %p8489_p8 = scmp.ne.s32.totalorder %s223_s15, %s8488_s29  ;;  %p8497_p6 = scmp.lt.s32.totalorder %s8488_s29, %s8488_s29 }
  0x21   : > { %p8491_p12 = pnand %p8489_p8, %p8477_p1  ;;  %p8498_p5 = por %p8497_p6, %p8496_p10 }
  0x23   : > { %p8492_p9 = pneg %p8491_p12 }
  0x25   : > { %p8499_p11 = pnand %p8498_p5, %p8492_p9 }
  0x27   : > { %8502 = shalt.err (!%p8499_p11)
}
  0x28   : > { %s8572_s8 = smov 64   ;;  %s8573_s9 = smov 4  }
  0x29   : > { %8195 = dma.hbm_to_vmem [thread:$0]  (!%p8676_p13), %s11291_s3, 9216, %s223_s15, [#allocation4], %s8572_s8, %s8572_s8, %s8573_s9  }
  0x2a   : > { %p11383_p0 = scmp.ne.s32.totalorder %s11381_s13, 0 }
  0x2c   : > { %255 = sbr.rel (%p11383_p0) target bundleno = 1341 (0x53d), region = 48 }
  0x33   : > { %p11384_p2 = scmp.eq.s32.totalorder %s8639_s28, 0 }
  0x35   : > { %8548 = dma.done.wait (%p11384_p2), [#allocation4], 9216   ;;  %p11385_p1 = pmov %p11384_p2 }
  0x36   : > { %s284_s18 = sand.u32 1, %s8561_s25   ;;  %v8241_v0 = vld [vmem:[%s11289_s1 + $0x40] sm:$0xff]   ;;  %v8244_v3 = vld [vmem:[%s11289_s1 + $0x48] sm:$0xff]   ;;  %v8247_v6 = vld [vmem:[%s11289_s1 + $0x50] sm:$0xff]   ;;  %p287_p5 = scmp.lt.s32.totalorder %s8639_s28, 1  ;;  %vm745_vm1 = vcmask 1046528  }
  0x37   : > { %8550 = vsyncadd (%p11385_p1), [#allocation4], 4294958080  ;;  %s8705_s19 = sshll.u32 %s284_s18, 8  ;;  %v8242_v1 = vld [vmem:[%s11289_s1 + $0x80] sm:$0xff]   ;;  %6545 = vmatprep.subr.bf16.mxu0 %v8241_v0  ;;  %v8245_v4 = vld [vmem:[%s11289_s1 + $0x88] sm:$0xff]   ;;  %p11468_p6 = scmp.ne.s32.totalorder %s8639_s28, 0 }
  0x38   : > { %v8243_v2 = vld [vmem:[%s11289_s1] sm:$0xff]   ;;  %7385 = vmatprep.subr.bf16.mxu1 %v8242_v1  ;;  %v8246_v5 = vld [vmem:[%s11289_s1 + $0x8] sm:$0xff]   ;;  %v8248_v7 = vld [vmem:[%s11289_s1 + $0x90] sm:$0xff]   ;;  %s288_s13 = scalar_select %p287_p5, %s8639_s28, 1  ;;  %vm510_vm0 = vsmask.f32 7424 }
  0x39   : > { %6546 = vmatpush3.bf16.msra.mxu0 %v8243_v2  ;;  %7386 = vmatpush3.bf16.msra.mxu1 %v8242_v1  ;;  %v8249_v8 = vld [vmem:[%s11289_s1 + $0x10] sm:$0xff]   ;;  %v8250_v9 = vld [vmem:[%s11289_s1 + $0x58] sm:$0xff]   ;;  %v8253_v12 = vld [vmem:[%s11289_s1 + $0x60] sm:$0xff]  }
  0x3a   : > { %6547 = vmatprep.subr.bf16.mxu0 %v8244_v3  ;;  %7387 = vmatprep.subr.bf16.mxu1 %v8245_v4  ;;  %v8251_v10 = vld [vmem:[%s11289_s1 + $0x98] sm:$0xff]   ;;  %v8254_v13 = vld [vmem:[%s11289_s1 + $0xa0] sm:$0xff]   ;;  %v8256_v15 = vld [vmem:[%s11289_s1 + $0x68] sm:$0xff]   ;;  %s8185_s17 = smul.u32 216, %s288_s13 }
  0x3b   : > { %v8252_v11 = vld [vmem:[%s11289_s1 + $0x18] sm:$0xff]   ;;  %v8255_v14 = vld [vmem:[%s11289_s1 + $0x20] sm:$0xff]   ;;  %v8257_v16 = vld [vmem:[%s11289_s1 + $0xa8] sm:$0xff]  }
  0x3c   : > { %v8258_v17 = vld [vmem:[%s11289_s1 + $0x28] sm:$0xff]   ;;  %v8259_v18 = vld [vmem:[%s11289_s1 + $0x70] sm:$0xff]   ;;  %s8775_s14 = scalar_lea.vmem %s11288_s0, %s8185_s17  ;;  %v8262_v21 = vld [vmem:[%s11289_s1 + $0x78] sm:$0xff]   ;;  %s9912_s17 = scalar_lea.vmem [#allocation6], %s8705_s19 }
  0x3d   : > { %6548 = vmatpush3.bf16.msra.mxu0 %v8246_v5  ;;  %7388 = vmatpush3.bf16.msra.mxu1 %v8245_v4  ;;  %v8260_v19 = vld [vmem:[%s11289_s1 + $0xb0] sm:$0xff]   ;;  %v8263_v22 = vld [vmem:[%s11289_s1 + $0xb8] sm:$0xff]   ;;  %v8265_v23 = vld [vmem:[%s8775_s14] sm:$0xff]  }
  0x3e   : > { %6549 = vmatprep.subr.bf16.mxu0 %v8247_v6  ;;  %7389 = vmatprep.subr.bf16.mxu1 %v8248_v7  ;;  %v8261_v20 = vld [vmem:[%s11289_s1 + $0x30] sm:$0xff]   ;;  %v8266_v24 = vld [vmem:[%s8775_s14 + $0x8] ss:$0 sps:$4 sm:$0x11]   ;;  %v8786_v25 = vld [vmem:[%s8775_s14 + $0xc] sm:$0xf] }
  0x3f   : > { %11386 = vst [vmem:[#allocation9_spill] sm:$0xff] %v8786_v25  ;;  %v8789_v26 = vld [vmem:[%s8775_s14 + $0x10] sm:$0xf]  ;;  %v8792_v27 = vld [vmem:[%s8775_s14 + $0x14] sm:$0x1]  ;;  %v512_v28 = vshrl.u32 %v8265_v23, 16 }
  0x40   : > { %11387 = vst [vmem:[#allocation10_spill] sm:$0xff] %v8789_v26  ;;  %11388 = vst [vmem:[#allocation11_spill] sm:$0xff] %v8792_v27  ;;  %v514_v29 = vshll.u32 %v8265_v23, 16  ;;  %v519_v30 = vshll.u32 %v8266_v24, 16  ;;  %v746_v31 = vrot.slane %v8265_v23, 1  ;;  %v8264_v32 = vld [vmem:[%s11289_s1 + $0x38] sm:$0xff]   ;;  %v8799_v34 = vcombine.low %v8786_v25, %v8789_v26 }
  0x41   : > { %6550 = vmatpush3.bf16.msra.mxu0 %v8249_v8  ;;  %7390 = vmatpush3.bf16.msra.mxu1 %v8248_v7  ;;  %v747_v33 = vrot.slane %v8266_v24, 1  ;;  %v6154_v35 = vcombine.low %v8792_v27, %v8792_v27  ;;  %v8269_v38 = vld [vmem:[%s11289_s1 + $0x100] sm:$0xff]   ;;  %v8807_v39 = vld [vmem:[%s8775_s14 + $0x18] sm:$0xf]  ;;  %v8816_v45 = vld [vmem:[%s8775_s14 + $0x1c] sm:$0xf] }
  0x42   : > { %6551 = vmatprep.subr.bf16.mxu0 %v8250_v9  ;;  %7391 = vmatprep.subr.bf16.mxu1 %v8251_v10  ;;  %v516_v36 = vrot.slane %v514_v29, 1  ;;  %v521_v37 = vrot.slane %v519_v30, 1  ;;  %11389 = vst [vmem:[#allocation12_spill] sm:$0xff] %v8807_v39  ;;  %v749_v41 = vrot.slane %v8799_v34, 1  ;;  %v8270_v43 = vld [vmem:[%s11289_s1 + $0xc0] sm:$0xff]   ;;  %v524_v44 = vshrl.u32 %v8799_v34, 16 }
  0x43   : > { %v748_v40 = vsel %vm745_vm1, %v746_v31, %v747_v33  ;;  %v750_v42 = vrot.slane %v6154_v35, 1  ;;  %11390 = vst [vmem:[#allocation13_spill] sm:$0xff] %v8816_v45  ;;  %v526_v47 = vshll.u32 %v8799_v34, 16  ;;  %v531_v48 = vshll.u32 %v6154_v35, 16  ;;  %v8820_v49 = vld [vmem:[%s8775_s14 + $0x20] sm:$0x1] }
  0x44   : > { %v517_v46 = vor.u32 %v516_v36, %v512_v28  ;;  %7401 = vmatprep.mubr.bf16.mxu1 %v748_v40  ;;  %11391 = vst [vmem:[#allocation14_spill] sm:$0xff] %v8820_v49  ;;  %v8824_v50 = vcombine.low %v8807_v39, %v8816_v45  ;;  %v8827_v51 = vld [vmem:[%s8775_s14 + $0x24] sm:$0xf]  ;;  %v6155_v53 = vcombine.low %v8820_v49, %v8820_v49  ;;  %v8835_v54 = vld [vmem:[%s8775_s14 + $0x28] sm:$0xf] }
  0x45   : > { %6552 = vmatpush3.bf16.msra.mxu0 %v8252_v11  ;;  %7392 = vmatpush3.bf16.msra.mxu1 %v8251_v10  ;;  %11392 = vst [vmem:[#allocation15_spill] sm:$0xff] %v8827_v51  ;;  %v8830_v52 = vsel %vm745_vm1, %v749_v41, %v750_v42  ;;  %11393 = vst [vmem:[#allocation16_spill] sm:$0xff] %v8835_v54  ;;  %v8838_v55 = vld [vmem:[%s8775_s14 + $0x2c] sm:$0x1]  ;;  %v8841_v56 = vld [vmem:[%s8775_s14 + $0x30] sm:$0xf]  ;;  %v8853_v0 = vcombine.low %v8827_v51, %v8835_v54 }
  0x46   : > { %6553 = vmatprep.subr.bf16.mxu0 %v8253_v12  ;;  %7393 = vmatprep.subr.bf16.mxu1 %v8254_v13  ;;  %11394 = vst [vmem:[#allocation17_spill] sm:$0xff] %v8838_v55  ;;  %11395 = vst [vmem:[#allocation18_spill] sm:$0xff] %v8841_v56  ;;  %v522_v57 = vsel %vm510_vm0, %v517_v46, %v521_v37  ;;  %v528_v58 = vrot.slane %v526_v47, 1  ;;  %v533_v59 = vrot.slane %v531_v48, 1  ;;  %v752_v60 = vrot.slane %v8824_v50, 1  ;;  %v8279_v62 = vld [vmem:[%s11289_s1 + $0x108] sm:$0xff]  }
  0x47   : > { %v8846_v61 = vld [vmem:[%s8775_s14 + $0x34] sm:$0xf]  ;;  %1048 = vmatprep.mubr.bf16.mxu0 %v522_v57  ;;  %v753_v63 = vrot.slane %v6155_v53, 1  ;;  %v6156_v1 = vcombine.low %v8838_v55, %v8838_v55  ;;  %v536_v2 = vshrl.u32 %v8824_v50, 16  ;;  %v8859_v3 = vld [vmem:[%s8775_s14 + $0x38] sm:$0x1] }
  0x48   : > { %11396 = vst [vmem:[#allocation19_spill] sm:$0xff] %v8846_v61  ;;  %11397 = vst [vmem:[#allocation20_spill] sm:$0xff] %v8859_v3  ;;  %v8862_v4 = vld [vmem:[%s8775_s14 + $0x3c] sm:$0xf]  ;;  %v8280_v5 = vld [vmem:[%s11289_s1 + $0xc8] sm:$0xff]   ;;  %v529_v6 = vor.u32 %v528_v58, %v524_v44  ;;  %v538_v7 = vshll.u32 %v8824_v50, 16  ;;  %v8871_v9 = vcombine.low %v8841_v56, %v8846_v61 }
  0x49   : > { %6554 = vmatpush3.bf16.msra.mxu0 %v8255_v14  ;;  %7394 = vmatpush3.bf16.msra.mxu1 %v8254_v13  ;;  %11398 = vst [vmem:[#allocation21_spill] sm:$0xff] %v8862_v4  ;;  %v543_v8 = vshll.u32 %v6155_v53, 16  ;;  %v8874_v10 = vld [vmem:[%s8775_s14 + $0x40] sm:$0xf]  ;;  %v8877_v11 = vld [vmem:[%s8775_s14 + $0x44] sm:$0x1]  ;;  %v8880_v12 = vsel %vm745_vm1, %v752_v60, %v753_v63 }
  0x4a   : > { %6555 = vmatprep.subr.bf16.mxu0 %v8256_v15  ;;  %7395 = vmatprep.subr.bf16.mxu1 %v8257_v16  ;;  %11399 = vst [vmem:[#allocation22_spill] sm:$0xff] %v8874_v10  ;;  %11400 = vst [vmem:[#allocation23_spill] sm:$0xff] %v8877_v11  ;;  %v755_v13 = vrot.slane %v8853_v0, 1  ;;  %v756_v14 = vrot.slane %v6156_v1, 1  ;;  %v8885_v15 = vcombine.low %v8859_v3, %v8859_v3  ;;  %v550_v29 = vshll.u32 %v8853_v0, 16  ;;  %v8290_v42 = vld [vmem:[%s11289_s1 + $0xd0] sm:$0xff]  }
  0x4b   : > { %v8902_v24 = vcombine.low %v8862_v4, %v8874_v10  ;;  %v8906_v28 = vcombine.low %v8877_v11, %v8877_v11  ;;  %v8910_v30 = vld [vmem:[%s8775_s14 + $0x4c] sm:$0xf]  ;;  %v555_v33 = vshll.u32 %v6156_v1, 16  ;;  %v8917_v35 = vld [vmem:[%s8775_s14 + $0x50] sm:$0x1]  ;;  %v8295_v46 = vld [vmem:[%s11289_s1 + $0x118] sm:$0xff]  }
  0x4c   : > { %11402 = vst [vmem:[#allocation25_spill] sm:$0xff] %v8910_v30  ;;  %v8913_v31 = vsel %vm745_vm1, %v755_v13, %v756_v14  ;;  %11403 = vst [vmem:[#allocation26_spill] sm:$0xff] %v8917_v35  ;;  %v552_v40 = vrot.slane %v550_v29, 1  ;;  %v8931_v41 = vcombine.low %v8917_v35, %v8917_v35  ;;  %v8940_v44 = vld [vmem:[%s8775_s14 + $0x58] sm:$0xf]  ;;  %v560_v14 = vshrl.u32 %v8871_v9, 16 }
  0x4d   : > { %6556 = vmatpush3.bf16.msra.mxu0 %v8258_v17  ;;  %7396 = vmatpush3.bf16.msra.mxu1 %v8257_v16  ;;  %v8888_v16 = vsel %vm510_vm0, %v529_v6, %v533_v59  ;;  %v540_v17 = vrot.slane %v538_v7, 1  ;;  %11405 = vst [vmem:[#allocation28_spill] sm:$0xff] %v8940_v44  ;;  %v761_v47 = vrot.slane %v8902_v24, 1  ;;  %v762_v48 = vrot.slane %v8906_v28, 1  ;;  %v8950_v53 = vld [vmem:[%s8775_s14 + $0x5c] sm:$0x1] }
  0x4e   : > { %6557 = vmatprep.subr.bf16.mxu0 %v8259_v18  ;;  %7397 = vmatprep.subr.bf16.mxu1 %v8260_v19  ;;  %v545_v18 = vrot.slane %v543_v8, 1  ;;  %11406 = vst [vmem:[#allocation29_spill] sm:$0xff] %v8950_v53  ;;  %v557_v57 = vrot.slane %v555_v33, 1  ;;  %v562_v59 = vshll.u32 %v8871_v9, 16  ;;  %v8296_v60 = vld [vmem:[%s11289_s1 + $0xd8] sm:$0xff]   ;;  %v765_v63 = vrot.slane %v8931_v41, 1 }
  0x4f   : > { %v8301_v6 = vld [vmem:[%s11289_s1 + $0x120] sm:$0xff]   ;;  %v8975_v7 = vcombine.low %v8950_v53, %v8950_v53  ;;  %v8978_v8 = vld [vmem:[%s8775_s14 + $0x68] sm:$0x1]  ;;  %v8981_v13 = vsel %vm745_vm1, %v761_v47, %v762_v48  ;;  %v9005_v33 = vld [vmem:[%s8775_s14 + $0x6c] sm:$0xf] }
  0x50   : > { %11409 = vst [vmem:[#allocation32_spill] sm:$0xff] %v8978_v8  ;;  %v8998_v29 = vcombine.low %v8978_v8, %v8978_v8  ;;  %11410 = vst [vmem:[#allocation33_spill] sm:$0xff] %v9005_v33  ;;  %v9048_v8 = vld [vmem:[%s8775_s14 + $0x88] sm:$0xf] }
  0x51   : > { %6558 = vmatpush3.bf16.msra.mxu0 %v8261_v20  ;;  %7398 = vmatpush3.bf16.msra.mxu1 %v8260_v19  ;;  %v758_v19 = vrot.slane %v8871_v9, 1  ;;  %v8289_v20 = vld [vmem:[%s11289_s1 + $0x110] sm:$0xff]   ;;  %11417 = vst [vmem:[#allocation40_spill] sm:$0xff] %v9048_v8  ;;  %v9152_v3 = vld [vmem:[%s8775_s14 + $0xa8] sm:$0xf]  ;;  %v603_v55 = vshll.u32 %v8975_v7, 16 }
  0x52   : > { %6559 = vmatprep.subr.bf16.mxu0 %v8262_v21  ;;  %7399 = vmatprep.subr.bf16.mxu1 %v8263_v22  ;;  %v759_v21 = vrot.slane %v8885_v15, 1  ;;  %11425 = vst [vmem:[#allocation48_spill] sm:$0xff] %v9152_v3 }
  0x55   : > { %6560 = vmatpush3.bf16.msra.mxu0 %v8264_v32  ;;  %7400 = vmatpush3.bf16.msra.mxu1 %v8263_v22  ;;  %v8898_v22 = vld [vmem:[%s8775_s14 + $0x48] sm:$0xf]  ;;  %v548_v32 = vshrl.u32 %v8853_v0, 16 }
  0x56   : > { %6681 = vmatprep.subr.bf16.mxu0 %v8269_v38  ;;  %7721 = vmatprep.subr.bf16.mxu1 %v8269_v38  ;;  %11401 = vst [vmem:[#allocation24_spill] sm:$0xff] %v8898_v22  ;;  %v8921_v36 = vcombine.low %v8898_v22, %v8910_v30  ;;  %v8927_v38 = vsel %vm745_vm1, %v758_v19, %v759_v21  ;;  %v9155_v30 = vld [vmem:[%s8775_s14 + $0xac] sm:$0xf]  ;;  %v9158_v22 = vld [vmem:[%s8775_s14 + $0xb0] sm:$0x1] }
  0x57   : > { %11426 = vst [vmem:[#allocation49_spill] sm:$0xff] %v9155_v30  ;;  %11427 = vst [vmem:[#allocation50_spill] sm:$0xff] %v9158_v22 }
  0x58   : > { %1049 = vmatmul.mubr.bf16.vlgmr.msra.gmra.mrb[0].mxu0 %v8265_v23  ;;  %7402 = vmatmul.mubr.bf16.vlgmr.msra.gmra.mrb[0].mxu1 %v8830_v52  ;;  %v541_v23 = vor.u32 %v540_v17, %v536_v2  ;;  %v764_v58 = vrot.slane %v8921_v36, 1  ;;  %v8965_v2 = vld [vmem:[%s8775_s14 + $0x60] sm:$0xf]  ;;  %v564_v17 = vrot.slane %v562_v59, 1  ;;  %v771_v59 = vrot.slane %v8998_v29, 1 }
  0x59   : > { %6682 = vmatpush3.bf16.msra.mxu0 %v8270_v43  ;;  %7729 = vmatpush3.bf16.msra.mxu1 %v8270_v43  ;;  %v8937_v43 = vld [vmem:[%s8775_s14 + $0x54] sm:$0xf]  ;;  %11407 = vst [vmem:[#allocation30_spill] sm:$0xff] %v8965_v2 }
  0x5a   : > { %7405 = vmatprep.mubr.bf16.mxu1 %v8880_v12  ;;  %6683 = vmatprep.subr.bf16.mxu0 %v8279_v62  ;;  %v8924_v37 = vsel %vm510_vm0, %v541_v23, %v545_v18  ;;  %11404 = vst [vmem:[#allocation27_spill] sm:$0xff] %v8937_v43  ;;  %v8962_v1 = vcombine.low %v8937_v43, %v8940_v44  ;;  %v567_v18 = vshll.u32 %v8885_v15, 16  ;;  %v8302_v15 = vld [vmem:[%s11289_s1 + $0xe0] sm:$0xff]   ;;  %v591_v44 = vshll.u32 %v8931_v41, 16 }
  0x5b   : > { %1056 = vmatprep.mubr.bf16.mxu0 %v8888_v16  ;;  %7722 = vmatprep.subr.bf16.mxu1 %v8279_v62  ;;  %v553_v62 = vor.u32 %v552_v40, %v548_v32  ;;  %v8993_v21 = vsel %vm745_vm1, %v764_v58, %v765_v63  ;;  %v768_v32 = vrot.slane %v8975_v7, 1  ;;  %v9008_v40 = vld [vmem:[%s8775_s14 + $0x70] sm:$0xf]  ;;  %v565_v47 = vor.u32 %v564_v17, %v560_v14  ;;  %v9031_v63 = vld [vmem:[%s8775_s14 + $0x78] sm:$0xf] }
  0x5c   : > { %v767_v23 = vrot.slane %v8962_v1, 1  ;;  %11411 = vst [vmem:[#allocation34_spill] sm:$0xff] %v9008_v40  ;;  %v569_v48 = vrot.slane %v567_v18, 1  ;;  %11413 = vst [vmem:[#allocation36_spill] sm:$0xff] %v9031_v63  ;;  %v9037_v14 = vld [vmem:[%s8775_s14 + $0x80] sm:$0x1] }
  0x5d   : > { %6684 = vmatpush3.bf16.msra.mxu0 %v8280_v5  ;;  %7730 = vmatpush3.bf16.msra.mxu1 %v8280_v5  ;;  %v8968_v5 = vld [vmem:[%s8775_s14 + $0x64] sm:$0xf]  ;;  %11415 = vst [vmem:[#allocation38_spill] sm:$0xff] %v9037_v14  ;;  %v572_v18 = vshrl.u32 %v8902_v24, 16  ;;  %v9069_v35 = vcombine.low %v9037_v14, %v9037_v14  ;;  %v9190_v7 = vld [vmem:[%s8775_s14 + $0xb4] sm:$0xf] }
  0x5e   : > { %6685 = vmatprep.subr.bf16.mxu0 %v8289_v20  ;;  %7723 = vmatprep.subr.bf16.mxu1 %v8289_v20  ;;  %11408 = vst [vmem:[#allocation31_spill] sm:$0xff] %v8968_v5  ;;  %v8987_v19 = vcombine.low %v8965_v2, %v8968_v5  ;;  %v8990_v20 = vsel %vm510_vm0, %v553_v62, %v557_v57  ;;  %v574_v57 = vshll.u32 %v8902_v24, 16  ;;  %11428 = vst [vmem:[#allocation51_spill] sm:$0xff] %v9190_v7 }
  0x5f   : > { %v9028_v62 = vcombine.low %v9005_v33, %v9008_v40  ;;  %v8309_v40 = vld [vmem:[%s11289_s1 + $0x130] sm:$0xff]   ;;  %v9054_v33 = vsel %vm745_vm1, %v767_v23, %v768_v32  ;;  %v9057_v5 = vsel %vm510_vm0, %v565_v47, %v569_v48  ;;  %v9072_v23 = vld [vmem:[%s8775_s14 + $0x8c] sm:$0x1]  ;;  %v586_v48 = vshll.u32 %v8921_v36, 16 }
  0x60   : > { %1057 = vmatmul.mubr.bf16.gmra.mrb[4].mxu0 %v8799_v34  ;;  %7406 = vmatmul.mubr.bf16.gmra.mrb[4].mxu1 %v8913_v31  ;;  %v770_v58 = vrot.slane %v8987_v19, 1  ;;  %11418 = vst [vmem:[#allocation41_spill] sm:$0xff] %v9072_v23  ;;  %v608_v27 = vshrl.u32 %v8987_v19, 16 }
  0x61   : > { %1064 = vmatprep.mubr.bf16.mxu0 %v8924_v37  ;;  %7409 = vmatprep.mubr.bf16.mxu1 %v8927_v38  ;;  %v588_v11 = vrot.slane %v586_v48, 1  ;;  %v8311_v48 = vld [vmem:[%s11289_s1 + $0x138] sm:$0xff]  }
  0x62   : > { %6686 = vmatpush3.bf16.msra.mxu0 %v8290_v42  ;;  %7731 = vmatpush3.bf16.msra.mxu1 %v8290_v42  ;;  %v8303_v42 = vld [vmem:[%s11289_s1 + $0x128] sm:$0xff]   ;;  %v9061_v53 = vsel %vm745_vm1, %v770_v58, %v771_v59  ;;  %v9090_v58 = vld [vmem:[%s8775_s14 + $0x90] sm:$0xf]  ;;  %v9093_v59 = vld [vmem:[%s8775_s14 + $0x94] sm:$0xf] }
  0x63   : > { %7724 = vmatprep.subr.bf16.mxu1 %v8295_v46  ;;  %6687 = vmatprep.subr.bf16.mxu0 %v8295_v46  ;;  %v9016_v46 = vld [vmem:[%s8775_s14 + $0x74] sm:$0x1]  ;;  %11419 = vst [vmem:[#allocation42_spill] sm:$0xff] %v9090_v58  ;;  %11420 = vst [vmem:[#allocation43_spill] sm:$0xff] %v9093_v59 }
  0x64   : > { %11412 = vst [vmem:[#allocation35_spill] sm:$0xff] %v9016_v46  ;;  %v9041_v17 = vcombine.low %v9016_v46, %v9016_v46  ;;  %v579_v46 = vshll.u32 %v8906_v28, 16  ;;  %v773_v28 = vrot.slane %v9028_v62, 1 }
  0x66   : > { %7732 = vmatpush3.bf16.msra.mxu1 %v8296_v60  ;;  %6688 = vmatpush3.bf16.msra.mxu0 %v8296_v60  ;;  %v8304_v60 = vld [vmem:[%s11289_s1 + $0xe8] sm:$0xff]   ;;  %v774_v47 = vrot.slane %v9041_v17, 1  ;;  %v581_v14 = vrot.slane %v579_v46, 1  ;;  %v9108_v46 = vcombine.low %v9090_v58, %v9093_v59  ;;  %v9138_v58 = vld [vmem:[%s8775_s14 + $0xa4] sm:$0x1] }
  0x67   : > { %7725 = vmatprep.subr.bf16.mxu1 %v8301_v6  ;;  %6689 = vmatprep.subr.bf16.mxu0 %v8301_v6  ;;  %v9034_v6 = vld [vmem:[%s8775_s14 + $0x7c] sm:$0xf]  ;;  %11424 = vst [vmem:[#allocation47_spill] sm:$0xff] %v9138_v58  ;;  %v6166_v10 = vcombine.low %v9138_v58, %v9138_v58 }
  0x68   : > { %1065 = vmatmul.mubr.bf16.gmra.mrb[8].mxu0 %v8824_v50  ;;  %7410 = vmatmul.mubr.bf16.gmra.mrb[8].mxu1 %v8981_v13  ;;  %11414 = vst [vmem:[#allocation37_spill] sm:$0xff] %v9034_v6  ;;  %v9065_v2 = vcombine.low %v9031_v63, %v9034_v6  ;;  %v8310_v6 = vld [vmem:[%s11289_s1 + $0xf0] sm:$0xff]   ;;  %v584_v63 = vshrl.u32 %v8921_v36, 16 }
  0x69   : > { %1072 = vmatprep.mubr.bf16.mxu0 %v8990_v20  ;;  %7413 = vmatprep.mubr.bf16.mxu1 %v8993_v21 }
  0x6a   : > { %7733 = vmatpush3.bf16.msra.mxu1 %v8302_v15  ;;  %6690 = vmatpush3.bf16.msra.mxu0 %v8302_v15  ;;  %v9045_v15 = vld [vmem:[%s8775_s14 + $0x84] sm:$0xf] }
  0x6b   : > { %7726 = vmatprep.subr.bf16.mxu1 %v8303_v42  ;;  %6691 = vmatprep.subr.bf16.mxu0 %v8303_v42  ;;  %11416 = vst [vmem:[#allocation39_spill] sm:$0xff] %v9045_v15  ;;  %v576_v42 = vrot.slane %v574_v57, 1  ;;  %v9077_v32 = vcombine.low %v9045_v15, %v9048_v8  ;;  %v9087_v57 = vcombine.low %v9072_v23, %v9072_v23  ;;  %v776_v8 = vrot.slane %v9065_v2, 1 }
  0x6c   : > { %v777_v15 = vrot.slane %v9069_v35, 1 }
  0x6d   : > { %v779_v23 = vrot.slane %v9077_v32, 1  ;;  %v780_v43 = vrot.slane %v9087_v57, 1  ;;  %v646_v26 = vshll.u32 %v9077_v32, 16 }
  0x6e   : > { %7734 = vmatpush3.bf16.msra.mxu1 %v8304_v60  ;;  %6692 = vmatpush3.bf16.msra.mxu0 %v8304_v60  ;;  %v577_v60 = vor.u32 %v576_v42, %v572_v18  ;;  %v9115_v42 = vsel %vm745_vm1, %v773_v28, %v774_v47  ;;  %v9125_v59 = vsel %vm745_vm1, %v776_v8, %v777_v15  ;;  %v8312_v28 = vld [vmem:[%s11289_s1 + $0xf8] sm:$0xff]   ;;  %v9135_v47 = vld [vmem:[%s8775_s14 + $0xa0] sm:$0xf]  ;;  %v593_v8 = vrot.slane %v591_v44, 1 }
  0x6f   : > { %7727 = vmatprep.subr.bf16.mxu1 %v8309_v40  ;;  %6693 = vmatprep.subr.bf16.mxu0 %v8309_v40  ;;  %v9096_v40 = vld [vmem:[%s8775_s14 + $0x98] sm:$0x1]  ;;  %11423 = vst [vmem:[#allocation46_spill] sm:$0xff] %v9135_v47  ;;  %v9168_v4 = vsel %vm745_vm1, %v779_v23, %v780_v43 }
  0x70   : > { %1073 = vmatmul.mubr.bf16.gmra.mrb[12].mxu0 %v8853_v0  ;;  %7414 = vmatmul.mubr.bf16.gmra.mrb[12].mxu1 %v9054_v33  ;;  %11421 = vst [vmem:[#allocation44_spill] sm:$0xff] %v9096_v40  ;;  %v9112_v18 = vcombine.low %v9096_v40, %v9096_v40  ;;  %v9122_v41 = vsel %vm510_vm0, %v577_v60, %v581_v14  ;;  %v9128_v40 = vld [vmem:[%s8775_s14 + $0x9c] sm:$0xf]  ;;  %v782_v14 = vrot.slane %v9108_v46, 1  ;;  %v9147_v60 = vld [vmem:[%s11289_s1 + $0x140] sm:$0xff]  }
  0x71   : > { %1080 = vmatprep.mubr.bf16.mxu0 %v9057_v5  ;;  %7417 = vmatprep.mubr.bf16.mxu1 %v9061_v53  ;;  %11422 = vst [vmem:[#allocation45_spill] sm:$0xff] %v9128_v40  ;;  %v9162_v44 = vcombine.low %v9128_v40, %v9135_v47  ;;  %v9178_v47 = vcombine.low %v9158_v22, %v9158_v22  ;;  %v9200_v22 = vld [vmem:[%s8775_s14 + $0xbc] sm:$0x1]  ;;  %v610_v40 = vshll.u32 %v8987_v19, 16 }
  0x72   : > { %7735 = vmatpush3.bf16.msra.mxu1 %v8310_v6  ;;  %6694 = vmatpush3.bf16.msra.mxu0 %v8310_v6  ;;  %v598_v6 = vshll.u32 %v8962_v1, 16  ;;  %v783_v15 = vrot.slane %v9112_v18, 1  ;;  %11430 = vst [vmem:[#allocation53_spill] sm:$0xff] %v9200_v22  ;;  %v663_v25 = vshll.u32 %v9112_v18, 16  ;;  %v8322_v18 = vld [vmem:[%s11289_s1 + $0x178] sm:$0xff]  }
  0x73   : > { %7728 = vmatprep.subr.bf16.mxu1 %v8311_v48  ;;  %6695 = vmatprep.subr.bf16.mxu0 %v8311_v48  ;;  %v589_v48 = vor.u32 %v588_v11, %v584_v63  ;;  %v596_v11 = vshrl.u32 %v8962_v1, 16  ;;  %v785_v23 = vrot.slane %v9162_v44, 1  ;;  %v670_v61 = vshll.u32 %v9162_v44, 16 }
  0x74   : > { %v600_v63 = vrot.slane %v598_v6, 1  ;;  %v9184_v43 = vsel %vm745_vm1, %v782_v14, %v783_v15  ;;  %v786_v6 = vrot.slane %v6166_v10, 1  ;;  %v789_v15 = vrot.slane %v9178_v47, 1 }
  0x75   : > { %v9181_v58 = vsel %vm510_vm0, %v589_v48, %v593_v8  ;;  %v605_v48 = vrot.slane %v603_v55, 1  ;;  %v6168_v55 = vcombine.low %v9200_v22, %v9200_v22 }
  0x76   : > { %7736 = vmatpush3.bf16.msra.mxu1 %v8312_v28  ;;  %6696 = vmatpush3.bf16.msra.mxu0 %v8312_v28  ;;  %v9174_v28 = vcombine.low %v9152_v3, %v9155_v30  ;;  %v9193_v30 = vld [vmem:[%s8775_s14 + $0xb8] sm:$0xf]  ;;  %v601_v8 = vor.u32 %v600_v63, %v596_v11  ;;  %v8323_v3 = vld [vmem:[%s11289_s1 + $0x1c0] sm:$0xff]   ;;  %v615_v11 = vshll.u32 %v8998_v29, 16  ;;  %v675_v63 = vshll.u32 %v6166_v10, 16 }
  0x77   : > { %7433 = vmatprep.subr.bf16.mxu1 %v9147_v60  ;;  %11429 = vst [vmem:[#allocation52_spill] sm:$0xff] %v9193_v30  ;;  %v9209_v56 = vcombine.low %v9190_v7, %v9193_v30  ;;  %6817 = vmatprep.subr.bf16.mxu0 %v8323_v3  ;;  %v9215_v54 = vsel %vm745_vm1, %v785_v23, %v786_v6  ;;  %v612_v30 = vrot.slane %v610_v40, 1  ;;  %v668_v3 = vshrl.u32 %v9162_v44, 16 }
  0x78   : > { %1081 = vmatmul.mubr.bf16.gmra.mrb[16].mxu0 %v8871_v9  ;;  %7418 = vmatmul.mubr.bf16.gmra.mrb[16].mxu1 %v9115_v42  ;;  %v788_v14 = vrot.slane %v9174_v28, 1  ;;  %v9218_v51 = vsel %vm510_vm0, %v601_v8, %v605_v48  ;;  %v672_v7 = vrot.slane %v670_v61, 1  ;;  %v792_v10 = vrot.slane %v6168_v55, 1 }
  0x79   : > { %1088 = vmatprep.mubr.bf16.mxu0 %v9122_v41  ;;  %7421 = vmatprep.mubr.bf16.mxu1 %v9125_v59  ;;  %v791_v22 = vrot.slane %v9209_v56, 1  ;;  %v617_v29 = vrot.slane %v615_v11, 1  ;;  %v677_v23 = vrot.slane %v675_v63, 1  ;;  %v622_v6 = vshll.u32 %v9028_v62, 16 }
  0x7a   : > { %v9221_v49 = vsel %vm745_vm1, %v788_v14, %v789_v15  ;;  %v613_v8 = vor.u32 %v612_v30, %v608_v27  ;;  %v673_v40 = vor.u32 %v672_v7, %v668_v3  ;;  %v627_v48 = vshll.u32 %v9041_v17, 16 }
  0x7b   : > { %v682_v61 = vshll.u32 %v9174_v28, 16  ;;  %v9234_v14 = vsel %vm745_vm1, %v791_v22, %v792_v10  ;;  %v620_v15 = vshrl.u32 %v9028_v62, 16  ;;  %v680_v11 = vshrl.u32 %v9174_v28, 16  ;;  %v9252_v10 = vld [vmem:[%s8775_s14 + $0xc0] sm:$0xf] }
  0x7c   : > { %v9239_v63 = vsel %vm510_vm0, %v613_v8, %v617_v29  ;;  %v9242_v45 = vsel %vm510_vm0, %v673_v40, %v677_v23  ;;  %v624_v27 = vrot.slane %v622_v6, 1  ;;  %v687_v30 = vshll.u32 %v9178_v47, 16  ;;  %11431 = vst [vmem:[#allocation54_spill] sm:$0xff] %v9252_v10  ;;  %v9255_v23 = vld [vmem:[%s8775_s14 + $0xc4] sm:$0xf]  ;;  %v8314_v40 = vld [vmem:[%s11289_s1 + $0x148] sm:$0xff]  }
  0x7d   : > { %v629_v17 = vrot.slane %v627_v48, 1  ;;  %v684_v7 = vrot.slane %v682_v61, 1  ;;  %v634_v22 = vshll.u32 %v9065_v2, 16  ;;  %v639_v3 = vshll.u32 %v9069_v35, 16  ;;  %11432 = vst [vmem:[#allocation55_spill] sm:$0xff] %v9255_v23 }
  0x7e   : > { %v625_v29 = vor.u32 %v624_v27, %v620_v15  ;;  %v689_v6 = vrot.slane %v687_v30, 1  ;;  %v694_v8 = vshll.u32 %v9209_v56, 16  ;;  %v632_v35 = vshrl.u32 %v9065_v2, 16 }
  0x7f   : > { %v685_v47 = vor.u32 %v684_v7, %v680_v11  ;;  %v692_v48 = vshrl.u32 %v9209_v56, 16  ;;  %v699_v61 = vshll.u32 %v6168_v55, 16  ;;  %v9265_v39 = vcombine.low %v9252_v10, %v9255_v23  ;;  %v8315_v55 = vld [vmem:[%s11289_s1 + $0x150] sm:$0xff]   ;;  %v9280_v23 = vld [vmem:[%s8775_s14 + $0xc8] sm:$0x1] }
  0x80   : > { %1089 = vmatmul.mubr.bf16.gmra.mrb[20].mxu0 %v8902_v24  ;;  %7422 = vmatmul.mubr.bf16.gmra.mrb[20].mxu1 %v9168_v4  ;;  %v9268_v15 = vsel %vm510_vm0, %v625_v29, %v629_v17  ;;  %v636_v11 = vrot.slane %v634_v22, 1  ;;  %v641_v27 = vrot.slane %v639_v3, 1  ;;  %v696_v7 = vrot.slane %v694_v8, 1  ;;  %11433 = vst [vmem:[#allocation56_spill] sm:$0xff] %v9280_v23 }
  0x81   : > { %1096 = vmatprep.mubr.bf16.mxu0 %v9181_v58  ;;  %7425 = vmatprep.mubr.bf16.mxu1 %v9184_v43  ;;  %v9271_v30 = vsel %vm510_vm0, %v685_v47, %v689_v6  ;;  %v701_v17 = vrot.slane %v699_v61, 1  ;;  %v706_v22 = vshll.u32 %v9265_v39, 16  ;;  %v9288_v47 = vcombine.low %v9280_v23, %v9280_v23 }
  0x82   : > { %v637_v3 = vor.u32 %v636_v11, %v632_v35  ;;  %v697_v29 = vor.u32 %v696_v7, %v692_v48  ;;  %v644_v8 = vshrl.u32 %v9077_v32, 16  ;;  %v648_v61 = vrot.slane %v646_v26, 1  ;;  %v8317_v26 = vld [vmem:[%s11289_s1 + $0x160] sm:$0xff]  }
  0x83   : > { %v651_v10 = vshll.u32 %v9087_v57, 16  ;;  %v704_v48 = vshrl.u32 %v9265_v39, 16  ;;  %v708_v11 = vrot.slane %v706_v22, 1  ;;  %v658_v7 = vshll.u32 %v9108_v46, 16 }
  0x84   : > { %v9294_v6 = vsel %vm510_vm0, %v637_v3, %v641_v27  ;;  %v9299_v35 = vsel %vm510_vm0, %v697_v29, %v701_v17  ;;  %v649_v57 = vor.u32 %v648_v61, %v644_v8  ;;  %v656_v29 = vshrl.u32 %v9108_v46, 16 }
  0x85   : > { %v653_v27 = vrot.slane %v651_v10, 1  ;;  %v709_v17 = vor.u32 %v708_v11, %v704_v48  ;;  %v660_v23 = vrot.slane %v658_v7, 1  ;;  %v665_v61 = vrot.slane %v663_v25, 1  ;;  %v8324_v25 = vld [vmem:[%s11289_s1 + $0x200] sm:$0xff]   ;;  %v8329_v11 = vld [vmem:[%s11289_s1 + $0x218] sm:$0xff]  }
  0x86   : > { %v8325_v7 = vld [vmem:[%s11289_s1 + $0x180] sm:$0xff]  }
  0x87   : > { %v9315_v3 = vsel %vm510_vm0, %v649_v57, %v653_v27  ;;  %v661_v8 = vor.u32 %v660_v23, %v656_v29  ;;  %v8326_v23 = vld [vmem:[%s11289_s1 + $0x208] sm:$0xff]   ;;  %v8334_v57 = vld [vmem:[%s11289_s1 + $0x230] sm:$0xff]   ;;  %v8336_v27 = vld [vmem:[%s11289_s1 + $0x238] sm:$0xff]  }
  0x88   : > { %1097 = vmatmul.mubr.bf16.gmra.mrb[24].mxu0 %v8921_v36  ;;  %7426 = vmatmul.mubr.bf16.gmra.mrb[24].mxu1 %v9215_v54  ;;  %v8338_v29 = vld [vmem:[%s11289_s1 + $0x198] sm:$0xff]  }
  0x89   : > { %1104 = vmatprep.mubr.bf16.mxu0 %v9218_v51  ;;  %7429 = vmatprep.mubr.bf16.mxu1 %v9221_v49  ;;  %v9333_v48 = vsel %vm510_vm0, %v661_v8, %v665_v61  ;;  %v8340_v8 = vld [vmem:[%s11289_s1 + $0x1a0] sm:$0xff]   ;;  %v8341_v61 = vld [vmem:[%s11289_s1 + $0x1e8] sm:$0xff]  }
  0x90   : > { %1105 = vmatmul.mubr.bf16.gmra.mrb[28].mxu0 %v8962_v1  ;;  %7430 = vmatmul.mubr.bf16.gmra.mrb[28].mxu1 %v9234_v14 }
  0x91   : > { %1112 = vmatprep.mubr.bf16.mxu0 %v9239_v63  ;;  %1691 = vmatprep.mubr.bf16.mxu1 %v9242_v45 }
  0x98   : > { %1113 = vmatmul.mubr.bf16.gmra.mrb[32].mxu0 %v8987_v19  ;;  %1692 = vmatmul.mubr.bf16.vlgmr.msra.gmra.mrb[32].mxu1 %v9162_v44 }
  0x99   : > { %7434 = vmatpush3.bf16.msra.mxu1 %v9147_v60  ;;  %1120 = vmatprep.mubr.bf16.mxu0 %v9268_v15  ;;  %v8316_v60 = vld [vmem:[%s11289_s1 + $0x158] sm:$0xff]  }
  0x9a   : > { %7435 = vmatprep.subr.bf16.mxu1 %v8314_v40  ;;  %1699 = vmatprep.mubr.bf16.mxu1 %v9271_v30 }
  0x9d   : > { %7436 = vmatpush3.bf16.msra.mxu1 %v8314_v40  ;;  %v711_v40 = vshll.u32 %v9288_v47, 16 }
  0x9e   : > { %7437 = vmatprep.subr.bf16.mxu1 %v8315_v55 }
  0x9f   : > { %v713_v22 = vrot.slane %v711_v40, 1  ;;  %v8331_v40 = vld [vmem:[%s11289_s1 + $0x220] sm:$0xff]  }
  0xa0   : > { %1121 = vmatmul.mubr.bf16.gmra.mrb[36].mxu0 %v9028_v62  ;;  %1700 = vmatmul.mubr.bf16.gmra.mrb[36].mxu1 %v9174_v28 }
  0xa1   : > { %7438 = vmatpush3.bf16.msra.mxu1 %v8315_v55  ;;  %1128 = vmatprep.mubr.bf16.mxu0 %v9294_v6  ;;  %v8318_v55 = vld [vmem:[%s11289_s1 + $0x168] sm:$0xff]   ;;  %v9320_v10 = vsel %vm510_vm0, %v709_v17, %v713_v22  ;;  %v8333_v22 = vld [vmem:[%s11289_s1 + $0x1d0] sm:$0xff]  }
  0xa2   : > { %7439 = vmatprep.subr.bf16.mxu1 %v8316_v60  ;;  %1707 = vmatprep.mubr.bf16.mxu1 %v9299_v35  ;;  %v8328_v17 = vld [vmem:[%s11289_s1 + $0x1c8] sm:$0xff]  }
  0xa5   : > { %7440 = vmatpush3.bf16.msra.mxu1 %v8316_v60  ;;  %v8321_v60 = vld [vmem:[%s11289_s1 + $0x170] sm:$0xff]  }
  0xa6   : > { %7441 = vmatprep.subr.bf16.mxu1 %v8317_v26 }
  0xa8   : > { %1129 = vmatmul.mubr.bf16.gmra.mrb[40].mxu0 %v9065_v2  ;;  %1708 = vmatmul.mubr.bf16.gmra.mrb[40].mxu1 %v9209_v56 }
  0xa9   : > { %7442 = vmatpush3.bf16.msra.mxu1 %v8317_v26  ;;  %1136 = vmatprep.mubr.bf16.mxu0 %v9315_v3  ;;  %v8332_v26 = vld [vmem:[%s11289_s1 + $0x228] sm:$0xff]  }
  0xaa   : > { %7443 = vmatprep.subr.bf16.mxu1 %v8318_v55  ;;  %1715 = vmatprep.mubr.bf16.mxu1 %v9320_v10 }
  0xad   : > { %7444 = vmatpush3.bf16.msra.mxu1 %v8318_v55  ;;  %v8337_v55 = vld [vmem:[%s11289_s1 + $0x1d8] sm:$0xff]  }
  0xae   : > { %7445 = vmatprep.subr.bf16.mxu1 %v8321_v60 }
  0xb0   : > { %1137 = vmatmul.mubr.bf16.gmra.mrb[44].mxu0 %v9077_v32  ;;  %1716 = vmatmul.mubr.bf16.gmra.mrb[44].mxu1 %v9265_v39 }
  0xb1   : > { %7446 = vmatpush3.bf16.msra.mxu1 %v8321_v60  ;;  %1144 = vmatprep.mubr.bf16.mxu0 %v9333_v48  ;;  %v8339_v60 = vld [vmem:[%s11289_s1 + $0x1e0] sm:$0xff]  }
  0xb2   : > { %7447 = vmatprep.subr.bf16.mxu1 %v8322_v18  ;;  %7449 = vmatprep.mubr.bf16.mxu1 %v8830_v52  ;;  %v8327_v52 = vld [vmem:[%s11289_s1 + $0x210] sm:$0xff]  }
  0xb5   : > { %7448 = vmatpush3.bf16.msra.mxu1 %v8322_v18  ;;  %v794_v18 = vrot.slane %v9265_v39, 1 }
  0xb6   : > { %7481 = vmatprep.subr.bf16.mxu1 %v8324_v25 }
  0xb8   : > { %1145 = vmatmul.mubr.bf16.gmra.mrb[48].mxu0 %v9108_v46  ;;  %7450 = vmatmul.mubr.bf16.vlgmr.msra.gmra.mrb[0].mxu1 %v8880_v12 }
  0xb9   : > { %1152 = vmatprep.mubr.bf16.mxu0 %v9242_v45  ;;  %7453 = vmatprep.mubr.bf16.mxu1 %v8913_v31 }
  0xba   : > { %7482 = vmatpush3.bf16.msra.mxu1 %v8324_v25  ;;  %v795_v25 = vrot.slane %v9288_v47, 1  ;;  %v8345_v47 = vld [vmem:[%s11289_s1 + $0x1f8] sm:$0xff]  }
  0xbb   : > { %7483 = vmatprep.subr.bf16.mxu1 %v8326_v23 }
  0xbe   : > { %7484 = vmatpush3.bf16.msra.mxu1 %v8326_v23  ;;  %v8342_v23 = vld [vmem:[%s11289_s1 + $0x1a8] sm:$0xff]  }
  0xbf   : > { %7485 = vmatprep.subr.bf16.mxu1 %v8327_v52 }
  0xc0   : > { %1153 = vmatmul.mubr.bf16.gmra.mrb[52].mxu0 %v9162_v44  ;;  %7454 = vmatmul.mubr.bf16.gmra.mrb[4].mxu1 %v8927_v38 }
  0xc1   : > { %1160 = vmatprep.mubr.bf16.mxu0 %v9271_v30  ;;  %7457 = vmatprep.mubr.bf16.mxu1 %v8981_v13 }
  0xc2   : > { %7486 = vmatpush3.bf16.msra.mxu1 %v8327_v52  ;;  %v8343_v52 = vld [vmem:[%s11289_s1 + $0x1f0] sm:$0xff]  }
  0xc3   : > { %7487 = vmatprep.subr.bf16.mxu1 %v8329_v11 }
  0xc6   : > { %7488 = vmatpush3.bf16.msra.mxu1 %v8329_v11  ;;  %v796_v11 = vsel %vm745_vm1, %v794_v18, %v795_v25 }
  0xc7   : > { %7489 = vmatprep.subr.bf16.mxu1 %v8331_v40 }
  0xc8   : > { %1161 = vmatmul.mubr.bf16.gmra.mrb[56].mxu0 %v9174_v28  ;;  %7458 = vmatmul.mubr.bf16.gmra.mrb[8].mxu1 %v8993_v21 }
  0xc9   : > { %1168 = vmatprep.mubr.bf16.mxu0 %v9299_v35  ;;  %7461 = vmatprep.mubr.bf16.mxu1 %v9054_v33 }
  0xca   : > { %7490 = vmatpush3.bf16.msra.mxu1 %v8331_v40  ;;  %v8344_v40 = vld [vmem:[%s11289_s1 + $0x1b0] sm:$0xff]  }
  0xcb   : > { %7491 = vmatprep.subr.bf16.mxu1 %v8332_v26 }
  0xce   : > { %7492 = vmatpush3.bf16.msra.mxu1 %v8332_v26  ;;  %v8346_v26 = vld [vmem:[%s11289_s1 + $0x1b8] sm:$0xff]  }
  0xcf   : > { %7493 = vmatprep.subr.bf16.mxu1 %v8334_v57 }
  0xd0   : > { %1169 = vmatmul.mubr.bf16.gmra.mrb[60].mxu0 %v9209_v56  ;;  %7462 = vmatmul.mubr.bf16.gmra.mrb[12].mxu1 %v9061_v53 }
  0xd1   : > { %1595 = vmatprep.mubr.bf16.mxu0 %v8888_v16  ;;  %7465 = vmatprep.mubr.bf16.mxu1 %v9115_v42  ;;  %v8330_v16 = vld [vmem:[%s11289_s1 + $0x188] sm:$0xff]  }
  0xd2   : > { %7494 = vmatpush3.bf16.msra.mxu1 %v8334_v57 }
  0xd3   : > { %7495 = vmatprep.subr.bf16.mxu1 %v8336_v27 }
  0xd6   : > { %7496 = vmatpush3.bf16.msra.mxu1 %v8336_v27 }
  0xd8   : > { %1596 = vmatmul.mubr.bf16.vlgmr.msra.gmra.mrb[64].mxu0 %v8799_v34  ;;  %7466 = vmatmul.mubr.bf16.gmra.mrb[16].mxu1 %v9125_v59  ;;  %v8335_v34 = vld [vmem:[%s11289_s1 + $0x190] sm:$0xff]  }
  0xd9   : > { %6818 = vmatpush3.bf16.msra.mxu0 %v8325_v7  ;;  %1603 = vmatprep.mubr.bf16.mxu0 %v8924_v37 }
  0xda   : > { %7469 = vmatprep.mubr.bf16.mxu1 %v9168_v4  ;;  %6819 = vmatprep.subr.bf16.mxu0 %v8328_v17 }
  0xdd   : > { %6820 = vmatpush3.bf16.msra.mxu0 %v8330_v16 }
  0xde   : > { %6821 = vmatprep.subr.bf16.mxu0 %v8333_v22 }
  0xe0   : > { %1604 = vmatmul.mubr.bf16.gmra.mrb[68].mxu0 %v8824_v50  ;;  %7470 = vmatmul.mubr.bf16.gmra.mrb[20].mxu1 %v9184_v43 }
  0xe1   : > { %1611 = vmatprep.mubr.bf16.mxu0 %v8990_v20  ;;  %7473 = vmatprep.mubr.bf16.mxu1 %v9215_v54 }
  0xe2   : > { %6822 = vmatpush3.bf16.msra.mxu0 %v8335_v34 }
  0xe3   : > { %6823 = vmatprep.subr.bf16.mxu0 %v8337_v55 }
  0xe6   : > { %6824 = vmatpush3.bf16.msra.mxu0 %v8338_v29 }
  0xe7   : > { %6825 = vmatprep.subr.bf16.mxu0 %v8339_v60 }
  0xe8   : > { %1612 = vmatmul.mubr.bf16.gmra.mrb[72].mxu0 %v8853_v0  ;;  %7474 = vmatmul.mubr.bf16.gmra.mrb[24].mxu1 %v9221_v49 }
  0xe9   : > { %1619 = vmatprep.mubr.bf16.mxu0 %v9057_v5  ;;  %7477 = vmatprep.mubr.bf16.mxu1 %v9234_v14 }
  0xea   : > { %6826 = vmatpush3.bf16.msra.mxu0 %v8340_v8 }
  0xeb   : > { %6827 = vmatprep.subr.bf16.mxu0 %v8341_v61 }
  0xee   : > { %6828 = vmatpush3.bf16.msra.mxu0 %v8342_v23 }
  0xef   : > { %6829 = vmatprep.subr.bf16.mxu0 %v8343_v52 }
  0xf0   : > { %1620 = vmatmul.mubr.bf16.gmra.mrb[76].mxu0 %v8871_v9  ;;  %7478 = vmatmul.mubr.bf16.gmra.mrb[28].mxu1 %v796_v11 }
  0xf1   : > { %1627 = vmatprep.mubr.bf16.mxu0 %v9122_v41  ;;  %7497 = vmatprep.mubr.bf16.mxu1 %v8880_v12  ;;  %v9467_v12 = vld [vmem:[%s8775_s14 + $0xcc] sm:$0xff]  }
  0xf2   : > { %6830 = vmatpush3.bf16.msra.mxu0 %v8344_v40 }
  0xf3   : > { %6831 = vmatprep.subr.bf16.mxu0 %v8345_v47 }
  0xf6   : > { %6832 = vmatpush3.bf16.msra.mxu0 %v8346_v26 }
  0xf8   : > { %1628 = vmatmul.mubr.bf16.gmra.mrb[80].mxu0 %v8902_v24  ;;  %7498 = vmatmul.mubr.bf16.vlgmr.msra.gmra.mrb[0].mxu1 %v8913_v31  ;;  %v9470_v31 = vld [vmem:[%s8775_s14 + $0xd4] ss:$0 sps:$4 sm:$0x11]  }
  0xf9   : > { %1635 = vmatprep.mubr.bf16.mxu0 %v9181_v58  ;;  %7501 = vmatprep.mubr.bf16.mxu1 %v8927_v38  ;;  %v798_v38 = vrot.slane %v9470_v31, 1 }
 0x100   : > { %1636 = vmatmul.mubr.bf16.gmra.mrb[84].mxu0 %v8921_v36  ;;  %7502 = vmatmul.mubr.bf16.gmra.mrb[4].mxu1 %v8981_v13 }
 0x101   : > { %1643 = vmatprep.mubr.bf16.mxu0 %v9218_v51  ;;  %7505 = vmatprep.mubr.bf16.mxu1 %v8993_v21 }
 0x108   : > { %1644 = vmatmul.mubr.bf16.gmra.mrb[88].mxu0 %v8962_v1  ;;  %7506 = vmatmul.mubr.bf16.gmra.mrb[8].mxu1 %v9054_v33 }
 0x109   : > { %1651 = vmatprep.mubr.bf16.mxu0 %v9239_v63  ;;  %7509 = vmatprep.mubr.bf16.mxu1 %v9061_v53 }
 0x110   : > { %1652 = vmatmul.mubr.bf16.gmra.mrb[92].mxu0 %v8987_v19  ;;  %7510 = vmatmul.mubr.bf16.gmra.mrb[12].mxu1 %v9115_v42 }
 0x111   : > { %1659 = vmatprep.mubr.bf16.mxu0 %v9268_v15  ;;  %7513 = vmatprep.mubr.bf16.mxu1 %v9125_v59 }
 0x118   : > { %1660 = vmatmul.mubr.bf16.gmra.mrb[96].mxu0 %v9028_v62  ;;  %7514 = vmatmul.mubr.bf16.gmra.mrb[16].mxu1 %v9168_v4  ;;  %v797_v4 = vrot.slane %v9467_v12, 1 }
 0x119   : > { %1667 = vmatprep.mubr.bf16.mxu0 %v9294_v6  ;;  %7517 = vmatprep.mubr.bf16.mxu1 %v9184_v43 }
 0x11a   : > { %v799_v21 = vsel %vm745_vm1, %v797_v4, %v798_v38 }
 0x120   : > { %1668 = vmatmul.mubr.bf16.gmra.mrb[100].mxu0 %v9065_v2  ;;  %7518 = vmatmul.mubr.bf16.gmra.mrb[20].mxu1 %v9215_v54 }
 0x121   : > { %1675 = vmatprep.mubr.bf16.mxu0 %v9315_v3  ;;  %7521 = vmatprep.mubr.bf16.mxu1 %v9221_v49 }
 0x128   : > { %1676 = vmatmul.mubr.bf16.gmra.mrb[104].mxu0 %v9077_v32  ;;  %7522 = vmatmul.mubr.bf16.gmra.mrb[24].mxu1 %v9234_v14 }
 0x129   : > { %1683 = vmatprep.mubr.bf16.mxu0 %v9333_v48  ;;  %7525 = vmatprep.mubr.bf16.mxu1 %v796_v11 }
 0x12b   : > { %v6561_v54 = vpop.f32.mrb[0].mxu0 }
 0x12c   : > { %v6562_v53 = vpop.f32.mrb[1].mxu0 }
 0x12d   : > { %v9477_v13 = vadd.f32 %v6562_v53, %v6561_v54  ;;  %v6564_v49 = vpop.f32.mrb[2].mxu0 }
 0x12e   : > { %v6565_v33 = vpop.f32.mrb[3].mxu0 }
 0x12f   : > { %v9480_v59 = vadd.f32 %v6565_v33, %v6564_v49 }
 0x130   : > { %1684 = vmatmul.mubr.bf16.gmra.mrb[108].mxu0 %v9108_v46  ;;  %7526 = vmatmul.mubr.bf16.gmra.mrb[28].mxu1 %v799_v21 }
 0x131   : > { %2142 = vmatprep.mubr.bf16.mxu0 %v8924_v37 }
 0x133   : > { %v6567_v42 = vpop.f32.mrb[4].mxu0 }
 0x134   : > { %v6568_v43 = vpop.f32.mrb[5].mxu0 }
 0x135   : > { %v9484_v14 = vadd.f32 %v6568_v43, %v6567_v42  ;;  %v6570_v57 = vpop.f32.mrb[6].mxu0 }
 0x136   : > { %v6571_v27 = vpop.f32.mrb[7].mxu0 }
 0x137   : > { %v9486_v7 = vadd.f32 %v6571_v27, %v6570_v57 }
 0x138   : > { %2143 = vmatmul.mubr.bf16.vlgmr.msra.gmra.mrb[112].mxu0 %v8824_v50 }
 0x139   : > { %2150 = vmatprep.mubr.bf16.mxu0 %v8990_v20 }
 0x13b   : > { %v6573_v17 = vpop.f32.mrb[8].mxu0 }
 0x13c   : > { %v6574_v16 = vpop.f32.mrb[9].mxu0 }
 0x13d   : > { %v9490_v22 = vadd.f32 %v6574_v16, %v6573_v17  ;;  %v6576_v34 = vpop.f32.mrb[10].mxu0 }
 0x13e   : > { %v6577_v55 = vpop.f32.mrb[11].mxu0 }
 0x13f   : > { %v9492_v29 = vadd.f32 %v6577_v55, %v6576_v34 }
 0x140   : > { %2151 = vmatmul.mubr.bf16.gmra.mrb[116].mxu0 %v8853_v0 }
 0x141   : > { %2158 = vmatprep.mubr.bf16.mxu0 %v9057_v5 }
 0x143   : > { %v6579_v37 = vpop.f32.mrb[12].mxu0 }
 0x144   : > { %v6580_v60 = vpop.f32.mrb[13].mxu0 }
 0x145   : > { %v9496_v8 = vadd.f32 %v6580_v60, %v6579_v37  ;;  %v6582_v61 = vpop.f32.mrb[14].mxu0 }
 0x146   : > { %v6583_v50 = vpop.f32.mrb[15].mxu0 }
 0x147   : > { %v9498_v18 = vadd.f32 %v6583_v50, %v6582_v61 }
 0x148   : > { %2159 = vmatmul.mubr.bf16.gmra.mrb[120].mxu0 %v8871_v9 }
 0x149   : > { %2166 = vmatprep.mubr.bf16.mxu0 %v9122_v41 }
 0x14b   : > { %v6585_v20 = vpop.f32.mrb[16].mxu0 }
 0x14c   : > { %v6586_v25 = vpop.f32.mrb[17].mxu0 }
 0x14d   : > { %v9502_v23 = vadd.f32 %v6586_v25, %v6585_v20  ;;  %v6588_v52 = vpop.f32.mrb[18].mxu0 }
 0x14e   : > { %v6589_v0 = vpop.f32.mrb[19].mxu0 }
 0x14f   : > { %v9504_v11 = vadd.f32 %v6589_v0, %v6588_v52 }
 0x150   : > { %2167 = vmatmul.mubr.bf16.gmra.mrb[124].mxu0 %v8902_v24 }
 0x151   : > { %2174 = vmatprep.mubr.bf16.mxu0 %v9181_v58 }
 0x153   : > { %v6591_v5 = vpop.f32.mrb[20].mxu0 }
 0x154   : > { %v6592_v40 = vpop.f32.mrb[21].mxu0 }
 0x155   : > { %v9508_v47 = vadd.f32 %v6592_v40, %v6591_v5  ;;  %v6594_v26 = vpop.f32.mrb[22].mxu0 }
 0x156   : > { %v6595_v9 = vpop.f32.mrb[23].mxu0 }
 0x157   : > { %v9510_v4 = vadd.f32 %v6595_v9, %v6594_v26 }
 0x158   : > { %2175 = vmatmul.mubr.bf16.gmra.mrb[128].mxu0 %v8921_v36 }
 0x159   : > { %2182 = vmatprep.mubr.bf16.mxu0 %v9218_v51 }
 0x15b   : > { %v6597_v41 = vpop.f32.mrb[24].mxu0 }
 0x15c   : > { %v6598_v38 = vpop.f32.mrb[25].mxu0 }
 0x15d   : > { %v9514_v54 = vadd.f32 %v6598_v38, %v6597_v41  ;;  %v6600_v53 = vpop.f32.mrb[26].mxu0 }
 0x15e   : > { %v6601_v24 = vpop.f32.mrb[27].mxu0 }
 0x15f   : > { %v9516_v49 = vadd.f32 %v6601_v24, %v6600_v53 }
 0x160   : > { %2183 = vmatmul.mubr.bf16.gmra.mrb[132].mxu0 %v8962_v1 }
 0x161   : > { %2190 = vmatprep.mubr.bf16.mxu0 %v9239_v63 }
 0x163   : > { %v6603_v58 = vpop.f32.mrb[28].mxu0 }
 0x164   : > { %v6604_v21 = vpop.f32.mrb[29].mxu0 }
 0x165   : > { %v9520_v33 = vadd.f32 %v6604_v21, %v6603_v58  ;;  %v6606_v42 = vpop.f32.mrb[30].mxu0 }
 0x166   : > { %v6607_v36 = vpop.f32.mrb[31].mxu0 }
 0x167   : > { %v9522_v43 = vadd.f32 %v6607_v36, %v6606_v42 }
 0x168   : > { %2191 = vmatmul.mubr.bf16.gmra.mrb[136].mxu0 %v8987_v19 }
 0x169   : > { %2198 = vmatprep.mubr.bf16.mxu0 %v9268_v15 }
 0x16b   : > { %v6609_v51 = vpop.f32.mrb[32].mxu0  ;;  %v6769_v57 = vpop.f32.mrb[32].mxu1 }
 0x16c   : > { %v6610_v27 = vpop.f32.mrb[33].mxu0  ;;  %v6770_v17 = vpop.f32.mrb[33].mxu1 }
 0x16d   : > { %v9526_v16 = vadd.f32 %v6610_v27, %v6609_v51  ;;  %v6612_v1 = vpop.f32.mrb[34].mxu0  ;;  %v6771_v63 = vadd.f32 %v6770_v17, %v6769_v57  ;;  %v6772_v34 = vpop.f32.mrb[34].mxu1 }
 0x16e   : > { %v6613_v55 = vpop.f32.mrb[35].mxu0  ;;  %v6773_v37 = vpop.f32.mrb[35].mxu1 }
 0x16f   : > { %v9528_v60 = vadd.f32 %v6613_v55, %v6612_v1  ;;  %v6774_v61 = vadd.f32 %v6773_v37, %v6772_v34 }
 0x170   : > { %2199 = vmatmul.mubr.bf16.gmra.mrb[140].mxu0 %v9028_v62 }
 0x171   : > { %2206 = vmatprep.mubr.bf16.mxu0 %v9294_v6 }
 0x173   : > { %v6615_v19 = vpop.f32.mrb[36].mxu0  ;;  %v6775_v15 = vpop.f32.mrb[36].mxu1 }
 0x174   : > { %v6616_v50 = vpop.f32.mrb[37].mxu0  ;;  %v6776_v20 = vpop.f32.mrb[37].mxu1 }
 0x175   : > { %v9532_v25 = vadd.f32 %v6616_v50, %v6615_v19  ;;  %v6618_v52 = vpop.f32.mrb[38].mxu0  ;;  %v6777_v0 = vadd.f32 %v6776_v20, %v6775_v15  ;;  %v6778_v5 = vpop.f32.mrb[38].mxu1 }
 0x176   : > { %v6619_v40 = vpop.f32.mrb[39].mxu0  ;;  %v6779_v26 = vpop.f32.mrb[39].mxu1 }
 0x177   : > { %v9534_v9 = vadd.f32 %v6619_v40, %v6618_v52  ;;  %v6780_v41 = vadd.f32 %v6779_v26, %v6778_v5  ;;  %v9553_v26 = vld [vmem:[%s11290_s2] ss:$0 sm:$0xff] }
 0x178   : > { %2207 = vmatmul.mubr.bf16.gmra.mrb[144].mxu0 %v9065_v2 }
 0x179   : > { %2214 = vmatprep.mubr.bf16.mxu0 %v9315_v3 }
 0x17b   : > { %v6621_v62 = vpop.f32.mrb[40].mxu0  ;;  %v6781_v6 = vpop.f32.mrb[40].mxu1 }
 0x17c   : > { %v6622_v38 = vpop.f32.mrb[41].mxu0  ;;  %v6782_v53 = vpop.f32.mrb[41].mxu1 }
 0x17d   : > { %v9538_v24 = vadd.f32 %v6622_v38, %v6621_v62  ;;  %v6624_v58 = vpop.f32.mrb[42].mxu0  ;;  %v6783_v21 = vadd.f32 %v6782_v53, %v6781_v6  ;;  %v6784_v42 = vpop.f32.mrb[42].mxu1 }
 0x17e   : > { %v6625_v36 = vpop.f32.mrb[43].mxu0  ;;  %v6785_v51 = vpop.f32.mrb[43].mxu1 }
 0x17f   : > { %v9540_v57 = vadd.f32 %v6625_v36, %v6624_v58  ;;  %v6786_v27 = vadd.f32 %v6785_v51, %v6784_v42 }
 0x180   : > { %2215 = vmatmul.mubr.bf16.gmra.mrb[148].mxu0 %v9077_v32 }
 0x181   : > { %2222 = vmatprep.mubr.bf16.mxu0 %v9333_v48 }
 0x183   : > { %v6627_v2 = vpop.f32.mrb[44].mxu0  ;;  %v6787_v3 = vpop.f32.mrb[44].mxu1 }
 0x184   : > { %v6628_v17 = vpop.f32.mrb[45].mxu0  ;;  %v6788_v1 = vpop.f32.mrb[45].mxu1 }
 0x185   : > { %v9544_v34 = vadd.f32 %v6628_v17, %v6627_v2  ;;  %v6630_v55 = vpop.f32.mrb[46].mxu0  ;;  %v6789_v37 = vadd.f32 %v6788_v1, %v6787_v3  ;;  %v6790_v19 = vpop.f32.mrb[46].mxu1 }
 0x186   : > { %v6631_v15 = vpop.f32.mrb[47].mxu0  ;;  %v6791_v50 = vpop.f32.mrb[47].mxu1 }
 0x187   : > { %v9546_v20 = vadd.f32 %v6631_v15, %v6630_v55  ;;  %v6792_v52 = vadd.f32 %v6791_v50, %v6790_v19 }
 0x188   : > { %2223 = vmatmul.mubr.bf16.gmra.mrb[152].mxu0 %v9108_v46 }
 0x189   : > { %2230 = vmatprep.mubr.bf16.mxu0 %v9242_v45 }
 0x18b   : > { %v6633_v32 = vpop.f32.mrb[48].mxu0 }
 0x18c   : > { %v6634_v48 = vpop.f32.mrb[49].mxu0 }
 0x18d   : > { %v6635_v5 = vadd.f32 %v6634_v48, %v6633_v32  ;;  %v6636_v40 = vpop.f32.mrb[50].mxu0  ;;  %v716_v32 = vshrl.u32 %v9467_v12, 16 }
 0x18e   : > { %v6637_v62 = vpop.f32.mrb[51].mxu0 }
 0x18f   : > { %v7837_v6 = vadd.f32 %v6635_v5, %v9553_v26  ;;  %v6638_v38 = vadd.f32 %v6637_v62, %v6636_v40 }
 0x190   : > { %2231 = vmatmul.mubr.bf16.gmra.mrb[156].mxu0 %v9162_v44 }
 0x191   : > { %v7845_v53 = vadd.f32 %v6638_v38, %v9553_v26  ;;  %v9558_v46 = vadd.f32 %v7837_v6, %v6771_v63  ;;  %2238 = vmatprep.mubr.bf16.mxu0 %v9271_v30  ;;  %v718_v30 = vshll.u32 %v9467_v12, 16 }
 0x193   : > { %11434 = vst [vmem:[#allocation57_spill] sm:$0xff] %v9558_v46  ;;  %v9561_v45 = vadd.f32 %v7845_v53, %v6774_v61  ;;  %v6639_v58 = vpop.f32.mrb[52].mxu0  ;;  %v720_v48 = vrot.slane %v718_v30, 1 }
 0x194   : > { %v6640_v42 = vpop.f32.mrb[53].mxu0 }
 0x195   : > { %11435 = vst [vmem:[#allocation58_spill] sm:$0xff] %v9561_v45  ;;  %v6641_v36 = vadd.f32 %v6640_v42, %v6639_v58  ;;  %v6642_v51 = vpop.f32.mrb[54].mxu0 }
 0x196   : > { %v6643_v2 = vpop.f32.mrb[55].mxu0 }
 0x197   : > { %v7833_v3 = vadd.f32 %v6641_v36, %v9553_v26  ;;  %v6644_v17 = vadd.f32 %v6643_v2, %v6642_v51 }
 0x198   : > { %2239 = vmatmul.mubr.bf16.gmra.mrb[160].mxu0 %v9174_v28  ;;  %v723_v28 = vshll.u32 %v9470_v31, 16 }
 0x199   : > { %v7841_v44 = vadd.f32 %v6644_v17, %v9553_v26  ;;  %v9566_v1 = vadd.f32 %v7833_v3, %v6777_v0  ;;  %2246 = vmatprep.mubr.bf16.mxu0 %v9299_v35  ;;  %v7741_v17 = vadd.f32 %v9477_v13, %v9553_v26 }
 0x19a   : > { %v725_v62 = vrot.slane %v723_v28, 1  ;;  %v7745_v28 = vadd.f32 %v9486_v7, %v9553_v26 }
 0x19b   : > { %11436 = vst [vmem:[#allocation59_spill] sm:$0xff] %v9566_v1  ;;  %v9570_v63 = vadd.f32 %v7841_v44, %v6780_v41  ;;  %v6645_v61 = vpop.f32.mrb[56].mxu0  ;;  %v721_v41 = vor.u32 %v720_v48, %v716_v32 }
 0x19c   : > { %v6646_v55 = vpop.f32.mrb[57].mxu0 }
 0x19d   : > { %11437 = vst [vmem:[#allocation60_spill] sm:$0xff] %v9570_v63  ;;  %v6647_v19 = vadd.f32 %v6646_v55, %v6645_v61  ;;  %v6648_v15 = vpop.f32.mrb[58].mxu0  ;;  %v726_v36 = vsel %vm510_vm0, %v721_v41, %v725_v62  ;;  %v7749_v55 = vadd.f32 %v9480_v59, %v9553_v26  ;;  %v7757_v41 = vadd.f32 %v9490_v22, %v9553_v26 }
 0x19e   : > { %v6649_v50 = vpop.f32.mrb[59].mxu0  ;;  %v7761_v22 = vadd.f32 %v9498_v18, %v9553_v26 }
 0x19f   : > { %v7853_v5 = vadd.f32 %v6647_v19, %v9553_v26  ;;  %v6650_v0 = vadd.f32 %v6649_v50, %v6648_v15  ;;  %v7737_v50 = vadd.f32 %v9484_v14, %v9553_v26  ;;  %v7765_v14 = vadd.f32 %v9492_v29, %v9553_v26 }
 0x1a0   : > { %2247 = vmatmul.mubr.bf16.gmra.mrb[164].mxu0 %v9209_v56 }
 0x1a1   : > { %v7861_v35 = vadd.f32 %v6650_v0, %v9553_v26  ;;  %v9577_v40 = vadd.f32 %v7853_v5, %v6783_v21  ;;  %2254 = vmatprep.mubr.bf16.mxu0 %v9320_v10 }
 0x1a3   : > { %11438 = vst [vmem:[#allocation61_spill] sm:$0xff] %v9577_v40  ;;  %v9580_v6 = vadd.f32 %v7861_v35, %v6786_v27  ;;  %v6651_v38 = vpop.f32.mrb[60].mxu0 }
 0x1a4   : > { %v6652_v53 = vpop.f32.mrb[61].mxu0 }
 0x1a5   : > { %11439 = vst [vmem:[#allocation62_spill] sm:$0xff] %v9580_v6  ;;  %v6653_v58 = vadd.f32 %v6652_v53, %v6651_v38  ;;  %v6654_v42 = vpop.f32.mrb[62].mxu0 }
 0x1a6   : > { %v6655_v31 = vpop.f32.mrb[63].mxu0 }
 0x1a7   : > { %v7849_v51 = vadd.f32 %v6653_v58, %v9553_v26  ;;  %v6656_v56 = vadd.f32 %v6655_v31, %v6654_v42 }
 0x1a8   : > { %2255 = vmatmul.mubr.bf16.gmra.mrb[168].mxu0 %v9265_v39 }
 0x1a9   : > { %v7857_v21 = vadd.f32 %v6656_v56, %v9553_v26  ;;  %v9586_v2 = vadd.f32 %v7849_v51, %v6789_v37  ;;  %2262 = vmatprep.mubr.bf16.mxu0 %v726_v36  ;;  %v7753_v51 = vadd.f32 %v9496_v8, %v9553_v26  ;;  %v7773_v8 = vadd.f32 %v9502_v23, %v9553_v26 }
 0x1ab   : > { %11440 = vst [vmem:[#allocation63_spill] sm:$0xff] %v9586_v2  ;;  %v9588_v10 = vadd.f32 %v7857_v21, %v6792_v52  ;;  %v6697_v27 = vpop.f32.mrb[64].mxu0 }
 0x1ac   : > { %v6698_v3 = vpop.f32.mrb[65].mxu0 }
 0x1ad   : > { %11441 = vst [vmem:[#allocation64_spill] sm:$0xff] %v9588_v10  ;;  %v6699_v44 = vadd.f32 %v6698_v3, %v6697_v27  ;;  %v6700_v30 = vpop.f32.mrb[66].mxu0 }
 0x1ae   : > { %v6701_v61 = vpop.f32.mrb[67].mxu0 }
 0x1af   : > { %v9594_v19 = vadd.f32 %v7741_v17, %v6699_v44  ;;  %v6702_v39 = vadd.f32 %v6701_v61, %v6700_v30 }
 0x1b0   : > { %2263 = vmatmul.mubr.bf16.gmra.mrb[172].mxu0 %v9467_v12 }
 0x1b1   : > { %v9597_v37 = vadd.f32 %v7749_v55, %v6702_v39 }
 0x1b3   : > { %v6703_v52 = vpop.f32.mrb[68].mxu0 }
 0x1b4   : > { %v6704_v15 = vpop.f32.mrb[69].mxu0 }
 0x1b5   : > { %v6705_v32 = vadd.f32 %v6704_v15, %v6703_v52  ;;  %v6706_v13 = vpop.f32.mrb[70].mxu0 }
 0x1b6   : > { %v6707_v48 = vpop.f32.mrb[71].mxu0 }
 0x1b7   : > { %v9603_v5 = vadd.f32 %v7737_v50, %v6705_v32  ;;  %v6708_v59 = vadd.f32 %v6707_v48, %v6706_v13  ;;  %v7781_v32 = vadd.f32 %v9504_v11, %v9553_v26 }
 0x1b9   : > { %v9605_v0 = vadd.f32 %v7745_v28, %v6708_v59 }
 0x1bb   : > { %v6709_v35 = vpop.f32.mrb[72].mxu0 }
 0x1bc   : > { %v6710_v12 = vpop.f32.mrb[73].mxu0 }
 0x1bd   : > { %v6711_v62 = vadd.f32 %v6710_v12, %v6709_v35  ;;  %v6712_v38 = vpop.f32.mrb[74].mxu0 }
 0x1be   : > { %v6713_v53 = vpop.f32.mrb[75].mxu0 }
 0x1bf   : > { %v9611_v58 = vadd.f32 %v7757_v41, %v6711_v62  ;;  %v6714_v42 = vadd.f32 %v6713_v53, %v6712_v38  ;;  %v7769_v41 = vadd.f32 %v9508_v47, %v9553_v26 }
 0x1c1   : > { %v9613_v7 = vadd.f32 %v7765_v14, %v6714_v42  ;;  %v7777_v42 = vadd.f32 %v9510_v4, %v9553_v26 }
 0x1c3   : > { %v6715_v31 = vpop.f32.mrb[76].mxu0 }
 0x1c4   : > { %v6716_v36 = vpop.f32.mrb[77].mxu0 }
 0x1c5   : > { %v6717_v56 = vadd.f32 %v6716_v36, %v6715_v31  ;;  %v6718_v21 = vpop.f32.mrb[78].mxu0 }
 0x1c6   : > { %v6719_v27 = vpop.f32.mrb[79].mxu0 }
 0x1c7   : > { %v9619_v3 = vadd.f32 %v7753_v51, %v6717_v56  ;;  %v6720_v17 = vadd.f32 %v6719_v27, %v6718_v21 }
 0x1c9   : > { %v9621_v29 = vadd.f32 %v7761_v22, %v6720_v17  ;;  %v7789_v22 = vadd.f32 %v9514_v54, %v9553_v26 }
 0x1cb   : > { %v6721_v44 = vpop.f32.mrb[80].mxu0  ;;  %v9623_v30 = vpop.f32.mrb[0].mxu1 }
 0x1cc   : > { %v6722_v61 = vpop.f32.mrb[81].mxu0  ;;  %v9625_v55 = vpop.f32.mrb[1].mxu1 }
 0x1cd   : > { %v6723_v39 = vadd.f32 %v6722_v61, %v6721_v44  ;;  %v6724_v52 = vpop.f32.mrb[82].mxu0  ;;  %v9629_v15 = vpop.f32.mrb[2].mxu1 }
 0x1ce   : > { %v6725_v50 = vpop.f32.mrb[83].mxu0  ;;  %v9631_v18 = vpop.f32.mrb[3].mxu1 }
 0x1cf   : > { %v9635_v13 = vadd.f32 %v7773_v8, %v6723_v39  ;;  %v6726_v48 = vadd.f32 %v6725_v50, %v6724_v52  ;;  %v7797_v39 = vadd.f32 %v9516_v49, %v9553_v26 }
 0x1d1   : > { %v9637_v28 = vadd.f32 %v7781_v32, %v6726_v48 }
 0x1d3   : > { %v6727_v59 = vpop.f32.mrb[84].mxu0  ;;  %v9639_v35 = vpop.f32.mrb[4].mxu1 }
 0x1d4   : > { %v6728_v12 = vpop.f32.mrb[85].mxu0  ;;  %v9641_v23 = vpop.f32.mrb[5].mxu1 }
 0x1d5   : > { %v6729_v62 = vadd.f32 %v6728_v12, %v6727_v59  ;;  %v6730_v38 = vpop.f32.mrb[86].mxu0  ;;  %v9645_v53 = vpop.f32.mrb[6].mxu1 }
 0x1d6   : > { %v6731_v14 = vpop.f32.mrb[87].mxu0  ;;  %v9647_v11 = vpop.f32.mrb[7].mxu1 }
 0x1d7   : > { %v9651_v31 = vadd.f32 %v7769_v41, %v6729_v62  ;;  %v6732_v36 = vadd.f32 %v6731_v14, %v6730_v38  ;;  %v7785_v41 = vadd.f32 %v9520_v33, %v9553_v26 }
 0x1d9   : > { %v9653_v51 = vadd.f32 %v7777_v42, %v6732_v36  ;;  %v7793_v36 = vadd.f32 %v9522_v43, %v9553_v26 }
 0x1db   : > { %v6733_v56 = vpop.f32.mrb[88].mxu0  ;;  %v9655_v21 = vpop.f32.mrb[8].mxu1 }
 0x1dc   : > { %v6734_v27 = vpop.f32.mrb[89].mxu0  ;;  %v9657_v47 = vpop.f32.mrb[9].mxu1 }
 0x1dd   : > { %v6735_v17 = vadd.f32 %v6734_v27, %v6733_v56  ;;  %v6736_v44 = vpop.f32.mrb[90].mxu0  ;;  %v9661_v61 = vpop.f32.mrb[10].mxu1 }
 0x1de   : > { %v6737_v8 = vpop.f32.mrb[91].mxu0  ;;  %v9663_v4 = vpop.f32.mrb[11].mxu1 }
 0x1df   : > { %v9667_v52 = vadd.f32 %v7789_v22, %v6735_v17  ;;  %v6738_v50 = vadd.f32 %v6737_v8, %v6736_v44 }
 0x1e1   : > { %v9669_v32 = vadd.f32 %v7797_v39, %v6738_v50  ;;  %v7805_v39 = vadd.f32 %v9526_v16, %v9553_v26 }
 0x1e3   : > { %v6739_v48 = vpop.f32.mrb[92].mxu0  ;;  %v9671_v59 = vpop.f32.mrb[12].mxu1 }
 0x1e4   : > { %v6740_v12 = vpop.f32.mrb[93].mxu0  ;;  %v9673_v54 = vpop.f32.mrb[13].mxu1 }
 0x1e5   : > { %v6741_v62 = vadd.f32 %v6740_v12, %v6739_v48  ;;  %v6742_v38 = vpop.f32.mrb[94].mxu0  ;;  %v9677_v14 = vpop.f32.mrb[14].mxu1 }
 0x1e6   : > { %v6743_v42 = vpop.f32.mrb[95].mxu0  ;;  %v9679_v49 = vpop.f32.mrb[15].mxu1 }
 0x1e7   : > { %v9683_v56 = vadd.f32 %v7785_v41, %v6741_v62  ;;  %v6744_v27 = vadd.f32 %v6743_v42, %v6742_v38  ;;  %v7813_v41 = vadd.f32 %v9528_v60, %v9553_v26 }
 0x1e9   : > { %v9685_v22 = vadd.f32 %v7793_v36, %v6744_v27 }
 0x1eb   : > { %v6745_v17 = vpop.f32.mrb[96].mxu0  ;;  %v9687_v44 = vpop.f32.mrb[16].mxu1 }
 0x1ec   : > { %v6746_v8 = vpop.f32.mrb[97].mxu0  ;;  %v9689_v33 = vpop.f32.mrb[17].mxu1 }
 0x1ed   : > { %v6747_v50 = vadd.f32 %v6746_v8, %v6745_v17  ;;  %v6748_v48 = vpop.f32.mrb[98].mxu0  ;;  %v9693_v12 = vpop.f32.mrb[18].mxu1  ;;  %v7801_v17 = vadd.f32 %v9532_v25, %v9553_v26 }
 0x1ee   : > { %v6749_v10 = vpop.f32.mrb[99].mxu0  ;;  %v9695_v43 = vpop.f32.mrb[19].mxu1 }
 0x1ef   : > { %v9699_v62 = vadd.f32 %v7805_v39, %v6747_v50  ;;  %v6750_v38 = vadd.f32 %v6749_v10, %v6748_v48  ;;  %v7809_v10 = vadd.f32 %v9534_v9, %v9553_v26 }
 0x1f1   : > { %v9701_v42 = vadd.f32 %v7813_v41, %v6750_v38 }
 0x1f3   : > { %v6751_v36 = vpop.f32.mrb[100].mxu0  ;;  %v9703_v27 = vpop.f32.mrb[20].mxu1 }
 0x1f4   : > { %v6752_v2 = vpop.f32.mrb[101].mxu0  ;;  %v9705_v16 = vpop.f32.mrb[21].mxu1 }
 0x1f5   : > { %v6753_v8 = vadd.f32 %v6752_v2, %v6751_v36  ;;  %v6754_v6 = vpop.f32.mrb[102].mxu0  ;;  %v9709_v40 = vpop.f32.mrb[22].mxu1  ;;  %v7821_v2 = vadd.f32 %v9538_v24, %v9553_v26 }
 0x1f6   : > { %11442 = vst [vmem:[#allocation65_spill] sm:$0xff] %v9709_v40  ;;  %v6755_v63 = vpop.f32.mrb[103].mxu0  ;;  %v9711_v60 = vpop.f32.mrb[23].mxu1 }
 0x1f7   : > { %v9715_v39 = vadd.f32 %v7801_v17, %v6753_v8  ;;  %v6756_v50 = vadd.f32 %v6755_v63, %v6754_v6  ;;  %v7829_v63 = vadd.f32 %v9540_v57, %v9553_v26 }
 0x1f9   : > { %v9717_v48 = vadd.f32 %v7809_v10, %v6756_v50 }
 0x1fb   : > { %v6757_v41 = vpop.f32.mrb[104].mxu0  ;;  %v9719_v38 = vpop.f32.mrb[24].mxu1 }
 0x1fc   : > { %11443 = vst [vmem:[#allocation66_spill] sm:$0xff] %v9719_v38  ;;  %v6758_v1 = vpop.f32.mrb[105].mxu0  ;;  %v9721_v25 = vpop.f32.mrb[25].mxu1 }
 0x1fd   : > { %11444 = vst [vmem:[#allocation67_spill] sm:$0xff] %v9721_v25  ;;  %v6759_v36 = vadd.f32 %v6758_v1, %v6757_v41  ;;  %v6760_v45 = vpop.f32.mrb[106].mxu0  ;;  %v9725_v46 = vpop.f32.mrb[26].mxu1  ;;  %v7817_v1 = vadd.f32 %v9544_v34, %v9553_v26 }
 0x1fe   : > { %11445 = vst [vmem:[#allocation68_spill] sm:$0xff] %v9725_v46  ;;  %v6761_v40 = vpop.f32.mrb[107].mxu0  ;;  %v9727_v9 = vpop.f32.mrb[27].mxu1 }
 0x1ff   : > { %11446 = vst [vmem:[#allocation69_spill] sm:$0xff] %v9727_v9  ;;  %v9731_v6 = vadd.f32 %v7821_v2, %v6759_v36  ;;  %v6762_v17 = vadd.f32 %v6761_v40, %v6760_v45  ;;  %v7825_v45 = vadd.f32 %v9546_v20, %v9553_v26 }
 0x201   : > { %v9733_v8 = vadd.f32 %v7829_v63, %v6762_v17 }
 0x203   : > { %v6763_v10 = vpop.f32.mrb[108].mxu0  ;;  %v9735_v50 = vpop.f32.mrb[28].mxu1 }
 0x204   : > { %11447 = vst [vmem:[#allocation70_spill] sm:$0xff] %v9735_v50  ;;  %v6764_v38 = vpop.f32.mrb[109].mxu0  ;;  %v9737_v24 = vpop.f32.mrb[29].mxu1 }
 0x205   : > { %11448 = vst [vmem:[#allocation71_spill] sm:$0xff] %v9737_v24  ;;  %v6765_v41 = vadd.f32 %v6764_v38, %v6763_v10  ;;  %v6766_v46 = vpop.f32.mrb[110].mxu0  ;;  %v9741_v9 = vpop.f32.mrb[30].mxu1 }
 0x206   : > { %11449 = vst [vmem:[#allocation72_spill] sm:$0xff] %v9741_v9  ;;  %v6767_v25 = vpop.f32.mrb[111].mxu0  ;;  %v9743_v57 = vpop.f32.mrb[31].mxu1 }
 0x207   : > { %11450 = vst [vmem:[#allocation73_spill] sm:$0xff] %v9743_v57  ;;  %v9747_v40 = vadd.f32 %v7817_v1, %v6765_v41  ;;  %v6768_v2 = vadd.f32 %v6767_v25, %v6766_v46 }
 0x209   : > { %v9749_v36 = vadd.f32 %v7825_v45, %v6768_v2 }
 0x20b   : > { %v6833_v63 = vpop.f32.mrb[112].mxu0 }
 0x20c   : > { %v6834_v17 = vpop.f32.mrb[113].mxu0 }
 0x20d   : > { %v6835_v50 = vadd.f32 %v6834_v17, %v6833_v63  ;;  %v6836_v24 = vpop.f32.mrb[114].mxu0 }
 0x20e   : > { %v6837_v34 = vpop.f32.mrb[115].mxu0 }
 0x20f   : > { %v7743_v38 = vadd.f32 %v9594_v19, %v6835_v50  ;;  %v6838_v10 = vadd.f32 %v6837_v34, %v6836_v24 }
 0x211   : > { %v9753_v9 = vadd.f32 %v7743_v38, %v9625_v55  ;;  %v7751_v57 = vadd.f32 %v9597_v37, %v6838_v10 }
 0x213   : > { %v2464_v20 = vmax.f32 %v9753_v9, 0.0  ;;  %v9758_v26 = vadd.f32 %v7751_v57, %v9631_v18  ;;  %v6839_v46 = vpop.f32.mrb[116].mxu0 }
 0x214   : > { %v6840_v25 = vpop.f32.mrb[117].mxu0 }
 0x215   : > { %v2465_v1 = vmax.f32 %v9758_v26, 0.0  ;;  %v6841_v41 = vadd.f32 %v6840_v25, %v6839_v46  ;;  %v6842_v45 = vpop.f32.mrb[118].mxu0 }
 0x216   : > { %v6843_v2 = vpop.f32.mrb[119].mxu0 }
 0x217   : > { %v7739_v19 = vadd.f32 %v9603_v5, %v6841_v41  ;;  %v6844_v50 = vadd.f32 %v6843_v2, %v6842_v45 }
 0x219   : > { %v9763_v55 = vadd.f32 %v7739_v19, %v9623_v30  ;;  %v7747_v37 = vadd.f32 %v9605_v0, %v6844_v50 }
 0x21b   : > { %v2466_v24 = vmax.f32 %v9763_v55, 0.0  ;;  %v9768_v18 = vadd.f32 %v7747_v37, %v9629_v15  ;;  %v6845_v57 = vpop.f32.mrb[120].mxu0 }
 0x21c   : > { %v6846_v63 = vpop.f32.mrb[121].mxu0 }
 0x21d   : > { %v2467_v17 = vmax.f32 %v9768_v18, 0.0  ;;  %v6847_v34 = vadd.f32 %v6846_v63, %v6845_v57  ;;  %v6848_v38 = vpop.f32.mrb[122].mxu0 }
 0x21e   : > { %v6849_v10 = vpop.f32.mrb[123].mxu0 }
 0x21f   : > { %v7759_v5 = vadd.f32 %v9611_v58, %v6847_v34  ;;  %v6850_v46 = vadd.f32 %v6849_v10, %v6848_v38 }
 0x221   : > { %v9773_v30 = vadd.f32 %v7759_v5, %v9641_v23  ;;  %v7767_v0 = vadd.f32 %v9613_v7, %v6850_v46 }
 0x223   : > { %v2468_v25 = vmax.f32 %v9773_v30, 0.0  ;;  %v9778_v15 = vadd.f32 %v7767_v0, %v9647_v11  ;;  %v6851_v41 = vpop.f32.mrb[124].mxu0 }
 0x224   : > { %v6852_v45 = vpop.f32.mrb[125].mxu0 }
 0x225   : > { %v2469_v2 = vmax.f32 %v9778_v15, 0.0  ;;  %v6853_v19 = vadd.f32 %v6852_v45, %v6851_v41  ;;  %v6854_v50 = vpop.f32.mrb[126].mxu0 }
 0x226   : > { %v6855_v37 = vpop.f32.mrb[127].mxu0 }
 0x227   : > { %v7755_v58 = vadd.f32 %v9619_v3, %v6853_v19  ;;  %v6856_v57 = vadd.f32 %v6855_v37, %v6854_v50 }
 0x229   : > { %v9783_v23 = vadd.f32 %v7755_v58, %v9639_v35  ;;  %v7763_v7 = vadd.f32 %v9621_v29, %v6856_v57 }
 0x22b   : > { %v2470_v63 = vmax.f32 %v9783_v23, 0.0  ;;  %v9788_v11 = vadd.f32 %v7763_v7, %v9645_v53  ;;  %v6857_v34 = vpop.f32.mrb[128].mxu0 }
 0x22c   : > { %v6858_v38 = vpop.f32.mrb[129].mxu0 }
 0x22d   : > { %v2471_v10 = vmax.f32 %v9788_v11, 0.0  ;;  %v6859_v5 = vadd.f32 %v6858_v38, %v6857_v34  ;;  %v6860_v46 = vpop.f32.mrb[130].mxu0 }
 0x22e   : > { %v6861_v0 = vpop.f32.mrb[131].mxu0 }
 0x22f   : > { %v7775_v3 = vadd.f32 %v9635_v13, %v6859_v5  ;;  %v6862_v41 = vadd.f32 %v6861_v0, %v6860_v46 }
 0x231   : > { %v9793_v35 = vadd.f32 %v7775_v3, %v9657_v47  ;;  %v7783_v29 = vadd.f32 %v9637_v28, %v6862_v41 }
 0x233   : > { %v2472_v45 = vmax.f32 %v9793_v35, 0.0  ;;  %v9798_v53 = vadd.f32 %v7783_v29, %v9663_v4  ;;  %v6863_v19 = vpop.f32.mrb[132].mxu0 }
 0x234   : > { %v6864_v50 = vpop.f32.mrb[133].mxu0 }
 0x235   : > { %v2473_v37 = vmax.f32 %v9798_v53, 0.0  ;;  %v6865_v58 = vadd.f32 %v6864_v50, %v6863_v19  ;;  %v6866_v57 = vpop.f32.mrb[134].mxu0 }
 0x236   : > { %v6867_v7 = vpop.f32.mrb[135].mxu0 }
 0x237   : > { %v7771_v13 = vadd.f32 %v9651_v31, %v6865_v58  ;;  %v6868_v34 = vadd.f32 %v6867_v7, %v6866_v57 }
 0x239   : > { %v9803_v47 = vadd.f32 %v7771_v13, %v9655_v21  ;;  %v7779_v28 = vadd.f32 %v9653_v51, %v6868_v34 }
 0x23b   : > { %v2474_v38 = vmax.f32 %v9803_v47, 0.0  ;;  %v9808_v4 = vadd.f32 %v7779_v28, %v9661_v61  ;;  %v6869_v5 = vpop.f32.mrb[136].mxu0 }
 0x23c   : > { %v6870_v46 = vpop.f32.mrb[137].mxu0 }
 0x23d   : > { %v2475_v0 = vmax.f32 %v9808_v4, 0.0  ;;  %v6871_v3 = vadd.f32 %v6870_v46, %v6869_v5  ;;  %v6872_v41 = vpop.f32.mrb[138].mxu0 }
 0x23e   : > { %v6873_v29 = vpop.f32.mrb[139].mxu0 }
 0x23f   : > { %v7791_v31 = vadd.f32 %v9667_v52, %v6871_v3  ;;  %v6874_v19 = vadd.f32 %v6873_v29, %v6872_v41 }
 0x241   : > { %v9813_v21 = vadd.f32 %v7791_v31, %v9673_v54  ;;  %v7799_v51 = vadd.f32 %v9669_v32, %v6874_v19 }
 0x243   : > { %v2476_v50 = vmax.f32 %v9813_v21, 0.0  ;;  %v9818_v61 = vadd.f32 %v7799_v51, %v9679_v49  ;;  %v6875_v58 = vpop.f32.mrb[140].mxu0 }
 0x244   : > { %v6876_v57 = vpop.f32.mrb[141].mxu0 }
 0x245   : > { %v6877_v13 = vadd.f32 %v6876_v57, %v6875_v58  ;;  %v6878_v34 = vpop.f32.mrb[142].mxu0 }
 0x246   : > { %v6879_v28 = vpop.f32.mrb[143].mxu0 }
 0x247   : > { %v7787_v52 = vadd.f32 %v9683_v56, %v6877_v13  ;;  %v6880_v5 = vadd.f32 %v6879_v28, %v6878_v34 }
 0x249   : > { %v9823_v54 = vadd.f32 %v7787_v52, %v9671_v59  ;;  %v7795_v32 = vadd.f32 %v9685_v22, %v6880_v5 }
 0x24b   : > { %v9828_v49 = vadd.f32 %v7795_v32, %v9677_v14  ;;  %v6881_v3 = vpop.f32.mrb[144].mxu0 }
 0x24c   : > { %v6882_v41 = vpop.f32.mrb[145].mxu0 }
 0x24d   : > { %v6883_v31 = vadd.f32 %v6882_v41, %v6881_v3  ;;  %v6884_v19 = vpop.f32.mrb[146].mxu0  ;;  %v11460_v41 = vld [vmem:[#allocation61_spill] sm:$0xff] }
 0x24e   : > { %v6885_v51 = vpop.f32.mrb[147].mxu0 }
 0x24f   : > { %v7807_v56 = vadd.f32 %v9699_v62, %v6883_v31  ;;  %v6886_v58 = vadd.f32 %v6885_v51, %v6884_v19 }
 0x251   : > { %v9833_v59 = vadd.f32 %v7807_v56, %v9689_v33  ;;  %v7815_v22 = vadd.f32 %v9701_v42, %v6886_v58 }
 0x253   : > { %v9838_v14 = vadd.f32 %v7815_v22, %v9695_v43  ;;  %v6887_v13 = vpop.f32.mrb[148].mxu0 }
 0x254   : > { %v6888_v34 = vpop.f32.mrb[149].mxu0 }
 0x255   : > { %v6889_v52 = vadd.f32 %v6888_v34, %v6887_v13  ;;  %v6890_v5 = vpop.f32.mrb[150].mxu0  ;;  %v11456_v34 = vld [vmem:[#allocation59_spill] sm:$0xff] }
 0x256   : > { %v6891_v32 = vpop.f32.mrb[151].mxu0 }
 0x257   : > { %v7803_v62 = vadd.f32 %v9715_v39, %v6889_v52  ;;  %v6892_v3 = vadd.f32 %v6891_v32, %v6890_v5 }
 0x259   : > { %v9843_v33 = vadd.f32 %v7803_v62, %v9687_v44  ;;  %v7811_v42 = vadd.f32 %v9717_v48, %v6892_v3 }
 0x25b   : > { %v9848_v43 = vadd.f32 %v7811_v42, %v9693_v12  ;;  %v6893_v31 = vpop.f32.mrb[152].mxu0 }
 0x25c   : > { %v6894_v19 = vpop.f32.mrb[153].mxu0 }
 0x25d   : > { %v6895_v56 = vadd.f32 %v6894_v19, %v6893_v31  ;;  %v6896_v58 = vpop.f32.mrb[154].mxu0 }
 0x25e   : > { %v6897_v22 = vpop.f32.mrb[155].mxu0 }
 0x25f   : > { %v7823_v39 = vadd.f32 %v9731_v6, %v6895_v56  ;;  %v6898_v13 = vadd.f32 %v6897_v22, %v6896_v58  ;;  %v11451_v56 = vld [vmem:[#allocation65_spill] sm:$0xff] }
 0x261   : > { %v9853_v44 = vadd.f32 %v7823_v39, %v9705_v16  ;;  %v7831_v48 = vadd.f32 %v9733_v8, %v6898_v13 }
 0x263   : > { %v9858_v12 = vadd.f32 %v7831_v48, %v9711_v60  ;;  %v6899_v52 = vpop.f32.mrb[156].mxu0 }
 0x264   : > { %v6900_v5 = vpop.f32.mrb[157].mxu0 }
 0x265   : > { %v6901_v62 = vadd.f32 %v6900_v5, %v6899_v52  ;;  %v6902_v3 = vpop.f32.mrb[158].mxu0  ;;  %v11452_v5 = vld [vmem:[#allocation57_spill] sm:$0xff] }
 0x266   : > { %v6903_v42 = vpop.f32.mrb[159].mxu0 }
 0x267   : > { %v7819_v6 = vadd.f32 %v9747_v40, %v6901_v62  ;;  %v6904_v31 = vadd.f32 %v6903_v42, %v6902_v3  ;;  %v11453_v3 = vld [vmem:[#allocation67_spill] sm:$0xff]  ;;  %v11454_v42 = vld [vmem:[#allocation58_spill] sm:$0xff] }
 0x269   : > { %v9863_v16 = vadd.f32 %v7819_v6, %v9703_v27  ;;  %v7827_v8 = vadd.f32 %v9749_v36, %v6904_v31  ;;  %v11455_v31 = vld [vmem:[#allocation69_spill] sm:$0xff] }
 0x26b   : > { %v9868_v60 = vadd.f32 %v7827_v8, %v11451_v56  ;;  %v6905_v58 = vpop.f32.mrb[160].mxu0 }
 0x26c   : > { %v6906_v22 = vpop.f32.mrb[161].mxu0 }
 0x26d   : > { %v6907_v13 = vadd.f32 %v6906_v22, %v6905_v58  ;;  %v6908_v48 = vpop.f32.mrb[162].mxu0 }
 0x26e   : > { %v6909_v52 = vpop.f32.mrb[163].mxu0 }
 0x26f   : > { %v7839_v40 = vadd.f32 %v11452_v5, %v6907_v13  ;;  %v6910_v62 = vadd.f32 %v6909_v52, %v6908_v48  ;;  %v11457_v52 = vld [vmem:[#allocation66_spill] sm:$0xff] }
 0x271   : > { %v9873_v27 = vadd.f32 %v7839_v40, %v11453_v3  ;;  %v7847_v36 = vadd.f32 %v11454_v42, %v6910_v62  ;;  %v11458_v40 = vld [vmem:[#allocation60_spill] sm:$0xff] }
 0x272   : > { %v11459_v42 = vld [vmem:[#allocation68_spill] sm:$0xff] }
 0x273   : > { %v9878_v8 = vadd.f32 %v7847_v36, %v11455_v31  ;;  %v6911_v56 = vpop.f32.mrb[164].mxu0 }
 0x274   : > { %v6912_v19 = vpop.f32.mrb[165].mxu0 }
 0x275   : > { %v6913_v58 = vadd.f32 %v6912_v19, %v6911_v56  ;;  %v6914_v22 = vpop.f32.mrb[166].mxu0 }
 0x276   : > { %v6915_v32 = vpop.f32.mrb[167].mxu0 }
 0x277   : > { %v7835_v13 = vadd.f32 %v11456_v34, %v6913_v58  ;;  %v6916_v48 = vadd.f32 %v6915_v32, %v6914_v22  ;;  %v11461_v58 = vld [vmem:[#allocation71_spill] sm:$0xff] }
 0x279   : > { %v9883_v5 = vadd.f32 %v7835_v13, %v11457_v52  ;;  %v7843_v62 = vadd.f32 %v11458_v40, %v6916_v48  ;;  %v11462_v13 = vld [vmem:[#allocation62_spill] sm:$0xff]  ;;  %v11463_v40 = vld [vmem:[#allocation73_spill] sm:$0xff]  ;;  %v11467_v52 = vld [vmem:[#allocation72_spill] sm:$0xff] }
 0x27b   : > { %v9888_v36 = vadd.f32 %v7843_v62, %v11459_v42  ;;  %v6917_v31 = vpop.f32.mrb[168].mxu0 }
 0x27c   : > { %v6918_v6 = vpop.f32.mrb[169].mxu0 }
 0x27d   : > { %v6919_v19 = vadd.f32 %v6918_v6, %v6917_v31  ;;  %v6920_v56 = vpop.f32.mrb[170].mxu0 }
 0x27e   : > { %v6921_v51 = vpop.f32.mrb[171].mxu0 }
 0x27f   : > { %v7855_v34 = vadd.f32 %v11460_v41, %v6919_v19  ;;  %v6922_v32 = vadd.f32 %v6921_v51, %v6920_v56  ;;  %v11464_v41 = vld [vmem:[#allocation63_spill] sm:$0xff]  ;;  %v11465_v56 = vld [vmem:[#allocation70_spill] sm:$0xff] }
 0x281   : > { %v9893_v22 = vadd.f32 %v7855_v34, %v11461_v58  ;;  %v7863_v48 = vadd.f32 %v11462_v13, %v6922_v32  ;;  %v11466_v32 = vld [vmem:[#allocation64_spill] sm:$0xff] }
 0x283   : > { %v9898_v62 = vadd.f32 %v7863_v48, %v11463_v40  ;;  %v6923_v42 = vpop.f32.mrb[172].mxu0 }
 0x284   : > { %v6924_v3 = vpop.f32.mrb[173].mxu0 }
 0x285   : > { %v6925_v31 = vadd.f32 %v6924_v3, %v6923_v42  ;;  %v6926_v39 = vpop.f32.mrb[174].mxu0  ;;  %2499 = sbr.rel (%p11468_p6) target bundleno = 673 (0x2a1), region = 56  ;;  %v8574_v3 = vmov (!%p11468_p6), 0  }
 0x286   : > { %v6927_v28 = vpop.f32.mrb[175].mxu0  ;;  %2500 = vst [vmem:[#allocation2] sm:$0xf] (!%p11468_p6), %v8574_v3  ;;  %2501 = vst [vmem:[#allocation2 + $0x4] sm:$0xf] (!%p11468_p6), %v8574_v3 }
 0x287   : > { %v7851_v51 = vadd.f32 %v11464_v41, %v6925_v31  ;;  %v6928_v19 = vadd.f32 %v6927_v28, %v6926_v39  ;;  %2502 = vst [vmem:[#allocation2 + $0x8] sm:$0x1] (!%p11468_p6), %v8574_v3  ;;  %2503 = vst [vmem:[#allocation2 + $0xc] sm:$0xf] (!%p11468_p6), %v8574_v3 }
 0x288   : > { %2504 = vst [vmem:[#allocation2 + $0x10] sm:$0xf] (!%p11468_p6), %v8574_v3  ;;  %2505 = vst [vmem:[#allocation2 + $0x14] sm:$0x1] (!%p11468_p6), %v8574_v3 }
 0x289   : > { %v9903_v34 = vadd.f32 %v7851_v51, %v11465_v56  ;;  %v7859_v58 = vadd.f32 %v11466_v32, %v6928_v19  ;;  %2506 = vst [vmem:[#allocation2 + $0x18] sm:$0xf] (!%p11468_p6), %v8574_v3  ;;  %2507 = vst [vmem:[#allocation2 + $0x1c] sm:$0xf] (!%p11468_p6), %v8574_v3 }
 0x28a   : > { %2508 = vst [vmem:[#allocation2 + $0x20] sm:$0x1] (!%p11468_p6), %v8574_v3  ;;  %2509 = vst [vmem:[#allocation2 + $0x24] sm:$0xf] (!%p11468_p6), %v8574_v3 }
 0x28b   : > { %v9908_v48 = vadd.f32 %v7859_v58, %v11467_v52  ;;  %2510 = vst [vmem:[#allocation2 + $0x28] sm:$0xf] (!%p11468_p6), %v8574_v3  ;;  %2511 = vst [vmem:[#allocation2 + $0x2c] sm:$0x1] (!%p11468_p6), %v8574_v3 }
 0x28c   : > { %2512 = vst [vmem:[#allocation2 + $0x30] sm:$0xf] %v8574_v3  ;;  %2513 = vst [vmem:[#allocation2 + $0x34] sm:$0xf] %v8574_v3 }
 0x28d   : > { %2514 = vst [vmem:[#allocation2 + $0x38] sm:$0x1] %v8574_v3  ;;  %2515 = vst [vmem:[#allocation2 + $0x3c] sm:$0xf] %v8574_v3 }
 0x28e   : > { %2516 = vst [vmem:[#allocation2 + $0x40] sm:$0xf] %v8574_v3  ;;  %2517 = vst [vmem:[#allocation2 + $0x44] sm:$0x1] %v8574_v3 }
 0x28f   : > { %2518 = vst [vmem:[#allocation2 + $0x48] sm:$0xf] %v8574_v3  ;;  %2519 = vst [vmem:[#allocation2 + $0x4c] sm:$0xf] %v8574_v3 }
 0x290   : > { %2520 = vst [vmem:[#allocation2 + $0x50] sm:$0x1] %v8574_v3  ;;  %2521 = vst [vmem:[#allocation2 + $0x54] sm:$0xf] %v8574_v3 }
 0x291   : > { %2522 = vst [vmem:[#allocation2 + $0x58] sm:$0xf] %v8574_v3  ;;  %2523 = vst [vmem:[#allocation2 + $0x5c] sm:$0x1] %v8574_v3 }
 0x292   : > { %2524 = vst [vmem:[#allocation2 + $0x60] sm:$0xf] %v8574_v3  ;;  %2525 = vst [vmem:[#allocation2 + $0x64] sm:$0xf] %v8574_v3 }
 0x293   : > { %2526 = vst [vmem:[#allocation2 + $0x68] sm:$0x1] %v8574_v3  ;;  %2527 = vst [vmem:[#allocation2 + $0x6c] sm:$0xf] %v8574_v3 }
 0x294   : > { %2528 = vst [vmem:[#allocation2 + $0x70] sm:$0xf] %v8574_v3  ;;  %2529 = vst [vmem:[#allocation2 + $0x74] sm:$0x1] %v8574_v3 }
 0x295   : > { %2530 = vst [vmem:[#allocation2 + $0x78] sm:$0xf] %v8574_v3  ;;  %2531 = vst [vmem:[#allocation2 + $0x7c] sm:$0xf] %v8574_v3 }
 0x296   : > { %2532 = vst [vmem:[#allocation2 + $0x80] sm:$0x1] %v8574_v3  ;;  %2533 = vst [vmem:[#allocation2 + $0x84] sm:$0xf] %v8574_v3 }
 0x297   : > { %2534 = vst [vmem:[#allocation2 + $0x88] sm:$0xf] %v8574_v3  ;;  %2535 = vst [vmem:[#allocation2 + $0x8c] sm:$0x1] %v8574_v3 }
 0x298   : > { %2536 = vst [vmem:[#allocation2 + $0x90] sm:$0xf] %v8574_v3  ;;  %2537 = vst [vmem:[#allocation2 + $0x94] sm:$0xf] %v8574_v3 }
 0x299   : > { %2538 = vst [vmem:[#allocation2 + $0x98] sm:$0x1] %v8574_v3  ;;  %2539 = vst [vmem:[#allocation2 + $0x9c] sm:$0xf] %v8574_v3 }
 0x29a   : > { %2540 = vst [vmem:[#allocation2 + $0xa0] sm:$0xf] %v8574_v3  ;;  %2541 = vst [vmem:[#allocation2 + $0xa4] sm:$0x1] %v8574_v3 }
 0x29b   : > { %2542 = vst [vmem:[#allocation2 + $0xa8] sm:$0xf] %v8574_v3  ;;  %2543 = vst [vmem:[#allocation2 + $0xac] sm:$0xf] %v8574_v3 }
 0x29c   : > { %2544 = vst [vmem:[#allocation2 + $0xb0] sm:$0x1] %v8574_v3  ;;  %2545 = vst [vmem:[#allocation2 + $0xb4] sm:$0xf] %v8574_v3 }
 0x29d   : > { %2546 = vst [vmem:[#allocation2 + $0xb8] sm:$0xf] %v8574_v3  ;;  %2547 = vst [vmem:[#allocation2 + $0xbc] sm:$0x1] %v8574_v3 }
 0x29e   : > { %2548 = vst [vmem:[#allocation2 + $0xc0] sm:$0xf] %v8574_v3  ;;  %2549 = vst [vmem:[#allocation2 + $0xc4] sm:$0xf] %v8574_v3 }
 0x29f   : > { %2550 = vst [vmem:[#allocation2 + $0xc8] sm:$0x1] %v8574_v3  ;;  %2551 = vst [vmem:[#allocation2 + $0xcc] sm:$0xf] %v8574_v3 }
 0x2a0   : > { %2552 = vst [vmem:[#allocation2 + $0xd0] sm:$0xf] %v8574_v3  ;;  %2553 = vst [vmem:[#allocation2 + $0xd4] sm:$0x1] %v8574_v3 }
 0x2a1 PF: > { %v8349_v28 = vld [vmem:[#allocation3 + $0x40] sm:$0xff]   ;;  %v9919_v39 = vpack.c.bf16 %v2464_v20, %v2464_v20  ;;  %v9924_v42 = vpack.c.bf16 %v2465_v1, %v2465_v1  ;;  %v8352_v41 = vld [vmem:[#allocation3 + $0x48] sm:$0xff]   ;;  %v8355_v56 = vld [vmem:[#allocation3 + $0x50] sm:$0xff]   ;;  %v9931_v26 = vpack.c.bf16 %v2466_v24, %v2466_v24  ;;  %v6515_v55 = vpack.c.bf16 %v2467_v17, %v2467_v17  ;;  %s6544_s14 = sshll.u32 %s8639_s28, 12  ;;  %s6053_s21 = sshll.u32 %s9912_s17, 4  ;;  %s11240_s21 = int_to_ptr.vmem [resolvable:$true] %s6053_s21 }
 0x2a2   : > { %v8350_v52 = vld [vmem:[#allocation3 + $0x80] sm:$0xff]   ;;  %6953 = vmatprep.subr.bf16.mxu0 %v8349_v28  ;;  %v8353_v19 = vld [vmem:[#allocation3 + $0x88] sm:$0xff]   ;;  %v8356_v1 = vld [vmem:[#allocation3 + $0x90] sm:$0xff]   ;;  %v6516_v17 = vpack.c.bf16 %v2468_v25, %v2468_v25  ;;  %vm2981_vm2 = vcmask 1040384   ;;  %vm2974_vm3 = vcmask 1043456   ;;  %v9957_v30 = vpack.c.bf16 %v2469_v2, %v2469_v2  ;;  %s11238_s23 = scalar_lea.hbm %s11295_s7, %s6544_s14  ;;  %s11247_s28 = scalar_lea.sflag [#allocation5], %s284_s18 }
 0x2a3   : > { %v8351_v31 = vld [vmem:[#allocation3] sm:$0xff]   ;;  %7529 = vmatprep.subr.bf16.mxu1 %v8350_v52  ;;  %v2654_v51 = vshrl.u32 %v9919_v39, 16  ;;  %v8354_v9 = vld [vmem:[#allocation3 + $0x8] sm:$0xff]   ;;  %v2662_v20 = vshrl.u32 %v9924_v42, 16  ;;  %v8357_v58 = vld [vmem:[#allocation3 + $0x10] sm:$0xff]   ;;  %v2657_v3 = vshll.u32 %v9919_v39, 16  ;;  %v9991_v11 = vpack.c.bf16 %v2473_v37, %v2473_v37 }
 0x2a4   : > { %6954 = vmatpush3.bf16.msra.mxu0 %v8351_v31  ;;  %7530 = vmatpush3.bf16.msra.mxu1 %v8350_v52  ;;  %v8358_v28 = vld [vmem:[#allocation3 + $0x58] sm:$0xff]   ;;  %v2671_v24 = vshrl.u32 %v9931_v26, 16  ;;  %v2665_v40 = vshll.u32 %v9924_v42, 16  ;;  %v8363_v13 = vld [vmem:[#allocation3 + $0x20] sm:$0xff]   ;;  %v2682_v25 = vshll.u32 %v6515_v55, 16  ;;  %v2696_v57 = vshrl.u32 %v9957_v30, 16 }
 0x2a5   : > { %6955 = vmatprep.subr.bf16.mxu0 %v8352_v41  ;;  %7531 = vmatprep.subr.bf16.mxu1 %v8353_v19  ;;  %v9933_v32 = vrot.slane %v2654_v51, 7  ;;  %v9936_v52 = vrot.slane %v2662_v20, 7  ;;  %v8359_v31 = vld [vmem:[#allocation3 + $0x98] sm:$0xff]   ;;  %v2679_v20 = vshrl.u32 %v6515_v55, 16  ;;  %v8369_v29 = vld [vmem:[#allocation3 + $0x30] sm:$0xff]   ;;  %v2691_v15 = vshll.u32 %v6516_v17, 16 }
 0x2a6   : > { %v8360_v41 = vld [vmem:[#allocation3 + $0x18] sm:$0xff]   ;;  %v9964_v7 = vrot.slane %v2696_v57, 7  ;;  %v9978_v57 = vld [vmem:[#allocation2] sm:$0xff]   ;;  %vm2650_vm4 = vsmask.f32 256  ;;  %s8503_s29 = scalar_lea.vmem %s11240_s21, 4096 }
 0x2a7   : > { %v2660_v51 = vrot.slane %v9933_v32, 4  ;;  %v2669_v18 = vrot.slane %v9936_v52, 4  ;;  %v9950_v6 = vrot.slane %v2679_v20, 7  ;;  %v8366_v20 = vld [vmem:[#allocation3 + $0x28] sm:$0xff]   ;;  %v8370_v46 = vld [vmem:[#allocation3 + $0x78] sm:$0xff]   ;;  %v2659_v23 = vor.u32 %v2657_v3, %v9933_v32  ;;  %vm9995_vm7 = vmand %vm2981_vm2, %vm2650_vm4  ;;  %p8504_p9 = scmp.ne.s32.totalorder %s11240_s21, %s8503_s29  ;;  %p11565_p10 = scmp.ne.s32.totalorder %s11379_s11, 0 }
 0x2a8   : > { %6956 = vmatpush3.bf16.msra.mxu0 %v8354_v9  ;;  %7532 = vmatpush3.bf16.msra.mxu1 %v8353_v19  ;;  %v8361_v19 = vld [vmem:[#allocation3 + $0x60] sm:$0xff]   ;;  %v9943_v9 = vrot.slane %v2671_v24, 7  ;;  %v2688_v24 = vshrl.u32 %v6516_v17, 16  ;;  %v8371_v2 = vld [vmem:[#allocation3 + $0xb8] sm:$0xff]   ;;  %v9976_v17 = vpack.c.bf16 %v2471_v10, %v2471_v10  ;;  %vm2651_vm5 = vsmask.f32 4368 }
 0x2a9   : > { %6957 = vmatprep.subr.bf16.mxu0 %v8355_v56  ;;  %7533 = vmatprep.subr.bf16.mxu1 %v8356_v1  ;;  %v8362_v56 = vld [vmem:[#allocation3 + $0xa0] sm:$0xff]   ;;  %v8372_v10 = vld [vmem:[#allocation3 + $0x38] sm:$0xff]   ;;  %vm2975_vm6 = vsmask.f32 7938  ;;  %v3309_v39 = vshrl.u32 %v9978_v57, 16  ;;  %v3311_v53 = vshll.u32 %v9978_v57, 16  ;;  %vm10005_vm8 = vmor %vm2650_vm4, %vm2651_vm5  ;;  %p8505_p11 = pnand %p8504_p9, %p11565_p10 }
 0x2aa   : > { %v2677_v42 = vrot.slane %v9943_v9, 4  ;;  %v3542_v3 = vrot.slane %v9978_v57, 1  ;;  %vm10015_vm9 = vmand %vm2974_vm3, %vm2975_vm6  ;;  %vm5260_vm10 = vsmask.f32 3328  ;;  %vm5261_vm11 = vsmask.f32 7440 }
 0x2ab   : > { %v3313_v32 = vrot.slane %v3311_v53, 1  ;;  %v2993_v53 = vld [vmem:[#allocation2 + $0x24] sm:$0xf]  ;;  %vm10693_vm12 = vmor %vm5260_vm10, %vm5261_vm11  ;;  %p8506_p13 = pneg %p8505_p11  ;;  %s8575_s8 = smov [#allocation6]  }
 0x2ac   : > { %6958 = vmatpush3.bf16.msra.mxu0 %v8357_v58  ;;  %7534 = vmatpush3.bf16.msra.mxu1 %v8356_v1  ;;  %v8364_v1 = vld [vmem:[#allocation3 + $0x68] sm:$0xff]   ;;  %v2674_v58 = vshll.u32 %v9931_v26, 16  ;;  %v9960_v26 = vrot.slane %v2688_v24, 7  ;;  %v8374_v24 = vld [vmem:[#allocation2 + $0x8] ss:$0 sps:$4 sm:$0x11]  }
 0x2ad   : > { %6959 = vmatprep.subr.bf16.mxu0 %v8358_v28  ;;  %7535 = vmatprep.subr.bf16.mxu1 %v8359_v31  ;;  %v8365_v28 = vld [vmem:[#allocation3 + $0xa8] sm:$0xff]   ;;  %v3316_v37 = vshll.u32 %v8374_v24, 16  ;;  %s8507_s13 = sshll.u32 %s8575_s8, 4  ;;  %s8508_s13 = int_to_ptr.vmem [resolvable:$false] %s8507_s13 }
 0x2ae   : > { %v2694_v55 = vrot.slane %v9960_v26, 4  ;;  %v2676_v35 = vor.u32 %v2674_v58, %v9943_v9  ;;  %s8509_s9 = scalar_lea.vmem %s8508_s13, 8192  ;;  %p8510_p3 = scmp.lt.s32.totalorder %s11240_s21, %s8508_s13 }
 0x2af   : > { %p8511_p4 = scmp.lt.s32.totalorder %s8509_s9, %s8503_s29 }
 0x2b0   : > { %6960 = vmatpush3.bf16.msra.mxu0 %v8360_v41  ;;  %7536 = vmatpush3.bf16.msra.mxu1 %v8359_v31  ;;  %v2686_v41 = vrot.slane %v9950_v6, 4  ;;  %v8367_v31 = vld [vmem:[#allocation3 + $0x70] sm:$0xff]  }
 0x2b1   : > { %6961 = vmatprep.subr.bf16.mxu0 %v8361_v19  ;;  %7537 = vmatprep.subr.bf16.mxu1 %v8362_v56  ;;  %v8368_v19 = vld [vmem:[#allocation3 + $0xb0] sm:$0xff]   ;;  %p8512_p7 = por %p8511_p4, %p8510_p3 }
 0x2b3   : > { %p8513_p8 = pnand %p8512_p7, %p8506_p13 }
 0x2b4   : > { %6962 = vmatpush3.bf16.msra.mxu0 %v8363_v13  ;;  %7538 = vmatpush3.bf16.msra.mxu1 %v8362_v56  ;;  %v9969_v13 = vpack.c.bf16 %v2470_v63, %v2470_v63  ;;  %v2667_v56 = vor.u32 %v2665_v40, %v9936_v52  ;;  %v9986_v63 = vpack.c.bf16 %v2472_v45, %v2472_v45  ;;  %v2977_v40 = vld [vmem:[#allocation2 + $0xc] sm:$0xf]  ;;  %v2699_v52 = vshll.u32 %v9957_v30, 16 }
 0x2b5   : > { %6963 = vmatprep.subr.bf16.mxu0 %v8364_v1  ;;  %7539 = vmatprep.subr.bf16.mxu1 %v8365_v28  ;;  %v2684_v1 = vor.u32 %v2682_v25, %v9950_v6  ;;  %v2693_v45 = vor.u32 %v2691_v15, %v9960_v26 }
 0x2b6   : > { %v2668_v9 = vsel %vm10005_vm8, %v2660_v51, %v2667_v56  ;;  %v2978_v51 = vsel %vm10015_vm9, %v2659_v23, %v2977_v40  ;;  %v10027_v56 = vld [vmem:[#allocation3 + $0x140] sm:$0xff]   ;;  %v10037_v23 = vpack.c.bf16 %v2474_v38, %v2474_v38  ;;  %v3314_v40 = vor.u32 %v3313_v32, %v3309_v39 }
 0x2b7   : > { %2980 = vst [vmem:[#allocation2 + $0x10] sm:$0xf] %v2668_v9  ;;  %2979 = vst [vmem:[#allocation2 + $0xc] sm:$0xf] %v2978_v51  ;;  %v2705_v38 = vshrl.u32 %v9969_v13, 16  ;;  %v2708_v6 = vshll.u32 %v9969_v13, 16 }
 0x2b8   : > { %6964 = vmatpush3.bf16.msra.mxu0 %v8366_v20  ;;  %7540 = vmatpush3.bf16.msra.mxu1 %v8365_v28  ;;  %v2983_v20 = vld [vmem:[#allocation2 + $0x14] sm:$0x1]  ;;  %v2713_v39 = vshrl.u32 %v9976_v17, 16  ;;  %v2730_v9 = vshrl.u32 %v9991_v11, 16  ;;  %v3004_v32 = vld [vmem:[#allocation2 + $0x38] sm:$0x1] }
 0x2b9   : > { %6965 = vmatprep.subr.bf16.mxu0 %v8367_v31  ;;  %7541 = vmatprep.subr.bf16.mxu1 %v8368_v19  ;;  %v3543_v31 = vrot.slane %v8374_v24, 1  ;;  %v2984_v15 = vsel %vm9995_vm7, %v2669_v18, %v2983_v20  ;;  %v2986_v24 = vld [vmem:[#allocation2 + $0x18] sm:$0xf]  ;;  %v3000_v20 = vld [vmem:[#allocation2 + $0x30] sm:$0xf]  ;;  %v8430_v28 = vld [vmem:[#allocation3 + $0x1a8] sm:$0xff]  }
 0x2ba   : > { %2985 = vst [vmem:[#allocation2 + $0x14] sm:$0x1] %v2984_v15  ;;  %v2715_v13 = vrot.slane %v2713_v39, 7  ;;  %v10073_v15 = vpack.c.bf16 %v2476_v50, %v2476_v50  ;;  %v11477_v50 = vmax.f32 %v9828_v49, 0.0 }
 0x2bb   : > { %v3544_v18 = vsel %vm745_vm1, %v3542_v3, %v3543_v31  ;;  %v2997_v3 = vld [vmem:[#allocation2 + $0x2c] sm:$0x1]  ;;  %v2725_v31 = vshll.u32 %v9986_v63, 16 }
 0x2bc   : > { %6966 = vmatpush3.bf16.msra.mxu0 %v8369_v29  ;;  %7542 = vmatpush3.bf16.msra.mxu1 %v8368_v19  ;;  %v2685_v29 = vsel %vm10005_vm8, %v2677_v42, %v2684_v1  ;;  %v3318_v19 = vrot.slane %v3316_v37, 1  ;;  %v2990_v42 = vld [vmem:[#allocation2 + $0x20] sm:$0x1]  ;;  %v2703_v1 = vrot.slane %v9964_v7, 4  ;;  %v2701_v37 = vor.u32 %v2699_v52, %v9964_v7 }
 0x2bd   : > { %6967 = vmatprep.subr.bf16.mxu0 %v8370_v46  ;;  %7543 = vmatprep.subr.bf16.mxu1 %v8371_v2  ;;  %2989 = vst [vmem:[#allocation2 + $0x1c] sm:$0xf] %v2685_v29  ;;  %v2987_v46 = vsel %vm10015_vm9, %v2676_v35, %v2986_v24  ;;  %v2991_v30 = vsel %vm9995_vm7, %v2686_v41, %v2990_v42 }
 0x2be   : > { %7545 = vmatprep.mubr.bf16.mxu1 %v3544_v18  ;;  %2988 = vst [vmem:[#allocation2 + $0x18] sm:$0xf] %v2987_v46  ;;  %v2994_v35 = vsel %vm10015_vm9, %v2693_v45, %v2993_v53  ;;  %2992 = vst [vmem:[#allocation2 + $0x20] sm:$0x1] %v2991_v30  ;;  %v2998_v47 = vsel %vm9995_vm7, %v2703_v1, %v2997_v3  ;;  %v3319_v41 = vsel %vm510_vm0, %v3314_v40, %v3318_v19  ;;  %v3007_v19 = vld [vmem:[#allocation2 + $0x3c] sm:$0xf] }
 0x2bf   : > { %2995 = vst [vmem:[#allocation2 + $0x24] sm:$0xf] %v2994_v35  ;;  %v2702_v7 = vsel %vm10005_vm8, %v2694_v55, %v2701_v37  ;;  %2999 = vst [vmem:[#allocation2 + $0x2c] sm:$0x1] %v2998_v47  ;;  %3844 = vmatprep.mubr.bf16.mxu0 %v3319_v41  ;;  %v2707_v45 = vrot.slane %v2705_v38, 7  ;;  %v2733_v55 = vshll.u32 %v9991_v11, 16  ;;  %v10089_v52 = vpack.c.bf16 %v11477_v50, %v11477_v50 }
 0x2c0   : > { %6968 = vmatpush3.bf16.msra.mxu0 %v8372_v10  ;;  %7544 = vmatpush3.bf16.msra.mxu1 %v8371_v2  ;;  %v2716_v2 = vshll.u32 %v9976_v17, 16  ;;  %v2722_v10 = vshrl.u32 %v9986_v63, 16  ;;  %2996 = vst [vmem:[#allocation2 + $0x28] sm:$0xf] %v2702_v7  ;;  %v10068_v17 = vpack.c.bf16 %v2475_v0, %v2475_v0  ;;  %v11476_v11 = vmax.f32 %v9823_v54, 0.0  ;;  %v8375_v0 = vld [vmem:[#allocation2 + $0xc] sm:$0xff]  }
 0x2c1   : > { %7577 = vmatprep.subr.bf16.mxu1 %v10027_v56  ;;  %v2710_v29 = vor.u32 %v2708_v6, %v2707_v45  ;;  %v8376_v24 = vld [vmem:[#allocation2 + $0x14] ss:$0 sps:$4 sm:$0x11]   ;;  %v11478_v18 = vmax.f32 %v9833_v59, 0.0  ;;  %v11479_v46 = vmax.f32 %v9838_v14, 0.0  ;;  %v8382_v1 = vld [vmem:[#allocation3 + $0x148] sm:$0xff]  }
 0x2c2   : > { %v10062_v26 = vrot.slane %v2722_v10, 7  ;;  %v2718_v63 = vor.u32 %v2716_v2, %v2715_v13  ;;  %v10083_v4 = vpack.c.bf16 %v11476_v11, %v11476_v11  ;;  %v2711_v53 = vrot.slane %v2707_v45, 4  ;;  %v3011_v50 = vld [vmem:[#allocation2 + $0x44] sm:$0x1] }
 0x2c3   : > { %3845 = vmatmul.mubr.bf16.vlgmr.msra.gmra.mrb[176].mxu0 %v9978_v57  ;;  %v11475_v57 = vmax.f32 %v9818_v61, 0.0  ;;  %v10094_v61 = vpack.c.bf16 %v11478_v18, %v11478_v18  ;;  %v10099_v54 = vpack.c.bf16 %v11479_v46, %v11479_v46  ;;  %v2720_v40 = vrot.slane %v2715_v13, 4  ;;  %v8387_v18 = vld [vmem:[#allocation3 + $0x150] sm:$0xff]  }
 0x2c4   : > { %v2727_v21 = vor.u32 %v2725_v31, %v10062_v26  ;;  %v3001_v49 = vsel %vm10015_vm9, %v2710_v29, %v3000_v20  ;;  %v2728_v30 = vrot.slane %v10062_v26, 4  ;;  %v3545_v37 = vrot.slane %v8375_v0, 1 }
 0x2c5   : > { %v10078_v51 = vpack.c.bf16 %v11475_v57, %v11475_v57  ;;  %v10101_v42 = vld [vmem:[#allocation2 + $0x18] sm:$0xff]   ;;  %v3546_v59 = vrot.slane %v8376_v24, 1  ;;  %v3321_v35 = vshrl.u32 %v8375_v0, 16  ;;  %v3323_v3 = vshll.u32 %v8375_v0, 16  ;;  %3002 = vst [vmem:[#allocation2 + $0x30] sm:$0xf] %v3001_v49 }
 0x2c6   : > { %v3328_v47 = vshll.u32 %v8376_v24, 16  ;;  %v8379_v14 = vld [vmem:[#allocation2 + $0x20] ss:$0 sps:$4 sm:$0x11]   ;;  %v3548_v38 = vrot.slane %v10101_v42, 1  ;;  %v3333_v6 = vshrl.u32 %v10101_v42, 16  ;;  %v2719_v39 = vsel %vm10005_vm8, %v2711_v53, %v2718_v63 }
 0x2c7   : > { %v10111_v41 = vsel %vm745_vm1, %v3545_v37, %v3546_v59  ;;  %v3325_v7 = vrot.slane %v3323_v3, 1  ;;  %v10113_v2 = vld [vmem:[#allocation2 + $0x24] sm:$0xff]   ;;  %3003 = vst [vmem:[#allocation2 + $0x34] sm:$0xf] %v2719_v39  ;;  %v3005_v10 = vsel %vm9995_vm7, %v2720_v40, %v3004_v32  ;;  %v3008_v45 = vsel %vm10015_vm9, %v2727_v21, %v3007_v19 }
 0x2c8   : > { %7546 = vmatmul.mubr.bf16.vlgmr.msra.gmra.mrb[48].mxu1 %v10111_v41  ;;  %v3330_v13 = vrot.slane %v3328_v47, 1  ;;  %v3549_v20 = vrot.slane %v8379_v14, 1  ;;  %v3335_v31 = vshll.u32 %v10101_v42, 16  ;;  %v3340_v26 = vshll.u32 %v8379_v14, 16  ;;  %3006 = vst [vmem:[#allocation2 + $0x38] sm:$0x1] %v3005_v10 }
 0x2c9   : > { %3009 = vst [vmem:[#allocation2 + $0x3c] sm:$0xf] %v3008_v45  ;;  %7578 = vmatpush3.bf16.msra.mxu1 %v10027_v56  ;;  %v3326_v29 = vor.u32 %v3325_v7, %v3321_v35  ;;  %v8381_v63 = vld [vmem:[#allocation2 + $0x2c] ss:$0 sps:$4 sm:$0x11]   ;;  %v3551_v57 = vrot.slane %v10113_v2, 1 }
 0x2ca   : > { %v2732_v11 = vrot.slane %v2730_v9, 7  ;;  %v3345_v32 = vshrl.u32 %v10113_v2, 16  ;;  %v10125_v19 = vsel %vm745_vm1, %v3548_v38, %v3549_v20  ;;  %7579 = vmatprep.subr.bf16.mxu1 %v8382_v1  ;;  %v3337_v24 = vrot.slane %v3335_v31, 1  ;;  %v3014_v38 = vld [vmem:[#allocation2 + $0x48] sm:$0xf]  ;;  %v8392_v10 = vld [vmem:[#allocation3 + $0x158] sm:$0xff]  }
 0x2cb   : > { %v3342_v21 = vrot.slane %v3340_v26, 1  ;;  %v3347_v46 = vshll.u32 %v10113_v2, 16  ;;  %v10129_v53 = vsel %vm510_vm0, %v3326_v29, %v3330_v13  ;;  %7549 = vmatprep.mubr.bf16.mxu1 %v10125_v19  ;;  %v3552_v56 = vrot.slane %v8381_v63, 1 }
 0x2cc   : > { %v2735_v40 = vor.u32 %v2733_v55, %v2732_v11  ;;  %v2737_v9 = vrot.slane %v2732_v11, 4  ;;  %3852 = vmatprep.mubr.bf16.mxu0 %v10129_v53  ;;  %v3338_v49 = vor.u32 %v3337_v24, %v3333_v6  ;;  %v3352_v59 = vshll.u32 %v8381_v63, 16 }
 0x2cd   : > { %v3349_v37 = vrot.slane %v3347_v46, 1  ;;  %v2739_v35 = vshrl.u32 %v10037_v23, 16  ;;  %3853 = vmatmul.mubr.bf16.gmra.mrb[180].mxu0 %v8375_v0  ;;  %v10135_v3 = vsel %vm745_vm1, %v3551_v57, %v3552_v56  ;;  %7580 = vmatpush3.bf16.msra.mxu1 %v8382_v1  ;;  %v2742_v55 = vshll.u32 %v10037_v23, 16 }
 0x2ce   : > { %v2736_v47 = vsel %vm10005_vm8, %v2728_v30, %v2735_v40  ;;  %v3012_v14 = vsel %vm9995_vm7, %v2737_v9, %v3011_v50  ;;  %v10143_v6 = vsel %vm510_vm0, %v3338_v49, %v3342_v21  ;;  %v10145_v39 = vld [vmem:[#allocation2 + $0x30] sm:$0xff]   ;;  %7581 = vmatprep.subr.bf16.mxu1 %v8387_v18  ;;  %v3354_v7 = vrot.slane %v3352_v59, 1  ;;  %v8397_v9 = vld [vmem:[#allocation3 + $0x160] sm:$0xff]  }
 0x2cf   : > { %3010 = vst [vmem:[#allocation2 + $0x40] sm:$0xf] %v2736_v47  ;;  %3013 = vst [vmem:[#allocation2 + $0x44] sm:$0x1] %v3012_v14  ;;  %v3350_v0 = vor.u32 %v3349_v37, %v3345_v32  ;;  %v2741_v1 = vrot.slane %v2739_v35, 7  ;;  %3860 = vmatprep.mubr.bf16.mxu0 %v10143_v6  ;;  %v2747_v45 = vshrl.u32 %v10068_v17, 16 }
 0x2d0   : > { %v8384_v30 = vld [vmem:[#allocation2 + $0x38] ss:$0 sps:$4 sm:$0x11]   ;;  %v11480_v23 = vmax.f32 %v9843_v33, 0.0  ;;  %v11481_v20 = vmax.f32 %v9848_v43, 0.0  ;;  %v11482_v26 = vmax.f32 %v9853_v44, 0.0  ;;  %7550 = vmatmul.mubr.bf16.gmra.mrb[52].mxu1 %v10135_v3 }
 0x2d1   : > { %v3554_v63 = vrot.slane %v10145_v39, 1  ;;  %v10167_v57 = vsel %vm510_vm0, %v3350_v0, %v3354_v7  ;;  %v2744_v33 = vor.u32 %v2742_v55, %v2741_v1  ;;  %v2745_v11 = vrot.slane %v2741_v1, 4  ;;  %7582 = vmatpush3.bf16.msra.mxu1 %v8387_v18  ;;  %v3018_v50 = vld [vmem:[#allocation2 + $0x50] sm:$0x1]  ;;  %v3021_v59 = vld [vmem:[#allocation2 + $0x54] sm:$0xf] }
 0x2d2   : > { %v10152_v13 = vpack.c.bf16 %v11480_v23, %v11480_v23  ;;  %v10157_v31 = vpack.c.bf16 %v11481_v20, %v11481_v20  ;;  %v10162_v29 = vpack.c.bf16 %v11482_v26, %v11482_v26  ;;  %v3555_v32 = vrot.slane %v8384_v30, 1  ;;  %7583 = vmatprep.subr.bf16.mxu1 %v8392_v10  ;;  %v3025_v35 = vld [vmem:[#allocation2 + $0x5c] sm:$0x1] }
 0x2d3   : > { %v2749_v43 = vrot.slane %v2747_v45, 7  ;;  %v2750_v24 = vshll.u32 %v10068_v17, 16  ;;  %v2756_v21 = vshrl.u32 %v10073_v15, 16  ;;  %v3015_v44 = vsel %vm10015_vm9, %v2744_v33, %v3014_v38 }
 0x2d4   : > { %v2759_v46 = vshll.u32 %v10073_v15, 16  ;;  %v2764_v56 = vshrl.u32 %v10078_v51, 16  ;;  %v2767_v40 = vshll.u32 %v10078_v51, 16  ;;  %v10177_v49 = vsel %vm745_vm1, %v3554_v63, %v3555_v32  ;;  %3016 = vst [vmem:[#allocation2 + $0x48] sm:$0xf] %v3015_v44  ;;  %v8402_v51 = vld [vmem:[#allocation3 + $0x168] sm:$0xff]  }
 0x2d5   : > { %v2752_v18 = vor.u32 %v2750_v24, %v2749_v43  ;;  %v2754_v37 = vrot.slane %v2749_v43, 4  ;;  %v2758_v17 = vrot.slane %v2756_v21, 7  ;;  %7553 = vmatprep.mubr.bf16.mxu1 %v10177_v49  ;;  %v3357_v15 = vshrl.u32 %v10145_v39, 16  ;;  %3861 = vmatmul.mubr.bf16.gmra.mrb[184].mxu0 %v10101_v42  ;;  %v8407_v44 = vld [vmem:[#allocation3 + $0x170] sm:$0xff]  }
 0x2d6   : > { %v2766_v47 = vrot.slane %v2764_v56, 7  ;;  %v3359_v14 = vshll.u32 %v10145_v39, 16  ;;  %v3364_v55 = vshll.u32 %v8384_v30, 16  ;;  %v10183_v38 = vld [vmem:[#allocation2 + $0x3c] sm:$0xff]   ;;  %7584 = vmatpush3.bf16.msra.mxu1 %v8392_v10  ;;  %3868 = vmatprep.mubr.bf16.mxu0 %v10167_v57  ;;  %v2776_v10 = vshll.u32 %v10083_v4, 16 }
 0x2d7   : > { %v2753_v0 = vsel %vm10005_vm8, %v2745_v11, %v2752_v18  ;;  %v3019_v7 = vsel %vm9995_vm7, %v2754_v37, %v3018_v50  ;;  %v2761_v1 = vor.u32 %v2759_v46, %v2758_v17  ;;  %v2762_v45 = vrot.slane %v2758_v17, 4  ;;  %v10189_v23 = vld [vmem:[#allocation2 + $0x44] ss:$0 sps:$4 sm:$0x11]   ;;  %7585 = vmatprep.subr.bf16.mxu1 %v8397_v9  ;;  %v3032_v17 = vld [vmem:[#allocation2 + $0x68] sm:$0x1] }
 0x2d8   : > { %3017 = vst [vmem:[#allocation2 + $0x4c] sm:$0xf] %v2753_v0  ;;  %3020 = vst [vmem:[#allocation2 + $0x50] sm:$0x1] %v3019_v7  ;;  %v2769_v30 = vor.u32 %v2767_v40, %v2766_v47  ;;  %v2771_v20 = vrot.slane %v2766_v47, 4  ;;  %v3361_v42 = vrot.slane %v3359_v14, 1 }
 0x2d9   : > { %v3366_v26 = vrot.slane %v3364_v55, 1  ;;  %v3557_v63 = vrot.slane %v10183_v38, 1  ;;  %v3022_v33 = vsel %vm10015_vm9, %v2761_v1, %v3021_v59  ;;  %v2773_v11 = vshrl.u32 %v10083_v4, 16  ;;  %v3028_v40 = vld [vmem:[#allocation2 + $0x60] sm:$0xf] }
 0x2da   : > { %v3558_v32 = vrot.slane %v10189_v23, 1  ;;  %v2770_v43 = vsel %vm10005_vm8, %v2762_v45, %v2769_v30  ;;  %3023 = vst [vmem:[#allocation2 + $0x54] sm:$0xf] %v3022_v33  ;;  %v3026_v24 = vsel %vm9995_vm7, %v2771_v20, %v3025_v35  ;;  %v3362_v21 = vor.u32 %v3361_v42, %v3357_v15  ;;  %7586 = vmatpush3.bf16.msra.mxu1 %v8397_v9  ;;  %v3035_v47 = vld [vmem:[#allocation2 + $0x6c] sm:$0xf]  ;;  %v8412_v30 = vld [vmem:[#allocation3 + $0x178] sm:$0xff]  }
 0x2db   : > { %3024 = vst [vmem:[#allocation2 + $0x58] sm:$0xf] %v2770_v43  ;;  %3027 = vst [vmem:[#allocation2 + $0x5c] sm:$0x1] %v3026_v24  ;;  %v2775_v50 = vrot.slane %v2773_v11, 7  ;;  %v2781_v46 = vshrl.u32 %v10089_v52, 16  ;;  %7587 = vmatprep.subr.bf16.mxu1 %v8402_v51 }
 0x2dc   : > { %v2784_v56 = vshll.u32 %v10089_v52, 16  ;;  %v2790_v4 = vshrl.u32 %v10094_v61, 16  ;;  %v10206_v18 = vsel %vm745_vm1, %v3557_v63, %v3558_v32  ;;  %v10209_v37 = vsel %vm510_vm0, %v3362_v21, %v3366_v26  ;;  %v3039_v9 = vld [vmem:[#allocation2 + $0x74] sm:$0x1] }
 0x2dd   : > { %v2793_v59 = vshll.u32 %v10094_v61, 16  ;;  %v2798_v35 = vshrl.u32 %v10099_v54, 16  ;;  %7554 = vmatmul.mubr.bf16.gmra.mrb[56].mxu1 %v10206_v18  ;;  %v2778_v52 = vor.u32 %v2776_v10, %v2775_v50  ;;  %v2779_v15 = vrot.slane %v2775_v50, 4  ;;  %3869 = vmatmul.mubr.bf16.gmra.mrb[188].mxu0 %v10113_v2 }
 0x2de   : > { %v2783_v14 = vrot.slane %v2781_v46, 7  ;;  %v2792_v55 = vrot.slane %v2790_v4, 7  ;;  %v2801_v7 = vshll.u32 %v10099_v54, 16  ;;  %v3369_v1 = vshrl.u32 %v10183_v38, 16  ;;  %7588 = vmatpush3.bf16.msra.mxu1 %v8402_v51  ;;  %3876 = vmatprep.mubr.bf16.mxu0 %v10209_v37 }
 0x2df   : > { %v2800_v0 = vrot.slane %v2798_v35, 7  ;;  %v3371_v45 = vshll.u32 %v10183_v38, 16  ;;  %v10217_v61 = vld [vmem:[#allocation2 + $0x48] sm:$0xff]   ;;  %v3029_v26 = vsel %vm10015_vm9, %v2778_v52, %v3028_v40  ;;  %v10222_v33 = vld [vmem:[#allocation2 + $0x50] ss:$0 sps:$4 sm:$0x11]   ;;  %7589 = vmatprep.subr.bf16.mxu1 %v8407_v44 }
 0x2e0   : > { %v2786_v20 = vor.u32 %v2784_v56, %v2783_v14  ;;  %v2788_v42 = vrot.slane %v2783_v14, 4  ;;  %v2795_v63 = vor.u32 %v2793_v59, %v2792_v55  ;;  %3030 = vst [vmem:[#allocation2 + $0x60] sm:$0xf] %v3029_v26  ;;  %v2796_v54 = vrot.slane %v2792_v55, 4 }
 0x2e1   : > { %v2803_v11 = vor.u32 %v2801_v7, %v2800_v0  ;;  %v2805_v10 = vrot.slane %v2800_v0, 4  ;;  %v3373_v32 = vrot.slane %v3371_v45, 1  ;;  %v3560_v43 = vrot.slane %v10217_v61, 1  ;;  %v3046_v45 = vld [vmem:[#allocation2 + $0x80] sm:$0x1] }
 0x2e2   : > { %v2787_v2 = vsel %vm10005_vm8, %v2779_v15, %v2786_v20  ;;  %v3033_v24 = vsel %vm9995_vm7, %v2788_v42, %v3032_v17  ;;  %v3036_v51 = vsel %vm10015_vm9, %v2795_v63, %v3035_v47  ;;  %v3561_v21 = vrot.slane %v10222_v33, 1  ;;  %v10233_v50 = vld [vmem:[#allocation2 + $0x54] sm:$0xff]   ;;  %v10242_v17 = vld [vmem:[#allocation2 + $0x5c] ss:$0 sps:$4 sm:$0x11]   ;;  %7590 = vmatpush3.bf16.msra.mxu1 %v8407_v44 }
 0x2e3   : > { %3031 = vst [vmem:[#allocation2 + $0x64] sm:$0xf] %v2787_v2  ;;  %3034 = vst [vmem:[#allocation2 + $0x68] sm:$0x1] %v3033_v24  ;;  %v2804_v46 = vsel %vm10005_vm8, %v2796_v54, %v2803_v11  ;;  %v3040_v56 = vsel %vm9995_vm7, %v2805_v10, %v3039_v9  ;;  %v11483_v40 = vmax.f32 %v9858_v12, 0.0  ;;  %v3374_v59 = vor.u32 %v3373_v32, %v3369_v1  ;;  %v8413_v9 = vld [vmem:[#allocation3 + $0x1c0] sm:$0xff]  }
 0x2e4   : > { %3037 = vst [vmem:[#allocation2 + $0x6c] sm:$0xf] %v3036_v51  ;;  %3038 = vst [vmem:[#allocation2 + $0x70] sm:$0xf] %v2804_v46  ;;  %v3376_v35 = vshll.u32 %v10189_v23, 16  ;;  %v2807_v47 = vshrl.u32 %v10152_v13, 16  ;;  %v10248_v15 = vsel %vm745_vm1, %v3560_v43, %v3561_v21  ;;  %7591 = vmatprep.subr.bf16.mxu1 %v8412_v30 }
 0x2e5   : > { %v6533_v4 = vpack.c.bf16 %v11483_v40, %v11483_v40  ;;  %3041 = vst [vmem:[#allocation2 + $0x74] sm:$0x1] %v3040_v56  ;;  %v2810_v52 = vshll.u32 %v10152_v13, 16  ;;  %v3563_v14 = vrot.slane %v10233_v50, 1  ;;  %v2815_v12 = vshrl.u32 %v10157_v31, 16  ;;  %7557 = vmatprep.mubr.bf16.mxu1 %v10248_v15  ;;  %3877 = vmatmul.mubr.bf16.gmra.mrb[192].mxu0 %v10145_v39 }
 0x2e6   : > { %v2818_v55 = vshll.u32 %v10157_v31, 16  ;;  %v3564_v23 = vrot.slane %v10242_v17, 1  ;;  %v3378_v0 = vrot.slane %v3376_v35, 1  ;;  %v2809_v7 = vrot.slane %v2807_v47, 7  ;;  %v3042_v1 = vld [vmem:[#allocation2 + $0x78] sm:$0xf]  ;;  %7592 = vmatpush3.bf16.msra.mxu1 %v8412_v30 }
 0x2e7   : > { %v2824_v13 = vshrl.u32 %v10162_v29, 16  ;;  %v2817_v44 = vrot.slane %v2815_v12, 7  ;;  %v2827_v20 = vshll.u32 %v10162_v29, 16  ;;  %v2832_v42 = vshrl.u32 %v6533_v4, 16  ;;  %v3049_v10 = vld [vmem:[#allocation2 + $0x84] sm:$0xf]  ;;  %7225 = vmatprep.subr.bf16.mxu1 %v8413_v9 }
 0x2e8   : > { %v2835_v26 = vshll.u32 %v6533_v4, 16  ;;  %v10258_v63 = vsel %vm745_vm1, %v3563_v14, %v3564_v23  ;;  %v10262_v31 = vsel %vm510_vm0, %v3374_v59, %v3378_v0  ;;  %v2812_v54 = vor.u32 %v2810_v52, %v2809_v7  ;;  %v3053_v51 = vld [vmem:[#allocation2 + $0x8c] sm:$0x1] }
 0x2e9   : > { %v2813_v11 = vrot.slane %v2809_v7, 4  ;;  %7558 = vmatmul.mubr.bf16.gmra.mrb[60].mxu1 %v10258_v63  ;;  %3884 = vmatprep.mubr.bf16.mxu0 %v10262_v31  ;;  %v2820_v32 = vor.u32 %v2818_v55, %v2817_v44  ;;  %v2822_v29 = vrot.slane %v2817_v44, 4  ;;  %v2826_v43 = vrot.slane %v2824_v13, 7 }
 0x2ea   : > { %v2834_v2 = vrot.slane %v2832_v42, 7  ;;  %v10266_v24 = vld [vmem:[#allocation2 + $0x60] sm:$0xff]   ;;  %v3043_v39 = vsel %vm10015_vm9, %v2812_v54, %v3042_v1  ;;  %v3381_v21 = vshrl.u32 %v10217_v61, 16  ;;  %v11484_v46 = vmax.f32 %v9863_v16, 0.0 }
 0x2eb   : > { %v11485_v56 = vmax.f32 %v9868_v60, 0.0  ;;  %v10277_v4 = vld [vmem:[#allocation2 + $0x68] ss:$0 sps:$4 sm:$0x11]   ;;  %v10279_v59 = vld [vmem:[#allocation2 + $0x6c] sm:$0xff]   ;;  %v2821_v35 = vsel %vm10005_vm8, %v2813_v11, %v2820_v32  ;;  %v3047_v47 = vsel %vm9995_vm7, %v2822_v29, %v3046_v45  ;;  %v2829_v52 = vor.u32 %v2827_v20, %v2826_v43 }
 0x2ec   : > { %v6534_v30 = vpack.c.bf16 %v11484_v46, %v11484_v46  ;;  %3044 = vst [vmem:[#allocation2 + $0x78] sm:$0xf] %v3043_v39  ;;  %v2837_v16 = vor.u32 %v2835_v26, %v2834_v2  ;;  %v3566_v14 = vrot.slane %v10266_v24, 1  ;;  %3045 = vst [vmem:[#allocation2 + $0x7c] sm:$0xf] %v2821_v35  ;;  %v2830_v60 = vrot.slane %v2826_v43, 4 }
 0x2ed   : > { %v6535_v40 = vpack.c.bf16 %v11485_v56, %v11485_v56  ;;  %3048 = vst [vmem:[#allocation2 + $0x80] sm:$0x1] %v3047_v47  ;;  %v11486_v12 = vmax.f32 %v9873_v27, 0.0  ;;  %v11487_v9 = vmax.f32 %v9878_v8, 0.0  ;;  %v3567_v0 = vrot.slane %v10277_v4, 1  ;;  %3885 = vmatmul.mubr.bf16.gmra.mrb[196].mxu0 %v10183_v38  ;;  %v8421_v47 = vld [vmem:[#allocation3 + $0x100] sm:$0xff]  }
 0x2ee   : > { %v10295_v7 = vld [vmem:[#allocation2 + $0x74] ss:$0 sps:$4 sm:$0x11]   ;;  %v3569_v1 = vrot.slane %v10279_v59, 1  ;;  %v2839_v13 = vrot.slane %v2834_v2, 4  ;;  %v3050_v44 = vsel %vm10015_vm9, %v2829_v52, %v3049_v10  ;;  %v2838_v27 = vsel %vm10005_vm8, %v2830_v60, %v2837_v16  ;;  %7089 = vmatprep.subr.bf16.mxu0 %v8421_v47 }
 0x2ef   : > { %v6536_v55 = vpack.c.bf16 %v11486_v12, %v11486_v12  ;;  %v10292_v23 = vpack.c.bf16 %v11487_v9, %v11487_v9  ;;  %3051 = vst [vmem:[#allocation2 + $0x84] sm:$0xf] %v3050_v44  ;;  %v3383_v45 = vshll.u32 %v10217_v61, 16  ;;  %v3388_v8 = vshll.u32 %v10222_v33, 16  ;;  %3052 = vst [vmem:[#allocation2 + $0x88] sm:$0xf] %v2838_v27 }
 0x2f0   : > { %v2841_v20 = vshrl.u32 %v6534_v30, 16  ;;  %v10305_v42 = vsel %vm745_vm1, %v3566_v14, %v3567_v0  ;;  %v3570_v26 = vrot.slane %v10295_v7, 1  ;;  %v3054_v54 = vsel %vm9995_vm7, %v2839_v13, %v3053_v51  ;;  %v3056_v43 = vld [vmem:[#allocation2 + $0x90] sm:$0xf]  ;;  %v3060_v46 = vld [vmem:[#allocation2 + $0x98] sm:$0x1] }
 0x2f1   : > { %v2844_v11 = vshll.u32 %v6534_v30, 16  ;;  %7561 = vmatprep.mubr.bf16.mxu1 %v10305_v42  ;;  %3055 = vst [vmem:[#allocation2 + $0x8c] sm:$0x1] %v3054_v54  ;;  %v3385_v10 = vrot.slane %v3383_v45, 1  ;;  %v3390_v32 = vrot.slane %v3388_v8, 1  ;;  %v2849_v33 = vshrl.u32 %v6535_v40, 16 }
 0x2f2   : > { %v2843_v29 = vrot.slane %v2841_v20, 7  ;;  %v10313_v2 = vsel %vm745_vm1, %v3569_v1, %v3570_v26  ;;  %v2852_v39 = vshll.u32 %v6535_v40, 16  ;;  %v2858_v56 = vshrl.u32 %v6536_v55, 16  ;;  %v3063_v16 = vld [vmem:[#allocation2 + $0x9c] sm:$0xf] }
 0x2f3   : > { %v2861_v35 = vshll.u32 %v6536_v55, 16  ;;  %7562 = vmatmul.mubr.bf16.gmra.mrb[64].mxu1 %v10313_v2  ;;  %v3386_v51 = vor.u32 %v3385_v10, %v3381_v21  ;;  %v2851_v38 = vrot.slane %v2849_v33, 7  ;;  %v10316_v14 = vld [vmem:[#allocation2 + $0x78] sm:$0xff]   ;;  %v11488_v12 = vmax.f32 %v9883_v5, 0.0  ;;  %v3067_v10 = vld [vmem:[#allocation2 + $0xa4] sm:$0x1] }
 0x2f4   : > { %v2846_v30 = vor.u32 %v2844_v11, %v2843_v29  ;;  %v2847_v52 = vrot.slane %v2843_v29, 4  ;;  %v2860_v60 = vrot.slane %v2858_v56, 7  ;;  %v11489_v40 = vmax.f32 %v9888_v36, 0.0  ;;  %v10328_v0 = vld [vmem:[#allocation2 + $0x80] ss:$0 sps:$4 sm:$0x11]  }
 0x2f5   : > { %v10321_v9 = vpack.c.bf16 %v11488_v12, %v11488_v12  ;;  %v10331_v21 = vsel %vm510_vm0, %v3386_v51, %v3390_v32  ;;  %v2854_v1 = vor.u32 %v2852_v39, %v2851_v38  ;;  %v2856_v13 = vrot.slane %v2851_v38, 4  ;;  %v8423_v32 = vld [vmem:[#allocation3 + $0xc0] sm:$0xff]  }
 0x2f6   : > { %v10326_v55 = vpack.c.bf16 %v11489_v40, %v11489_v40  ;;  %v3057_v44 = vsel %vm10015_vm9, %v2846_v30, %v3056_v43  ;;  %v3572_v5 = vrot.slane %v10316_v14, 1  ;;  %3892 = vmatprep.mubr.bf16.mxu0 %v10331_v21  ;;  %v2863_v36 = vor.u32 %v2861_v35, %v2860_v60  ;;  %v10339_v20 = vld [vmem:[#allocation2 + $0x84] sm:$0xff]   ;;  %7090 = vmatpush3.bf16.msra.mxu0 %v8423_v32 }
 0x2f7   : > { %3058 = vst [vmem:[#allocation2 + $0x90] sm:$0xf] %v3057_v44  ;;  %v2864_v27 = vrot.slane %v2860_v60, 4  ;;  %v2866_v45 = vshrl.u32 %v10292_v23, 16  ;;  %v3573_v8 = vrot.slane %v10328_v0, 1  ;;  %v2855_v26 = vsel %vm10005_vm8, %v2847_v52, %v2854_v1  ;;  %3893 = vmatmul.mubr.bf16.gmra.mrb[200].mxu0 %v10217_v61 }
 0x2f8   : > { %v3061_v54 = vsel %vm9995_vm7, %v2856_v13, %v3060_v46  ;;  %v2869_v11 = vshll.u32 %v10292_v23, 16  ;;  %v10346_v29 = vld [vmem:[#allocation2 + $0x8c] ss:$0 sps:$4 sm:$0x11]   ;;  %3059 = vst [vmem:[#allocation2 + $0x94] sm:$0xf] %v2855_v26  ;;  %v3064_v43 = vsel %vm10015_vm9, %v2863_v36, %v3063_v16 }
 0x2f9   : > { %3062 = vst [vmem:[#allocation2 + $0x98] sm:$0x1] %v3061_v54  ;;  %v2868_v33 = vrot.slane %v2866_v45, 7  ;;  %v11490_v39 = vmax.f32 %v9893_v22, 0.0  ;;  %v11491_v35 = vmax.f32 %v9898_v62, 0.0  ;;  %v10361_v23 = vsel %vm745_vm1, %v3572_v5, %v3573_v8  ;;  %v8425_v16 = vld [vmem:[#allocation3 + $0x108] sm:$0xff]  }
 0x2fa   : > { %v3575_v47 = vrot.slane %v10339_v20, 1  ;;  %3065 = vst [vmem:[#allocation2 + $0x9c] sm:$0xf] %v3064_v43  ;;  %v3393_v51 = vshrl.u32 %v10233_v50, 16  ;;  %v3395_v22 = vshll.u32 %v10233_v50, 16  ;;  %7565 = vmatprep.mubr.bf16.mxu1 %v10361_v23  ;;  %v3576_v30 = vrot.slane %v10346_v29, 1  ;;  %7091 = vmatprep.subr.bf16.mxu0 %v8425_v16 }
 0x2fb   : > { %v10353_v56 = vpack.c.bf16 %v11490_v39, %v11490_v39  ;;  %v10358_v46 = vpack.c.bf16 %v11491_v35, %v11491_v35  ;;  %v2871_v62 = vor.u32 %v2869_v11, %v2868_v33  ;;  %v2873_v52 = vrot.slane %v2868_v33, 4  ;;  %v8426_v36 = vld [vmem:[#allocation3 + $0xc8] sm:$0xff]   ;;  %v3074_v54 = vld [vmem:[#allocation2 + $0xb0] sm:$0x1]  ;;  %v8427_v11 = vld [vmem:[#allocation3 + $0x110] sm:$0xff]  }
 0x2fc   : > { %v3400_v38 = vshll.u32 %v10242_v17, 16  ;;  %v3397_v60 = vrot.slane %v3395_v22, 1  ;;  %v2875_v12 = vshrl.u32 %v10321_v9, 16  ;;  %v2878_v61 = vshll.u32 %v10321_v9, 16  ;;  %v3070_v17 = vld [vmem:[#allocation2 + $0xa8] sm:$0xf]  ;;  %7092 = vmatpush3.bf16.msra.mxu0 %v8426_v36 }
 0x2fd   : > { %v2883_v40 = vshrl.u32 %v10326_v55, 16  ;;  %v10374_v1 = vsel %vm745_vm1, %v3575_v47, %v3576_v30  ;;  %v2872_v13 = vsel %vm10005_vm8, %v2864_v27, %v2871_v62  ;;  %v3068_v44 = vsel %vm9995_vm7, %v2873_v52, %v3067_v10  ;;  %7093 = vmatprep.subr.bf16.mxu0 %v8427_v11 }
 0x2fe   : > { %v3402_v5 = vrot.slane %v3400_v38, 1  ;;  %7566 = vmatmul.mubr.bf16.gmra.mrb[68].mxu1 %v10374_v1  ;;  %3066 = vst [vmem:[#allocation2 + $0xa0] sm:$0xf] %v2872_v13  ;;  %3069 = vst [vmem:[#allocation2 + $0xa4] sm:$0x1] %v3068_v44  ;;  %v3398_v9 = vor.u32 %v3397_v60, %v3393_v51  ;;  %v2877_v45 = vrot.slane %v2875_v12, 7 }
 0x2ff   : > { %v2885_v8 = vrot.slane %v2883_v40, 7  ;;  %v2886_v26 = vshll.u32 %v10326_v55, 16  ;;  %v2892_v27 = vshrl.u32 %v10353_v56, 16  ;;  %v2895_v32 = vshll.u32 %v10353_v56, 16  ;;  %v10386_v43 = vld [vmem:[#allocation2 + $0x90] sm:$0xff]  }
 0x300   : > { %v2900_v10 = vshrl.u32 %v10358_v46, 16  ;;  %v2903_v33 = vshll.u32 %v10358_v46, 16  ;;  %v10389_v39 = vsel %vm510_vm0, %v3398_v9, %v3402_v5  ;;  %v2880_v35 = vor.u32 %v2878_v61, %v2877_v45  ;;  %v10391_v55 = vld [vmem:[#allocation2 + $0x98] ss:$0 sps:$4 sm:$0x11]  }
 0x301   : > { %v2881_v47 = vrot.slane %v2877_v45, 4  ;;  %v2888_v51 = vor.u32 %v2886_v26, %v2885_v8  ;;  %3900 = vmatprep.mubr.bf16.mxu0 %v10389_v39  ;;  %v2890_v22 = vrot.slane %v2885_v8, 4  ;;  %v3077_v56 = vld [vmem:[#allocation2 + $0xb4] sm:$0xf]  ;;  %v3578_v30 = vrot.slane %v10386_v43, 1 }
 0x302   : > { %v3071_v62 = vsel %vm10015_vm9, %v2880_v35, %v3070_v17  ;;  %3901 = vmatmul.mubr.bf16.gmra.mrb[204].mxu0 %v10233_v50  ;;  %v2894_v52 = vrot.slane %v2892_v27, 7  ;;  %v3081_v38 = vld [vmem:[#allocation2 + $0xbc] sm:$0x1]  ;;  %v3579_v16 = vrot.slane %v10391_v55, 1  ;;  %v2902_v12 = vrot.slane %v2900_v10, 7  ;;  %v8429_v50 = vld [vmem:[#allocation3 + $0xd0] sm:$0xff]  }
 0x303   : > { %v2889_v46 = vsel %vm10005_vm8, %v2881_v47, %v2888_v51  ;;  %3072 = vst [vmem:[#allocation2 + $0xa8] sm:$0xf] %v3071_v62  ;;  %v3075_v60 = vsel %vm9995_vm7, %v2890_v22, %v3074_v54  ;;  %v3405_v61 = vshrl.u32 %v10266_v24, 16  ;;  %v3407_v44 = vshll.u32 %v10266_v24, 16  ;;  %7094 = vmatpush3.bf16.msra.mxu0 %v8429_v50 }
 0x304   : > { %3073 = vst [vmem:[#allocation2 + $0xac] sm:$0xf] %v2889_v46  ;;  %3076 = vst [vmem:[#allocation2 + $0xb0] sm:$0x1] %v3075_v60  ;;  %v2897_v40 = vor.u32 %v2895_v32, %v2894_v52  ;;  %v2898_v13 = vrot.slane %v2894_v52, 4  ;;  %v3412_v5 = vshll.u32 %v10277_v4, 16  ;;  %v10407_v17 = vsel %vm745_vm1, %v3578_v30, %v3579_v16 }
 0x305   : > { %v10409_v36 = vld [vmem:[#allocation2 + $0x9c] sm:$0xff]   ;;  %v2905_v9 = vor.u32 %v2903_v33, %v2902_v12  ;;  %v2907_v45 = vrot.slane %v2902_v12, 4  ;;  %7569 = vmatprep.mubr.bf16.mxu1 %v10407_v17  ;;  %v10412_v8 = vld [vmem:[#allocation2 + $0xa4] ss:$0 sps:$4 sm:$0x11]   ;;  %v3409_v54 = vrot.slane %v3407_v44, 1 }
 0x306   : > { %v3078_v26 = vsel %vm10015_vm9, %v2897_v40, %v3077_v56  ;;  %v3414_v11 = vrot.slane %v3412_v5, 1  ;;  %v3417_v27 = vshrl.u32 %v10279_v59, 16  ;;  %v3581_v4 = vrot.slane %v10409_v36, 1 }
 0x307   : > { %v2906_v32 = vsel %vm10005_vm8, %v2898_v13, %v2905_v9  ;;  %3079 = vst [vmem:[#allocation2 + $0xb4] sm:$0xf] %v3078_v26  ;;  %v3082_v10 = vsel %vm9995_vm7, %v2907_v45, %v3081_v38  ;;  %v3419_v33 = vshll.u32 %v10279_v59, 16  ;;  %v3582_v35 = vrot.slane %v10412_v8, 1 }
 0x308   : > { %3080 = vst [vmem:[#allocation2 + $0xb8] sm:$0xf] %v2906_v32  ;;  %3083 = vst [vmem:[#allocation2 + $0xbc] sm:$0x1] %v3082_v10  ;;  %v3410_v47 = vor.u32 %v3409_v54, %v3405_v61  ;;  %v3424_v51 = vshll.u32 %v10295_v7, 16  ;;  %v3429_v56 = vshrl.u32 %v10316_v14, 16 }
 0x309   : > { %v3421_v22 = vrot.slane %v3419_v33, 1  ;;  %v3431_v30 = vshll.u32 %v10316_v14, 16  ;;  %v3436_v46 = vshll.u32 %v10328_v0, 16  ;;  %v10429_v62 = vsel %vm745_vm1, %v3581_v4, %v3582_v35  ;;  %v8431_v33 = vld [vmem:[#allocation3 + $0x118] sm:$0xff]  }
 0x30a   : > { %v10434_v38 = vsel %vm510_vm0, %v3410_v47, %v3414_v11  ;;  %v3426_v16 = vrot.slane %v3424_v51, 1  ;;  %7570 = vmatmul.mubr.bf16.gmra.mrb[72].mxu1 %v10429_v62  ;;  %v3443_v13 = vshll.u32 %v10339_v20, 16  ;;  %v3448_v50 = vshll.u32 %v10346_v29, 16  ;;  %7095 = vmatprep.subr.bf16.mxu0 %v8431_v33  ;;  %v8414_v47 = vld [vmem:[#allocation3 + $0x180] sm:$0xff]   ;;  %v8419_v33 = vld [vmem:[#allocation3 + $0x1d8] sm:$0xff]  }
 0x30b   : > { %v10431_v52 = vld [vmem:[#allocation2 + $0xa8] sm:$0xff]   ;;  %v10437_v60 = vld [vmem:[#allocation2 + $0xb0] ss:$0 sps:$4 sm:$0x11]   ;;  %3908 = vmatprep.mubr.bf16.mxu0 %v10434_v38  ;;  %v3422_v7 = vor.u32 %v3421_v22, %v3417_v27  ;;  %v3433_v12 = vrot.slane %v3431_v30, 1  ;;  %v3438_v5 = vrot.slane %v3436_v46, 1 }
 0x30c   : > { %v3584_v61 = vrot.slane %v10431_v52, 1  ;;  %3909 = vmatmul.mubr.bf16.gmra.mrb[208].mxu0 %v10266_v24  ;;  %v3585_v0 = vrot.slane %v10437_v60, 1  ;;  %v3441_v26 = vshrl.u32 %v10339_v20, 16  ;;  %v3445_v11 = vrot.slane %v3443_v13, 1  ;;  %v8433_v46 = vld [vmem:[#allocation3 + $0x120] sm:$0xff]  }
 0x30d   : > { %v10444_v40 = vsel %vm510_vm0, %v3422_v7, %v3426_v16  ;;  %v3434_v44 = vor.u32 %v3433_v12, %v3429_v56  ;;  %v3450_v29 = vrot.slane %v3448_v50, 1  ;;  %v3455_v10 = vshll.u32 %v10386_v43, 16  ;;  %v8432_v56 = vld [vmem:[#allocation3 + $0xd8] sm:$0xff]   ;;  %v8415_v16 = vld [vmem:[#allocation3 + $0x1c8] sm:$0xff]   ;;  %v8435_v13 = vld [vmem:[#allocation3 + $0xe0] sm:$0xff]  }
 0x30e   : > { %3916 = vmatprep.mubr.bf16.mxu0 %v10444_v40  ;;  %v10450_v9 = vsel %vm745_vm1, %v3584_v61, %v3585_v0  ;;  %v3446_v35 = vor.u32 %v3445_v11, %v3441_v26  ;;  %v3453_v51 = vshrl.u32 %v10386_v43, 16  ;;  %v3460_v22 = vshll.u32 %v10391_v55, 16  ;;  %7096 = vmatpush3.bf16.msra.mxu0 %v8432_v56  ;;  %v8416_v12 = vld [vmem:[#allocation3 + $0x188] sm:$0xff]   ;;  %v8417_v55 = vld [vmem:[#allocation3 + $0x1d0] sm:$0xff]  }
 0x30f   : > { %v10452_v45 = vld [vmem:[#allocation2 + $0xb4] sm:$0xff]   ;;  %7573 = vmatprep.mubr.bf16.mxu1 %v10450_v9  ;;  %v10455_v24 = vld [vmem:[#allocation2 + $0xbc] ss:$0 sps:$4 sm:$0x11]   ;;  %v10461_v4 = vsel %vm510_vm0, %v3434_v44, %v3438_v5  ;;  %v3467_v7 = vshll.u32 %v10409_v36, 16  ;;  %7097 = vmatprep.subr.bf16.mxu0 %v8433_v46  ;;  %v3465_v0 = vshrl.u32 %v10409_v36, 16 }
 0x310   : > { %v3587_v54 = vrot.slane %v10452_v45, 1  ;;  %v3588_v27 = vrot.slane %v10455_v24, 1  ;;  %v10474_v30 = vsel %vm510_vm0, %v3446_v35, %v3450_v29  ;;  %v11493_v44 = vmax.f32 %v9908_v48, 0.0  ;;  %v8437_v11 = vld [vmem:[#allocation3 + $0x128] sm:$0xff]   ;;  %v8439_v35 = vld [vmem:[#allocation3 + $0x130] sm:$0xff]  }
 0x311   : > { %v3462_v26 = vrot.slane %v3460_v22, 1  ;;  %v8438_v29 = vld [vmem:[#allocation3 + $0xe8] sm:$0xff]  }
 0x312   : > { %v10464_v32 = vsel %vm745_vm1, %v3587_v54, %v3588_v27  ;;  %v6543_v5 = vpack.c.bf16 %v11493_v44, %v11493_v44  ;;  %v3469_v54 = vrot.slane %v3467_v7, 1  ;;  %7098 = vmatpush3.bf16.msra.mxu0 %v8435_v13  ;;  %v8418_v27 = vld [vmem:[#allocation3 + $0x190] sm:$0xff]   ;;  %v3479_v13 = vshll.u32 %v10431_v52, 16 }
 0x313   : > { %7574 = vmatmul.mubr.bf16.gmra.mrb[76].mxu1 %v10464_v32  ;;  %7099 = vmatprep.subr.bf16.mxu0 %v8437_v11  ;;  %v8443_v7 = vld [vmem:[#allocation3 + $0xf0] sm:$0xff]  }
 0x314   : > { %3917 = vmatmul.mubr.bf16.gmra.mrb[212].mxu0 %v10279_v59  ;;  %7593 = vmatprep.mubr.bf16.mxu1 %v10111_v41  ;;  %v3457_v59 = vrot.slane %v3455_v10, 1  ;;  %v11492_v41 = vmax.f32 %v9903_v34, 0.0  ;;  %v3472_v34 = vshll.u32 %v10412_v8, 16  ;;  %v2917_v56 = vshrl.u32 %v6543_v5, 16 }
 0x315   : > { %3924 = vmatprep.mubr.bf16.mxu0 %v10461_v4  ;;  %v2920_v46 = vshll.u32 %v6543_v5, 16  ;;  %v3481_v25 = vrot.slane %v3479_v13, 1  ;;  %v8447_v13 = vld [vmem:[#allocation3 + $0x200] sm:$0xff]  }
 0x316   : > { %v6542_v61 = vpack.c.bf16 %v11492_v41, %v11492_v41  ;;  %v3458_v50 = vor.u32 %v3457_v59, %v3453_v51  ;;  %v3474_v22 = vrot.slane %v3472_v34, 1  ;;  %v3088_v59 = vld [vmem:[#allocation2 + $0xc8] sm:$0x1]  ;;  %7100 = vmatpush3.bf16.msra.mxu0 %v8438_v29  ;;  %v8420_v41 = vld [vmem:[#allocation3 + $0x198] sm:$0xff]  }
 0x317   : > { %7101 = vmatprep.subr.bf16.mxu0 %v8439_v35  ;;  %v3484_v35 = vshll.u32 %v10437_v60, 16  ;;  %v3491_v60 = vshll.u32 %v10452_v45, 16 }
 0x318   : > { %v2909_v10 = vshrl.u32 %v6542_v61, 16  ;;  %v2912_v48 = vshll.u32 %v6542_v61, 16  ;;  %v10490_v51 = vsel %vm510_vm0, %v3458_v50, %v3462_v26  ;;  %v8445_v26 = vld [vmem:[#allocation3 + $0x138] sm:$0xff]  }
 0x31a   : > { %v2911_v8 = vrot.slane %v2909_v10, 7  ;;  %7102 = vmatpush3.bf16.msra.mxu0 %v8443_v7  ;;  %v8446_v10 = vld [vmem:[#allocation3 + $0xf8] sm:$0xff]  }
 0x31b   : > { %7594 = vmatmul.mubr.bf16.vlgmr.msra.gmra.mrb[48].mxu1 %v10125_v19  ;;  %7103 = vmatprep.subr.bf16.mxu0 %v8445_v26  ;;  %v8442_v7 = vld [vmem:[#allocation3 + $0x1f8] sm:$0xff]  }
 0x31c   : > { %3925 = vmatmul.mubr.bf16.gmra.mrb[216].mxu0 %v10316_v14  ;;  %7226 = vmatpush3.bf16.msra.mxu1 %v8414_v47  ;;  %v3084_v47 = vld [vmem:[#allocation2 + $0xc0] sm:$0xf]  ;;  %v2914_v61 = vor.u32 %v2912_v48, %v2911_v8  ;;  %v2915_v44 = vrot.slane %v2911_v8, 4  ;;  %v3496_v48 = vshll.u32 %v10455_v24, 16  ;;  %v3493_v8 = vrot.slane %v3491_v60, 1  ;;  %v8444_v24 = vld [vmem:[#allocation3 + $0x1b8] sm:$0xff]  }
 0x31d   : > { %3932 = vmatprep.mubr.bf16.mxu0 %v10474_v30  ;;  %7597 = vmatprep.mubr.bf16.mxu1 %v10135_v3 }
 0x31e   : > { %7227 = vmatprep.subr.bf16.mxu1 %v8415_v16  ;;  %v2919_v16 = vrot.slane %v2917_v56, 7  ;;  %v3085_v34 = vsel %vm10015_vm9, %v2914_v61, %v3084_v47  ;;  %7104 = vmatpush3.bf16.msra.mxu0 %v8446_v10  ;;  %v3489_v47 = vshrl.u32 %v10452_v45, 16  ;;  %v8450_v10 = vld [vmem:[#allocation3 + $0x218] sm:$0xff]  }
 0x31f   : > { %3086 = vst [vmem:[#allocation2 + $0xc0] sm:$0xf] %v3085_v34  ;;  %v8448_v34 = vld [vmem:[#allocation3 + $0x208] sm:$0xff]  }
 0x320   : > { %7228 = vmatpush3.bf16.msra.mxu1 %v8416_v12  ;;  %v8422_v12 = vld [vmem:[#allocation3 + $0x1e0] sm:$0xff]   ;;  %v2922_v5 = vor.u32 %v2920_v46, %v2919_v16  ;;  %v2924_v50 = vrot.slane %v2919_v16, 4  ;;  %v8434_v46 = vld [vmem:[#allocation3 + $0x1f0] sm:$0xff]   ;;  %v3498_v16 = vrot.slane %v3496_v48, 1 }
 0x321   : > { %7229 = vmatprep.subr.bf16.mxu1 %v8417_v55  ;;  %v3470_v55 = vor.u32 %v3469_v54, %v3465_v0  ;;  %v3477_v0 = vshrl.u32 %v10431_v52, 16  ;;  %v8428_v54 = vld [vmem:[#allocation3 + $0x1e8] sm:$0xff]  }
 0x322   : > { %v2923_v11 = vsel %vm10005_vm8, %v2915_v44, %v2922_v5  ;;  %v3089_v29 = vsel %vm9995_vm7, %v2924_v50, %v3088_v59  ;;  %v8465_v5 = vld [vmem:[#allocation2 + $0xc] sm:$0xff]  }
 0x323   : > { %7598 = vmatmul.mubr.bf16.gmra.mrb[52].mxu1 %v10177_v49  ;;  %3087 = vst [vmem:[#allocation2 + $0xc4] sm:$0xf] %v2923_v11  ;;  %3090 = vst [vmem:[#allocation2 + $0xc8] sm:$0x1] %v3089_v29  ;;  %v10505_v58 = vsel %vm510_vm0, %v3470_v55, %v3474_v22  ;;  %v3482_v56 = vor.u32 %v3481_v25, %v3477_v0  ;;  %v8436_v22 = vld [vmem:[#allocation3 + $0x1b0] sm:$0xff]   ;;  %v8466_v55 = vld [vmem:[#allocation2 + $0x18] sm:$0xff]  }
 0x324   : > { %3933 = vmatmul.mubr.bf16.gmra.mrb[220].mxu0 %v10339_v20  ;;  %7601 = vmatprep.mubr.bf16.mxu1 %v10206_v18  ;;  %v8467_v11 = vld [vmem:[#allocation2 + $0x24] sm:$0xff]   ;;  %v8469_v0 = vld [vmem:[#allocation2 + $0x3c] sm:$0xff]   ;;  %v8454_v25 = vld [vmem:[#allocation3 + $0x238] sm:$0xff]  }
 0x325   : > { %3940 = vmatprep.mubr.bf16.mxu0 %v10490_v51  ;;  %7230 = vmatpush3.bf16.msra.mxu1 %v8418_v27  ;;  %v8424_v27 = vld [vmem:[#allocation3 + $0x1a0] sm:$0xff]   ;;  %v8449_v29 = vld [vmem:[#allocation3 + $0x210] sm:$0xff]  }
 0x326   : > { %7231 = vmatprep.subr.bf16.mxu1 %v8419_v33  ;;  %v3486_v33 = vrot.slane %v3484_v35, 1  ;;  %v8468_v35 = vld [vmem:[#allocation2 + $0x30] sm:$0xff]  }
 0x328   : > { %v10516_v59 = vsel %vm510_vm0, %v3482_v56, %v3486_v33 }
 0x329   : > { %7232 = vmatpush3.bf16.msra.mxu1 %v8420_v41  ;;  %v3494_v41 = vor.u32 %v3493_v8, %v3489_v47 }
 0x32a   : > { %7233 = vmatprep.subr.bf16.mxu1 %v8422_v12  ;;  %v10533_v44 = vld [vmem:[#allocation2 + $0xc0] sm:$0xff]   ;;  %v10535_v12 = vld [vmem:[#allocation2 + $0xc8] ss:$0 sps:$4 sm:$0x11]  }
 0x32b   : > { %7602 = vmatmul.mubr.bf16.gmra.mrb[56].mxu1 %v10248_v15  ;;  %v10523_v61 = vsel %vm510_vm0, %v3494_v41, %v3498_v16  ;;  %v3590_v50 = vrot.slane %v10533_v44, 1  ;;  %v3591_v26 = vrot.slane %v10535_v12, 1  ;;  %v3503_v16 = vshll.u32 %v10533_v44, 16 }
 0x32c   : > { %3941 = vmatmul.mubr.bf16.gmra.mrb[224].mxu0 %v10386_v43  ;;  %7605 = vmatprep.mubr.bf16.mxu1 %v10258_v63  ;;  %v3501_v41 = vshrl.u32 %v10533_v44, 16 }
 0x32d   : > { %3948 = vmatprep.mubr.bf16.mxu0 %v10505_v58  ;;  %7234 = vmatpush3.bf16.msra.mxu1 %v8424_v27  ;;  %v8452_v27 = vld [vmem:[#allocation3 + $0x228] sm:$0xff]  }
 0x32e   : > { %7235 = vmatprep.subr.bf16.mxu1 %v8428_v54  ;;  %v10559_v54 = vld [vmem:[%s11293_s5] sm:$0xff]  }
 0x331   : > { %7236 = vmatpush3.bf16.msra.mxu1 %v8430_v28  ;;  %v8472_v28 = vld [vmem:[#allocation2 + $0x60] sm:$0xff]  }
 0x332   : > { %7237 = vmatprep.subr.bf16.mxu1 %v8434_v46 }
 0x333   : > { %7606 = vmatmul.mubr.bf16.gmra.mrb[60].mxu1 %v10305_v42 }
 0x334   : > { %3949 = vmatmul.mubr.bf16.gmra.mrb[228].mxu0 %v10409_v36  ;;  %7609 = vmatprep.mubr.bf16.mxu1 %v10313_v2 }
 0x335   : > { %3956 = vmatprep.mubr.bf16.mxu0 %v10516_v59  ;;  %7238 = vmatpush3.bf16.msra.mxu1 %v8436_v22 }
 0x336   : > { %7239 = vmatprep.subr.bf16.mxu1 %v8442_v7 }
 0x339   : > { %7240 = vmatpush3.bf16.msra.mxu1 %v8444_v24 }
 0x33a   : > { %7625 = vmatprep.subr.bf16.mxu1 %v8447_v13 }
 0x33b   : > { %7610 = vmatmul.mubr.bf16.gmra.mrb[64].mxu1 %v10361_v23 }
 0x33c   : > { %3957 = vmatmul.mubr.bf16.gmra.mrb[232].mxu0 %v10431_v52  ;;  %7613 = vmatprep.mubr.bf16.mxu1 %v10374_v1 }
 0x33d   : > { %3964 = vmatprep.mubr.bf16.mxu0 %v10523_v61 }
 0x343   : > { %7614 = vmatmul.mubr.bf16.gmra.mrb[68].mxu1 %v10407_v17 }
 0x344   : > { %3965 = vmatmul.mubr.bf16.gmra.mrb[236].mxu0 %v10452_v45  ;;  %7617 = vmatprep.mubr.bf16.mxu1 %v10429_v62 }
 0x345   : > { %4391 = vmatprep.mubr.bf16.mxu0 %v10129_v53  ;;  %v10543_v53 = vsel %vm745_vm1, %v3590_v50, %v3591_v26 }
 0x34b   : > { %7618 = vmatmul.mubr.bf16.gmra.mrb[72].mxu1 %v10450_v9 }
 0x34c   : > { %4392 = vmatmul.mubr.bf16.vlgmr.msra.gmra.mrb[240].mxu0 %v8465_v5  ;;  %7621 = vmatprep.mubr.bf16.mxu1 %v10464_v32 }
 0x34d   : > { %4399 = vmatprep.mubr.bf16.mxu0 %v10143_v6 }
 0x353   : > { %7622 = vmatmul.mubr.bf16.gmra.mrb[76].mxu1 %v10543_v53 }
 0x354   : > { %4400 = vmatmul.mubr.bf16.gmra.mrb[244].mxu0 %v8466_v55  ;;  %4938 = vmatprep.mubr.bf16.mxu1 %v10143_v6  ;;  %v8451_v6 = vld [vmem:[#allocation3 + $0x220] sm:$0xff]  }
 0x355   : > { %4407 = vmatprep.mubr.bf16.mxu0 %v10167_v57 }
 0x35b   : > { %4939 = vmatmul.mubr.bf16.vlgmr.msra.gmra.mrb[80].mxu1 %v8466_v55 }
 0x35c   : > { %4408 = vmatmul.mubr.bf16.gmra.mrb[248].mxu0 %v8467_v11  ;;  %7626 = vmatpush3.bf16.msra.mxu1 %v8447_v13  ;;  %v3505_v13 = vrot.slane %v3503_v16, 1 }
 0x35d   : > { %4415 = vmatprep.mubr.bf16.mxu0 %v10209_v37  ;;  %4946 = vmatprep.mubr.bf16.mxu1 %v10167_v57  ;;  %v8453_v57 = vld [vmem:[#allocation3 + $0x230] sm:$0xff]  }
 0x35e   : > { %7627 = vmatprep.subr.bf16.mxu1 %v8448_v34  ;;  %v3506_v55 = vor.u32 %v3505_v13, %v3501_v41 }
 0x360   : > { %7628 = vmatpush3.bf16.msra.mxu1 %v8448_v34 }
 0x361   : > { %7629 = vmatprep.subr.bf16.mxu1 %v8449_v29 }
 0x363   : > { %4947 = vmatmul.mubr.bf16.gmra.mrb[84].mxu1 %v8467_v11 }
 0x364   : > { %4416 = vmatmul.mubr.bf16.gmra.mrb[252].mxu0 %v8468_v35  ;;  %4954 = vmatprep.mubr.bf16.mxu1 %v10209_v37  ;;  %v8470_v37 = vld [vmem:[#allocation2 + $0x48] sm:$0xff]  }
 0x365   : > { %4423 = vmatprep.mubr.bf16.mxu0 %v10262_v31  ;;  %7630 = vmatpush3.bf16.msra.mxu1 %v8449_v29 }
 0x366   : > { %7631 = vmatprep.subr.bf16.mxu1 %v8450_v10 }
 0x369   : > { %7632 = vmatpush3.bf16.msra.mxu1 %v8450_v10  ;;  %v10606_v10 = vld [vmem:[#allocation2 + $0xcc] sm:$0xff]  }
 0x36a   : > { %7633 = vmatprep.subr.bf16.mxu1 %v8451_v6 }
 0x36b   : > { %4955 = vmatmul.mubr.bf16.gmra.mrb[88].mxu1 %v8468_v35  ;;  %v10612_v35 = vld [vmem:[#allocation2 + $0xd4] ss:$0 sps:$4 sm:$0x11]  }
 0x36c   : > { %4424 = vmatmul.mubr.bf16.gmra.mrb[0].mxu0 %v8469_v0  ;;  %4962 = vmatprep.mubr.bf16.mxu1 %v10262_v31  ;;  %v8471_v31 = vld [vmem:[#allocation2 + $0x54] sm:$0xff]  }
 0x36d   : > { %4431 = vmatprep.mubr.bf16.mxu0 %v10331_v21  ;;  %7634 = vmatpush3.bf16.msra.mxu1 %v8451_v6  ;;  %v3515_v6 = vshll.u32 %v10606_v10, 16 }
 0x36e   : > { %7635 = vmatprep.subr.bf16.mxu1 %v8452_v27 }
 0x371   : > { %7636 = vmatpush3.bf16.msra.mxu1 %v8452_v27 }
 0x372   : > { %7637 = vmatprep.subr.bf16.mxu1 %v8453_v57 }
 0x373   : > { %4963 = vmatmul.mubr.bf16.gmra.mrb[92].mxu1 %v8469_v0 }
 0x374   : > { %4432 = vmatmul.mubr.bf16.gmra.mrb[4].mxu0 %v8470_v37  ;;  %4970 = vmatprep.mubr.bf16.mxu1 %v10331_v21  ;;  %v8473_v21 = vld [vmem:[#allocation2 + $0x6c] sm:$0xff]  }
 0x375   : > { %4439 = vmatprep.mubr.bf16.mxu0 %v10389_v39  ;;  %7638 = vmatpush3.bf16.msra.mxu1 %v8453_v57 }
 0x376   : > { %7639 = vmatprep.subr.bf16.mxu1 %v8454_v25 }
 0x379   : > { %7640 = vmatpush3.bf16.msra.mxu1 %v8454_v25 }
 0x37a   : > { %7673 = vmatprep.subr.bf16.mxu1 %v10559_v54 }
 0x37b   : > { %4971 = vmatmul.mubr.bf16.gmra.mrb[96].mxu1 %v8470_v37  ;;  %v3513_v37 = vshrl.u32 %v10606_v10, 16 }
 0x37c   : > { %4440 = vmatmul.mubr.bf16.gmra.mrb[8].mxu0 %v8471_v31  ;;  %4978 = vmatprep.mubr.bf16.mxu1 %v10389_v39 }
 0x37d   : > { %4447 = vmatprep.mubr.bf16.mxu0 %v10434_v38 }
 0x383   : > { %4979 = vmatmul.mubr.bf16.gmra.mrb[100].mxu1 %v8471_v31  ;;  %v3517_v31 = vrot.slane %v3515_v6, 1 }
 0x384   : > { %4448 = vmatmul.mubr.bf16.gmra.mrb[12].mxu0 %v8472_v28  ;;  %4986 = vmatprep.mubr.bf16.mxu1 %v10434_v38 }
 0x385   : > { %4455 = vmatprep.mubr.bf16.mxu0 %v10444_v40 }
 0x38b   : > { %4987 = vmatmul.mubr.bf16.gmra.mrb[104].mxu1 %v8472_v28 }
 0x38c   : > { %4456 = vmatmul.mubr.bf16.gmra.mrb[16].mxu0 %v8473_v21  ;;  %4994 = vmatprep.mubr.bf16.mxu1 %v10444_v40 }
 0x38d   : > { %4463 = vmatprep.mubr.bf16.mxu0 %v10461_v4 }
 0x393   : > { %4995 = vmatmul.mubr.bf16.gmra.mrb[108].mxu1 %v8473_v21  ;;  %v3518_v21 = vor.u32 %v3517_v31, %v3513_v37 }
 0x394   : > { %4464 = vmatmul.mubr.bf16.gmra.mrb[20].mxu0 %v10316_v14  ;;  %5002 = vmatprep.mubr.bf16.mxu1 %v10461_v4 }
 0x395   : > { %4471 = vmatprep.mubr.bf16.mxu0 %v10474_v30 }
 0x396   : > { %v6969_v39 = vpop.f32.mrb[176].mxu0 }
 0x397   : > { %v6970_v33 = vpop.f32.mrb[177].mxu0 }
 0x398   : > { %v10571_v60 = vadd.f32 %v6970_v33, %v6969_v39  ;;  %v6972_v48 = vpop.f32.mrb[178].mxu0 }
 0x399   : > { %v6973_v38 = vpop.f32.mrb[179].mxu0 }
 0x39a   : > { %v10576_v40 = vadd.f32 %v6973_v38, %v6972_v48 }
 0x39b   : > { %5003 = vmatmul.mubr.bf16.gmra.mrb[112].mxu1 %v10316_v14 }
 0x39c   : > { %4472 = vmatmul.mubr.bf16.gmra.mrb[24].mxu0 %v10339_v20  ;;  %5010 = vmatprep.mubr.bf16.mxu1 %v10474_v30 }
 0x39d   : > { %4479 = vmatprep.mubr.bf16.mxu0 %v10490_v51 }
 0x3a0   : > { %v6975_v4 = vpop.f32.mrb[180].mxu0 }
 0x3a1   : > { %v6976_v56 = vpop.f32.mrb[181].mxu0 }
 0x3a2   : > { %v10583_v46 = vadd.f32 %v6976_v56, %v6975_v4  ;;  %v6978_v47 = vpop.f32.mrb[182].mxu0 }
 0x3a3   : > { %5011 = vmatmul.mubr.bf16.gmra.mrb[116].mxu1 %v10339_v20  ;;  %v6979_v14 = vpop.f32.mrb[183].mxu0 }
 0x3a4   : > { %4480 = vmatmul.mubr.bf16.gmra.mrb[28].mxu0 %v10386_v43  ;;  %5018 = vmatprep.mubr.bf16.mxu1 %v10490_v51  ;;  %v10585_v22 = vadd.f32 %v6979_v14, %v6978_v47 }
 0x3a5   : > { %4487 = vmatprep.mubr.bf16.mxu0 %v10505_v58 }
 0x3a8   : > { %v6981_v30 = vpop.f32.mrb[184].mxu0 }
 0x3a9   : > { %v6982_v20 = vpop.f32.mrb[185].mxu0 }
 0x3aa   : > { %v10591_v8 = vadd.f32 %v6982_v20, %v6981_v30  ;;  %v6984_v51 = vpop.f32.mrb[186].mxu0 }
 0x3ab   : > { %5019 = vmatmul.mubr.bf16.gmra.mrb[120].mxu1 %v10386_v43  ;;  %v6985_v7 = vpop.f32.mrb[187].mxu0  ;;  %v3508_v43 = vshll.u32 %v10535_v12, 16 }
 0x3ac   : > { %4488 = vmatmul.mubr.bf16.gmra.mrb[32].mxu0 %v10409_v36  ;;  %5026 = vmatprep.mubr.bf16.mxu1 %v10505_v58  ;;  %v10594_v24 = vadd.f32 %v6985_v7, %v6984_v51 }
 0x3ad   : > { %4495 = vmatprep.mubr.bf16.mxu0 %v10516_v59  ;;  %v3510_v34 = vrot.slane %v3508_v43, 1 }
 0x3af   : > { %v3511_v12 = vsel %vm510_vm0, %v3506_v55, %v3510_v34 }
 0x3b0   : > { %v6987_v58 = vpop.f32.mrb[188].mxu0 }
 0x3b1   : > { %v6988_v5 = vpop.f32.mrb[189].mxu0 }
 0x3b2   : > { %v10602_v50 = vadd.f32 %v6988_v5, %v6987_v58  ;;  %v6990_v26 = vpop.f32.mrb[190].mxu0  ;;  %v8458_v58 = vld [vmem:[%s11293_s5 + $0x8] sm:$0xff]  }
 0x3b3   : > { %5027 = vmatmul.mubr.bf16.gmra.mrb[124].mxu1 %v10409_v36  ;;  %v6991_v11 = vpop.f32.mrb[191].mxu0 }
 0x3b4   : > { %4496 = vmatmul.mubr.bf16.gmra.mrb[36].mxu0 %v10431_v52  ;;  %5034 = vmatprep.mubr.bf16.mxu1 %v10516_v59  ;;  %v10604_v29 = vadd.f32 %v6991_v11, %v6990_v26 }
 0x3b5   : > { %4503 = vmatprep.mubr.bf16.mxu0 %v10523_v61 }
 0x3b8   : > { %v6993_v36 = vpop.f32.mrb[192].mxu0 }
 0x3b9   : > { %v6994_v59 = vpop.f32.mrb[193].mxu0 }
 0x3ba   : > { %v10615_v27 = vadd.f32 %v6994_v59, %v6993_v36  ;;  %v6996_v0 = vpop.f32.mrb[194].mxu0 }
 0x3bb   : > { %5035 = vmatmul.mubr.bf16.gmra.mrb[128].mxu1 %v10431_v52  ;;  %v6997_v57 = vpop.f32.mrb[195].mxu0  ;;  %v3520_v52 = vshll.u32 %v10612_v35, 16 }
 0x3bc   : > { %4504 = vmatmul.mubr.bf16.gmra.mrb[40].mxu0 %v10452_v45  ;;  %5042 = vmatprep.mubr.bf16.mxu1 %v10523_v61  ;;  %v10617_v25 = vadd.f32 %v6997_v57, %v6996_v0 }
 0x3bd   : > { %4511 = vmatprep.mubr.bf16.mxu0 %v3511_v12  ;;  %v3522_v39 = vrot.slane %v3520_v52, 1  ;;  %v11495_v52 = vld [vmem:[#allocation10_spill] sm:$0xff] }
 0x3bf   : > { %v3523_v56 = vsel %vm510_vm0, %v3518_v21, %v3522_v39  ;;  %v11496_v21 = vld [vmem:[#allocation12_spill] sm:$0xff] }
 0x3c0   : > { %v6999_v61 = vpop.f32.mrb[196].mxu0  ;;  %v5288_v39 = vshrl.u32 %v11496_v21, 16 }
 0x3c1   : > { %v7000_v28 = vpop.f32.mrb[197].mxu0 }
 0x3c2   : > { %v10623_v33 = vadd.f32 %v7000_v28, %v6999_v61  ;;  %v7002_v48 = vpop.f32.mrb[198].mxu0  ;;  %v5273_v61 = vshll.u32 %v11495_v52, 16  ;;  %v5277_v28 = vshrl.u32 %v11495_v52, 16 }
 0x3c3   : > { %5043 = vmatmul.mubr.bf16.gmra.mrb[132].mxu1 %v10452_v45  ;;  %v7003_v38 = vpop.f32.mrb[199].mxu0 }
 0x3c4   : > { %4512 = vmatmul.mubr.bf16.gmra.mrb[44].mxu0 %v10533_v44  ;;  %5050 = vmatprep.mubr.bf16.mxu1 %v3511_v12  ;;  %v10625_v4 = vadd.f32 %v7003_v38, %v7002_v48  ;;  %v5291_v48 = vshll.u32 %v11496_v21, 16 }
 0x3ca   : > { %v7005_v47 = vpop.f32.mrb[200].mxu0 }
 0x3cb   : > { %5051 = vmatmul.mubr.bf16.gmra.mrb[136].mxu1 %v10533_v44  ;;  %v7006_v14 = vpop.f32.mrb[201].mxu0 }
 0x3cc   : > { %5058 = vmatprep.mubr.bf16.mxu1 %v3523_v56  ;;  %v10629_v30 = vadd.f32 %v7006_v14, %v7005_v47  ;;  %v7008_v45 = vpop.f32.mrb[202].mxu0  ;;  %v11497_v56 = vld [vmem:[#allocation13_spill] sm:$0xff] }
 0x3cd   : > { %v7009_v20 = vpop.f32.mrb[203].mxu0  ;;  %v5297_v47 = vshll.u32 %v11497_v56, 16  ;;  %v5301_v14 = vshrl.u32 %v11497_v56, 16 }
 0x3ce   : > { %v10631_v51 = vadd.f32 %v7009_v20, %v7008_v45 }
 0x3d3   : > { %5059 = vmatmul.mubr.bf16.gmra.mrb[140].mxu1 %v10606_v10 }
 0x3d4   : > { %7641 = vmatprep.mubr.bf16.mxu1 %v10125_v19  ;;  %v8459_v19 = vld [vmem:[%s11293_s5 + $0x10] sm:$0xff]  }
 0x3d5   : > { %v7011_v16 = vpop.f32.mrb[204].mxu0 }
 0x3d6   : > { %v7012_v7 = vpop.f32.mrb[205].mxu0 }
 0x3d7   : > { %v10635_v41 = vadd.f32 %v7012_v7, %v7011_v16  ;;  %v7014_v13 = vpop.f32.mrb[206].mxu0 }
 0x3d8   : > { %v7015_v43 = vpop.f32.mrb[207].mxu0 }
 0x3d9   : > { %v10637_v44 = vadd.f32 %v7015_v43, %v7014_v13  ;;  %v5275_v43 = vrot.slane %v5273_v61, 5 }
 0x3db   : > { %7642 = vmatmul.mubr.bf16.vlgmr.msra.gmra.mrb[48].mxu1 %v10135_v3  ;;  %v8460_v3 = vld [vmem:[%s11293_s5 + $0x18] sm:$0xff]  }
 0x3dc   : > { %7674 = vmatpush3.bf16.msra.mxu1 %v10559_v54  ;;  %7645 = vmatprep.mubr.bf16.mxu1 %v10177_v49  ;;  %v8461_v49 = vld [vmem:[%s11293_s5 + $0x20] sm:$0xff]  }
 0x3dd   : > { %7675 = vmatprep.subr.bf16.mxu1 %v8458_v58 }
 0x3df   : > { %v7017_v5 = vpop.f32.mrb[208].mxu0 }
 0x3e0   : > { %v7018_v26 = vpop.f32.mrb[209].mxu0  ;;  %7676 = vmatpush3.bf16.msra.mxu1 %v8458_v58  ;;  %v5279_v58 = vrot.slane %v5277_v28, 4 }
 0x3e1   : > { %v10648_v55 = vadd.f32 %v7018_v26, %v7017_v5  ;;  %v7020_v34 = vpop.f32.mrb[210].mxu0  ;;  %7677 = vmatprep.subr.bf16.mxu1 %v8459_v19  ;;  %v5293_v5 = vrot.slane %v5291_v48, 5  ;;  %v8464_v26 = vld [vmem:[%s11293_s5 + $0x38] sm:$0xff]  }
 0x3e2   : > { %v7021_v11 = vpop.f32.mrb[211].mxu0 }
 0x3e3   : > { %v10653_v54 = vadd.f32 %v7021_v11, %v7020_v34  ;;  %7646 = vmatmul.mubr.bf16.gmra.mrb[52].mxu1 %v10206_v18  ;;  %v8462_v18 = vld [vmem:[%s11293_s5 + $0x28] sm:$0xff]   ;;  %v5299_v11 = vrot.slane %v5297_v47, 5 }
 0x3e4   : > { %7649 = vmatprep.mubr.bf16.mxu1 %v10248_v15  ;;  %7678 = vmatpush3.bf16.msra.mxu1 %v8459_v19  ;;  %v11494_v15 = vld [vmem:[#allocation9_spill] sm:$0xff]  ;;  %v5290_v19 = vrot.slane %v5288_v39, 4 }
 0x3e5   : > { %7679 = vmatprep.subr.bf16.mxu1 %v8460_v3  ;;  %v5264_v37 = vshrl.u32 %v11494_v15, 16  ;;  %v5267_v31 = vshll.u32 %v11494_v15, 16 }
 0x3e7   : > { %v7023_v12 = vpop.f32.mrb[212].mxu0  ;;  %v5266_v16 = vrot.slane %v5264_v37, 4  ;;  %v5269_v7 = vrot.slane %v5267_v31, 5  ;;  %v11499_v37 = vld [vmem:[#allocation14_spill] sm:$0xff] }
 0x3e8   : > { %v7024_v36 = vpop.f32.mrb[213].mxu0  ;;  %7680 = vmatpush3.bf16.msra.mxu1 %v8460_v3  ;;  %v5303_v3 = vrot.slane %v5301_v14, 4  ;;  %v5307_v31 = vshll.u32 %v11499_v37, 16  ;;  %v11504_v14 = vld [vmem:[#allocation15_spill] sm:$0xff] }
 0x3e9   : > { %v10660_v59 = vadd.f32 %v7024_v36, %v7023_v12  ;;  %v7026_v6 = vpop.f32.mrb[214].mxu0  ;;  %7681 = vmatprep.subr.bf16.mxu1 %v8461_v49  ;;  %v5280_v12 = vor.u32 %v5279_v58, %v5275_v43  ;;  %v11498_v36 = vld [vmem:[#allocation11_spill] sm:$0xff]  ;;  %v3593_v58 = vrot.slane %v10606_v10, 1 }
 0x3ea   : > { %v7027_v0 = vpop.f32.mrb[215].mxu0  ;;  %v5304_v15 = vor.u32 %v5303_v3, %v5299_v11  ;;  %v5309_v56 = vrot.slane %v5307_v31, 5  ;;  %v11508_v37 = vld [vmem:[#allocation19_spill] sm:$0xff] }
 0x3eb   : > { %v10665_v57 = vadd.f32 %v7027_v0, %v7026_v6  ;;  %7650 = vmatmul.mubr.bf16.gmra.mrb[56].mxu1 %v10258_v63  ;;  %v8463_v63 = vld [vmem:[%s11293_s5 + $0x30] sm:$0xff]   ;;  %v5283_v6 = vshll.u32 %v11498_v36, 16  ;;  %v5294_v0 = vor.u32 %v5293_v5, %v5290_v19  ;;  %v3594_v19 = vrot.slane %v10612_v35, 1  ;;  %v11506_v35 = vld [vmem:[#allocation18_spill] sm:$0xff] }
 0x3ec   : > { %7653 = vmatprep.mubr.bf16.mxu1 %v10305_v42  ;;  %7682 = vmatpush3.bf16.msra.mxu1 %v8461_v49  ;;  %v5270_v49 = vor.u32 %v5269_v7, %v5266_v16  ;;  %v11505_v16 = vld [vmem:[#allocation16_spill] sm:$0xff]  ;;  %v5345_v31 = vshll.u32 %v11508_v37, 16 }
 0x3ed   : > { %7683 = vmatprep.subr.bf16.mxu1 %v8462_v18  ;;  %v5285_v21 = vrot.slane %v5283_v6, 5  ;;  %v5295_v39 = vrot.slane %v5294_v0, 4  ;;  %v5321_v7 = vshll.u32 %v11505_v16, 16  ;;  %v5336_v0 = vshrl.u32 %v11506_v35, 16 }
 0x3ef   : > { %v7029_v38 = vpop.f32.mrb[216].mxu0  ;;  %v5300_v3 = vsel %vm10693_vm12, %v5295_v39, %v5299_v11  ;;  %v10715_v6 = vrot.slane %v5321_v7, 5  ;;  %v5349_v11 = vshrl.u32 %v11508_v37, 16 }
 0x3f0   : > { %v7030_v42 = vpop.f32.mrb[217].mxu0  ;;  %7684 = vmatpush3.bf16.msra.mxu1 %v8462_v18 }
 0x3f1   : > { %v10680_v45 = vadd.f32 %v7030_v42, %v7029_v38  ;;  %v7032_v20 = vpop.f32.mrb[218].mxu0  ;;  %7685 = vmatprep.subr.bf16.mxu1 %v8463_v63  ;;  %v5305_v38 = vrot.slane %v5304_v15, 4  ;;  %v5312_v42 = vshrl.u32 %v11504_v14, 16  ;;  %v5339_v15 = vshll.u32 %v11506_v35, 16 }
 0x3f2   : > { %v7033_v13 = vpop.f32.mrb[219].mxu0  ;;  %v5351_v7 = vrot.slane %v5349_v11, 4  ;;  %v11516_v11 = vld [vmem:[#allocation20_spill] sm:$0xff] }
 0x3f3   : > { %v10685_v34 = vadd.f32 %v7033_v13, %v7032_v20  ;;  %7654 = vmatmul.mubr.bf16.gmra.mrb[60].mxu1 %v10313_v2  ;;  %v5271_v2 = vrot.slane %v5270_v49, 4  ;;  %v5315_v20 = vshll.u32 %v11504_v14, 16  ;;  %v5325_v13 = vshrl.u32 %v11505_v16, 16 }
 0x3f4   : > { %7657 = vmatprep.mubr.bf16.mxu1 %v10361_v23  ;;  %7686 = vmatpush3.bf16.msra.mxu1 %v8463_v63  ;;  %v5281_v23 = vrot.slane %v5280_v12, 4  ;;  %v5310_v49 = vsel %vm10693_vm12, %v5305_v38, %v5309_v56  ;;  %v11510_v56 = vld [vmem:[#allocation17_spill] sm:$0xff]  ;;  %v10740_v16 = vrot.slane %v5345_v31, 5 }
 0x3f5   : > { %7687 = vmatprep.subr.bf16.mxu1 %v8464_v26  ;;  %v5276_v5 = vsel %vm10693_vm12, %v5271_v2, %v5275_v43  ;;  %v5327_v10 = vrot.slane %v5325_v13, 4  ;;  %v10735_v39 = vcombine.low %v5300_v3, %v5310_v49  ;;  %v5331_v14 = vshll.u32 %v11510_v56, 16  ;;  %v11511_v13 = vld [vmem:[#allocation21_spill] sm:$0xff] }
 0x3f7   : > { %v7035_v18 = vpop.f32.mrb[220].mxu0  ;;  %v5328_v38 = vor.u32 %v5327_v10, %v10715_v6 }
 0x3f8   : > { %v7036_v52 = vpop.f32.mrb[221].mxu0  ;;  %7688 = vmatpush3.bf16.msra.mxu1 %v8464_v26  ;;  %v5286_v26 = vsel %vm10693_vm12, %v5281_v23, %v5285_v21  ;;  %v10733_v21 = vld [vmem:[%s11292_s4] ss:$0 sm:$0xff] }
 0x3f9   : > { %v10691_v61 = vadd.f32 %v7036_v52, %v7035_v18  ;;  %v7038_v28 = vpop.f32.mrb[222].mxu0  ;;  %v10726_v2 = vcombine.low %v5276_v5, %v5286_v26  ;;  %v11512_v5 = vld [vmem:[#allocation22_spill] sm:$0xff]  ;;  %v10749_v49 = vadd.f32 %v10571_v60, %v10733_v21  ;;  %v5329_v35 = vrot.slane %v5328_v38, 4 }
 0x3fa   : > { %v7039_v48 = vpop.f32.mrb[223].mxu0  ;;  %v5369_v26 = vshll.u32 %v11512_v5, 16  ;;  %v5373_v3 = vshrl.u32 %v11512_v5, 16  ;;  %v5352_v60 = vor.u32 %v5351_v7, %v10740_v16  ;;  %v11519_v7 = vld [vmem:[#allocation28_spill] sm:$0xff] }
 0x3fb   : > { %11500 = vst [vmem:[#allocation65_spill] sm:$0xff] %v10691_v61  ;;  %v10697_v47 = vadd.f32 %v7039_v48, %v7038_v28  ;;  %7658 = vmatmul.mubr.bf16.gmra.mrb[64].mxu1 %v10374_v1  ;;  %v5314_v1 = vrot.slane %v5312_v42, 4  ;;  %v10724_v28 = vsel %vm745_vm1, %v3593_v58, %v3594_v19  ;;  %v5338_v42 = vrot.slane %v5336_v0, 4 }
 0x3fc   : > { %7661 = vmatprep.mubr.bf16.mxu1 %v10407_v17  ;;  %v5317_v17 = vrot.slane %v5315_v20, 5  ;;  %v5341_v20 = vrot.slane %v5339_v15, 5  ;;  %v5360_v58 = vshrl.u32 %v11511_v13, 16  ;;  %v5363_v19 = vshll.u32 %v11511_v13, 16 }
 0x3fd   : > { %11503 = vst [vmem:[#allocation57_spill] sm:$0xff] %v10697_v47  ;;  %v5333_v0 = vrot.slane %v5331_v14, 5 }
 0x3fe   : > { %v5318_v48 = vor.u32 %v5317_v17, %v5314_v1  ;;  %v11514_v17 = vld [vmem:[#allocation25_spill] sm:$0xff]  ;;  %v5342_v31 = vor.u32 %v5341_v20, %v5338_v42  ;;  %v5362_v5 = vrot.slane %v5360_v58, 4  ;;  %v10772_v58 = vadd.f32 %v10576_v40, %v10733_v21 }
 0x3ff   : > { %v7041_v12 = vpop.f32.mrb[224].mxu0  ;;  %v5393_v10 = vshll.u32 %v11514_v17, 16  ;;  %v5397_v15 = vshrl.u32 %v11514_v17, 16  ;;  %v11518_v17 = vld [vmem:[#allocation27_spill] sm:$0xff]  ;;  %v5334_v40 = vsel %vm10693_vm12, %v5329_v35, %v5333_v0 }
 0x400   : > { %v7042_v36 = vpop.f32.mrb[225].mxu0  ;;  %v5408_v42 = vshrl.u32 %v11518_v17, 16  ;;  %v5411_v20 = vshll.u32 %v11518_v17, 16  ;;  %v11521_v17 = vld [vmem:[#allocation26_spill] sm:$0xff] }
 0x401   : > { %v10718_v18 = vadd.f32 %v7042_v36, %v7041_v12  ;;  %v7044_v43 = vpop.f32.mrb[226].mxu0  ;;  %v11513_v12 = vld [vmem:[#allocation24_spill] sm:$0xff]  ;;  %v10765_v47 = vrot.slane %v5393_v10, 5 }
 0x402   : > { %v7045_v52 = vpop.f32.mrb[227].mxu0  ;;  %v5384_v1 = vshrl.u32 %v11513_v12, 16  ;;  %v5387_v36 = vshll.u32 %v11513_v12, 16  ;;  %v5365_v12 = vrot.slane %v5363_v19, 5 }
 0x403   : > { %11507 = vst [vmem:[#allocation67_spill] sm:$0xff] %v10718_v18  ;;  %v10728_v23 = vadd.f32 %v7045_v52, %v7044_v43  ;;  %7662 = vmatmul.mubr.bf16.gmra.mrb[68].mxu1 %v10429_v62  ;;  %v5355_v52 = vshll.u32 %v11516_v11, 16 }
 0x404   : > { %7665 = vmatprep.mubr.bf16.mxu1 %v10450_v9  ;;  %v10754_v9 = vrot.slane %v5318_v48, 4  ;;  %v5375_v48 = vrot.slane %v5373_v3, 4  ;;  %v5386_v38 = vrot.slane %v5384_v1, 4  ;;  %v5389_v14 = vrot.slane %v5387_v36, 5 }
 0x405   : > { %11509 = vst [vmem:[#allocation58_spill] sm:$0xff] %v10728_v23  ;;  %v10761_v23 = vrot.slane %v5369_v26, 5  ;;  %v5357_v26 = vrot.slane %v5355_v52, 5  ;;  %v5421_v3 = vshrl.u32 %v11519_v7, 16  ;;  %v5343_v1 = vrot.slane %v5342_v31, 4 }
 0x406   : > { %v5324_v19 = vsel %vm10693_vm12, %v10754_v9, %v10715_v6  ;;  %v5353_v36 = vrot.slane %v5352_v60, 4  ;;  %v5366_v10 = vor.u32 %v5365_v12, %v5362_v5  ;;  %v5410_v52 = vrot.slane %v5408_v42, 4  ;;  %v11523_v12 = vld [vmem:[#allocation30_spill] sm:$0xff] }
 0x407   : > { %v7047_v62 = vpop.f32.mrb[228].mxu0  ;;  %v5423_v5 = vrot.slane %v5421_v3, 4  ;;  %v5435_v35 = vshll.u32 %v11523_v12, 16  ;;  %v5348_v0 = vsel %vm10693_vm12, %v5343_v1, %v10740_v16  ;;  %v6485_v16 = vcombine.low %v5324_v19, %v5334_v40 }
 0x408   : > { %v7048_v43 = vpop.f32.mrb[229].mxu0 }
 0x409   : > { %v10757_v37 = vadd.f32 %v7048_v43, %v7047_v62  ;;  %v7050_v56 = vpop.f32.mrb[230].mxu0  ;;  %v5399_v62 = vrot.slane %v5397_v15, 4  ;;  %v5417_v43 = vshll.u32 %v11519_v7, 16  ;;  %v11520_v15 = vld [vmem:[#allocation23_spill] sm:$0xff]  ;;  %v5413_v7 = vrot.slane %v5411_v20, 5 }
 0x40a   : > { %v7051_v13 = vpop.f32.mrb[231].mxu0  ;;  %v5379_v11 = vshll.u32 %v11520_v15, 16  ;;  %v5432_v15 = vshrl.u32 %v11523_v12, 16  ;;  %v11526_v12 = vld [vmem:[#allocation31_spill] sm:$0xff] }
 0x40b   : > { %11515 = vst [vmem:[#allocation69_spill] sm:$0xff] %v10757_v37  ;;  %v10763_v18 = vadd.f32 %v7051_v13, %v7050_v56  ;;  %7666 = vmatmul.mubr.bf16.gmra.mrb[72].mxu1 %v10464_v32  ;;  %v5376_v32 = vor.u32 %v5375_v48, %v10761_v23  ;;  %v5390_v13 = vor.u32 %v5389_v14, %v5386_v38  ;;  %v5367_v14 = vrot.slane %v5366_v10, 4 }
 0x40c   : > { %7669 = vmatprep.mubr.bf16.mxu1 %v10543_v53  ;;  %v5400_v9 = vor.u32 %v5399_v62, %v10765_v47  ;;  %v10787_v53 = vrot.slane %v5417_v43, 5  ;;  %v5358_v48 = vsel %vm10693_vm12, %v5353_v36, %v5357_v26  ;;  %v5381_v62 = vrot.slane %v5379_v11, 5 }
 0x40d   : > { %11517 = vst [vmem:[#allocation59_spill] sm:$0xff] %v10763_v18  ;;  %v5403_v18 = vshll.u32 %v11521_v17, 16  ;;  %v5377_v20 = vrot.slane %v5376_v32, 4  ;;  %v5391_v43 = vrot.slane %v5390_v13, 4  ;;  %v5414_v17 = vor.u32 %v5413_v7, %v5410_v52 }
 0x40e   : > { %v5401_v3 = vrot.slane %v5400_v9, 4  ;;  %v5441_v37 = vshll.u32 %v11526_v12, 16  ;;  %v5424_v1 = vor.u32 %v5423_v5, %v10787_v53  ;;  %v5434_v26 = vrot.slane %v5432_v15, 4 }
 0x40f   : > { %v7053_v56 = vpop.f32.mrb[232].mxu0  ;;  %v5437_v36 = vrot.slane %v5435_v35, 5  ;;  %v10805_v10 = vcombine.low %v5348_v0, %v5358_v48  ;;  %v5445_v11 = vshrl.u32 %v11526_v12, 16  ;;  %v10812_v9 = vadd.f32 %v10583_v46, %v10733_v21  ;;  %v11529_v48 = vld [vmem:[#allocation32_spill] sm:$0xff] }
 0x410   : > { %v7054_v6 = vpop.f32.mrb[233].mxu0  ;;  %v5372_v19 = vsel %vm10693_vm12, %v5367_v14, %v10761_v23  ;;  %v5396_v40 = vsel %vm10693_vm12, %v5391_v43, %v10765_v47  ;;  %v10824_v46 = vrot.slane %v5441_v37, 5  ;;  %v5425_v0 = vrot.slane %v5424_v1, 4  ;;  %v11530_v47 = vld [vmem:[#allocation34_spill] sm:$0xff] }
 0x411   : > { %v10789_v31 = vadd.f32 %v7054_v6, %v7053_v56  ;;  %v7056_v60 = vpop.f32.mrb[234].mxu0  ;;  %v5405_v56 = vrot.slane %v5403_v18, 5  ;;  %v11525_v6 = vld [vmem:[#allocation29_spill] sm:$0xff]  ;;  %v5438_v23 = vor.u32 %v5437_v36, %v5434_v26  ;;  %v5465_v43 = vshll.u32 %v11530_v47, 16 }
 0x412   : > { %v7057_v38 = vpop.f32.mrb[235].mxu0  ;;  %v11527_v18 = vld [vmem:[#allocation33_spill] sm:$0xff] }
 0x413   : > { %11522 = vst [vmem:[#allocation66_spill] sm:$0xff] %v10789_v31  ;;  %v10798_v42 = vadd.f32 %v7057_v38, %v7056_v60  ;;  %v5427_v31 = vshll.u32 %v11525_v6, 16  ;;  %7670 = vmatmul.mubr.bf16.gmra.mrb[76].mxu1 %v10724_v28  ;;  %v5456_v32 = vshrl.u32 %v11527_v18, 16  ;;  %v5459_v13 = vshll.u32 %v11527_v18, 16  ;;  %v11533_v26 = vld [vmem:[#allocation37_spill] sm:$0xff] }
 0x414   : > { %7689 = vmatprep.mubr.bf16.mxu1 %v10726_v2  ;;  %v5382_v2 = vsel %vm10693_vm12, %v5377_v20, %v5381_v62  ;;  %v5406_v7 = vsel %vm10693_vm12, %v5401_v3, %v5405_v56  ;;  %v5415_v60 = vrot.slane %v5414_v17, 4  ;;  %v5451_v38 = vshll.u32 %v11529_v48, 16 }
 0x415   : > { %11524 = vst [vmem:[#allocation60_spill] sm:$0xff] %v10798_v42  ;;  %v5429_v5 = vrot.slane %v5427_v31, 5  ;;  %v5447_v62 = vrot.slane %v5445_v11, 4  ;;  %v5458_v20 = vrot.slane %v5456_v32, 4  ;;  %v5461_v6 = vrot.slane %v5459_v13, 5  ;;  %v11532_v31 = vld [vmem:[#allocation36_spill] sm:$0xff] }
 0x416   : > { %v5469_v56 = vshrl.u32 %v11530_v47, 16  ;;  %v5480_v37 = vshrl.u32 %v11532_v31, 16  ;;  %v5483_v3 = vshll.u32 %v11532_v31, 16  ;;  %v10837_v17 = vadd.f32 %v10585_v22, %v10733_v21  ;;  %v11535_v47 = vld [vmem:[#allocation35_spill] sm:$0xff] }
 0x417   : > { %v7059_v28 = vpop.f32.mrb[236].mxu0  ;;  %v6487_v1 = vcombine.low %v5372_v19, %v5382_v2  ;;  %v5489_v36 = vshll.u32 %v11533_v26, 16  ;;  %v5493_v11 = vshrl.u32 %v11533_v26, 16  ;;  %v10843_v18 = vadd.f32 %v10591_v8, %v10733_v21 }
 0x418   : > { %v7060_v52 = vpop.f32.mrb[237].mxu0  ;;  %v10846_v32 = vcombine.low %v5396_v40, %v5406_v7  ;;  %v5420_v13 = vsel %vm10693_vm12, %v5415_v60, %v10787_v53  ;;  %v5430_v22 = vsel %vm10693_vm12, %v5425_v0, %v5429_v5  ;;  %v10855_v19 = vrot.slane %v5438_v23, 4  ;;  %v11534_v60 = vld [vmem:[#allocation39_spill] sm:$0xff] }
 0x419   : > { %v10826_v15 = vadd.f32 %v7060_v52, %v7059_v28  ;;  %v7062_v35 = vpop.f32.mrb[238].mxu0  ;;  %v10851_v28 = vrot.slane %v5451_v38, 5  ;;  %v5448_v2 = vor.u32 %v5447_v62, %v10824_v46  ;;  %v5462_v8 = vor.u32 %v5461_v6, %v5458_v20  ;;  %v11536_v20 = vld [vmem:[#allocation40_spill] sm:$0xff] }
 0x41a   : > { %v7063_v14 = vpop.f32.mrb[239].mxu0  ;;  %v5482_v40 = vrot.slane %v5480_v37, 4  ;;  %v5485_v7 = vrot.slane %v5483_v3, 5  ;;  %v5495_v53 = vrot.slane %v5493_v11, 4  ;;  %v5507_v38 = vshll.u32 %v11534_v60, 16 }
 0x41b   : > { %11528 = vst [vmem:[#allocation68_spill] sm:$0xff] %v10826_v15  ;;  %v10830_v12 = vadd.f32 %v7063_v14, %v7062_v35  ;;  %7690 = vmatmul.mubr.bf16.vlgmr.msra.gmra.mrb[48].mxu1 %v10735_v39  ;;  %v10858_v35 = vrot.slane %v5465_v43, 5  ;;  %v5471_v39 = vrot.slane %v5469_v56, 4  ;;  %v10860_v14 = vrot.slane %v5489_v36, 5 }
 0x41c   : > { %7693 = vmatprep.mubr.bf16.mxu1 %v6485_v16  ;;  %v5504_v16 = vshrl.u32 %v11534_v60, 16  ;;  %v6489_v23 = vcombine.low %v5420_v13, %v5430_v22  ;;  %v5475_v62 = vshll.u32 %v11535_v47, 16  ;;  %v5513_v6 = vshll.u32 %v11536_v20, 16 }
 0x41d   : > { %11531 = vst [vmem:[#allocation61_spill] sm:$0xff] %v10830_v12  ;;  %v10870_v31 = vrot.slane %v5448_v2, 4  ;;  %v10872_v37 = vrot.slane %v5462_v8, 4  ;;  %v5517_v3 = vshrl.u32 %v11536_v20, 16  ;;  %v5472_v11 = vor.u32 %v5471_v39, %v10858_v35  ;;  %v11541_v12 = vld [vmem:[#allocation45_spill] sm:$0xff] }
 0x41e   : > { %v5486_v13 = vor.u32 %v5485_v7, %v5482_v40  ;;  %v5496_v22 = vor.u32 %v5495_v53, %v10860_v14  ;;  %v5506_v60 = vrot.slane %v5504_v16, 4  ;;  %v5509_v47 = vrot.slane %v5507_v38, 5  ;;  %v11539_v40 = vld [vmem:[#allocation43_spill] sm:$0xff] }
 0x41f   : > { %v7105_v52 = vpop.f32.mrb[240].mxu0  ;;  %v5477_v8 = vrot.slane %v5475_v62, 5  ;;  %v10885_v20 = vrot.slane %v5513_v6, 5  ;;  %v5537_v7 = vshll.u32 %v11539_v40, 16  ;;  %v5541_v53 = vshrl.u32 %v11539_v40, 16 }
 0x420   : > { %v7106_v48 = vpop.f32.mrb[241].mxu0  ;;  %v5468_v16 = vsel %vm10693_vm12, %v10872_v37, %v10858_v35  ;;  %v5473_v38 = vrot.slane %v5472_v11, 4  ;;  %v5497_v6 = vrot.slane %v5496_v22, 4  ;;  %v5552_v15 = vshrl.u32 %v11541_v12, 16 }
 0x421   : > { %v7107_v5 = vadd.f32 %v7106_v48, %v7105_v52  ;;  %v7108_v0 = vpop.f32.mrb[242].mxu0  ;;  %v11537_v52 = vld [vmem:[#allocation38_spill] sm:$0xff]  ;;  %v10903_v35 = vrot.slane %v5537_v7, 5  ;;  %v5543_v37 = vrot.slane %v5541_v53, 4 }
 0x422   : > { %v7109_v43 = vpop.f32.mrb[243].mxu0  ;;  %v5499_v48 = vshll.u32 %v11537_v52, 16  ;;  %v5478_v22 = vsel %vm10693_vm12, %v5473_v38, %v5477_v8  ;;  %v5554_v7 = vrot.slane %v5552_v15, 4 }
 0x423   : > { %v10876_v26 = vadd.f32 %v10749_v49, %v7107_v5  ;;  %v7110_v36 = vadd.f32 %v7109_v43, %v7108_v0  ;;  %7694 = vmatmul.mubr.bf16.gmra.mrb[52].mxu1 %v10805_v10  ;;  %v11538_v49 = vld [vmem:[#allocation42_spill] sm:$0xff]  ;;  %v5519_v0 = vrot.slane %v5517_v3, 4  ;;  %v5454_v10 = vsel %vm10693_vm12, %v10870_v31, %v10851_v28 }
 0x424   : > { %v5528_v5 = vshrl.u32 %v11538_v49, 16  ;;  %7697 = vmatprep.mubr.bf16.mxu1 %v6487_v1  ;;  %v5531_v39 = vshll.u32 %v11538_v49, 16  ;;  %v5487_v1 = vrot.slane %v5486_v13, 4  ;;  %v5501_v43 = vrot.slane %v5499_v48, 5 }
 0x425   : > { %v10883_v2 = vadd.f32 %v10772_v58, %v7110_v36  ;;  %v5510_v3 = vor.u32 %v5509_v47, %v5506_v60  ;;  %v11540_v36 = vld [vmem:[#allocation41_spill] sm:$0xff]  ;;  %v5555_v28 = vshll.u32 %v11541_v12, 16  ;;  %v5520_v42 = vor.u32 %v5519_v0, %v10885_v20  ;;  %v11542_v47 = vld [vmem:[#allocation44_spill] sm:$0xff]  ;;  %v11543_v0 = vld [vmem:[#allocation46_spill] sm:$0xff] }
 0x426   : > { %v5523_v52 = vshll.u32 %v11540_v36, 16  ;;  %v5530_v56 = vrot.slane %v5528_v5, 4  ;;  %v5533_v61 = vrot.slane %v5531_v39, 5  ;;  %v5492_v48 = vsel %vm10693_vm12, %v5487_v1, %v10860_v14 }
 0x427   : > { %v7111_v58 = vpop.f32.mrb[244].mxu0  ;;  %v5502_v12 = vsel %vm10693_vm12, %v5497_v6, %v5501_v43  ;;  %v5511_v60 = vrot.slane %v5510_v3, 4  ;;  %v5547_v5 = vshll.u32 %v11542_v47, 16  ;;  %v5561_v39 = vshll.u32 %v11543_v0, 16  ;;  %v11546_v47 = vld [vmem:[#allocation49_spill] sm:$0xff] }
 0x428   : > { %v7112_v62 = vpop.f32.mrb[245].mxu0  ;;  %v5557_v53 = vrot.slane %v5555_v28, 5  ;;  %v5565_v8 = vshrl.u32 %v11543_v0, 16  ;;  %v5525_v14 = vrot.slane %v5523_v52, 5  ;;  %v5534_v38 = vor.u32 %v5533_v61, %v5530_v56 }
 0x429   : > { %v7113_v49 = vadd.f32 %v7112_v62, %v7111_v58  ;;  %v7114_v40 = vpop.f32.mrb[246].mxu0  ;;  %v5521_v58 = vrot.slane %v5520_v42, 4  ;;  %v5544_v1 = vor.u32 %v5543_v37, %v10903_v35  ;;  %v7900_v62 = vadd.f32 %v10594_v24, %v10733_v21 }
 0x42a   : > { %v7115_v31 = vpop.f32.mrb[247].mxu0  ;;  %v10927_v6 = vadd.f32 %v10602_v50, %v10733_v21  ;;  %v11544_v42 = vsel %vm10693_vm12, %v10855_v19, %v10824_v46  ;;  %v10938_v56 = vcombine.low %v5492_v48, %v5502_v12  ;;  %v5516_v50 = vsel %vm10693_vm12, %v5511_v60, %v10885_v20 }
 0x42b   : > { %v10906_v11 = vadd.f32 %v10812_v9, %v7113_v49  ;;  %v7116_v13 = vadd.f32 %v7115_v31, %v7114_v40  ;;  %7698 = vmatmul.mubr.bf16.gmra.mrb[56].mxu1 %v10846_v32  ;;  %v6490_v15 = vcombine.low %v11544_v42, %v5454_v10  ;;  %v10943_v43 = vrot.slane %v5547_v5, 5 }
 0x42c   : > { %7701 = vmatprep.mubr.bf16.mxu1 %v6489_v23  ;;  %v6491_v23 = vcombine.low %v5468_v16, %v5478_v22  ;;  %v5558_v52 = vor.u32 %v5557_v53, %v5554_v7  ;;  %v10945_v49 = vrot.slane %v5561_v39, 5  ;;  %v5567_v46 = vrot.slane %v5565_v8, 4  ;;  %v11545_v22 = vld [vmem:[#allocation48_spill] sm:$0xff]  ;;  %v11547_v8 = vld [vmem:[#allocation47_spill] sm:$0xff] }
 0x42d   : > { %v10919_v9 = vadd.f32 %v10837_v17, %v7116_v13  ;;  %v10931_v17 = vadd.f32 %v10604_v29, %v10733_v21  ;;  %v5526_v16 = vsel %vm10693_vm12, %v5521_v58, %v5525_v14  ;;  %v10949_v28 = vrot.slane %v5534_v38, 4 }
 0x42e   : > { %v7241_v32 = vpop.f32.mrb[80].mxu1  ;;  %v10951_v31 = vrot.slane %v5544_v1, 4  ;;  %v5576_v48 = vshrl.u32 %v11545_v22, 16  ;;  %v5579_v12 = vshll.u32 %v11545_v22, 16  ;;  %v5585_v5 = vshll.u32 %v11546_v47, 16  ;;  %v11548_v1 = vld [vmem:[#allocation51_spill] sm:$0xff] }
 0x42f   : > { %v7117_v61 = vpop.f32.mrb[248].mxu0  ;;  %v7242_v29 = vpop.f32.mrb[81].mxu1  ;;  %v5589_v0 = vshrl.u32 %v11546_v47, 16  ;;  %v5559_v53 = vrot.slane %v5558_v52, 4  ;;  %v5571_v58 = vshll.u32 %v11547_v8, 16  ;;  %v6493_v38 = vcombine.low %v5516_v50, %v5526_v16 }
 0x430   : > { %v7118_v24 = vpop.f32.mrb[249].mxu0  ;;  %v7243_v19 = vadd.f32 %v7242_v29, %v7241_v32  ;;  %v7244_v10 = vpop.f32.mrb[82].mxu1  ;;  %v5600_v42 = vshrl.u32 %v11548_v1, 16  ;;  %v11549_v32 = vld [vmem:[#allocation52_spill] sm:$0xff]  ;;  %v5578_v29 = vrot.slane %v5576_v48, 4 }
 0x431   : > { %v7119_v3 = vadd.f32 %v7118_v24, %v7117_v61  ;;  %v7120_v36 = vpop.f32.mrb[250].mxu0  ;;  %v7245_v20 = vpop.f32.mrb[83].mxu1  ;;  %v5603_v61 = vshll.u32 %v11548_v1, 16  ;;  %v5591_v52 = vrot.slane %v5589_v0, 4 }
 0x432   : > { %v7121_v40 = vpop.f32.mrb[251].mxu0  ;;  %v7246_v60 = vadd.f32 %v7245_v20, %v7244_v10  ;;  %v10961_v39 = vadd.f32 %v10876_v26, %v7243_v19  ;;  %v5540_v26 = vsel %vm10693_vm12, %v10949_v28, %v10903_v35  ;;  %v5564_v10 = vsel %vm10693_vm12, %v5559_v53, %v10945_v49  ;;  %v11550_v20 = vld [vmem:[#allocation50_spill] sm:$0xff] }
 0x433   : > { %v10954_v37 = vadd.f32 %v10843_v18, %v7119_v3  ;;  %v7122_v13 = vadd.f32 %v7121_v40, %v7120_v36  ;;  %7702 = vmatmul.mubr.bf16.gmra.mrb[60].mxu1 %v6490_v15  ;;  %v5568_v18 = vor.u32 %v5567_v46, %v10945_v49  ;;  %v5581_v3 = vrot.slane %v5579_v12, 5 }
 0x434   : > { %v10968_v14 = vadd.f32 %v10883_v2, %v7246_v60  ;;  %7705 = vmatprep.mubr.bf16.mxu1 %v6491_v23  ;;  %v5609_v2 = vshll.u32 %v11549_v32, 16  ;;  %v5613_v23 = vshrl.u32 %v11549_v32, 16  ;;  %v10982_v36 = vrot.slane %v5585_v5, 5  ;;  %v11552_v32 = vld [vmem:[#allocation53_spill] sm:$0xff] }
 0x435   : > { %v10963_v7 = vadd.f32 %v7900_v62, %v7122_v13  ;;  %v5550_v62 = vsel %vm10693_vm12, %v10951_v31, %v10943_v43  ;;  %v5569_v43 = vrot.slane %v5568_v18, 4  ;;  %v5573_v40 = vrot.slane %v5571_v58, 5  ;;  %v11551_v58 = vld [vmem:[#allocation54_spill] sm:$0xff] }
 0x436   : > { %v7247_v24 = vpop.f32.mrb[84].mxu1  ;;  %v5595_v13 = vshll.u32 %v11550_v20, 16  ;;  %v5602_v22 = vrot.slane %v5600_v42, 4  ;;  %v5605_v48 = vrot.slane %v5603_v61, 5  ;;  %v10991_v5 = vrot.slane %v5609_v2, 5 }
 0x437   : > { %v7123_v15 = vpop.f32.mrb[252].mxu0  ;;  %v7248_v46 = vpop.f32.mrb[85].mxu1  ;;  %v5615_v0 = vrot.slane %v5613_v23, 4  ;;  %v5582_v1 = vor.u32 %v5581_v3, %v5578_v29  ;;  %v5592_v49 = vor.u32 %v5591_v52, %v10982_v36  ;;  %v5624_v42 = vshrl.u32 %v11551_v58, 16 }
 0x438   : > { %v7124_v50 = vpop.f32.mrb[253].mxu0  ;;  %v7249_v16 = vadd.f32 %v7248_v46, %v7247_v24  ;;  %v7250_v28 = vpop.f32.mrb[86].mxu1  ;;  %v5627_v61 = vshll.u32 %v11551_v58, 16  ;;  %v5619_v2 = vshll.u32 %v11552_v32, 16  ;;  %v7920_v24 = vadd.f32 %v10617_v25, %v10733_v21 }
 0x439   : > { %v7125_v19 = vadd.f32 %v7124_v50, %v7123_v15  ;;  %v7126_v35 = vpop.f32.mrb[254].mxu0  ;;  %v7251_v12 = vpop.f32.mrb[87].mxu1  ;;  %v5606_v29 = vor.u32 %v5605_v48, %v5602_v22  ;;  %v5616_v3 = vor.u32 %v5615_v0, %v10991_v5 }
 0x43a   : > { %v7127_v31 = vpop.f32.mrb[255].mxu0  ;;  %v7252_v8 = vadd.f32 %v7251_v12, %v7250_v28  ;;  %v10995_v53 = vadd.f32 %v10906_v11, %v7249_v16  ;;  %v11553_v11 = vld [vmem:[#allocation55_spill] sm:$0xff]  ;;  %v5629_v20 = vrot.slane %v5627_v61, 5  ;;  %v5621_v25 = vrot.slane %v5619_v2, 5  ;;  %v11554_v2 = vld [vmem:[#allocation56_spill] sm:$0xff] }
 0x43b   : > { %v10989_v60 = vadd.f32 %v10927_v6, %v7125_v19  ;;  %v7128_v47 = vadd.f32 %v7127_v31, %v7126_v35  ;;  %7706 = vmatmul.mubr.bf16.gmra.mrb[64].mxu1 %v10938_v56  ;;  %v5574_v6 = vsel %vm10693_vm12, %v5569_v43, %v5573_v40  ;;  %v5633_v23 = vshll.u32 %v11553_v11, 16 }
 0x43c   : > { %v11006_v15 = vadd.f32 %v10919_v9, %v7252_v8  ;;  %7709 = vmatprep.mubr.bf16.mxu1 %v6493_v38  ;;  %v5637_v56 = vshrl.u32 %v11553_v11, 16  ;;  %v6494_v9 = vcombine.low %v5540_v26, %v5550_v62  ;;  %v6495_v46 = vcombine.low %v5564_v10, %v5574_v6 }
 0x43d   : > { %v10999_v18 = vadd.f32 %v10931_v17, %v7128_v47  ;;  %v7910_v17 = vadd.f32 %v10615_v27, %v10733_v21  ;;  %v5583_v38 = vrot.slane %v5582_v1, 4  ;;  %v5597_v19 = vrot.slane %v5595_v13, 5 }
 0x43e   : > { %v7253_v52 = vpop.f32.mrb[88].mxu1  ;;  %v5593_v40 = vrot.slane %v5592_v49, 4  ;;  %v5626_v31 = vrot.slane %v5624_v42, 4  ;;  %v5635_v8 = vrot.slane %v5633_v23, 5  ;;  %v5639_v22 = vrot.slane %v5637_v56, 4 }
 0x43f   : > { %v7129_v50 = vpop.f32.mrb[0].mxu0  ;;  %v7254_v43 = vpop.f32.mrb[89].mxu1  ;;  %v5607_v26 = vrot.slane %v5606_v29, 4  ;;  %v5617_v62 = vrot.slane %v5616_v3, 4  ;;  %v5588_v1 = vsel %vm10693_vm12, %v5583_v38, %v10982_v36  ;;  %v5643_v11 = vshll.u32 %v11554_v2, 16 }
 0x440   : > { %v7130_v35 = vpop.f32.mrb[1].mxu0  ;;  %v7255_v27 = vadd.f32 %v7254_v43, %v7253_v52  ;;  %v7256_v12 = vpop.f32.mrb[90].mxu1  ;;  %v5630_v6 = vor.u32 %v5629_v20, %v5626_v31  ;;  %v5598_v61 = vsel %vm10693_vm12, %v5593_v40, %v5597_v19  ;;  %v5640_v32 = vor.u32 %v5639_v22, %v5635_v8 }
 0x441   : > { %v7131_v16 = vadd.f32 %v7130_v35, %v7129_v50  ;;  %v7132_v28 = vpop.f32.mrb[2].mxu0  ;;  %v7257_v48 = vpop.f32.mrb[91].mxu1  ;;  %v5622_v23 = vsel %vm10693_vm12, %v5617_v62, %v5621_v25  ;;  %v6496_v50 = vcombine.low %v5588_v1, %v5598_v61  ;;  %v5645_v35 = vrot.slane %v5643_v11, 5 }
 0x442   : > { %v7133_v47 = vpop.f32.mrb[3].mxu0  ;;  %v11017_v10 = vadd.f32 %v10954_v37, %v7255_v27  ;;  %v7258_v13 = vadd.f32 %v7257_v48, %v7256_v12  ;;  %v5612_v37 = vsel %vm10693_vm12, %v5607_v26, %v10991_v5  ;;  %v5631_v29 = vrot.slane %v5630_v6, 4 }
 0x443   : > { %v7911_v0 = vadd.f32 %v7910_v17, %v7131_v16  ;;  %v7134_v58 = vadd.f32 %v7133_v47, %v7132_v28  ;;  %7710 = vmatmul.mubr.bf16.gmra.mrb[68].mxu1 %v6494_v9  ;;  %v6497_v38 = vcombine.low %v5612_v37, %v5622_v23  ;;  %v5641_v19 = vrot.slane %v5640_v32, 4 }
 0x444   : > { %v11023_v42 = vadd.f32 %v10963_v7, %v7258_v13  ;;  %7713 = vmatprep.mubr.bf16.mxu1 %v6495_v46  ;;  %v7905_v7 = vadd.f32 %v10623_v33, %v10733_v21  ;;  %v7915_v43 = vadd.f32 %v10625_v4, %v10733_v21  ;;  %v5636_v12 = vsel %vm10693_vm12, %v5631_v29, %v5635_v8 }
 0x445   : > { %v7921_v49 = vadd.f32 %v7920_v24, %v7134_v58  ;;  %v5646_v47 = vsel %vm10693_vm12, %v5641_v19, %v5645_v35  ;;  %v7940_v6 = vadd.f32 %v10631_v51, %v10733_v21 }
 0x446   : > { %v7259_v56 = vpop.f32.mrb[92].mxu1  ;;  %v6498_v58 = vcombine.low %v5636_v12, %v5646_v47 }
 0x447   : > { %v7135_v36 = vpop.f32.mrb[4].mxu0  ;;  %v7260_v24 = vpop.f32.mrb[93].mxu1 }
 0x448   : > { %v7136_v17 = vpop.f32.mrb[5].mxu0  ;;  %v7261_v9 = vadd.f32 %v7260_v24, %v7259_v56  ;;  %v7262_v46 = vpop.f32.mrb[94].mxu1  ;;  %v7925_v56 = vadd.f32 %v10635_v41, %v10733_v21 }
 0x449   : > { %v7137_v3 = vadd.f32 %v7136_v17, %v7135_v36  ;;  %v7138_v52 = vpop.f32.mrb[6].mxu0  ;;  %v7263_v40 = vpop.f32.mrb[95].mxu1 }
 0x44a   : > { %v7139_v5 = vpop.f32.mrb[7].mxu0  ;;  %v11038_v31 = vadd.f32 %v10989_v60, %v7261_v9  ;;  %v7264_v33 = vadd.f32 %v7263_v40, %v7262_v46  ;;  %v7930_v60 = vadd.f32 %v10629_v30, %v10733_v21 }
 0x44b   : > { %v7906_v16 = vadd.f32 %v7905_v7, %v7137_v3  ;;  %v7140_v28 = vadd.f32 %v7139_v5, %v7138_v52  ;;  %7714 = vmatmul.mubr.bf16.gmra.mrb[72].mxu1 %v6496_v50 }
 0x44c   : > { %v11041_v27 = vadd.f32 %v10999_v18, %v7264_v33  ;;  %7717 = vmatprep.mubr.bf16.mxu1 %v6497_v38 }
 0x44d   : > { %v7916_v20 = vadd.f32 %v7915_v43, %v7140_v28  ;;  %v7950_v43 = vadd.f32 %v10648_v55, %v10733_v21 }
 0x44e   : > { %v7265_v25 = vpop.f32.mrb[96].mxu1 }
 0x44f   : > { %v7141_v4 = vpop.f32.mrb[8].mxu0  ;;  %v7266_v48 = vpop.f32.mrb[97].mxu1 }
 0x450   : > { %v7142_v22 = vpop.f32.mrb[9].mxu0  ;;  %v7267_v13 = vadd.f32 %v7266_v48, %v7265_v25  ;;  %v7268_v18 = vpop.f32.mrb[98].mxu1 }
 0x451   : > { %v7143_v26 = vadd.f32 %v7142_v22, %v7141_v4  ;;  %v7144_v62 = vpop.f32.mrb[10].mxu0  ;;  %v7269_v8 = vpop.f32.mrb[99].mxu1 }
 0x452   : > { %v7145_v1 = vpop.f32.mrb[11].mxu0  ;;  %v11051_v32 = vadd.f32 %v7911_v0, %v7267_v13  ;;  %v7270_v2 = vadd.f32 %v7269_v8, %v7268_v18  ;;  %v7935_v0 = vadd.f32 %v10637_v44, %v10733_v21  ;;  %v7945_v13 = vadd.f32 %v10660_v59, %v10733_v21 }
 0x453   : > { %v7931_v61 = vadd.f32 %v7930_v60, %v7143_v26  ;;  %v7146_v63 = vadd.f32 %v7145_v1, %v7144_v62  ;;  %7718 = vmatmul.mubr.bf16.gmra.mrb[76].mxu1 %v6498_v58 }
 0x454   : > { %v11053_v37 = vadd.f32 %v7921_v49, %v7270_v2 }
 0x455   : > { %v7941_v11 = vadd.f32 %v7940_v6, %v7146_v63 }
 0x456   : > { %v7271_v23 = vpop.f32.mrb[100].mxu1 }
 0x457   : > { %v7147_v30 = vpop.f32.mrb[12].mxu0  ;;  %v7272_v17 = vpop.f32.mrb[101].mxu1 }
 0x458   : > { %v7148_v36 = vpop.f32.mrb[13].mxu0  ;;  %v7273_v51 = vadd.f32 %v7272_v17, %v7271_v23  ;;  %v7274_v50 = vpop.f32.mrb[102].mxu1 }
 0x459   : > { %v7149_v7 = vadd.f32 %v7148_v36, %v7147_v30  ;;  %v7150_v24 = vpop.f32.mrb[14].mxu0  ;;  %v7275_v3 = vpop.f32.mrb[103].mxu1 }
 0x45a   : > { %v7151_v29 = vpop.f32.mrb[15].mxu0  ;;  %v11059_v49 = vadd.f32 %v7906_v16, %v7273_v51  ;;  %v7276_v46 = vadd.f32 %v7275_v3, %v7274_v50  ;;  %v7960_v16 = vadd.f32 %v10653_v54, %v10733_v21  ;;  %v7970_v51 = vadd.f32 %v10680_v45, %v10733_v21 }
 0x45b   : > { %v7926_v52 = vadd.f32 %v7925_v56, %v7149_v7  ;;  %v7152_v9 = vadd.f32 %v7151_v29, %v7150_v24 }
 0x45c   : > { %v11061_v19 = vadd.f32 %v7916_v20, %v7276_v46 }
 0x45d   : > { %v7936_v38 = vadd.f32 %v7935_v0, %v7152_v9 }
 0x45e   : > { %v7277_v41 = vpop.f32.mrb[104].mxu1 }
 0x45f   : > { %v7153_v35 = vpop.f32.mrb[16].mxu0  ;;  %v7278_v40 = vpop.f32.mrb[105].mxu1 }
 0x460   : > { %v7154_v5 = vpop.f32.mrb[17].mxu0  ;;  %v7279_v12 = vadd.f32 %v7278_v40, %v7277_v41  ;;  %v7280_v44 = vpop.f32.mrb[106].mxu1 }
 0x461   : > { %v7155_v28 = vadd.f32 %v7154_v5, %v7153_v35  ;;  %v7156_v33 = vpop.f32.mrb[18].mxu0  ;;  %v7281_v4 = vpop.f32.mrb[107].mxu1 }
 0x462   : > { %v7157_v47 = vpop.f32.mrb[19].mxu0  ;;  %v11067_v20 = vadd.f32 %v7931_v61, %v7279_v12  ;;  %v7282_v60 = vadd.f32 %v7281_v4, %v7280_v44  ;;  %v7955_v61 = vadd.f32 %v10665_v57, %v10733_v21  ;;  %v11555_v12 = vld [vmem:[#allocation65_spill] sm:$0xff] }
 0x463   : > { %v7951_v25 = vadd.f32 %v7950_v43, %v7155_v28  ;;  %v7158_v22 = vadd.f32 %v7157_v47, %v7156_v33  ;;  %v7965_v44 = vadd.f32 %v11555_v12, %v10733_v21 }
 0x464   : > { %v11069_v58 = vadd.f32 %v7941_v11, %v7282_v60 }
 0x465   : > { %v7961_v48 = vadd.f32 %v7960_v16, %v7158_v22 }
 0x466   : > { %v7283_v55 = vpop.f32.mrb[108].mxu1 }
 0x467   : > { %v7159_v26 = vpop.f32.mrb[20].mxu0  ;;  %v7284_v18 = vpop.f32.mrb[109].mxu1 }
 0x468   : > { %v7160_v62 = vpop.f32.mrb[21].mxu0  ;;  %v7285_v8 = vadd.f32 %v7284_v18, %v7283_v55  ;;  %v7286_v54 = vpop.f32.mrb[110].mxu1 }
 0x469   : > { %v7161_v1 = vadd.f32 %v7160_v62, %v7159_v26  ;;  %v7162_v6 = vpop.f32.mrb[22].mxu0  ;;  %v7287_v2 = vpop.f32.mrb[111].mxu1  ;;  %v11556_v26 = vld [vmem:[#allocation57_spill] sm:$0xff] }
 0x46a   : > { %v7163_v63 = vpop.f32.mrb[23].mxu0  ;;  %v11075_v11 = vadd.f32 %v7926_v52, %v7285_v8  ;;  %v7288_v36 = vadd.f32 %v7287_v2, %v7286_v54  ;;  %v7980_v52 = vadd.f32 %v10685_v34, %v10733_v21 }
 0x46b   : > { %v7946_v30 = vadd.f32 %v7945_v13, %v7161_v1  ;;  %v7164_v23 = vadd.f32 %v7163_v63, %v7162_v6 }
 0x46c   : > { %v11077_v17 = vadd.f32 %v7936_v38, %v7288_v36 }
 0x46d   : > { %v7956_v56 = vadd.f32 %v7955_v61, %v7164_v23  ;;  %v11557_v61 = vld [vmem:[#allocation67_spill] sm:$0xff] }
 0x46e   : > { %v7289_v59 = vpop.f32.mrb[112].mxu1  ;;  %v7990_v2 = vadd.f32 %v11557_v61, %v10733_v21 }
 0x46f   : > { %v7165_v7 = vpop.f32.mrb[24].mxu0  ;;  %v7290_v50 = vpop.f32.mrb[113].mxu1 }
 0x470   : > { %v7166_v24 = vpop.f32.mrb[25].mxu0  ;;  %v7291_v3 = vadd.f32 %v7290_v50, %v7289_v59  ;;  %v7292_v57 = vpop.f32.mrb[114].mxu1  ;;  %v11558_v50 = vld [vmem:[#allocation58_spill] sm:$0xff] }
 0x471   : > { %v7167_v29 = vadd.f32 %v7166_v24, %v7165_v7  ;;  %v7168_v0 = vpop.f32.mrb[26].mxu0  ;;  %v7293_v46 = vpop.f32.mrb[115].mxu1 }
 0x472   : > { %v7169_v9 = vpop.f32.mrb[27].mxu0  ;;  %v11083_v38 = vadd.f32 %v7951_v25, %v7291_v3  ;;  %v7294_v5 = vadd.f32 %v7293_v46, %v7292_v57  ;;  %v7975_v25 = vadd.f32 %v11556_v26, %v10733_v21 }
 0x473   : > { %v7971_v35 = vadd.f32 %v7970_v51, %v7167_v29  ;;  %v7170_v41 = vadd.f32 %v7169_v9, %v7168_v0 }
 0x474   : > { %v11085_v40 = vadd.f32 %v7961_v48, %v7294_v5 }
 0x475   : > { %v7981_v43 = vadd.f32 %v7980_v52, %v7170_v41 }
 0x476   : > { %v7295_v45 = vpop.f32.mrb[116].mxu1 }
 0x477   : > { %v7171_v28 = vpop.f32.mrb[28].mxu0  ;;  %v7296_v47 = vpop.f32.mrb[117].mxu1 }
 0x478   : > { %v7172_v33 = vpop.f32.mrb[29].mxu0  ;;  %v7297_v22 = vadd.f32 %v7296_v47, %v7295_v45  ;;  %v7298_v34 = vpop.f32.mrb[118].mxu1 }
 0x479   : > { %v7173_v16 = vadd.f32 %v7172_v33, %v7171_v28  ;;  %v7174_v4 = vpop.f32.mrb[30].mxu0  ;;  %v7299_v55 = vpop.f32.mrb[119].mxu1  ;;  %v11559_v28 = vld [vmem:[#allocation69_spill] sm:$0xff] }
 0x47a   : > { %v7175_v60 = vpop.f32.mrb[31].mxu0  ;;  %v11091_v48 = vadd.f32 %v7946_v30, %v7297_v22  ;;  %v7300_v18 = vadd.f32 %v7299_v55, %v7298_v34  ;;  %v8000_v30 = vadd.f32 %v11558_v50, %v10733_v21  ;;  %v7985_v45 = vadd.f32 %v11559_v28, %v10733_v21  ;;  %v11560_v22 = vld [vmem:[#allocation59_spill] sm:$0xff] }
 0x47b   : > { %v7966_v62 = vadd.f32 %v7965_v44, %v7173_v16  ;;  %v7176_v13 = vadd.f32 %v7175_v60, %v7174_v4 }
 0x47c   : > { %v11093_v6 = vadd.f32 %v7956_v56, %v7300_v18 }
 0x47d   : > { %v7976_v1 = vadd.f32 %v7975_v25, %v7176_v13 }
 0x47e   : > { %v7301_v54 = vpop.f32.mrb[120].mxu1 }
 0x47f   : > { %v7177_v8 = vpop.f32.mrb[32].mxu0  ;;  %v7302_v23 = vpop.f32.mrb[121].mxu1 }
 0x480   : > { %v7178_v63 = vpop.f32.mrb[33].mxu0  ;;  %v7303_v59 = vadd.f32 %v7302_v23, %v7301_v54  ;;  %v7304_v24 = vpop.f32.mrb[122].mxu1 }
 0x481   : > { %v7179_v36 = vadd.f32 %v7178_v63, %v7177_v8  ;;  %v7180_v7 = vpop.f32.mrb[34].mxu0  ;;  %v7305_v29 = vpop.f32.mrb[123].mxu1  ;;  %v11561_v63 = vld [vmem:[#allocation66_spill] sm:$0xff] }
 0x482   : > { %v7181_v51 = vpop.f32.mrb[35].mxu0  ;;  %v11099_v56 = vadd.f32 %v7971_v35, %v7303_v59  ;;  %v7306_v57 = vadd.f32 %v7305_v29, %v7304_v24  ;;  %v7995_v35 = vadd.f32 %v11560_v22, %v10733_v21  ;;  %v8010_v61 = vadd.f32 %v11561_v63, %v10733_v21 }
 0x483   : > { %v7991_v0 = vadd.f32 %v7990_v2, %v7179_v36  ;;  %v7182_v3 = vadd.f32 %v7181_v51, %v7180_v7  ;;  %v11562_v51 = vld [vmem:[#allocation60_spill] sm:$0xff] }
 0x484   : > { %v11101_v52 = vadd.f32 %v7981_v43, %v7306_v57 }
 0x485   : > { %v8001_v9 = vadd.f32 %v8000_v30, %v7182_v3 }
 0x486   : > { %v7307_v41 = vpop.f32.mrb[124].mxu1 }
 0x487   : > { %v7183_v46 = vpop.f32.mrb[36].mxu0  ;;  %v7308_v33 = vpop.f32.mrb[125].mxu1 }
 0x488   : > { %v7184_v5 = vpop.f32.mrb[37].mxu0  ;;  %v7309_v47 = vadd.f32 %v7308_v33, %v7307_v41  ;;  %v7310_v16 = vpop.f32.mrb[126].mxu1 }
 0x489   : > { %v7185_v12 = vadd.f32 %v7184_v5, %v7183_v46  ;;  %v7186_v44 = vpop.f32.mrb[38].mxu0  ;;  %v7311_v34 = vpop.f32.mrb[127].mxu1 }
 0x48a   : > { %v7187_v4 = vpop.f32.mrb[39].mxu0  ;;  %v11107_v43 = vadd.f32 %v7966_v62, %v7309_v47  ;;  %v7312_v25 = vadd.f32 %v7311_v34, %v7310_v16  ;;  %v8474_v62 = vld [vmem:[%s11292_s4] ss:$0 sm:$0xff] }
 0x48b   : > { %v7986_v60 = vadd.f32 %v7985_v45, %v7185_v12  ;;  %v7188_v26 = vadd.f32 %v7187_v4, %v7186_v44  ;;  %v8020_v50 = vadd.f32 %v8474_v62, %v11562_v51  ;;  %v11563_v45 = vld [vmem:[#allocation68_spill] sm:$0xff] }
 0x48c   : > { %v11109_v13 = vadd.f32 %v7976_v1, %v7312_v25  ;;  %v8005_v33 = vadd.f32 %v8474_v62, %v11563_v45 }
 0x48d   : > { %v7996_v55 = vadd.f32 %v7995_v35, %v7188_v26  ;;  %v11564_v35 = vld [vmem:[#allocation61_spill] sm:$0xff] }
 0x48e   : > { %v7313_v8 = vpop.f32.mrb[128].mxu1  ;;  %v8015_v34 = vadd.f32 %v8474_v62, %v11564_v35 }
 0x48f   : > { %v7189_v18 = vpop.f32.mrb[40].mxu0  ;;  %v7314_v2 = vpop.f32.mrb[129].mxu1 }
 0x490   : > { %v7190_v54 = vpop.f32.mrb[41].mxu0  ;;  %v7315_v7 = vadd.f32 %v7314_v2, %v7313_v8  ;;  %v7316_v59 = vpop.f32.mrb[130].mxu1 }
 0x491   : > { %v7191_v23 = vadd.f32 %v7190_v54, %v7189_v18  ;;  %v7192_v36 = vpop.f32.mrb[42].mxu0  ;;  %v7317_v1 = vpop.f32.mrb[131].mxu1 }
 0x492   : > { %v7193_v24 = vpop.f32.mrb[43].mxu0  ;;  %v11117_v3 = vadd.f32 %v7991_v0, %v7315_v7  ;;  %v7318_v57 = vadd.f32 %v7317_v1, %v7316_v59 }
 0x493   : > { %v8011_v30 = vadd.f32 %v8010_v61, %v7191_v23  ;;  %v7194_v29 = vadd.f32 %v7193_v24, %v7192_v36 }
 0x494   : > { %v11119_v21 = vadd.f32 %v8001_v9, %v7318_v57 }
 0x495   : > { %v8021_v46 = vadd.f32 %v8020_v50, %v7194_v29 }
 0x496   : > { %v7319_v5 = vpop.f32.mrb[132].mxu1 }
 0x497   : > { %v7195_v41 = vpop.f32.mrb[44].mxu0  ;;  %v7320_v12 = vpop.f32.mrb[133].mxu1 }
 0x498   : > { %v7196_v28 = vpop.f32.mrb[45].mxu0  ;;  %v7321_v16 = vadd.f32 %v7320_v12, %v7319_v5  ;;  %v7322_v4 = vpop.f32.mrb[134].mxu1 }
 0x499   : > { %v7197_v44 = vadd.f32 %v7196_v28, %v7195_v41  ;;  %v7198_v47 = vpop.f32.mrb[46].mxu0  ;;  %v7323_v26 = vpop.f32.mrb[135].mxu1  ;;  %v11138_v41 = vld [vmem:[%s11294_s6] ss:$0 sm:$0xff] }
 0x49a   : > { %v7199_v22 = vpop.f32.mrb[47].mxu0  ;;  %v11123_v18 = vadd.f32 %v7986_v60, %v7321_v16  ;;  %v7324_v9 = vadd.f32 %v7323_v26, %v7322_v4  ;;  %v7878_v28 = vadd.f32 %v11006_v15, %v11138_v41  ;;  %v7883_v12 = vadd.f32 %v10968_v14, %v11138_v41 }
 0x49b   : > { %v8006_v0 = vadd.f32 %v8005_v33, %v7197_v44  ;;  %v7200_v25 = vadd.f32 %v7199_v22, %v7198_v47  ;;  %v7893_v15 = vadd.f32 %v11017_v10, %v11138_v41 }
 0x49c   : > { %v11125_v54 = vadd.f32 %v7996_v55, %v7324_v9  ;;  %v7898_v9 = vadd.f32 %v11041_v27, %v11138_v41 }
 0x49d   : > { %v8016_v8 = vadd.f32 %v8015_v34, %v7200_v25 }
 0x49e   : > { %v7325_v63 = vpop.f32.mrb[136].mxu1 }
 0x49f   : > { %v7326_v61 = vpop.f32.mrb[137].mxu1 }
 0x4a0   : > { %v7327_v2 = vadd.f32 %v7326_v61, %v7325_v63  ;;  %v7328_v23 = vpop.f32.mrb[138].mxu1 }
 0x4a1   : > { %v7329_v36 = vpop.f32.mrb[139].mxu1 }
 0x4a2   : > { %v11127_v7 = vadd.f32 %v8011_v30, %v7327_v2  ;;  %v7330_v59 = vadd.f32 %v7329_v36, %v7328_v23 }
 0x4a4   : > { %v11129_v24 = vadd.f32 %v8021_v46, %v7330_v59 }
 0x4a6   : > { %v7331_v62 = vpop.f32.mrb[140].mxu1 }
 0x4a7   : > { %v7332_v51 = vpop.f32.mrb[141].mxu1 }
 0x4a8   : > { %v7333_v50 = vadd.f32 %v7332_v51, %v7331_v62  ;;  %v7334_v1 = vpop.f32.mrb[142].mxu1  ;;  %v7908_v51 = vadd.f32 %v11059_v49, %v11138_v41 }
 0x4a9   : > { %v7335_v60 = vpop.f32.mrb[143].mxu1 }
 0x4aa   : > { %v11131_v29 = vadd.f32 %v8006_v0, %v7333_v50  ;;  %v7336_v57 = vadd.f32 %v7335_v60, %v7334_v1  ;;  %v7918_v60 = vadd.f32 %v11061_v19, %v11138_v41 }
 0x4ac   : > { %v11133_v55 = vadd.f32 %v8016_v8, %v7336_v57 }
 0x4ee   : > { %v7691_v30 = vpop.f32.mrb[48].mxu1 }
 0x4ef   : > { %v7868_v46 = vadd.f32 %v10995_v53, %v7691_v30  ;;  %v5816_v5 = vpop.f32.mrb[49].mxu1 }
 0x4f0   : > { %v7873_v45 = vadd.f32 %v10961_v39, %v5816_v5  ;;  %v7692_v33 = vpop.f32.mrb[50].mxu1  ;;  %v7888_v39 = vadd.f32 %v11038_v31, %v11138_v41  ;;  %v7903_v31 = vadd.f32 %v11023_v42, %v11138_v41  ;;  %v7913_v42 = vadd.f32 %v11051_v32, %v11138_v41 }
 0x4f1   : > { %v7869_v44 = vadd.f32 %v7868_v46, %v11138_v41  ;;  %v7879_v47 = vadd.f32 %v7878_v28, %v7692_v33  ;;  %v5819_v16 = vpop.f32.mrb[51].mxu1  ;;  %v7923_v46 = vadd.f32 %v11053_v37, %v11138_v41  ;;  %v7933_v37 = vadd.f32 %v11067_v20, %v11138_v41 }
 0x4f2   : > { %v7874_v4 = vadd.f32 %v7873_v45, %v11138_v41  ;;  %v7884_v53 = vadd.f32 %v7883_v12, %v5819_v16 }
 0x4f3   : > { %v5977_v22 = vmax.f32 %v7869_v44, 0.0  ;;  %v5978_v35 = vmax.f32 %v7879_v47, 0.0  ;;  %v7928_v44 = vadd.f32 %v11075_v11, %v11138_v41 }
 0x4f4   : > { %v5975_v34 = vmax.f32 %v7874_v4, 0.0  ;;  %v5976_v26 = vmax.f32 %v7884_v53, 0.0  ;;  %v7938_v4 = vadd.f32 %v11077_v17, %v11138_v41 }
 0x4f5   : > { %6009 = vst [vmem:[%s9912_s17 + $0x10] sm:$0xff] %v5977_v22  ;;  %6010 = vst [vmem:[%s9912_s17 + $0x18] sm:$0xff] %v5978_v35  ;;  %v7943_v35 = vadd.f32 %v11069_v58, %v11138_v41  ;;  %v7953_v58 = vadd.f32 %v11083_v38, %v11138_v41 }
 0x4f6   : > { %6007 = vst [vmem:[%s9912_s17] sm:$0xff] %v5975_v34  ;;  %6008 = vst [vmem:[%s9912_s17 + $0x8] sm:$0xff] %v5976_v26  ;;  %v7695_v14 = vpop.f32.mrb[52].mxu1 }
 0x4f7   : > { %v7889_v0 = vadd.f32 %v7888_v39, %v7695_v14  ;;  %v5832_v25 = vpop.f32.mrb[53].mxu1 }
 0x4f8   : > { %v7894_v8 = vadd.f32 %v7893_v15, %v5832_v25  ;;  %v7696_v63 = vpop.f32.mrb[54].mxu1 }
 0x4f9   : > { %v5981_v61 = vmax.f32 %v7889_v0, 0.0  ;;  %v7899_v2 = vadd.f32 %v7898_v9, %v7696_v63  ;;  %v5835_v23 = vpop.f32.mrb[55].mxu1  ;;  %v7948_v0 = vadd.f32 %v11091_v48, %v11138_v41 }
 0x4fa   : > { %v5979_v36 = vmax.f32 %v7894_v8, 0.0  ;;  %v7904_v59 = vadd.f32 %v7903_v31, %v5835_v23  ;;  %v7958_v8 = vadd.f32 %v11093_v6, %v11138_v41 }
 0x4fb   : > { %6013 = vst [vmem:[%s9912_s17 + $0x30] sm:$0xff] %v5981_v61  ;;  %v5982_v62 = vmax.f32 %v7899_v2, 0.0  ;;  %v7963_v61 = vadd.f32 %v11085_v40, %v11138_v41  ;;  %v7973_v40 = vadd.f32 %v11099_v56, %v11138_v41 }
 0x4fc   : > { %6011 = vst [vmem:[%s9912_s17 + $0x20] sm:$0xff] %v5979_v36  ;;  %v5980_v10 = vmax.f32 %v7904_v59, 0.0 }
 0x4fd   : > { %6014 = vst [vmem:[%s9912_s17 + $0x38] sm:$0xff] %v5982_v62 }
 0x4fe   : > { %6012 = vst [vmem:[%s9912_s17 + $0x28] sm:$0xff] %v5980_v10  ;;  %v7699_v27 = vpop.f32.mrb[56].mxu1  ;;  %v7968_v10 = vadd.f32 %v11107_v43, %v11138_v41 }
 0x4ff   : > { %v7909_v50 = vadd.f32 %v7908_v51, %v7699_v27  ;;  %v5848_v1 = vpop.f32.mrb[57].mxu1 }
 0x500   : > { %v7914_v57 = vadd.f32 %v7913_v42, %v5848_v1  ;;  %v7700_v30 = vpop.f32.mrb[58].mxu1  ;;  %v7978_v42 = vadd.f32 %v11109_v13, %v11138_v41 }
 0x501   : > { %v5985_v5 = vmax.f32 %v7909_v50, 0.0  ;;  %v7919_v49 = vadd.f32 %v7918_v60, %v7700_v30  ;;  %v5851_v28 = vpop.f32.mrb[59].mxu1  ;;  %v7983_v60 = vadd.f32 %v11101_v52, %v11138_v41  ;;  %v7993_v52 = vadd.f32 %v11117_v3, %v11138_v41 }
 0x502   : > { %v5983_v45 = vmax.f32 %v7914_v57, 0.0  ;;  %v7924_v33 = vadd.f32 %v7923_v46, %v5851_v28  ;;  %v7988_v28 = vadd.f32 %v11123_v18, %v11138_v41 }
 0x503   : > { %6017 = vst [vmem:[%s9912_s17 + $0x50] sm:$0xff] %v5985_v5  ;;  %v5986_v12 = vmax.f32 %v7919_v49, 0.0 }
 0x504   : > { %6015 = vst [vmem:[%s9912_s17 + $0x40] sm:$0xff] %v5983_v45  ;;  %v5984_v32 = vmax.f32 %v7924_v33, 0.0 }
 0x505   : > { %6018 = vst [vmem:[%s9912_s17 + $0x58] sm:$0xff] %v5986_v12  ;;  %v7998_v12 = vadd.f32 %v11125_v54, %v11138_v41  ;;  %v8008_v54 = vadd.f32 %v11131_v29, %v11138_v41 }
 0x506   : > { %6016 = vst [vmem:[%s9912_s17 + $0x48] sm:$0xff] %v5984_v32  ;;  %v7703_v19 = vpop.f32.mrb[60].mxu1 }
 0x507   : > { %v7929_v47 = vadd.f32 %v7928_v44, %v7703_v19  ;;  %v5864_v16 = vpop.f32.mrb[61].mxu1  ;;  %v8003_v19 = vadd.f32 %v11119_v21, %v11138_v41  ;;  %v8013_v21 = vadd.f32 %v11127_v7, %v11138_v41 }
 0x508   : > { %v7934_v53 = vadd.f32 %v7933_v37, %v5864_v16  ;;  %v7704_v22 = vpop.f32.mrb[62].mxu1 }
 0x509   : > { %v5989_v34 = vmax.f32 %v7929_v47, 0.0  ;;  %v7939_v11 = vadd.f32 %v7938_v4, %v7704_v22  ;;  %v5867_v26 = vpop.f32.mrb[63].mxu1 }
 0x50a   : > { %v5987_v39 = vmax.f32 %v7934_v53, 0.0  ;;  %v7944_v14 = vadd.f32 %v7943_v35, %v5867_v26 }
 0x50b   : > { %6021 = vst [vmem:[%s9912_s17 + $0x70] sm:$0xff] %v5989_v34  ;;  %v5990_v15 = vmax.f32 %v7939_v11, 0.0  ;;  %v8018_v11 = vadd.f32 %v11133_v55, %v11138_v41 }
 0x50c   : > { %6019 = vst [vmem:[%s9912_s17 + $0x60] sm:$0xff] %v5987_v39  ;;  %v5988_v20 = vmax.f32 %v7944_v14, 0.0  ;;  %v8023_v14 = vadd.f32 %v11129_v24, %v11138_v41 }
 0x50d   : > { %6022 = vst [vmem:[%s9912_s17 + $0x78] sm:$0xff] %v5990_v15 }
 0x50e   : > { %6020 = vst [vmem:[%s9912_s17 + $0x68] sm:$0xff] %v5988_v20  ;;  %v7707_v17 = vpop.f32.mrb[64].mxu1 }
 0x50f   : > { %v7949_v25 = vadd.f32 %v7948_v0, %v7707_v17  ;;  %v5880_v9 = vpop.f32.mrb[65].mxu1 }
 0x510   : > { %v7954_v63 = vadd.f32 %v7953_v58, %v5880_v9  ;;  %v7708_v31 = vpop.f32.mrb[66].mxu1 }
 0x511   : > { %v5993_v2 = vmax.f32 %v7949_v25, 0.0  ;;  %v7959_v48 = vadd.f32 %v7958_v8, %v7708_v31  ;;  %v5883_v23 = vpop.f32.mrb[67].mxu1 }
 0x512   : > { %v5991_v36 = vmax.f32 %v7954_v63, 0.0  ;;  %v7964_v59 = vadd.f32 %v7963_v61, %v5883_v23 }
 0x513   : > { %6025 = vst [vmem:[%s9912_s17 + $0x90] sm:$0xff] %v5993_v2  ;;  %v5994_v62 = vmax.f32 %v7959_v48, 0.0 }
 0x514   : > { %6023 = vst [vmem:[%s9912_s17 + $0x80] sm:$0xff] %v5991_v36  ;;  %v5992_v38 = vmax.f32 %v7964_v59, 0.0 }
 0x515   : > { %6026 = vst [vmem:[%s9912_s17 + $0x98] sm:$0xff] %v5994_v62 }
 0x516   : > { %6024 = vst [vmem:[%s9912_s17 + $0x88] sm:$0xff] %v5992_v38  ;;  %v7711_v6 = vpop.f32.mrb[68].mxu1 }
 0x517   : > { %v7969_v51 = vadd.f32 %v7968_v10, %v7711_v6  ;;  %v5896_v27 = vpop.f32.mrb[69].mxu1 }
 0x518   : > { %v7974_v50 = vadd.f32 %v7973_v40, %v5896_v27  ;;  %v7712_v1 = vpop.f32.mrb[70].mxu1 }
 0x519   : > { %v5997_v57 = vmax.f32 %v7969_v51, 0.0  ;;  %v7979_v43 = vadd.f32 %v7978_v42, %v7712_v1  ;;  %v5899_v30 = vpop.f32.mrb[71].mxu1 }
 0x51a   : > { %v5995_v46 = vmax.f32 %v7974_v50, 0.0  ;;  %v7984_v5 = vadd.f32 %v7983_v60, %v5899_v30 }
 0x51b   : > { %6029 = vst [vmem:[%s9912_s17 + $0xb0] sm:$0xff] %v5997_v57  ;;  %v5998_v49 = vmax.f32 %v7979_v43, 0.0 }
 0x51c   : > { %6027 = vst [vmem:[%s9912_s17 + $0xa0] sm:$0xff] %v5995_v46  ;;  %v5996_v56 = vmax.f32 %v7984_v5, 0.0 }
 0x51d   : > { %6030 = vst [vmem:[%s9912_s17 + $0xb8] sm:$0xff] %v5998_v49 }
 0x51e   : > { %6028 = vst [vmem:[%s9912_s17 + $0xa8] sm:$0xff] %v5996_v56  ;;  %v7715_v13 = vpop.f32.mrb[72].mxu1 }
 0x51f   : > { %v7989_v45 = vadd.f32 %v7988_v28, %v7715_v13  ;;  %v5912_v33 = vpop.f32.mrb[73].mxu1 }
 0x520   : > { %v7994_v32 = vadd.f32 %v7993_v52, %v5912_v33  ;;  %v7716_v44 = vpop.f32.mrb[74].mxu1 }
 0x521   : > { %v6001_v37 = vmax.f32 %v7989_v45, 0.0  ;;  %v7999_v18 = vadd.f32 %v7998_v12, %v7716_v44  ;;  %v5915_v47 = vpop.f32.mrb[75].mxu1 }
 0x522   : > { %v5999_v16 = vmax.f32 %v7994_v32, 0.0  ;;  %v8004_v4 = vadd.f32 %v8003_v19, %v5915_v47 }
 0x523   : > { %6033 = vst [vmem:[%s9912_s17 + $0xd0] sm:$0xff] %v6001_v37  ;;  %v6002_v3 = vmax.f32 %v7999_v18, 0.0 }
 0x524   : > { %6031 = vst [vmem:[%s9912_s17 + $0xc0] sm:$0xff] %v5999_v16  ;;  %v6000_v53 = vmax.f32 %v8004_v4, 0.0 }
 0x525   : > { %6034 = vst [vmem:[%s9912_s17 + $0xd8] sm:$0xff] %v6002_v3 }
 0x526   : > { %6032 = vst [vmem:[%s9912_s17 + $0xc8] sm:$0xff] %v6000_v53  ;;  %v7719_v22 = vpop.f32.mrb[76].mxu1 }
 0x527   : > { %v8009_v35 = vadd.f32 %v8008_v54, %v7719_v22  ;;  %v5928_v34 = vpop.f32.mrb[77].mxu1 }
 0x528   : > { %v8014_v26 = vadd.f32 %v8013_v21, %v5928_v34  ;;  %v7720_v39 = vpop.f32.mrb[78].mxu1 }
 0x529   : > { %v6005_v29 = vmax.f32 %v8009_v35, 0.0  ;;  %v8019_v15 = vadd.f32 %v8018_v11, %v7720_v39  ;;  %v5931_v7 = vpop.f32.mrb[79].mxu1 }
 0x52a   : > { %v6003_v20 = vmax.f32 %v8014_v26, 0.0  ;;  %v8024_v0 = vadd.f32 %v8023_v14, %v5931_v7 }
 0x52b   : > { %6037 = vst [vmem:[%s9912_s17 + $0xf0] sm:$0xff] %v6005_v29  ;;  %v6006_v17 = vmax.f32 %v8019_v15, 0.0 }
 0x52c   : > { %6035 = vst [vmem:[%s9912_s17 + $0xe0] sm:$0xff] %v6003_v20  ;;  %v6004_v24 = vmax.f32 %v8024_v0, 0.0 }
 0x52d   : > { %6038 = vst [vmem:[%s9912_s17 + $0xf8] sm:$0xff] %v6006_v17 }
 0x52e   : > { %6036 = vst [vmem:[%s9912_s17 + $0xe8] sm:$0xff] %v6004_v24 }
 0x52f   : > { %8516 = shalt.err (!%p8513_p8)
}
 0x530   : > { %s8517_s18 = scalar_lea.hbm %s11238_s23, 4096  ;;  %s8521_s20 = scalar_lea.hbm %s11295_s7, 8192 }
 0x531   : > { %p8518_p12 = scmp.ne.s32.totalorder %s11238_s23, %s8517_s18  ;;  %p8522_p1 = scmp.lt.u32.totalorder %s11238_s23, %s11295_s7 }
 0x532   : > { %p8523_p5 = scmp.lt.u32.totalorder %s8521_s20, %s8517_s18  ;;  %p8525_p9 = scmp.lt.u32.totalorder %s8517_s18, %s11238_s23 }
 0x533   : > { %p8519_p0 = pnand %p8518_p12, %p11565_p10 }
 0x534   : > { %p8524_p6 = por %p8523_p5, %p8522_p1 }
 0x535   : > { %p8520_p2 = pneg %p8519_p0 }
 0x536   : > { %p8526_p11 = por %p8525_p9, %p8524_p6 }
 0x538   : > { %p8527_p13 = pnand %p8526_p11, %p8520_p2 }
 0x53a   : > { %8530 = shalt.err (!%p8527_p13)
}
 0x53b   : > { %s8576_s19 = smov 128   ;;  %s8577_s22 = smov 8  }
 0x53c   : > { %8190 = dma.vmem_to_hbm [thread:$0]  (%p11565_p10), %s11240_s21, 4096, %s11238_s23, %s11247_s28, %s8576_s19, %s8576_s19, %s8577_s22  }
 0x53d PF: > { %p8202_p3 = scmp.ge.s32.totalorder %s8569_s27, 2  ;;  %s6068_s29 = sand.u32 1, %s8557_s24  }
 0x53e   : > { %p11566_p4 = scmp.ne.s32.totalorder %s11380_s12, 0  ;;  %s6069_s8 = scalar_lea.sflag [#allocation5], %s6068_s29 }
 0x540   : > { %p8197_p7 = pnand %p8202_p3, %p11566_p4 }
 0x542   : > { %8552 = dma.done.wait (!%p8197_p7), %s6069_s8, 4096  }
 0x543   : > { %8554 = vsyncadd (!%p8197_p7), %s6069_s8, 4294963200  ;;  %p18_p8 = scmp.ge.s32.totalorder %s8643_s30, 4   ;;  %s11567_s24 = smov %s8561_s25 }
 0x544   : > { %s11568_s25 = smov %s8565_s26  ;;  %s11569_s26 = smov %s8654_s10 }
 0x545   : > { %s11570_s27 = smov %s8643_s30  ;;  %20 = sbr.rel (!%p18_p8) target bundleno = 4 (0x4), region = 97 }
 0x54c   :  { %6074 = vsyncpa [#allocation4], 1 }
 0x54d   :  { %6076 = vsyncpa [#allocation4 + $0x1], 1 }
 0x54e   :  { %6077 = vsyncpa [#allocation5], 1 }
 0x54f   :  { %6079 = vsyncpa [#allocation5 + $0x1], 1 }

</bundles_post_ra>
